<compile_context>
chip_gen: v6e
topology: v6e:2x2x1
jax: 0.10.0
libtpu: 0.0.40
codegen_flags: <defaults>
</compile_context>

<pallas_src>
import jax
import jax.numpy as jnp
import numpy as np
from jax.experimental import pallas as pl
from jax.experimental.pallas import tpu as pltpu


def _make_kernel(H, W, C, M, use_bf16):
    """Fused ResNetBlock: 6 x (3x3 conv as 9 accumulating dots + bias [+res] [+lrelu])."""
    # Tap order matches the HWIO weight reshape: t = kh*3 + kw, (dh,dw)=(kh-1,kw-1).
    taps = [(dh * W + dw, dh, dw) for dh in (-1, 0, 1) for dw in (-1, 0, 1)]

    def kernel(x_ref, w_ref, b_ref, mask_ref, o_ref):
        x = x_ref[0]                                  # (C, M) f32, pixels on lanes

        # Hoist the (1, M) border masks once; reused by all 6 convs.
        masks = [mask_ref[t] if (dh or dw) else None
                 for t, (_, dh, dw) in enumerate(taps)]

        def conv(a, idx, residual=None, lrelu=True):
            a_mm = a.astype(jnp.bfloat16) if use_bf16 else a
            acc = jnp.zeros((C, M), jnp.float32)
            for t, (dm, dh, dw) in enumerate(taps):
                # Shifted view: at[:, m] == a[:, m + dm]  (wrap handled by mask).
                at = a_mm if dm == 0 else pltpu.roll(a_mm, (-dm) % M, axis=1)
                if masks[t] is not None:              # zero the "same"-padding halo
                    at = at * masks[t].astype(at.dtype)
                wt = w_ref[idx, t]                    # (C, C) == (Cout, Cin)
                if use_bf16:
                    wt = wt.astype(jnp.bfloat16)
                acc = acc + jnp.dot(wt, at, preferred_element_type=jnp.float32)
            y = acc + b_ref[idx]                      # (C, 1) broadcast over lanes
            if residual is not None:                  # residual BEFORE activation
                y = y + residual
            if lrelu:
                y = jnp.where(y >= 0, y, 0.2 * y)
            return y

        x1 = conv(x, 0)                               # lrelu(conv1(x))
        t2 = conv(x1, 1)                              # lrelu(conv2(x1))
        x2 = conv(t2, 2, residual=x1)                 # lrelu(x1 + conv3(t2))
        t4 = conv(x2, 3)                              # lrelu(conv4(x2))
        x3 = conv(t4, 4, residual=x2)                 # lrelu(x2 + conv5(t4))
        x4 = conv(x3, 5, lrelu=False)                 # conv6(x3)
        o_ref[0] = x4                                 # (C, M), lane-dense store

    return kernel


def resnet_block_forward(x, params, use_bf16=False):
    """Pallas ResNetBlock.forward.  x: (N, Cin, H, W) NCHW.  Returns (N, Cout, H, W)."""
    N, cin, H, W = x.shape
    weights = [p[0] for p in params]                  # HWIO (3,3,Ci,Co)
    biases = [p[1] for p in params]
    gc = weights[0].shape[-1]
    cout = weights[-1].shape[-1]
    M = H * W
    C = ((max(cin, gc, cout) + 7) // 8) * 8           # common sublane channel width

    # Stack the six convs' weights as (conv, tap, Cout, Cin) so each conv is
    # out_T = sum_t W_t @ x_shifted_t in the pixels-on-lanes layout.
    w_stack, b_stack = [], []
    for wmat, bvec in zip(weights, biases):
        kh, kw, ci, co = wmat.shape
        wt = wmat.reshape(kh * kw, ci, co).transpose(0, 2, 1)     # (9, Co, Ci)
        wt = jnp.pad(wt, ((0, 0), (0, C - co), (0, C - ci)))      # zero-pad channels
        w_stack.append(wt.astype(jnp.float32))
        b_stack.append(jnp.pad(bvec, (0, C - co)).reshape(C, 1).astype(jnp.float32))
    w_all = jnp.stack(w_stack)                        # (6, 9, C, C)
    b_all = jnp.stack(b_stack)                        # (6, C, 1)

    # Per-tap "same"-padding border masks (static, host-precomputed): 1.0 where
    # the shifted source pixel (h+dh, w+dw) is inside the image, else 0.0.
    hh, ww = np.meshgrid(np.arange(H), np.arange(W), indexing="ij")
    mask_list = []
    for dh in (-1, 0, 1):
        for dw in (-1, 0, 1):
            ok = ((hh + dh >= 0) & (hh + dh < H) & (ww + dw >= 0) & (ww + dw < W))
            mask_list.append(ok.reshape(1, M))
    mask_all = jnp.asarray(np.stack(mask_list).astype(np.float32))   # (9, 1, M)

    # Input: pad channels up to C, flatten HxW onto the lane axis.
    x_pad = jnp.pad(x.astype(jnp.float32), ((0, 0), (0, C - cin), (0, 0), (0, 0)))
    x_flat = x_pad.reshape(N, C, M)                   # (N, C, M)

    kernel = _make_kernel(H, W, C, M, use_bf16)

    out = pl.pallas_call(
        kernel,
        out_shape=jax.ShapeDtypeStruct((N, C, M), jnp.float32),
        grid=(N,),                                    # one image per step -> feeds both v7x TCs
        in_specs=[
            pl.BlockSpec((1, C, M), lambda n: (n, 0, 0)),          # this image's activations
            pl.BlockSpec((6, 9, C, C), lambda n: (0, 0, 0, 0)),    # all weights (fetched once)
            pl.BlockSpec((6, C, 1), lambda n: (0, 0, 0)),          # all biases
            pl.BlockSpec((9, 1, M), lambda n: (0, 0, 0)),          # border masks
        ],
        out_specs=pl.BlockSpec((1, C, M), lambda n: (n, 0, 0)),
        compiler_params=pltpu.CompilerParams(
            dimension_semantics=("parallel",)),
    )(x_flat, w_all, b_all, mask_all)

    # TODO(synk): for much larger H*W, tile the image into row stripes with a
    # 1-row halo instead of whole-image blocks (VMEM guard, esp. v7x 64 MiB).
    return out[:, :cout, :].reshape(N, cout, H, W)


# ---------------------------------------------------------------------------
# Pure-JAX reference (lax conv, NCHW) for correctness check.
# ---------------------------------------------------------------------------
def _conv_ref(x, w, b):
    y = jax.lax.conv_general_dilated(
        x, w, window_strides=(1, 1), padding="SAME",
        dimension_numbers=("NCHW", "HWIO", "NCHW"))
    return y + b[None, :, None, None]


def _lrelu(y):
    return jnp.where(y >= 0, y, 0.2 * y)


def resnet_block_ref(x, params):
    (w1, b1), (w2, b2), (w3, b3), (w4, b4), (w5, b5), (w6, b6) = params
    x1 = _lrelu(_conv_ref(x, w1, b1))
    x2 = _lrelu(x1 + _conv_ref(_lrelu(_conv_ref(x1, w2, b2)), w3, b3))
    x3 = _lrelu(x2 + _conv_ref(_lrelu(_conv_ref(x2, w4, b4)), w5, b5))
    return _conv_ref(x3, w6, b6)


def init_params(key, channel_in, channel_out, gc):
    """Deterministic xavier-normal * 0.1 init for all convs (HWIO weights).

    NOTE: the original module zeros conv6 (initialize_weights(conv6, 0)); we
    use a small nonzero init here so the end-to-end numerical check exercises
    the full pipeline.
    """
    dims = [(channel_in, gc), (gc, gc), (gc, gc), (gc, gc), (gc, gc),
            (gc, channel_out)]
    params = []
    for cin, cout in dims:
        key, wk = jax.random.split(key)
        fan_in, fan_out = cin * 9, cout * 9
        std = np.sqrt(2.0 / (fan_in + fan_out))
        w = (jax.random.normal(wk, (3, 3, cin, cout), jnp.float32) * std * 0.1)
        b = jnp.zeros((cout,), jnp.float32)
        params.append((w, b))
    return params


if __name__ == "__main__":
    N, H, W = 2, 16, 16
    channel_in, channel_out, gc = 4, 4, 32

    key = jax.random.PRNGKey(0)
    key, xk = jax.random.split(key)
    # NCHW input, matching the PyTorch module: (2, 4, 16, 16).
    x = jax.random.normal(xk, (N, channel_in, H, W), jnp.float32)
    params = init_params(key, channel_in, channel_out, gc)

    fwd = jax.jit(resnet_block_forward)
    out = jax.block_until_ready(fwd(x, params))
    ref = jax.block_until_ready(resnet_block_ref(x, params))

    assert out.shape == (N, channel_out, H, W)
    np.testing.assert_allclose(np.asarray(out), np.asarray(ref),
                               rtol=1e-4, atol=1e-4)
    print("KERNEL_OK")
</pallas_src>

<mosaic_0001>
module attributes {stable_mosaic.version = 11 : i64} {
  func.func @kernel(%arg0: i32, %arg1: memref<1x32x256xf32, #tpu.memory_space<vmem>>, %arg2: memref<6x9x32x32xf32, #tpu.memory_space<vmem>>, %arg3: memref<6x32x1xf32, #tpu.memory_space<vmem>>, %arg4: memref<9x1x256xf32, #tpu.memory_space<vmem>>, %arg5: memref<1x32x256xf32, #tpu.memory_space<vmem>>) attributes {dimension_semantics = [#tpu.dimension_semantics<parallel>], iteration_bounds = array<i64: 2>, scalar_prefetch = 0 : i64, scratch_operands = 0 : i64, tpu.core_type = #tpu.core_type<tc>, window_params = [{transform_indices = @transform_0, window_bounds = array<i64: 1, 32, 256>}, {pipeline_mode = #tpu.pipeline_mode<synchronous>, transform_indices = @transform_1, window_bounds = array<i64: 6, 9, 32, 32>}, {pipeline_mode = #tpu.pipeline_mode<synchronous>, transform_indices = @transform_2, window_bounds = array<i64: 6, 32, 1>}, {pipeline_mode = #tpu.pipeline_mode<synchronous>, transform_indices = @transform_3, window_bounds = array<i64: 9, 1, 256>}, {transform_indices = @transform_4, window_bounds = array<i64: 1, 32, 256>}]} {
    %c0 = arith.constant 0 : index
    %c0_0 = arith.constant 0 : index
    %c0_1 = arith.constant 0 : index
    %0 = vector.load %arg1[%c0, %c0_0, %c0_1] : memref<1x32x256xf32, #tpu.memory_space<vmem>>, vector<1x32x256xf32>
    %1 = vector.shape_cast %0 : vector<1x32x256xf32> to vector<32x256xf32>
    %c0_2 = arith.constant 0 : index
    %c0_3 = arith.constant 0 : index
    %c0_4 = arith.constant 0 : index
    %2 = vector.load %arg4[%c0_2, %c0_3, %c0_4] : memref<9x1x256xf32, #tpu.memory_space<vmem>>, vector<1x1x256xf32>
    %3 = vector.shape_cast %2 : vector<1x1x256xf32> to vector<1x256xf32>
    %c1 = arith.constant 1 : index
    %c0_5 = arith.constant 0 : index
    %c0_6 = arith.constant 0 : index
    %4 = vector.load %arg4[%c1, %c0_5, %c0_6] : memref<9x1x256xf32, #tpu.memory_space<vmem>>, vector<1x1x256xf32>
    %5 = vector.shape_cast %4 : vector<1x1x256xf32> to vector<1x256xf32>
    %c2 = arith.constant 2 : index
    %c0_7 = arith.constant 0 : index
    %c0_8 = arith.constant 0 : index
    %6 = vector.load %arg4[%c2, %c0_7, %c0_8] : memref<9x1x256xf32, #tpu.memory_space<vmem>>, vector<1x1x256xf32>
    %7 = vector.shape_cast %6 : vector<1x1x256xf32> to vector<1x256xf32>
    %c3 = arith.constant 3 : index
    %c0_9 = arith.constant 0 : index
    %c0_10 = arith.constant 0 : index
    %8 = vector.load %arg4[%c3, %c0_9, %c0_10] : memref<9x1x256xf32, #tpu.memory_space<vmem>>, vector<1x1x256xf32>
    %9 = vector.shape_cast %8 : vector<1x1x256xf32> to vector<1x256xf32>
    %c5 = arith.constant 5 : index
    %c0_11 = arith.constant 0 : index
    %c0_12 = arith.constant 0 : index
    %10 = vector.load %arg4[%c5, %c0_11, %c0_12] : memref<9x1x256xf32, #tpu.memory_space<vmem>>, vector<1x1x256xf32>
    %11 = vector.shape_cast %10 : vector<1x1x256xf32> to vector<1x256xf32>
    %c6 = arith.constant 6 : index
    %c0_13 = arith.constant 0 : index
    %c0_14 = arith.constant 0 : index
    %12 = vector.load %arg4[%c6, %c0_13, %c0_14] : memref<9x1x256xf32, #tpu.memory_space<vmem>>, vector<1x1x256xf32>
    %13 = vector.shape_cast %12 : vector<1x1x256xf32> to vector<1x256xf32>
    %c7 = arith.constant 7 : index
    %c0_15 = arith.constant 0 : index
    %c0_16 = arith.constant 0 : index
    %14 = vector.load %arg4[%c7, %c0_15, %c0_16] : memref<9x1x256xf32, #tpu.memory_space<vmem>>, vector<1x1x256xf32>
    %15 = vector.shape_cast %14 : vector<1x1x256xf32> to vector<1x256xf32>
    %c8 = arith.constant 8 : index
    %c0_17 = arith.constant 0 : index
    %c0_18 = arith.constant 0 : index
    %16 = vector.load %arg4[%c8, %c0_17, %c0_18] : memref<9x1x256xf32, #tpu.memory_space<vmem>>, vector<1x1x256xf32>
    %17 = vector.shape_cast %16 : vector<1x1x256xf32> to vector<1x256xf32>
    %cst = arith.constant 0.000000e+00 : f32
    %18 = vector.broadcast %cst : f32 to vector<32x256xf32>
    %c17_i32 = arith.constant 17 : i32
    %19 = tpu.dynamic_rotate %1 by %c17_i32 dim 1 : vector<32x256xf32>, i32 -> vector<32x256xf32>
    %20 = vector.broadcast %3 : vector<1x256xf32> to vector<32x256xf32>
    %21 = arith.mulf %19, %20 : vector<32x256xf32>
    %c0_19 = arith.constant 0 : index
    %c0_20 = arith.constant 0 : index
    %c0_21 = arith.constant 0 : index
    %c0_22 = arith.constant 0 : index
    %22 = vector.load %arg2[%c0_19, %c0_20, %c0_21, %c0_22] : memref<6x9x32x32xf32, #tpu.memory_space<vmem>>, vector<1x1x32x32xf32>
    %23 = vector.shape_cast %22 : vector<1x1x32x32xf32> to vector<32x32xf32>
    %cst_23 = arith.constant dense<0.000000e+00> : vector<32x256xf32>
    %24 = tpu.matmul %23, %21, %cst_23 {dimension_numbers = #tpu.dot_dimension_numbers<[1], [0], [0], [1], [0, 0, 1, 1], [], []>} : vector<32x32xf32>, vector<32x256xf32>, vector<32x256xf32> -> vector<32x256xf32>
    %25 = arith.addf %18, %24 : vector<32x256xf32>
    %c16_i32 = arith.constant 16 : i32
    %26 = tpu.dynamic_rotate %1 by %c16_i32 dim 1 : vector<32x256xf32>, i32 -> vector<32x256xf32>
    %27 = vector.broadcast %5 : vector<1x256xf32> to vector<32x256xf32>
    %28 = arith.mulf %26, %27 : vector<32x256xf32>
    %c0_24 = arith.constant 0 : index
    %c1_25 = arith.constant 1 : index
    %c0_26 = arith.constant 0 : index
    %c0_27 = arith.constant 0 : index
    %29 = vector.load %arg2[%c0_24, %c1_25, %c0_26, %c0_27] : memref<6x9x32x32xf32, #tpu.memory_space<vmem>>, vector<1x1x32x32xf32>
    %30 = vector.shape_cast %29 : vector<1x1x32x32xf32> to vector<32x32xf32>
    %cst_28 = arith.constant dense<0.000000e+00> : vector<32x256xf32>
    %31 = tpu.matmul %30, %28, %cst_28 {dimension_numbers = #tpu.dot_dimension_numbers<[1], [0], [0], [1], [0, 0, 1, 1], [], []>} : vector<32x32xf32>, vector<32x256xf32>, vector<32x256xf32> -> vector<32x256xf32>
    %32 = arith.addf %25, %31 : vector<32x256xf32>
    %c15_i32 = arith.constant 15 : i32
    %33 = tpu.dynamic_rotate %1 by %c15_i32 dim 1 : vector<32x256xf32>, i32 -> vector<32x256xf32>
    %34 = vector.broadcast %7 : vector<1x256xf32> to vector<32x256xf32>
    %35 = arith.mulf %33, %34 : vector<32x256xf32>
    %c0_29 = arith.constant 0 : index
    %c2_30 = arith.constant 2 : index
    %c0_31 = arith.constant 0 : index
    %c0_32 = arith.constant 0 : index
    %36 = vector.load %arg2[%c0_29, %c2_30, %c0_31, %c0_32] : memref<6x9x32x32xf32, #tpu.memory_space<vmem>>, vector<1x1x32x32xf32>
    %37 = vector.shape_cast %36 : vector<1x1x32x32xf32> to vector<32x32xf32>
    %cst_33 = arith.constant dense<0.000000e+00> : vector<32x256xf32>
    %38 = tpu.matmul %37, %35, %cst_33 {dimension_numbers = #tpu.dot_dimension_numbers<[1], [0], [0], [1], [0, 0, 1, 1], [], []>} : vector<32x32xf32>, vector<32x256xf32>, vector<32x256xf32> -> vector<32x256xf32>
    %39 = arith.addf %32, %38 : vector<32x256xf32>
    %c1_i32 = arith.constant 1 : i32
    %40 = tpu.dynamic_rotate %1 by %c1_i32 dim 1 : vector<32x256xf32>, i32 -> vector<32x256xf32>
    %41 = vector.broadcast %9 : vector<1x256xf32> to vector<32x256xf32>
    %42 = arith.mulf %40, %41 : vector<32x256xf32>
    %c0_34 = arith.constant 0 : index
    %c3_35 = arith.constant 3 : index
    %c0_36 = arith.constant 0 : index
    %c0_37 = arith.constant 0 : index
    %43 = vector.load %arg2[%c0_34, %c3_35, %c0_36, %c0_37] : memref<6x9x32x32xf32, #tpu.memory_space<vmem>>, vector<1x1x32x32xf32>
    %44 = vector.shape_cast %43 : vector<1x1x32x32xf32> to vector<32x32xf32>
    %cst_38 = arith.constant dense<0.000000e+00> : vector<32x256xf32>
    %45 = tpu.matmul %44, %42, %cst_38 {dimension_numbers = #tpu.dot_dimension_numbers<[1], [0], [0], [1], [0, 0, 1, 1], [], []>} : vector<32x32xf32>, vector<32x256xf32>, vector<32x256xf32> -> vector<32x256xf32>
    %46 = arith.addf %39, %45 : vector<32x256xf32>
    %c0_39 = arith.constant 0 : index
    %c4 = arith.constant 4 : index
    %c0_40 = arith.constant 0 : index
    %c0_41 = arith.constant 0 : index
    %47 = vector.load %arg2[%c0_39, %c4, %c0_40, %c0_41] : memref<6x9x32x32xf32, #tpu.memory_space<vmem>>, vector<1x1x32x32xf32>
    %48 = vector.shape_cast %47 : vector<1x1x32x32xf32> to vector<32x32xf32>
    %cst_42 = arith.constant dense<0.000000e+00> : vector<32x256xf32>
    %49 = tpu.matmul %48, %1, %cst_42 {dimension_numbers = #tpu.dot_dimension_numbers<[1], [0], [0], [1], [0, 0, 1, 1], [], []>} : vector<32x32xf32>, vector<32x256xf32>, vector<32x256xf32> -> vector<32x256xf32>
    %50 = arith.addf %46, %49 : vector<32x256xf32>
    %c255_i32 = arith.constant 255 : i32
    %51 = tpu.dynamic_rotate %1 by %c255_i32 dim 1 : vector<32x256xf32>, i32 -> vector<32x256xf32>
    %52 = vector.broadcast %11 : vector<1x256xf32> to vector<32x256xf32>
    %53 = arith.mulf %51, %52 : vector<32x256xf32>
    %c0_43 = arith.constant 0 : index
    %c5_44 = arith.constant 5 : index
    %c0_45 = arith.constant 0 : index
    %c0_46 = arith.constant 0 : index
    %54 = vector.load %arg2[%c0_43, %c5_44, %c0_45, %c0_46] : memref<6x9x32x32xf32, #tpu.memory_space<vmem>>, vector<1x1x32x32xf32>
    %55 = vector.shape_cast %54 : vector<1x1x32x32xf32> to vector<32x32xf32>
    %cst_47 = arith.constant dense<0.000000e+00> : vector<32x256xf32>
    %56 = tpu.matmul %55, %53, %cst_47 {dimension_numbers = #tpu.dot_dimension_numbers<[1], [0], [0], [1], [0, 0, 1, 1], [], []>} : vector<32x32xf32>, vector<32x256xf32>, vector<32x256xf32> -> vector<32x256xf32>
    %57 = arith.addf %50, %56 : vector<32x256xf32>
    %c241_i32 = arith.constant 241 : i32
    %58 = tpu.dynamic_rotate %1 by %c241_i32 dim 1 : vector<32x256xf32>, i32 -> vector<32x256xf32>
    %59 = vector.broadcast %13 : vector<1x256xf32> to vector<32x256xf32>
    %60 = arith.mulf %58, %59 : vector<32x256xf32>
    %c0_48 = arith.constant 0 : index
    %c6_49 = arith.constant 6 : index
    %c0_50 = arith.constant 0 : index
    %c0_51 = arith.constant 0 : index
    %61 = vector.load %arg2[%c0_48, %c6_49, %c0_50, %c0_51] : memref<6x9x32x32xf32, #tpu.memory_space<vmem>>, vector<1x1x32x32xf32>
    %62 = vector.shape_cast %61 : vector<1x1x32x32xf32> to vector<32x32xf32>
    %cst_52 = arith.constant dense<0.000000e+00> : vector<32x256xf32>
    %63 = tpu.matmul %62, %60, %cst_52 {dimension_numbers = #tpu.dot_dimension_numbers<[1], [0], [0], [1], [0, 0, 1, 1], [], []>} : vector<32x32xf32>, vector<32x256xf32>, vector<32x256xf32> -> vector<32x256xf32>
    %64 = arith.addf %57, %63 : vector<32x256xf32>
    %c240_i32 = arith.constant 240 : i32
    %65 = tpu.dynamic_rotate %1 by %c240_i32 dim 1 : vector<32x256xf32>, i32 -> vector<32x256xf32>
    %66 = vector.broadcast %15 : vector<1x256xf32> to vector<32x256xf32>
    %67 = arith.mulf %65, %66 : vector<32x256xf32>
    %c0_53 = arith.constant 0 : index
    %c7_54 = arith.constant 7 : index
    %c0_55 = arith.constant 0 : index
    %c0_56 = arith.constant 0 : index
    %68 = vector.load %arg2[%c0_53, %c7_54, %c0_55, %c0_56] : memref<6x9x32x32xf32, #tpu.memory_space<vmem>>, vector<1x1x32x32xf32>
    %69 = vector.shape_cast %68 : vector<1x1x32x32xf32> to vector<32x32xf32>
    %cst_57 = arith.constant dense<0.000000e+00> : vector<32x256xf32>
    %70 = tpu.matmul %69, %67, %cst_57 {dimension_numbers = #tpu.dot_dimension_numbers<[1], [0], [0], [1], [0, 0, 1, 1], [], []>} : vector<32x32xf32>, vector<32x256xf32>, vector<32x256xf32> -> vector<32x256xf32>
    %71 = arith.addf %64, %70 : vector<32x256xf32>
    %c239_i32 = arith.constant 239 : i32
    %72 = tpu.dynamic_rotate %1 by %c239_i32 dim 1 : vector<32x256xf32>, i32 -> vector<32x256xf32>
    %73 = vector.broadcast %17 : vector<1x256xf32> to vector<32x256xf32>
    %74 = arith.mulf %72, %73 : vector<32x256xf32>
    %c0_58 = arith.constant 0 : index
    %c8_59 = arith.constant 8 : index
    %c0_60 = arith.constant 0 : index
    %c0_61 = arith.constant 0 : index
    %75 = vector.load %arg2[%c0_58, %c8_59, %c0_60, %c0_61] : memref<6x9x32x32xf32, #tpu.memory_space<vmem>>, vector<1x1x32x32xf32>
    %76 = vector.shape_cast %75 : vector<1x1x32x32xf32> to vector<32x32xf32>
    %cst_62 = arith.constant dense<0.000000e+00> : vector<32x256xf32>
    %77 = tpu.matmul %76, %74, %cst_62 {dimension_numbers = #tpu.dot_dimension_numbers<[1], [0], [0], [1], [0, 0, 1, 1], [], []>} : vector<32x32xf32>, vector<32x256xf32>, vector<32x256xf32> -> vector<32x256xf32>
    %78 = arith.addf %71, %77 : vector<32x256xf32>
    %c0_63 = arith.constant 0 : index
    %c0_64 = arith.constant 0 : index
    %c0_65 = arith.constant 0 : index
    %79 = vector.load %arg3[%c0_63, %c0_64, %c0_65] : memref<6x32x1xf32, #tpu.memory_space<vmem>>, vector<1x32x1xf32>
    %80 = vector.shape_cast %79 : vector<1x32x1xf32> to vector<32x1xf32>
    %81 = vector.broadcast %80 : vector<32x1xf32> to vector<32x256xf32>
    %82 = arith.addf %78, %81 : vector<32x256xf32>
    %cst_66 = arith.constant 0.000000e+00 : f32
    %83 = vector.broadcast %cst_66 : f32 to vector<32x256xf32>
    %84 = arith.cmpf oge, %82, %83 : vector<32x256xf32>
    %cst_67 = arith.constant 2.000000e-01 : f32
    %85 = vector.broadcast %cst_67 : f32 to vector<32x256xf32>
    %86 = arith.mulf %85, %82 : vector<32x256xf32>
    %87 = arith.select %84, %82, %86 : vector<32x256xi1>, vector<32x256xf32>
    %cst_68 = arith.constant 0.000000e+00 : f32
    %88 = vector.broadcast %cst_68 : f32 to vector<32x256xf32>
    %c17_i32_69 = arith.constant 17 : i32
    %89 = tpu.dynamic_rotate %87 by %c17_i32_69 dim 1 : vector<32x256xf32>, i32 -> vector<32x256xf32>
    %90 = vector.broadcast %3 : vector<1x256xf32> to vector<32x256xf32>
    %91 = arith.mulf %89, %90 : vector<32x256xf32>
    %c1_70 = arith.constant 1 : index
    %c0_71 = arith.constant 0 : index
    %c0_72 = arith.constant 0 : index
    %c0_73 = arith.constant 0 : index
    %92 = vector.load %arg2[%c1_70, %c0_71, %c0_72, %c0_73] : memref<6x9x32x32xf32, #tpu.memory_space<vmem>>, vector<1x1x32x32xf32>
    %93 = vector.shape_cast %92 : vector<1x1x32x32xf32> to vector<32x32xf32>
    %cst_74 = arith.constant dense<0.000000e+00> : vector<32x256xf32>
    %94 = tpu.matmul %93, %91, %cst_74 {dimension_numbers = #tpu.dot_dimension_numbers<[1], [0], [0], [1], [0, 0, 1, 1], [], []>} : vector<32x32xf32>, vector<32x256xf32>, vector<32x256xf32> -> vector<32x256xf32>
    %95 = arith.addf %88, %94 : vector<32x256xf32>
    %c16_i32_75 = arith.constant 16 : i32
    %96 = tpu.dynamic_rotate %87 by %c16_i32_75 dim 1 : vector<32x256xf32>, i32 -> vector<32x256xf32>
    %97 = vector.broadcast %5 : vector<1x256xf32> to vector<32x256xf32>
    %98 = arith.mulf %96, %97 : vector<32x256xf32>
    %c1_76 = arith.constant 1 : index
    %c1_77 = arith.constant 1 : index
    %c0_78 = arith.constant 0 : index
    %c0_79 = arith.constant 0 : index
    %99 = vector.load %arg2[%c1_76, %c1_77, %c0_78, %c0_79] : memref<6x9x32x32xf32, #tpu.memory_space<vmem>>, vector<1x1x32x32xf32>
    %100 = vector.shape_cast %99 : vector<1x1x32x32xf32> to vector<32x32xf32>
    %cst_80 = arith.constant dense<0.000000e+00> : vector<32x256xf32>
    %101 = tpu.matmul %100, %98, %cst_80 {dimension_numbers = #tpu.dot_dimension_numbers<[1], [0], [0], [1], [0, 0, 1, 1], [], []>} : vector<32x32xf32>, vector<32x256xf32>, vector<32x256xf32> -> vector<32x256xf32>
    %102 = arith.addf %95, %101 : vector<32x256xf32>
    %c15_i32_81 = arith.constant 15 : i32
    %103 = tpu.dynamic_rotate %87 by %c15_i32_81 dim 1 : vector<32x256xf32>, i32 -> vector<32x256xf32>
    %104 = vector.broadcast %7 : vector<1x256xf32> to vector<32x256xf32>
    %105 = arith.mulf %103, %104 : vector<32x256xf32>
    %c1_82 = arith.constant 1 : index
    %c2_83 = arith.constant 2 : index
    %c0_84 = arith.constant 0 : index
    %c0_85 = arith.constant 0 : index
    %106 = vector.load %arg2[%c1_82, %c2_83, %c0_84, %c0_85] : memref<6x9x32x32xf32, #tpu.memory_space<vmem>>, vector<1x1x32x32xf32>
    %107 = vector.shape_cast %106 : vector<1x1x32x32xf32> to vector<32x32xf32>
    %cst_86 = arith.constant dense<0.000000e+00> : vector<32x256xf32>
    %108 = tpu.matmul %107, %105, %cst_86 {dimension_numbers = #tpu.dot_dimension_numbers<[1], [0], [0], [1], [0, 0, 1, 1], [], []>} : vector<32x32xf32>, vector<32x256xf32>, vector<32x256xf32> -> vector<32x256xf32>
    %109 = arith.addf %102, %108 : vector<32x256xf32>
    %c1_i32_87 = arith.constant 1 : i32
    %110 = tpu.dynamic_rotate %87 by %c1_i32_87 dim 1 : vector<32x256xf32>, i32 -> vector<32x256xf32>
    %111 = vector.broadcast %9 : vector<1x256xf32> to vector<32x256xf32>
    %112 = arith.mulf %110, %111 : vector<32x256xf32>
    %c1_88 = arith.constant 1 : index
    %c3_89 = arith.constant 3 : index
    %c0_90 = arith.constant 0 : index
    %c0_91 = arith.constant 0 : index
    %113 = vector.load %arg2[%c1_88, %c3_89, %c0_90, %c0_91] : memref<6x9x32x32xf32, #tpu.memory_space<vmem>>, vector<1x1x32x32xf32>
    %114 = vector.shape_cast %113 : vector<1x1x32x32xf32> to vector<32x32xf32>
    %cst_92 = arith.constant dense<0.000000e+00> : vector<32x256xf32>
    %115 = tpu.matmul %114, %112, %cst_92 {dimension_numbers = #tpu.dot_dimension_numbers<[1], [0], [0], [1], [0, 0, 1, 1], [], []>} : vector<32x32xf32>, vector<32x256xf32>, vector<32x256xf32> -> vector<32x256xf32>
    %116 = arith.addf %109, %115 : vector<32x256xf32>
    %c1_93 = arith.constant 1 : index
    %c4_94 = arith.constant 4 : index
    %c0_95 = arith.constant 0 : index
    %c0_96 = arith.constant 0 : index
    %117 = vector.load %arg2[%c1_93, %c4_94, %c0_95, %c0_96] : memref<6x9x32x32xf32, #tpu.memory_space<vmem>>, vector<1x1x32x32xf32>
    %118 = vector.shape_cast %117 : vector<1x1x32x32xf32> to vector<32x32xf32>
    %cst_97 = arith.constant dense<0.000000e+00> : vector<32x256xf32>
    %119 = tpu.matmul %118, %87, %cst_97 {dimension_numbers = #tpu.dot_dimension_numbers<[1], [0], [0], [1], [0, 0, 1, 1], [], []>} : vector<32x32xf32>, vector<32x256xf32>, vector<32x256xf32> -> vector<32x256xf32>
    %120 = arith.addf %116, %119 : vector<32x256xf32>
    %c255_i32_98 = arith.constant 255 : i32
    %121 = tpu.dynamic_rotate %87 by %c255_i32_98 dim 1 : vector<32x256xf32>, i32 -> vector<32x256xf32>
    %122 = vector.broadcast %11 : vector<1x256xf32> to vector<32x256xf32>
    %123 = arith.mulf %121, %122 : vector<32x256xf32>
    %c1_99 = arith.constant 1 : index
    %c5_100 = arith.constant 5 : index
    %c0_101 = arith.constant 0 : index
    %c0_102 = arith.constant 0 : index
    %124 = vector.load %arg2[%c1_99, %c5_100, %c0_101, %c0_102] : memref<6x9x32x32xf32, #tpu.memory_space<vmem>>, vector<1x1x32x32xf32>
    %125 = vector.shape_cast %124 : vector<1x1x32x32xf32> to vector<32x32xf32>
    %cst_103 = arith.constant dense<0.000000e+00> : vector<32x256xf32>
    %126 = tpu.matmul %125, %123, %cst_103 {dimension_numbers = #tpu.dot_dimension_numbers<[1], [0], [0], [1], [0, 0, 1, 1], [], []>} : vector<32x32xf32>, vector<32x256xf32>, vector<32x256xf32> -> vector<32x256xf32>
    %127 = arith.addf %120, %126 : vector<32x256xf32>
    %c241_i32_104 = arith.constant 241 : i32
    %128 = tpu.dynamic_rotate %87 by %c241_i32_104 dim 1 : vector<32x256xf32>, i32 -> vector<32x256xf32>
    %129 = vector.broadcast %13 : vector<1x256xf32> to vector<32x256xf32>
    %130 = arith.mulf %128, %129 : vector<32x256xf32>
    %c1_105 = arith.constant 1 : index
    %c6_106 = arith.constant 6 : index
    %c0_107 = arith.constant 0 : index
    %c0_108 = arith.constant 0 : index
    %131 = vector.load %arg2[%c1_105, %c6_106, %c0_107, %c0_108] : memref<6x9x32x32xf32, #tpu.memory_space<vmem>>, vector<1x1x32x32xf32>
    %132 = vector.shape_cast %131 : vector<1x1x32x32xf32> to vector<32x32xf32>
    %cst_109 = arith.constant dense<0.000000e+00> : vector<32x256xf32>
    %133 = tpu.matmul %132, %130, %cst_109 {dimension_numbers = #tpu.dot_dimension_numbers<[1], [0], [0], [1], [0, 0, 1, 1], [], []>} : vector<32x32xf32>, vector<32x256xf32>, vector<32x256xf32> -> vector<32x256xf32>
    %134 = arith.addf %127, %133 : vector<32x256xf32>
    %c240_i32_110 = arith.constant 240 : i32
    %135 = tpu.dynamic_rotate %87 by %c240_i32_110 dim 1 : vector<32x256xf32>, i32 -> vector<32x256xf32>
    %136 = vector.broadcast %15 : vector<1x256xf32> to vector<32x256xf32>
    %137 = arith.mulf %135, %136 : vector<32x256xf32>
    %c1_111 = arith.constant 1 : index
    %c7_112 = arith.constant 7 : index
    %c0_113 = arith.constant 0 : index
    %c0_114 = arith.constant 0 : index
    %138 = vector.load %arg2[%c1_111, %c7_112, %c0_113, %c0_114] : memref<6x9x32x32xf32, #tpu.memory_space<vmem>>, vector<1x1x32x32xf32>
    %139 = vector.shape_cast %138 : vector<1x1x32x32xf32> to vector<32x32xf32>
    %cst_115 = arith.constant dense<0.000000e+00> : vector<32x256xf32>
    %140 = tpu.matmul %139, %137, %cst_115 {dimension_numbers = #tpu.dot_dimension_numbers<[1], [0], [0], [1], [0, 0, 1, 1], [], []>} : vector<32x32xf32>, vector<32x256xf32>, vector<32x256xf32> -> vector<32x256xf32>
    %141 = arith.addf %134, %140 : vector<32x256xf32>
    %c239_i32_116 = arith.constant 239 : i32
    %142 = tpu.dynamic_rotate %87 by %c239_i32_116 dim 1 : vector<32x256xf32>, i32 -> vector<32x256xf32>
    %143 = vector.broadcast %17 : vector<1x256xf32> to vector<32x256xf32>
    %144 = arith.mulf %142, %143 : vector<32x256xf32>
    %c1_117 = arith.constant 1 : index
    %c8_118 = arith.constant 8 : index
    %c0_119 = arith.constant 0 : index
    %c0_120 = arith.constant 0 : index
    %145 = vector.load %arg2[%c1_117, %c8_118, %c0_119, %c0_120] : memref<6x9x32x32xf32, #tpu.memory_space<vmem>>, vector<1x1x32x32xf32>
    %146 = vector.shape_cast %145 : vector<1x1x32x32xf32> to vector<32x32xf32>
    %cst_121 = arith.constant dense<0.000000e+00> : vector<32x256xf32>
    %147 = tpu.matmul %146, %144, %cst_121 {dimension_numbers = #tpu.dot_dimension_numbers<[1], [0], [0], [1], [0, 0, 1, 1], [], []>} : vector<32x32xf32>, vector<32x256xf32>, vector<32x256xf32> -> vector<32x256xf32>
    %148 = arith.addf %141, %147 : vector<32x256xf32>
    %c1_122 = arith.constant 1 : index
    %c0_123 = arith.constant 0 : index
    %c0_124 = arith.constant 0 : index
    %149 = vector.load %arg3[%c1_122, %c0_123, %c0_124] : memref<6x32x1xf32, #tpu.memory_space<vmem>>, vector<1x32x1xf32>
    %150 = vector.shape_cast %149 : vector<1x32x1xf32> to vector<32x1xf32>
    %151 = vector.broadcast %150 : vector<32x1xf32> to vector<32x256xf32>
    %152 = arith.addf %148, %151 : vector<32x256xf32>
    %cst_125 = arith.constant 0.000000e+00 : f32
    %153 = vector.broadcast %cst_125 : f32 to vector<32x256xf32>
    %154 = arith.cmpf oge, %152, %153 : vector<32x256xf32>
    %cst_126 = arith.constant 2.000000e-01 : f32
    %155 = vector.broadcast %cst_126 : f32 to vector<32x256xf32>
    %156 = arith.mulf %155, %152 : vector<32x256xf32>
    %157 = arith.select %154, %152, %156 : vector<32x256xi1>, vector<32x256xf32>
    %cst_127 = arith.constant 0.000000e+00 : f32
    %158 = vector.broadcast %cst_127 : f32 to vector<32x256xf32>
    %c17_i32_128 = arith.constant 17 : i32
    %159 = tpu.dynamic_rotate %157 by %c17_i32_128 dim 1 : vector<32x256xf32>, i32 -> vector<32x256xf32>
    %160 = vector.broadcast %3 : vector<1x256xf32> to vector<32x256xf32>
    %161 = arith.mulf %159, %160 : vector<32x256xf32>
    %c2_129 = arith.constant 2 : index
    %c0_130 = arith.constant 0 : index
    %c0_131 = arith.constant 0 : index
    %c0_132 = arith.constant 0 : index
    %162 = vector.load %arg2[%c2_129, %c0_130, %c0_131, %c0_132] : memref<6x9x32x32xf32, #tpu.memory_space<vmem>>, vector<1x1x32x32xf32>
    %163 = vector.shape_cast %162 : vector<1x1x32x32xf32> to vector<32x32xf32>
    %cst_133 = arith.constant dense<0.000000e+00> : vector<32x256xf32>
    %164 = tpu.matmul %163, %161, %cst_133 {dimension_numbers = #tpu.dot_dimension_numbers<[1], [0], [0], [1], [0, 0, 1, 1], [], []>} : vector<32x32xf32>, vector<32x256xf32>, vector<32x256xf32> -> vector<32x256xf32>
    %165 = arith.addf %158, %164 : vector<32x256xf32>
    %c16_i32_134 = arith.constant 16 : i32
    %166 = tpu.dynamic_rotate %157 by %c16_i32_134 dim 1 : vector<32x256xf32>, i32 -> vector<32x256xf32>
    %167 = vector.broadcast %5 : vector<1x256xf32> to vector<32x256xf32>
    %168 = arith.mulf %166, %167 : vector<32x256xf32>
    %c2_135 = arith.constant 2 : index
    %c1_136 = arith.constant 1 : index
    %c0_137 = arith.constant 0 : index
    %c0_138 = arith.constant 0 : index
    %169 = vector.load %arg2[%c2_135, %c1_136, %c0_137, %c0_138] : memref<6x9x32x32xf32, #tpu.memory_space<vmem>>, vector<1x1x32x32xf32>
    %170 = vector.shape_cast %169 : vector<1x1x32x32xf32> to vector<32x32xf32>
    %cst_139 = arith.constant dense<0.000000e+00> : vector<32x256xf32>
    %171 = tpu.matmul %170, %168, %cst_139 {dimension_numbers = #tpu.dot_dimension_numbers<[1], [0], [0], [1], [0, 0, 1, 1], [], []>} : vector<32x32xf32>, vector<32x256xf32>, vector<32x256xf32> -> vector<32x256xf32>
    %172 = arith.addf %165, %171 : vector<32x256xf32>
    %c15_i32_140 = arith.constant 15 : i32
    %173 = tpu.dynamic_rotate %157 by %c15_i32_140 dim 1 : vector<32x256xf32>, i32 -> vector<32x256xf32>
    %174 = vector.broadcast %7 : vector<1x256xf32> to vector<32x256xf32>
    %175 = arith.mulf %173, %174 : vector<32x256xf32>
    %c2_141 = arith.constant 2 : index
    %c2_142 = arith.constant 2 : index
    %c0_143 = arith.constant 0 : index
    %c0_144 = arith.constant 0 : index
    %176 = vector.load %arg2[%c2_141, %c2_142, %c0_143, %c0_144] : memref<6x9x32x32xf32, #tpu.memory_space<vmem>>, vector<1x1x32x32xf32>
    %177 = vector.shape_cast %176 : vector<1x1x32x32xf32> to vector<32x32xf32>
    %cst_145 = arith.constant dense<0.000000e+00> : vector<32x256xf32>
    %178 = tpu.matmul %177, %175, %cst_145 {dimension_numbers = #tpu.dot_dimension_numbers<[1], [0], [0], [1], [0, 0, 1, 1], [], []>} : vector<32x32xf32>, vector<32x256xf32>, vector<32x256xf32> -> vector<32x256xf32>
    %179 = arith.addf %172, %178 : vector<32x256xf32>
    %c1_i32_146 = arith.constant 1 : i32
    %180 = tpu.dynamic_rotate %157 by %c1_i32_146 dim 1 : vector<32x256xf32>, i32 -> vector<32x256xf32>
    %181 = vector.broadcast %9 : vector<1x256xf32> to vector<32x256xf32>
    %182 = arith.mulf %180, %181 : vector<32x256xf32>
    %c2_147 = arith.constant 2 : index
    %c3_148 = arith.constant 3 : index
    %c0_149 = arith.constant 0 : index
    %c0_150 = arith.constant 0 : index
    %183 = vector.load %arg2[%c2_147, %c3_148, %c0_149, %c0_150] : memref<6x9x32x32xf32, #tpu.memory_space<vmem>>, vector<1x1x32x32xf32>
    %184 = vector.shape_cast %183 : vector<1x1x32x32xf32> to vector<32x32xf32>
    %cst_151 = arith.constant dense<0.000000e+00> : vector<32x256xf32>
    %185 = tpu.matmul %184, %182, %cst_151 {dimension_numbers = #tpu.dot_dimension_numbers<[1], [0], [0], [1], [0, 0, 1, 1], [], []>} : vector<32x32xf32>, vector<32x256xf32>, vector<32x256xf32> -> vector<32x256xf32>
    %186 = arith.addf %179, %185 : vector<32x256xf32>
    %c2_152 = arith.constant 2 : index
    %c4_153 = arith.constant 4 : index
    %c0_154 = arith.constant 0 : index
    %c0_155 = arith.constant 0 : index
    %187 = vector.load %arg2[%c2_152, %c4_153, %c0_154, %c0_155] : memref<6x9x32x32xf32, #tpu.memory_space<vmem>>, vector<1x1x32x32xf32>
    %188 = vector.shape_cast %187 : vector<1x1x32x32xf32> to vector<32x32xf32>
    %cst_156 = arith.constant dense<0.000000e+00> : vector<32x256xf32>
    %189 = tpu.matmul %188, %157, %cst_156 {dimension_numbers = #tpu.dot_dimension_numbers<[1], [0], [0], [1], [0, 0, 1, 1], [], []>} : vector<32x32xf32>, vector<32x256xf32>, vector<32x256xf32> -> vector<32x256xf32>
    %190 = arith.addf %186, %189 : vector<32x256xf32>
    %c255_i32_157 = arith.constant 255 : i32
    %191 = tpu.dynamic_rotate %157 by %c255_i32_157 dim 1 : vector<32x256xf32>, i32 -> vector<32x256xf32>
    %192 = vector.broadcast %11 : vector<1x256xf32> to vector<32x256xf32>
    %193 = arith.mulf %191, %192 : vector<32x256xf32>
    %c2_158 = arith.constant 2 : index
    %c5_159 = arith.constant 5 : index
    %c0_160 = arith.constant 0 : index
    %c0_161 = arith.constant 0 : index
    %194 = vector.load %arg2[%c2_158, %c5_159, %c0_160, %c0_161] : memref<6x9x32x32xf32, #tpu.memory_space<vmem>>, vector<1x1x32x32xf32>
    %195 = vector.shape_cast %194 : vector<1x1x32x32xf32> to vector<32x32xf32>
    %cst_162 = arith.constant dense<0.000000e+00> : vector<32x256xf32>
    %196 = tpu.matmul %195, %193, %cst_162 {dimension_numbers = #tpu.dot_dimension_numbers<[1], [0], [0], [1], [0, 0, 1, 1], [], []>} : vector<32x32xf32>, vector<32x256xf32>, vector<32x256xf32> -> vector<32x256xf32>
    %197 = arith.addf %190, %196 : vector<32x256xf32>
    %c241_i32_163 = arith.constant 241 : i32
    %198 = tpu.dynamic_rotate %157 by %c241_i32_163 dim 1 : vector<32x256xf32>, i32 -> vector<32x256xf32>
    %199 = vector.broadcast %13 : vector<1x256xf32> to vector<32x256xf32>
    %200 = arith.mulf %198, %199 : vector<32x256xf32>
    %c2_164 = arith.constant 2 : index
    %c6_165 = arith.constant 6 : index
    %c0_166 = arith.constant 0 : index
    %c0_167 = arith.constant 0 : index
    %201 = vector.load %arg2[%c2_164, %c6_165, %c0_166, %c0_167] : memref<6x9x32x32xf32, #tpu.memory_space<vmem>>, vector<1x1x32x32xf32>
    %202 = vector.shape_cast %201 : vector<1x1x32x32xf32> to vector<32x32xf32>
    %cst_168 = arith.constant dense<0.000000e+00> : vector<32x256xf32>
    %203 = tpu.matmul %202, %200, %cst_168 {dimension_numbers = #tpu.dot_dimension_numbers<[1], [0], [0], [1], [0, 0, 1, 1], [], []>} : vector<32x32xf32>, vector<32x256xf32>, vector<32x256xf32> -> vector<32x256xf32>
    %204 = arith.addf %197, %203 : vector<32x256xf32>
    %c240_i32_169 = arith.constant 240 : i32
    %205 = tpu.dynamic_rotate %157 by %c240_i32_169 dim 1 : vector<32x256xf32>, i32 -> vector<32x256xf32>
    %206 = vector.broadcast %15 : vector<1x256xf32> to vector<32x256xf32>
    %207 = arith.mulf %205, %206 : vector<32x256xf32>
    %c2_170 = arith.constant 2 : index
    %c7_171 = arith.constant 7 : index
    %c0_172 = arith.constant 0 : index
    %c0_173 = arith.constant 0 : index
    %208 = vector.load %arg2[%c2_170, %c7_171, %c0_172, %c0_173] : memref<6x9x32x32xf32, #tpu.memory_space<vmem>>, vector<1x1x32x32xf32>
    %209 = vector.shape_cast %208 : vector<1x1x32x32xf32> to vector<32x32xf32>
    %cst_174 = arith.constant dense<0.000000e+00> : vector<32x256xf32>
    %210 = tpu.matmul %209, %207, %cst_174 {dimension_numbers = #tpu.dot_dimension_numbers<[1], [0], [0], [1], [0, 0, 1, 1], [], []>} : vector<32x32xf32>, vector<32x256xf32>, vector<32x256xf32> -> vector<32x256xf32>
    %211 = arith.addf %204, %210 : vector<32x256xf32>
    %c239_i32_175 = arith.constant 239 : i32
    %212 = tpu.dynamic_rotate %157 by %c239_i32_175 dim 1 : vector<32x256xf32>, i32 -> vector<32x256xf32>
    %213 = vector.broadcast %17 : vector<1x256xf32> to vector<32x256xf32>
    %214 = arith.mulf %212, %213 : vector<32x256xf32>
    %c2_176 = arith.constant 2 : index
    %c8_177 = arith.constant 8 : index
    %c0_178 = arith.constant 0 : index
    %c0_179 = arith.constant 0 : index
    %215 = vector.load %arg2[%c2_176, %c8_177, %c0_178, %c0_179] : memref<6x9x32x32xf32, #tpu.memory_space<vmem>>, vector<1x1x32x32xf32>
    %216 = vector.shape_cast %215 : vector<1x1x32x32xf32> to vector<32x32xf32>
    %cst_180 = arith.constant dense<0.000000e+00> : vector<32x256xf32>
    %217 = tpu.matmul %216, %214, %cst_180 {dimension_numbers = #tpu.dot_dimension_numbers<[1], [0], [0], [1], [0, 0, 1, 1], [], []>} : vector<32x32xf32>, vector<32x256xf32>, vector<32x256xf32> -> vector<32x256xf32>
    %218 = arith.addf %211, %217 : vector<32x256xf32>
    %c2_181 = arith.constant 2 : index
    %c0_182 = arith.constant 0 : index
    %c0_183 = arith.constant 0 : index
    %219 = vector.load %arg3[%c2_181, %c0_182, %c0_183] : memref<6x32x1xf32, #tpu.memory_space<vmem>>, vector<1x32x1xf32>
    %220 = vector.shape_cast %219 : vector<1x32x1xf32> to vector<32x1xf32>
    %221 = vector.broadcast %220 : vector<32x1xf32> to vector<32x256xf32>
    %222 = arith.addf %218, %221 : vector<32x256xf32>
    %223 = arith.addf %222, %87 : vector<32x256xf32>
    %cst_184 = arith.constant 0.000000e+00 : f32
    %224 = vector.broadcast %cst_184 : f32 to vector<32x256xf32>
    %225 = arith.cmpf oge, %223, %224 : vector<32x256xf32>
    %cst_185 = arith.constant 2.000000e-01 : f32
    %226 = vector.broadcast %cst_185 : f32 to vector<32x256xf32>
    %227 = arith.mulf %226, %223 : vector<32x256xf32>
    %228 = arith.select %225, %223, %227 : vector<32x256xi1>, vector<32x256xf32>
    %cst_186 = arith.constant 0.000000e+00 : f32
    %229 = vector.broadcast %cst_186 : f32 to vector<32x256xf32>
    %c17_i32_187 = arith.constant 17 : i32
    %230 = tpu.dynamic_rotate %228 by %c17_i32_187 dim 1 : vector<32x256xf32>, i32 -> vector<32x256xf32>
    %231 = vector.broadcast %3 : vector<1x256xf32> to vector<32x256xf32>
    %232 = arith.mulf %230, %231 : vector<32x256xf32>
    %c3_188 = arith.constant 3 : index
    %c0_189 = arith.constant 0 : index
    %c0_190 = arith.constant 0 : index
    %c0_191 = arith.constant 0 : index
    %233 = vector.load %arg2[%c3_188, %c0_189, %c0_190, %c0_191] : memref<6x9x32x32xf32, #tpu.memory_space<vmem>>, vector<1x1x32x32xf32>
    %234 = vector.shape_cast %233 : vector<1x1x32x32xf32> to vector<32x32xf32>
    %cst_192 = arith.constant dense<0.000000e+00> : vector<32x256xf32>
    %235 = tpu.matmul %234, %232, %cst_192 {dimension_numbers = #tpu.dot_dimension_numbers<[1], [0], [0], [1], [0, 0, 1, 1], [], []>} : vector<32x32xf32>, vector<32x256xf32>, vector<32x256xf32> -> vector<32x256xf32>
    %236 = arith.addf %229, %235 : vector<32x256xf32>
    %c16_i32_193 = arith.constant 16 : i32
    %237 = tpu.dynamic_rotate %228 by %c16_i32_193 dim 1 : vector<32x256xf32>, i32 -> vector<32x256xf32>
    %238 = vector.broadcast %5 : vector<1x256xf32> to vector<32x256xf32>
    %239 = arith.mulf %237, %238 : vector<32x256xf32>
    %c3_194 = arith.constant 3 : index
    %c1_195 = arith.constant 1 : index
    %c0_196 = arith.constant 0 : index
    %c0_197 = arith.constant 0 : index
    %240 = vector.load %arg2[%c3_194, %c1_195, %c0_196, %c0_197] : memref<6x9x32x32xf32, #tpu.memory_space<vmem>>, vector<1x1x32x32xf32>
    %241 = vector.shape_cast %240 : vector<1x1x32x32xf32> to vector<32x32xf32>
    %cst_198 = arith.constant dense<0.000000e+00> : vector<32x256xf32>
    %242 = tpu.matmul %241, %239, %cst_198 {dimension_numbers = #tpu.dot_dimension_numbers<[1], [0], [0], [1], [0, 0, 1, 1], [], []>} : vector<32x32xf32>, vector<32x256xf32>, vector<32x256xf32> -> vector<32x256xf32>
    %243 = arith.addf %236, %242 : vector<32x256xf32>
    %c15_i32_199 = arith.constant 15 : i32
    %244 = tpu.dynamic_rotate %228 by %c15_i32_199 dim 1 : vector<32x256xf32>, i32 -> vector<32x256xf32>
    %245 = vector.broadcast %7 : vector<1x256xf32> to vector<32x256xf32>
    %246 = arith.mulf %244, %245 : vector<32x256xf32>
    %c3_200 = arith.constant 3 : index
    %c2_201 = arith.constant 2 : index
    %c0_202 = arith.constant 0 : index
    %c0_203 = arith.constant 0 : index
    %247 = vector.load %arg2[%c3_200, %c2_201, %c0_202, %c0_203] : memref<6x9x32x32xf32, #tpu.memory_space<vmem>>, vector<1x1x32x32xf32>
    %248 = vector.shape_cast %247 : vector<1x1x32x32xf32> to vector<32x32xf32>
    %cst_204 = arith.constant dense<0.000000e+00> : vector<32x256xf32>
    %249 = tpu.matmul %248, %246, %cst_204 {dimension_numbers = #tpu.dot_dimension_numbers<[1], [0], [0], [1], [0, 0, 1, 1], [], []>} : vector<32x32xf32>, vector<32x256xf32>, vector<32x256xf32> -> vector<32x256xf32>
    %250 = arith.addf %243, %249 : vector<32x256xf32>
    %c1_i32_205 = arith.constant 1 : i32
    %251 = tpu.dynamic_rotate %228 by %c1_i32_205 dim 1 : vector<32x256xf32>, i32 -> vector<32x256xf32>
    %252 = vector.broadcast %9 : vector<1x256xf32> to vector<32x256xf32>
    %253 = arith.mulf %251, %252 : vector<32x256xf32>
    %c3_206 = arith.constant 3 : index
    %c3_207 = arith.constant 3 : index
    %c0_208 = arith.constant 0 : index
    %c0_209 = arith.constant 0 : index
    %254 = vector.load %arg2[%c3_206, %c3_207, %c0_208, %c0_209] : memref<6x9x32x32xf32, #tpu.memory_space<vmem>>, vector<1x1x32x32xf32>
    %255 = vector.shape_cast %254 : vector<1x1x32x32xf32> to vector<32x32xf32>
    %cst_210 = arith.constant dense<0.000000e+00> : vector<32x256xf32>
    %256 = tpu.matmul %255, %253, %cst_210 {dimension_numbers = #tpu.dot_dimension_numbers<[1], [0], [0], [1], [0, 0, 1, 1], [], []>} : vector<32x32xf32>, vector<32x256xf32>, vector<32x256xf32> -> vector<32x256xf32>
    %257 = arith.addf %250, %256 : vector<32x256xf32>
    %c3_211 = arith.constant 3 : index
    %c4_212 = arith.constant 4 : index
    %c0_213 = arith.constant 0 : index
    %c0_214 = arith.constant 0 : index
    %258 = vector.load %arg2[%c3_211, %c4_212, %c0_213, %c0_214] : memref<6x9x32x32xf32, #tpu.memory_space<vmem>>, vector<1x1x32x32xf32>
    %259 = vector.shape_cast %258 : vector<1x1x32x32xf32> to vector<32x32xf32>
    %cst_215 = arith.constant dense<0.000000e+00> : vector<32x256xf32>
    %260 = tpu.matmul %259, %228, %cst_215 {dimension_numbers = #tpu.dot_dimension_numbers<[1], [0], [0], [1], [0, 0, 1, 1], [], []>} : vector<32x32xf32>, vector<32x256xf32>, vector<32x256xf32> -> vector<32x256xf32>
    %261 = arith.addf %257, %260 : vector<32x256xf32>
    %c255_i32_216 = arith.constant 255 : i32
    %262 = tpu.dynamic_rotate %228 by %c255_i32_216 dim 1 : vector<32x256xf32>, i32 -> vector<32x256xf32>
    %263 = vector.broadcast %11 : vector<1x256xf32> to vector<32x256xf32>
    %264 = arith.mulf %262, %263 : vector<32x256xf32>
    %c3_217 = arith.constant 3 : index
    %c5_218 = arith.constant 5 : index
    %c0_219 = arith.constant 0 : index
    %c0_220 = arith.constant 0 : index
    %265 = vector.load %arg2[%c3_217, %c5_218, %c0_219, %c0_220] : memref<6x9x32x32xf32, #tpu.memory_space<vmem>>, vector<1x1x32x32xf32>
    %266 = vector.shape_cast %265 : vector<1x1x32x32xf32> to vector<32x32xf32>
    %cst_221 = arith.constant dense<0.000000e+00> : vector<32x256xf32>
    %267 = tpu.matmul %266, %264, %cst_221 {dimension_numbers = #tpu.dot_dimension_numbers<[1], [0], [0], [1], [0, 0, 1, 1], [], []>} : vector<32x32xf32>, vector<32x256xf32>, vector<32x256xf32> -> vector<32x256xf32>
    %268 = arith.addf %261, %267 : vector<32x256xf32>
    %c241_i32_222 = arith.constant 241 : i32
    %269 = tpu.dynamic_rotate %228 by %c241_i32_222 dim 1 : vector<32x256xf32>, i32 -> vector<32x256xf32>
    %270 = vector.broadcast %13 : vector<1x256xf32> to vector<32x256xf32>
    %271 = arith.mulf %269, %270 : vector<32x256xf32>
    %c3_223 = arith.constant 3 : index
    %c6_224 = arith.constant 6 : index
    %c0_225 = arith.constant 0 : index
    %c0_226 = arith.constant 0 : index
    %272 = vector.load %arg2[%c3_223, %c6_224, %c0_225, %c0_226] : memref<6x9x32x32xf32, #tpu.memory_space<vmem>>, vector<1x1x32x32xf32>
    %273 = vector.shape_cast %272 : vector<1x1x32x32xf32> to vector<32x32xf32>
    %cst_227 = arith.constant dense<0.000000e+00> : vector<32x256xf32>
    %274 = tpu.matmul %273, %271, %cst_227 {dimension_numbers = #tpu.dot_dimension_numbers<[1], [0], [0], [1], [0, 0, 1, 1], [], []>} : vector<32x32xf32>, vector<32x256xf32>, vector<32x256xf32> -> vector<32x256xf32>
    %275 = arith.addf %268, %274 : vector<32x256xf32>
    %c240_i32_228 = arith.constant 240 : i32
    %276 = tpu.dynamic_rotate %228 by %c240_i32_228 dim 1 : vector<32x256xf32>, i32 -> vector<32x256xf32>
    %277 = vector.broadcast %15 : vector<1x256xf32> to vector<32x256xf32>
    %278 = arith.mulf %276, %277 : vector<32x256xf32>
    %c3_229 = arith.constant 3 : index
    %c7_230 = arith.constant 7 : index
    %c0_231 = arith.constant 0 : index
    %c0_232 = arith.constant 0 : index
    %279 = vector.load %arg2[%c3_229, %c7_230, %c0_231, %c0_232] : memref<6x9x32x32xf32, #tpu.memory_space<vmem>>, vector<1x1x32x32xf32>
    %280 = vector.shape_cast %279 : vector<1x1x32x32xf32> to vector<32x32xf32>
    %cst_233 = arith.constant dense<0.000000e+00> : vector<32x256xf32>
    %281 = tpu.matmul %280, %278, %cst_233 {dimension_numbers = #tpu.dot_dimension_numbers<[1], [0], [0], [1], [0, 0, 1, 1], [], []>} : vector<32x32xf32>, vector<32x256xf32>, vector<32x256xf32> -> vector<32x256xf32>
    %282 = arith.addf %275, %281 : vector<32x256xf32>
    %c239_i32_234 = arith.constant 239 : i32
    %283 = tpu.dynamic_rotate %228 by %c239_i32_234 dim 1 : vector<32x256xf32>, i32 -> vector<32x256xf32>
    %284 = vector.broadcast %17 : vector<1x256xf32> to vector<32x256xf32>
    %285 = arith.mulf %283, %284 : vector<32x256xf32>
    %c3_235 = arith.constant 3 : index
    %c8_236 = arith.constant 8 : index
    %c0_237 = arith.constant 0 : index
    %c0_238 = arith.constant 0 : index
    %286 = vector.load %arg2[%c3_235, %c8_236, %c0_237, %c0_238] : memref<6x9x32x32xf32, #tpu.memory_space<vmem>>, vector<1x1x32x32xf32>
    %287 = vector.shape_cast %286 : vector<1x1x32x32xf32> to vector<32x32xf32>
    %cst_239 = arith.constant dense<0.000000e+00> : vector<32x256xf32>
    %288 = tpu.matmul %287, %285, %cst_239 {dimension_numbers = #tpu.dot_dimension_numbers<[1], [0], [0], [1], [0, 0, 1, 1], [], []>} : vector<32x32xf32>, vector<32x256xf32>, vector<32x256xf32> -> vector<32x256xf32>
    %289 = arith.addf %282, %288 : vector<32x256xf32>
    %c3_240 = arith.constant 3 : index
    %c0_241 = arith.constant 0 : index
    %c0_242 = arith.constant 0 : index
    %290 = vector.load %arg3[%c3_240, %c0_241, %c0_242] : memref<6x32x1xf32, #tpu.memory_space<vmem>>, vector<1x32x1xf32>
    %291 = vector.shape_cast %290 : vector<1x32x1xf32> to vector<32x1xf32>
    %292 = vector.broadcast %291 : vector<32x1xf32> to vector<32x256xf32>
    %293 = arith.addf %289, %292 : vector<32x256xf32>
    %cst_243 = arith.constant 0.000000e+00 : f32
    %294 = vector.broadcast %cst_243 : f32 to vector<32x256xf32>
    %295 = arith.cmpf oge, %293, %294 : vector<32x256xf32>
    %cst_244 = arith.constant 2.000000e-01 : f32
    %296 = vector.broadcast %cst_244 : f32 to vector<32x256xf32>
    %297 = arith.mulf %296, %293 : vector<32x256xf32>
    %298 = arith.select %295, %293, %297 : vector<32x256xi1>, vector<32x256xf32>
    %cst_245 = arith.constant 0.000000e+00 : f32
    %299 = vector.broadcast %cst_245 : f32 to vector<32x256xf32>
    %c17_i32_246 = arith.constant 17 : i32
    %300 = tpu.dynamic_rotate %298 by %c17_i32_246 dim 1 : vector<32x256xf32>, i32 -> vector<32x256xf32>
    %301 = vector.broadcast %3 : vector<1x256xf32> to vector<32x256xf32>
    %302 = arith.mulf %300, %301 : vector<32x256xf32>
    %c4_247 = arith.constant 4 : index
    %c0_248 = arith.constant 0 : index
    %c0_249 = arith.constant 0 : index
    %c0_250 = arith.constant 0 : index
    %303 = vector.load %arg2[%c4_247, %c0_248, %c0_249, %c0_250] : memref<6x9x32x32xf32, #tpu.memory_space<vmem>>, vector<1x1x32x32xf32>
    %304 = vector.shape_cast %303 : vector<1x1x32x32xf32> to vector<32x32xf32>
    %cst_251 = arith.constant dense<0.000000e+00> : vector<32x256xf32>
    %305 = tpu.matmul %304, %302, %cst_251 {dimension_numbers = #tpu.dot_dimension_numbers<[1], [0], [0], [1], [0, 0, 1, 1], [], []>} : vector<32x32xf32>, vector<32x256xf32>, vector<32x256xf32> -> vector<32x256xf32>
    %306 = arith.addf %299, %305 : vector<32x256xf32>
    %c16_i32_252 = arith.constant 16 : i32
    %307 = tpu.dynamic_rotate %298 by %c16_i32_252 dim 1 : vector<32x256xf32>, i32 -> vector<32x256xf32>
    %308 = vector.broadcast %5 : vector<1x256xf32> to vector<32x256xf32>
    %309 = arith.mulf %307, %308 : vector<32x256xf32>
    %c4_253 = arith.constant 4 : index
    %c1_254 = arith.constant 1 : index
    %c0_255 = arith.constant 0 : index
    %c0_256 = arith.constant 0 : index
    %310 = vector.load %arg2[%c4_253, %c1_254, %c0_255, %c0_256] : memref<6x9x32x32xf32, #tpu.memory_space<vmem>>, vector<1x1x32x32xf32>
    %311 = vector.shape_cast %310 : vector<1x1x32x32xf32> to vector<32x32xf32>
    %cst_257 = arith.constant dense<0.000000e+00> : vector<32x256xf32>
    %312 = tpu.matmul %311, %309, %cst_257 {dimension_numbers = #tpu.dot_dimension_numbers<[1], [0], [0], [1], [0, 0, 1, 1], [], []>} : vector<32x32xf32>, vector<32x256xf32>, vector<32x256xf32> -> vector<32x256xf32>
    %313 = arith.addf %306, %312 : vector<32x256xf32>
    %c15_i32_258 = arith.constant 15 : i32
    %314 = tpu.dynamic_rotate %298 by %c15_i32_258 dim 1 : vector<32x256xf32>, i32 -> vector<32x256xf32>
    %315 = vector.broadcast %7 : vector<1x256xf32> to vector<32x256xf32>
    %316 = arith.mulf %314, %315 : vector<32x256xf32>
    %c4_259 = arith.constant 4 : index
    %c2_260 = arith.constant 2 : index
    %c0_261 = arith.constant 0 : index
    %c0_262 = arith.constant 0 : index
    %317 = vector.load %arg2[%c4_259, %c2_260, %c0_261, %c0_262] : memref<6x9x32x32xf32, #tpu.memory_space<vmem>>, vector<1x1x32x32xf32>
    %318 = vector.shape_cast %317 : vector<1x1x32x32xf32> to vector<32x32xf32>
    %cst_263 = arith.constant dense<0.000000e+00> : vector<32x256xf32>
    %319 = tpu.matmul %318, %316, %cst_263 {dimension_numbers = #tpu.dot_dimension_numbers<[1], [0], [0], [1], [0, 0, 1, 1], [], []>} : vector<32x32xf32>, vector<32x256xf32>, vector<32x256xf32> -> vector<32x256xf32>
    %320 = arith.addf %313, %319 : vector<32x256xf32>
    %c1_i32_264 = arith.constant 1 : i32
    %321 = tpu.dynamic_rotate %298 by %c1_i32_264 dim 1 : vector<32x256xf32>, i32 -> vector<32x256xf32>
    %322 = vector.broadcast %9 : vector<1x256xf32> to vector<32x256xf32>
    %323 = arith.mulf %321, %322 : vector<32x256xf32>
    %c4_265 = arith.constant 4 : index
    %c3_266 = arith.constant 3 : index
    %c0_267 = arith.constant 0 : index
    %c0_268 = arith.constant 0 : index
    %324 = vector.load %arg2[%c4_265, %c3_266, %c0_267, %c0_268] : memref<6x9x32x32xf32, #tpu.memory_space<vmem>>, vector<1x1x32x32xf32>
    %325 = vector.shape_cast %324 : vector<1x1x32x32xf32> to vector<32x32xf32>
    %cst_269 = arith.constant dense<0.000000e+00> : vector<32x256xf32>
    %326 = tpu.matmul %325, %323, %cst_269 {dimension_numbers = #tpu.dot_dimension_numbers<[1], [0], [0], [1], [0, 0, 1, 1], [], []>} : vector<32x32xf32>, vector<32x256xf32>, vector<32x256xf32> -> vector<32x256xf32>
    %327 = arith.addf %320, %326 : vector<32x256xf32>
    %c4_270 = arith.constant 4 : index
    %c4_271 = arith.constant 4 : index
    %c0_272 = arith.constant 0 : index
    %c0_273 = arith.constant 0 : index
    %328 = vector.load %arg2[%c4_270, %c4_271, %c0_272, %c0_273] : memref<6x9x32x32xf32, #tpu.memory_space<vmem>>, vector<1x1x32x32xf32>
    %329 = vector.shape_cast %328 : vector<1x1x32x32xf32> to vector<32x32xf32>
    %cst_274 = arith.constant dense<0.000000e+00> : vector<32x256xf32>
    %330 = tpu.matmul %329, %298, %cst_274 {dimension_numbers = #tpu.dot_dimension_numbers<[1], [0], [0], [1], [0, 0, 1, 1], [], []>} : vector<32x32xf32>, vector<32x256xf32>, vector<32x256xf32> -> vector<32x256xf32>
    %331 = arith.addf %327, %330 : vector<32x256xf32>
    %c255_i32_275 = arith.constant 255 : i32
    %332 = tpu.dynamic_rotate %298 by %c255_i32_275 dim 1 : vector<32x256xf32>, i32 -> vector<32x256xf32>
    %333 = vector.broadcast %11 : vector<1x256xf32> to vector<32x256xf32>
    %334 = arith.mulf %332, %333 : vector<32x256xf32>
    %c4_276 = arith.constant 4 : index
    %c5_277 = arith.constant 5 : index
    %c0_278 = arith.constant 0 : index
    %c0_279 = arith.constant 0 : index
    %335 = vector.load %arg2[%c4_276, %c5_277, %c0_278, %c0_279] : memref<6x9x32x32xf32, #tpu.memory_space<vmem>>, vector<1x1x32x32xf32>
    %336 = vector.shape_cast %335 : vector<1x1x32x32xf32> to vector<32x32xf32>
    %cst_280 = arith.constant dense<0.000000e+00> : vector<32x256xf32>
    %337 = tpu.matmul %336, %334, %cst_280 {dimension_numbers = #tpu.dot_dimension_numbers<[1], [0], [0], [1], [0, 0, 1, 1], [], []>} : vector<32x32xf32>, vector<32x256xf32>, vector<32x256xf32> -> vector<32x256xf32>
    %338 = arith.addf %331, %337 : vector<32x256xf32>
    %c241_i32_281 = arith.constant 241 : i32
    %339 = tpu.dynamic_rotate %298 by %c241_i32_281 dim 1 : vector<32x256xf32>, i32 -> vector<32x256xf32>
    %340 = vector.broadcast %13 : vector<1x256xf32> to vector<32x256xf32>
    %341 = arith.mulf %339, %340 : vector<32x256xf32>
    %c4_282 = arith.constant 4 : index
    %c6_283 = arith.constant 6 : index
    %c0_284 = arith.constant 0 : index
    %c0_285 = arith.constant 0 : index
    %342 = vector.load %arg2[%c4_282, %c6_283, %c0_284, %c0_285] : memref<6x9x32x32xf32, #tpu.memory_space<vmem>>, vector<1x1x32x32xf32>
    %343 = vector.shape_cast %342 : vector<1x1x32x32xf32> to vector<32x32xf32>
    %cst_286 = arith.constant dense<0.000000e+00> : vector<32x256xf32>
    %344 = tpu.matmul %343, %341, %cst_286 {dimension_numbers = #tpu.dot_dimension_numbers<[1], [0], [0], [1], [0, 0, 1, 1], [], []>} : vector<32x32xf32>, vector<32x256xf32>, vector<32x256xf32> -> vector<32x256xf32>
    %345 = arith.addf %338, %344 : vector<32x256xf32>
    %c240_i32_287 = arith.constant 240 : i32
    %346 = tpu.dynamic_rotate %298 by %c240_i32_287 dim 1 : vector<32x256xf32>, i32 -> vector<32x256xf32>
    %347 = vector.broadcast %15 : vector<1x256xf32> to vector<32x256xf32>
    %348 = arith.mulf %346, %347 : vector<32x256xf32>
    %c4_288 = arith.constant 4 : index
    %c7_289 = arith.constant 7 : index
    %c0_290 = arith.constant 0 : index
    %c0_291 = arith.constant 0 : index
    %349 = vector.load %arg2[%c4_288, %c7_289, %c0_290, %c0_291] : memref<6x9x32x32xf32, #tpu.memory_space<vmem>>, vector<1x1x32x32xf32>
    %350 = vector.shape_cast %349 : vector<1x1x32x32xf32> to vector<32x32xf32>
    %cst_292 = arith.constant dense<0.000000e+00> : vector<32x256xf32>
    %351 = tpu.matmul %350, %348, %cst_292 {dimension_numbers = #tpu.dot_dimension_numbers<[1], [0], [0], [1], [0, 0, 1, 1], [], []>} : vector<32x32xf32>, vector<32x256xf32>, vector<32x256xf32> -> vector<32x256xf32>
    %352 = arith.addf %345, %351 : vector<32x256xf32>
    %c239_i32_293 = arith.constant 239 : i32
    %353 = tpu.dynamic_rotate %298 by %c239_i32_293 dim 1 : vector<32x256xf32>, i32 -> vector<32x256xf32>
    %354 = vector.broadcast %17 : vector<1x256xf32> to vector<32x256xf32>
    %355 = arith.mulf %353, %354 : vector<32x256xf32>
    %c4_294 = arith.constant 4 : index
    %c8_295 = arith.constant 8 : index
    %c0_296 = arith.constant 0 : index
    %c0_297 = arith.constant 0 : index
    %356 = vector.load %arg2[%c4_294, %c8_295, %c0_296, %c0_297] : memref<6x9x32x32xf32, #tpu.memory_space<vmem>>, vector<1x1x32x32xf32>
    %357 = vector.shape_cast %356 : vector<1x1x32x32xf32> to vector<32x32xf32>
    %cst_298 = arith.constant dense<0.000000e+00> : vector<32x256xf32>
    %358 = tpu.matmul %357, %355, %cst_298 {dimension_numbers = #tpu.dot_dimension_numbers<[1], [0], [0], [1], [0, 0, 1, 1], [], []>} : vector<32x32xf32>, vector<32x256xf32>, vector<32x256xf32> -> vector<32x256xf32>
    %359 = arith.addf %352, %358 : vector<32x256xf32>
    %c4_299 = arith.constant 4 : index
    %c0_300 = arith.constant 0 : index
    %c0_301 = arith.constant 0 : index
    %360 = vector.load %arg3[%c4_299, %c0_300, %c0_301] : memref<6x32x1xf32, #tpu.memory_space<vmem>>, vector<1x32x1xf32>
    %361 = vector.shape_cast %360 : vector<1x32x1xf32> to vector<32x1xf32>
    %362 = vector.broadcast %361 : vector<32x1xf32> to vector<32x256xf32>
    %363 = arith.addf %359, %362 : vector<32x256xf32>
    %364 = arith.addf %363, %228 : vector<32x256xf32>
    %cst_302 = arith.constant 0.000000e+00 : f32
    %365 = vector.broadcast %cst_302 : f32 to vector<32x256xf32>
    %366 = arith.cmpf oge, %364, %365 : vector<32x256xf32>
    %cst_303 = arith.constant 2.000000e-01 : f32
    %367 = vector.broadcast %cst_303 : f32 to vector<32x256xf32>
    %368 = arith.mulf %367, %364 : vector<32x256xf32>
    %369 = arith.select %366, %364, %368 : vector<32x256xi1>, vector<32x256xf32>
    %cst_304 = arith.constant 0.000000e+00 : f32
    %370 = vector.broadcast %cst_304 : f32 to vector<32x256xf32>
    %c17_i32_305 = arith.constant 17 : i32
    %371 = tpu.dynamic_rotate %369 by %c17_i32_305 dim 1 : vector<32x256xf32>, i32 -> vector<32x256xf32>
    %372 = vector.broadcast %3 : vector<1x256xf32> to vector<32x256xf32>
    %373 = arith.mulf %371, %372 : vector<32x256xf32>
    %c5_306 = arith.constant 5 : index
    %c0_307 = arith.constant 0 : index
    %c0_308 = arith.constant 0 : index
    %c0_309 = arith.constant 0 : index
    %374 = vector.load %arg2[%c5_306, %c0_307, %c0_308, %c0_309] : memref<6x9x32x32xf32, #tpu.memory_space<vmem>>, vector<1x1x32x32xf32>
    %375 = vector.shape_cast %374 : vector<1x1x32x32xf32> to vector<32x32xf32>
    %cst_310 = arith.constant dense<0.000000e+00> : vector<32x256xf32>
    %376 = tpu.matmul %375, %373, %cst_310 {dimension_numbers = #tpu.dot_dimension_numbers<[1], [0], [0], [1], [0, 0, 1, 1], [], []>} : vector<32x32xf32>, vector<32x256xf32>, vector<32x256xf32> -> vector<32x256xf32>
    %377 = arith.addf %370, %376 : vector<32x256xf32>
    %c16_i32_311 = arith.constant 16 : i32
    %378 = tpu.dynamic_rotate %369 by %c16_i32_311 dim 1 : vector<32x256xf32>, i32 -> vector<32x256xf32>
    %379 = vector.broadcast %5 : vector<1x256xf32> to vector<32x256xf32>
    %380 = arith.mulf %378, %379 : vector<32x256xf32>
    %c5_312 = arith.constant 5 : index
    %c1_313 = arith.constant 1 : index
    %c0_314 = arith.constant 0 : index
    %c0_315 = arith.constant 0 : index
    %381 = vector.load %arg2[%c5_312, %c1_313, %c0_314, %c0_315] : memref<6x9x32x32xf32, #tpu.memory_space<vmem>>, vector<1x1x32x32xf32>
    %382 = vector.shape_cast %381 : vector<1x1x32x32xf32> to vector<32x32xf32>
    %cst_316 = arith.constant dense<0.000000e+00> : vector<32x256xf32>
    %383 = tpu.matmul %382, %380, %cst_316 {dimension_numbers = #tpu.dot_dimension_numbers<[1], [0], [0], [1], [0, 0, 1, 1], [], []>} : vector<32x32xf32>, vector<32x256xf32>, vector<32x256xf32> -> vector<32x256xf32>
    %384 = arith.addf %377, %383 : vector<32x256xf32>
    %c15_i32_317 = arith.constant 15 : i32
    %385 = tpu.dynamic_rotate %369 by %c15_i32_317 dim 1 : vector<32x256xf32>, i32 -> vector<32x256xf32>
    %386 = vector.broadcast %7 : vector<1x256xf32> to vector<32x256xf32>
    %387 = arith.mulf %385, %386 : vector<32x256xf32>
    %c5_318 = arith.constant 5 : index
    %c2_319 = arith.constant 2 : index
    %c0_320 = arith.constant 0 : index
    %c0_321 = arith.constant 0 : index
    %388 = vector.load %arg2[%c5_318, %c2_319, %c0_320, %c0_321] : memref<6x9x32x32xf32, #tpu.memory_space<vmem>>, vector<1x1x32x32xf32>
    %389 = vector.shape_cast %388 : vector<1x1x32x32xf32> to vector<32x32xf32>
    %cst_322 = arith.constant dense<0.000000e+00> : vector<32x256xf32>
    %390 = tpu.matmul %389, %387, %cst_322 {dimension_numbers = #tpu.dot_dimension_numbers<[1], [0], [0], [1], [0, 0, 1, 1], [], []>} : vector<32x32xf32>, vector<32x256xf32>, vector<32x256xf32> -> vector<32x256xf32>
    %391 = arith.addf %384, %390 : vector<32x256xf32>
    %c1_i32_323 = arith.constant 1 : i32
    %392 = tpu.dynamic_rotate %369 by %c1_i32_323 dim 1 : vector<32x256xf32>, i32 -> vector<32x256xf32>
    %393 = vector.broadcast %9 : vector<1x256xf32> to vector<32x256xf32>
    %394 = arith.mulf %392, %393 : vector<32x256xf32>
    %c5_324 = arith.constant 5 : index
    %c3_325 = arith.constant 3 : index
    %c0_326 = arith.constant 0 : index
    %c0_327 = arith.constant 0 : index
    %395 = vector.load %arg2[%c5_324, %c3_325, %c0_326, %c0_327] : memref<6x9x32x32xf32, #tpu.memory_space<vmem>>, vector<1x1x32x32xf32>
    %396 = vector.shape_cast %395 : vector<1x1x32x32xf32> to vector<32x32xf32>
    %cst_328 = arith.constant dense<0.000000e+00> : vector<32x256xf32>
    %397 = tpu.matmul %396, %394, %cst_328 {dimension_numbers = #tpu.dot_dimension_numbers<[1], [0], [0], [1], [0, 0, 1, 1], [], []>} : vector<32x32xf32>, vector<32x256xf32>, vector<32x256xf32> -> vector<32x256xf32>
    %398 = arith.addf %391, %397 : vector<32x256xf32>
    %c5_329 = arith.constant 5 : index
    %c4_330 = arith.constant 4 : index
    %c0_331 = arith.constant 0 : index
    %c0_332 = arith.constant 0 : index
    %399 = vector.load %arg2[%c5_329, %c4_330, %c0_331, %c0_332] : memref<6x9x32x32xf32, #tpu.memory_space<vmem>>, vector<1x1x32x32xf32>
    %400 = vector.shape_cast %399 : vector<1x1x32x32xf32> to vector<32x32xf32>
    %cst_333 = arith.constant dense<0.000000e+00> : vector<32x256xf32>
    %401 = tpu.matmul %400, %369, %cst_333 {dimension_numbers = #tpu.dot_dimension_numbers<[1], [0], [0], [1], [0, 0, 1, 1], [], []>} : vector<32x32xf32>, vector<32x256xf32>, vector<32x256xf32> -> vector<32x256xf32>
    %402 = arith.addf %398, %401 : vector<32x256xf32>
    %c255_i32_334 = arith.constant 255 : i32
    %403 = tpu.dynamic_rotate %369 by %c255_i32_334 dim 1 : vector<32x256xf32>, i32 -> vector<32x256xf32>
    %404 = vector.broadcast %11 : vector<1x256xf32> to vector<32x256xf32>
    %405 = arith.mulf %403, %404 : vector<32x256xf32>
    %c5_335 = arith.constant 5 : index
    %c5_336 = arith.constant 5 : index
    %c0_337 = arith.constant 0 : index
    %c0_338 = arith.constant 0 : index
    %406 = vector.load %arg2[%c5_335, %c5_336, %c0_337, %c0_338] : memref<6x9x32x32xf32, #tpu.memory_space<vmem>>, vector<1x1x32x32xf32>
    %407 = vector.shape_cast %406 : vector<1x1x32x32xf32> to vector<32x32xf32>
    %cst_339 = arith.constant dense<0.000000e+00> : vector<32x256xf32>
    %408 = tpu.matmul %407, %405, %cst_339 {dimension_numbers = #tpu.dot_dimension_numbers<[1], [0], [0], [1], [0, 0, 1, 1], [], []>} : vector<32x32xf32>, vector<32x256xf32>, vector<32x256xf32> -> vector<32x256xf32>
    %409 = arith.addf %402, %408 : vector<32x256xf32>
    %c241_i32_340 = arith.constant 241 : i32
    %410 = tpu.dynamic_rotate %369 by %c241_i32_340 dim 1 : vector<32x256xf32>, i32 -> vector<32x256xf32>
    %411 = vector.broadcast %13 : vector<1x256xf32> to vector<32x256xf32>
    %412 = arith.mulf %410, %411 : vector<32x256xf32>
    %c5_341 = arith.constant 5 : index
    %c6_342 = arith.constant 6 : index
    %c0_343 = arith.constant 0 : index
    %c0_344 = arith.constant 0 : index
    %413 = vector.load %arg2[%c5_341, %c6_342, %c0_343, %c0_344] : memref<6x9x32x32xf32, #tpu.memory_space<vmem>>, vector<1x1x32x32xf32>
    %414 = vector.shape_cast %413 : vector<1x1x32x32xf32> to vector<32x32xf32>
    %cst_345 = arith.constant dense<0.000000e+00> : vector<32x256xf32>
    %415 = tpu.matmul %414, %412, %cst_345 {dimension_numbers = #tpu.dot_dimension_numbers<[1], [0], [0], [1], [0, 0, 1, 1], [], []>} : vector<32x32xf32>, vector<32x256xf32>, vector<32x256xf32> -> vector<32x256xf32>
    %416 = arith.addf %409, %415 : vector<32x256xf32>
    %c240_i32_346 = arith.constant 240 : i32
    %417 = tpu.dynamic_rotate %369 by %c240_i32_346 dim 1 : vector<32x256xf32>, i32 -> vector<32x256xf32>
    %418 = vector.broadcast %15 : vector<1x256xf32> to vector<32x256xf32>
    %419 = arith.mulf %417, %418 : vector<32x256xf32>
    %c5_347 = arith.constant 5 : index
    %c7_348 = arith.constant 7 : index
    %c0_349 = arith.constant 0 : index
    %c0_350 = arith.constant 0 : index
    %420 = vector.load %arg2[%c5_347, %c7_348, %c0_349, %c0_350] : memref<6x9x32x32xf32, #tpu.memory_space<vmem>>, vector<1x1x32x32xf32>
    %421 = vector.shape_cast %420 : vector<1x1x32x32xf32> to vector<32x32xf32>
    %cst_351 = arith.constant dense<0.000000e+00> : vector<32x256xf32>
    %422 = tpu.matmul %421, %419, %cst_351 {dimension_numbers = #tpu.dot_dimension_numbers<[1], [0], [0], [1], [0, 0, 1, 1], [], []>} : vector<32x32xf32>, vector<32x256xf32>, vector<32x256xf32> -> vector<32x256xf32>
    %423 = arith.addf %416, %422 : vector<32x256xf32>
    %c239_i32_352 = arith.constant 239 : i32
    %424 = tpu.dynamic_rotate %369 by %c239_i32_352 dim 1 : vector<32x256xf32>, i32 -> vector<32x256xf32>
    %425 = vector.broadcast %17 : vector<1x256xf32> to vector<32x256xf32>
    %426 = arith.mulf %424, %425 : vector<32x256xf32>
    %c5_353 = arith.constant 5 : index
    %c8_354 = arith.constant 8 : index
    %c0_355 = arith.constant 0 : index
    %c0_356 = arith.constant 0 : index
    %427 = vector.load %arg2[%c5_353, %c8_354, %c0_355, %c0_356] : memref<6x9x32x32xf32, #tpu.memory_space<vmem>>, vector<1x1x32x32xf32>
    %428 = vector.shape_cast %427 : vector<1x1x32x32xf32> to vector<32x32xf32>
    %cst_357 = arith.constant dense<0.000000e+00> : vector<32x256xf32>
    %429 = tpu.matmul %428, %426, %cst_357 {dimension_numbers = #tpu.dot_dimension_numbers<[1], [0], [0], [1], [0, 0, 1, 1], [], []>} : vector<32x32xf32>, vector<32x256xf32>, vector<32x256xf32> -> vector<32x256xf32>
    %430 = arith.addf %423, %429 : vector<32x256xf32>
    %c5_358 = arith.constant 5 : index
    %c0_359 = arith.constant 0 : index
    %c0_360 = arith.constant 0 : index
    %431 = vector.load %arg3[%c5_358, %c0_359, %c0_360] : memref<6x32x1xf32, #tpu.memory_space<vmem>>, vector<1x32x1xf32>
    %432 = vector.shape_cast %431 : vector<1x32x1xf32> to vector<32x1xf32>
    %433 = vector.broadcast %432 : vector<32x1xf32> to vector<32x256xf32>
    %434 = arith.addf %430, %433 : vector<32x256xf32>
    %c0_361 = arith.constant 0 : index
    %c0_362 = arith.constant 0 : index
    %c0_363 = arith.constant 0 : index
    %435 = vector.load %arg5[%c0_361, %c0_362, %c0_363] : memref<1x32x256xf32, #tpu.memory_space<vmem>>, vector<1x32x256xf32>
    %436 = vector.shape_cast %435 : vector<1x32x256xf32> to vector<32x256xf32>
    %437 = vector.shape_cast %434 : vector<32x256xf32> to vector<1x32x256xf32>
    tpu.vector_store %arg5[%c0_361, %c0_362, %c0_363], %437 {strides = array<i32>} : memref<1x32x256xf32, #tpu.memory_space<vmem>>, vector<1x32x256xf32>,
    return
  }
  func.func @transform_0(%arg0: i32) -> (i32, i32, i32) {
    %c0_i32 = arith.constant 0 : i32
    %c0_i32_0 = arith.constant 0 : i32
    %c0_i32_1 = arith.constant 0 : i32
    return %arg0, %c0_i32, %c0_i32_0 : i32, i32, i32
  }
  func.func @transform_1(%arg0: i32) -> (i32, i32, i32, i32) {
    %c0_i32 = arith.constant 0 : i32
    %c0_i32_0 = arith.constant 0 : i32
    %c0_i32_1 = arith.constant 0 : i32
    %c0_i32_2 = arith.constant 0 : i32
    %c0_i32_3 = arith.constant 0 : i32
    return %c0_i32, %c0_i32_0, %c0_i32_1, %c0_i32_2 : i32, i32, i32, i32
  }
  func.func @transform_2(%arg0: i32) -> (i32, i32, i32) {
    %c0_i32 = arith.constant 0 : i32
    %c0_i32_0 = arith.constant 0 : i32
    %c0_i32_1 = arith.constant 0 : i32
    %c0_i32_2 = arith.constant 0 : i32
    return %c0_i32, %c0_i32_0, %c0_i32_1 : i32, i32, i32
  }
  func.func @transform_3(%arg0: i32) -> (i32, i32, i32) {
    %c0_i32 = arith.constant 0 : i32
    %c0_i32_0 = arith.constant 0 : i32
    %c0_i32_1 = arith.constant 0 : i32
    %c0_i32_2 = arith.constant 0 : i32
    return %c0_i32, %c0_i32_0, %c0_i32_1 : i32, i32, i32
  }
  func.func @transform_4(%arg0: i32) -> (i32, i32, i32) {
    %c0_i32 = arith.constant 0 : i32
    %c0_i32_0 = arith.constant 0 : i32
    %c0_i32_1 = arith.constant 0 : i32
    return %arg0, %c0_i32, %c0_i32_0 : i32, i32, i32
  }
}

</mosaic_0001>

<bundles_post_ra>
// kernel: resnet_block_forward.1
= control target key start
LH: loop header
LB: loop body
LE: loop exit
PB: predicated region body
PF: predicated region fallthrough
CT: control target
= control target key end

     0   :  { %s8842_s15 = smov 0   ;;  %s13283_s0 = inlined_call_operand.vmem [shape: f32[2,32,256], index: 0, kind: input, shape index: {}]   ;;  %s13284_s1 = inlined_call_operand.vmem [shape: f32[6,9,32,32], index: 1, kind: input, shape index: {}]   ;;  %s13285_s2 = inlined_call_operand.vmem [shape: f32[6,32,1], index: 2, kind: input, shape index: {}]   ;;  %s13286_s3 = inlined_call_operand.vmem [shape: f32[9,1,256], index: 3, kind: input, shape index: {}]   ;;  %s13287_s4 = inlined_call_operand.vmem [shape: f32[2,32,256], index: 4, kind: output, shape index: {}]  }
   0x1 LB: > { %s8311_s16 = sadd.s32 4294967295, %s8805_s15   ;;  %p8315_p0 = scmp.ge.s32.totalorder %s8805_s15, 1  ;;  %s8805_s15 = sphi %s8842_s15, %s14_s15  }
   0x2   : > { %p162_p1 = scmp.lt.s32.totalorder %s8805_s15, 3 }
   0x4   : > { %p163_p2 = pnand %p8315_p0, %p162_p1 }
   0x6   : > { %166 = sbr.rel (%p163_p2) target bundleno = 2727 (0xaa7), region = 36 }
   0xb   : > { %p188_p3 = scmp.lt.s32.totalorder %s8311_s16, 1  ;;  %s8807_s21 = smov 16   ;;  %v13288_v8 = vmov 0.0   ;;  %v237_v9 = vlaneseq  ;;  %v8320_v14 = vld [vmem:[%s13286_s3 + $0x2] sm:$0x3]  ;;  %vm320_vm2 = vcmask 261120  }
   0xc   : > { %397 = vmatprep.mubr.f32.mxu0 %v13288_v8  ;;  %498 = vmatprep.mubr.f32.mxu1 %v13288_v8  ;;  %s8809_s22 = smov 17   ;;  %s8810_s23 = smov 15   ;;  %v206_v35 = vld [vmem:[%s13286_s3] sm:$0x3]  ;;  %v1588_v45 = vld [vmem:[%s13285_s2 + $0x18] sm:$0xff]  ;;  %v8816_v48 = vmov 0  }
   0xd   : > { %s13462_s16 = smov (!%p188_p3, %s8311_s16), 1  ;;  %s8811_s24 = smov 1   ;;  %v250_v10 = vshrl.u32 %v237_v9, 7  ;;  %v8992_v11 = vand.u32 127, %v237_v9  ;;  %v8327_v44 = vld [vmem:[%s13284_s1 + $0x20] sm:$0xff]  ;;  %8797 = vset.pattern.permute.xlu0 %v8816_v48  ;;  %v1587_v49 = vld [vmem:[%s13285_s2 + $0x10] sm:$0xff]  ;;  %8798 = vset.pattern.permute.xlu1 %v8816_v48 }
   0xe   : > { %s8777_s17 = sshll.u32 %s13462_s16, 6  ;;  %s8812_s25 = smov 127   ;;  %v1585_v54 = vld [vmem:[%s13285_s2] sm:$0xff]  ;;  %v8328_v56 = vld [vmem:[%s13284_s1 + $0x28] sm:$0xff] }
   0xf   : > { %s192_s20 = scalar_lea.vmem %s13283_s0, %s8777_s17  ;;  %s8813_s26 = smov 113   ;;  %v8994_v12 = vsub.s32 1, %v250_v10  ;;  %v8996_v13 = vsub.s32 0, %v250_v10  ;;  %vm287_vm0 = vcmp.lt.s32.totalorder %v8992_v11, 16  ;;  %vm239_vm1 = vcmp.lt.s32.totalorder %v8992_v11, 17  ;;  %v1586_v59 = vld [vmem:[%s13285_s2 + $0x8] sm:$0xff] }
  0x10   : > { %v8858_v0 = vld [vmem:[%s192_s20 + $0x30] sm:$0xff]  ;;  %v8860_v1 = vld [vmem:[%s192_s20 + $0x20] sm:$0xff]  ;;  %v8866_v2 = vld [vmem:[%s192_s20 + $0x38] sm:$0xff]  ;;  %s8814_s27 = smov 112   ;;  %s8815_s28 = smov 111   ;;  %vm539_vm3 = vcmp.lt.s32.totalorder %v8992_v11, 15 }
  0x11   : > { %277 = vrot.lane.b32.xlu0 %v8858_v0, %s8807_s21  ;;  %275 = vrot.lane.b32.xlu1 %v8860_v1, %s8807_s21  ;;  %v8868_v3 = vld [vmem:[%s192_s20 + $0x28] sm:$0xff]  ;;  %v8874_v4 = vld [vmem:[%s192_s20 + $0x18] sm:$0xff]  ;;  %v9007_v17 = vrot.slane %v8320_v14, %v8994_v12  ;;  %v9010_v18 = vrot.slane %v8320_v14, %v8996_v13  ;;  %v9049_v42 = vrot.slane %v206_v35, %v8994_v12  ;;  %vm697_vm4 = vcmp.lt.s32.totalorder %v8992_v11, 1  ;;  %s13269_s30 = scalar_lea.vmem %s13287_s4, %s8777_s17 }
  0x12   : > { %v8876_v5 = vld [vmem:[%s192_s20 + $0x10] sm:$0xff]  ;;  %v8882_v6 = vld [vmem:[%s192_s20 + $0x8] sm:$0xff]  ;;  %v8884_v7 = vld [vmem:[%s192_s20] sm:$0xff]  ;;  %v9052_v43 = vrot.slane %v206_v35, %v8996_v13  ;;  %vm969_vm5 = vcmp.lt.s32.totalorder %v8992_v11, 127  ;;  %vm1127_vm6 = vcmp.lt.s32.totalorder %v8992_v11, 113  ;;  %vm1285_vm7 = vcmp.lt.s32.totalorder %v8992_v11, 112 }
  0x13   : > { %13367 = vst [vmem:[#allocation2_spill] sm:$0xff] %v9049_v42  ;;  %v8321_v55 = vld [vmem:[%s13286_s3 + $0x4] sm:$0x3]  ;;  %v8329_v14 = vld [vmem:[%s13284_s1 + $0x30] sm:$0xff]  ;;  %vm1443_vm8 = vcmp.lt.s32.totalorder %v8992_v11, 111 }
  0x14   : > { %13368 = vst [vmem:[#allocation3_spill] sm:$0xff] %v9052_v43  ;;  %v9090_v63 = vrot.slane %v8321_v55, %v8996_v13  ;;  %v9094_v10 = vrot.slane %v8321_v55, %v8994_v12  ;;  %v8755_v11 = vld [vmem:[%s13284_s1 + $0x680] sm:$0xff] }
  0x15   : > { %285 = vrot.lane.b32.xlu0 %v8866_v2, %s8807_s21  ;;  %283 = vrot.lane.b32.xlu1 %v8868_v3, %s8807_s21 }
  0x16   : > { %13369 = vst [vmem:[#allocation4_spill] sm:$0xff] %v9090_v63  ;;  %13370 = vst [vmem:[#allocation5_spill] sm:$0xff] %v9094_v10 }
  0x19   : > { %281 = vrot.lane.b32.xlu1 %v8874_v4, %s8807_s21  ;;  %273 = vrot.lane.b32.xlu0 %v8876_v5, %s8807_s21 }
  0x1d   : > { %279 = vrot.lane.b32.xlu1 %v8882_v6, %s8807_s21  ;;  %271 = vrot.lane.b32.xlu0 %v8884_v7, %s8807_s21 }
  0x21   : > { %235 = vrot.lane.b32.xlu1 %v8866_v2, %s8809_s22  ;;  %227 = vrot.lane.b32.xlu0 %v8858_v0, %s8809_s22 }
  0x25   : > { %233 = vrot.lane.b32.xlu1 %v8868_v3, %s8809_s22  ;;  %225 = vrot.lane.b32.xlu0 %v8860_v1, %s8809_s22 }
  0x29   : > { %537 = vrot.lane.b32.xlu1 %v8866_v2, %s8810_s23  ;;  %529 = vrot.lane.b32.xlu0 %v8858_v0, %s8810_s23 }
  0x2d   : > { %231 = vrot.lane.b32.xlu1 %v8874_v4, %s8809_s22  ;;  %223 = vrot.lane.b32.xlu0 %v8876_v5, %s8809_s22 }
  0x31   : > { %535 = vrot.lane.b32.xlu1 %v8868_v3, %s8810_s23  ;;  %527 = vrot.lane.b32.xlu0 %v8860_v1, %s8810_s23 }
  0x35   : > { %229 = vrot.lane.b32.xlu1 %v8882_v6, %s8809_s22  ;;  %221 = vrot.lane.b32.xlu0 %v8884_v7, %s8809_s22 }
  0x39   : > { %533 = vrot.lane.b32.xlu1 %v8874_v4, %s8810_s23  ;;  %525 = vrot.lane.b32.xlu0 %v8876_v5, %s8810_s23 }
  0x3d   : > { %531 = vrot.lane.b32.xlu1 %v8882_v6, %s8810_s23  ;;  %523 = vrot.lane.b32.xlu0 %v8884_v7, %s8810_s23 }
  0x41   : > { %695 = vrot.lane.b32.xlu1 %v8866_v2, %s8811_s24  ;;  %687 = vrot.lane.b32.xlu0 %v8858_v0, %s8811_s24 }
  0x45   : > { %693 = vrot.lane.b32.xlu1 %v8868_v3, %s8811_s24  ;;  %685 = vrot.lane.b32.xlu0 %v8860_v1, %s8811_s24 }
  0x49   : > { %691 = vrot.lane.b32.xlu1 %v8874_v4, %s8811_s24  ;;  %683 = vrot.lane.b32.xlu0 %v8876_v5, %s8811_s24 }
  0x4d   : > { %689 = vrot.lane.b32.xlu1 %v8882_v6, %s8811_s24  ;;  %681 = vrot.lane.b32.xlu0 %v8884_v7, %s8811_s24 }
  0x51   : > { %967 = vrot.lane.b32.xlu1 %v8866_v2, %s8812_s25  ;;  %959 = vrot.lane.b32.xlu0 %v8858_v0, %s8812_s25 }
  0x55   : > { %965 = vrot.lane.b32.xlu1 %v8868_v3, %s8812_s25  ;;  %957 = vrot.lane.b32.xlu0 %v8860_v1, %s8812_s25 }
  0x59   : > { %1125 = vrot.lane.b32.xlu1 %v8866_v2, %s8813_s26  ;;  %1117 = vrot.lane.b32.xlu0 %v8858_v0, %s8813_s26 }
  0x5d   : > { %963 = vrot.lane.b32.xlu1 %v8874_v4, %s8812_s25  ;;  %955 = vrot.lane.b32.xlu0 %v8876_v5, %s8812_s25 }
  0x61   : > { %1123 = vrot.lane.b32.xlu1 %v8868_v3, %s8813_s26  ;;  %1115 = vrot.lane.b32.xlu0 %v8860_v1, %s8813_s26 }
  0x65   : > { %961 = vrot.lane.b32.xlu1 %v8882_v6, %s8812_s25  ;;  %953 = vrot.lane.b32.xlu0 %v8884_v7, %s8812_s25 }
  0x69   : > { %1121 = vrot.lane.b32.xlu1 %v8874_v4, %s8813_s26  ;;  %1113 = vrot.lane.b32.xlu0 %v8876_v5, %s8813_s26 }
  0x6d   : > { %1119 = vrot.lane.b32.xlu1 %v8882_v6, %s8813_s26  ;;  %1111 = vrot.lane.b32.xlu0 %v8884_v7, %s8813_s26 }
  0x71   : > { %1283 = vrot.lane.b32.xlu1 %v8866_v2, %s8814_s27  ;;  %1275 = vrot.lane.b32.xlu0 %v8858_v0, %s8814_s27 }
  0x75   : > { %1281 = vrot.lane.b32.xlu1 %v8868_v3, %s8814_s27  ;;  %1273 = vrot.lane.b32.xlu0 %v8860_v1, %s8814_s27 }
  0x79   : > { %1441 = vrot.lane.b32.xlu1 %v8866_v2, %s8815_s28  ;;  %1433 = vrot.lane.b32.xlu0 %v8858_v0, %s8815_s28 }
  0x7d   : > { %1279 = vrot.lane.b32.xlu1 %v8874_v4, %s8814_s27  ;;  %1271 = vrot.lane.b32.xlu0 %v8876_v5, %s8814_s27 }
  0x81   : > { %1439 = vrot.lane.b32.xlu1 %v8868_v3, %s8815_s28  ;;  %1431 = vrot.lane.b32.xlu0 %v8860_v1, %s8815_s28 }
  0x83   : > { %v278_v15 = vpop.permute.xlu0 %277  ;;  %v276_v16 = vpop.permute.xlu1 %275 }
  0x85   : > { %1277 = vrot.lane.b32.xlu1 %v8882_v6, %s8814_s27  ;;  %1269 = vrot.lane.b32.xlu0 %v8884_v7, %s8814_s27 }
  0x87   : > { %v286_v19 = vpop.permute.xlu0 %285  ;;  %v284_v20 = vpop.permute.xlu1 %283 }
  0x88   : > { %v290_v21 = vsel %vm287_vm0, %v276_v16, %v284_v20  ;;  %v291_v22 = vsel %vm287_vm0, %v278_v15, %v286_v19  ;;  %v295_v23 = vsel %vm287_vm0, %v286_v19, %v278_v15  ;;  %v294_v24 = vsel %vm287_vm0, %v284_v20, %v276_v16 }
  0x89   : > { %1437 = vrot.lane.b32.xlu1 %v8874_v4, %s8815_s28  ;;  %1429 = vrot.lane.b32.xlu0 %v8876_v5, %s8815_s28  ;;  %v314_v25 = vmul.f32 %v9007_v17, %v291_v22  ;;  %v313_v26 = vmul.f32 %v9010_v18, %v295_v23  ;;  %v312_v29 = vmul.f32 %v9007_v17, %v290_v21  ;;  %v8330_v23 = vld [vmem:[%s13284_s1 + $0x38] sm:$0xff] }
  0x8a   : > { %v311_v32 = vmul.f32 %v9010_v18, %v294_v24 }
  0x8b   : > { %357 = vmatprep.subr.mxu0 %v314_v25  ;;  %v282_v27 = vpop.permute.xlu1 %281  ;;  %v274_v28 = vpop.permute.xlu0 %273 }
  0x8c   : > { %v289_v30 = vsel %vm287_vm0, %v274_v28, %v282_v27  ;;  %v293_v31 = vsel %vm287_vm0, %v282_v27, %v274_v28  ;;  %358 = vmatpush1.msra.mxu0 %v313_v26 }
  0x8d   : > { %359 = vmatprep.subr.mxu0 %v312_v29  ;;  %1435 = vrot.lane.b32.xlu1 %v8882_v6, %s8815_s28  ;;  %v310_v33 = vmul.f32 %v9007_v17, %v289_v30  ;;  %v309_v34 = vmul.f32 %v9010_v18, %v293_v31 }
  0x8e   : > { %1427 = vrot.lane.b32.xlu0 %v8884_v7, %s8815_s28  ;;  %360 = vmatpush1.msra.mxu0 %v311_v32 }
  0x8f   : > { %361 = vmatprep.subr.mxu0 %v310_v33  ;;  %v280_v36 = vpop.permute.xlu1 %279  ;;  %v272_v37 = vpop.permute.xlu0 %271 }
  0x90   : > { %v288_v38 = vsel %vm287_vm0, %v272_v37, %v280_v36  ;;  %v292_v39 = vsel %vm287_vm0, %v280_v36, %v272_v37  ;;  %362 = vmatpush1.msra.mxu0 %v309_v34 }
  0x91   : > { %v308_v40 = vmul.f32 %v9007_v17, %v288_v38  ;;  %v307_v41 = vmul.f32 %v9010_v18, %v292_v39  ;;  %1601 = vperm.xlu1 %8798, %v1587_v49  }
  0x92   : > { %1606 = vperm.xlu0 %8797, %v1588_v45  }
  0x93   : > { %v236_v46 = vpop.permute.xlu1 %235  ;;  %363 = vmatprep.subr.mxu0 %v308_v40  ;;  %v228_v47 = vpop.permute.xlu0 %227 }
  0x94   : > { %364 = vmatpush1.msra.mxu0 %v307_v41  ;;  %v243_v50 = vsel %vm239_vm1, %v228_v47, %v236_v46  ;;  %v247_v51 = vsel %vm239_vm1, %v236_v46, %v228_v47 }
  0x95   : > { %v266_v52 = vmul.f32 %v9049_v42, %v243_v50  ;;  %v265_v53 = vmul.f32 %v9052_v43, %v247_v51  ;;  %8331 = vmatmul.mubr.msk.f32.vlgmr.msra.gmra.mxu0 %vm320_vm2, %v8327_v44  ;;  %1596 = vperm.xlu1 %8798, %v1586_v59   ;;  %v267_v44 = vld [vmem:[%s13284_s1] sm:$0xff] }
  0x96   : > { %403 = vmatprep.mubr.f32.mxu0 %v13288_v8  ;;  %1591 = vperm.xlu0 %8797, %v1585_v54   ;;  %v8322_v51 = vld [vmem:[%s13286_s3 + $0x6] sm:$0x3] }
  0x97   : > { %v234_v57 = vpop.permute.xlu1 %233  ;;  %458 = vmatprep.subr.mxu1 %v266_v52  ;;  %v226_v58 = vpop.permute.xlu0 %225  ;;  %v268_v52 = vld [vmem:[%s13284_s1 + $0x8] sm:$0xff]  ;;  %v9157_v59 = vrot.slane %v8322_v51, %v8996_v13 }
  0x98   : > { %v242_v60 = vsel %vm239_vm1, %v226_v58, %v234_v57  ;;  %v246_v61 = vsel %vm239_vm1, %v234_v57, %v226_v58  ;;  %459 = vmatpush1.msra.mxu1 %v265_v53 }
  0x99   : > { %v264_v62 = vmul.f32 %v9049_v42, %v242_v60  ;;  %v263_v9 = vmul.f32 %v9052_v43, %v246_v61  ;;  %8332 = vmatmul.mubr.msk.f32.gmra.mxu0 %vm320_vm2, %v8328_v56  ;;  %13371 = vst [vmem:[#allocation6_spill] sm:$0xff] %v9157_v59  ;;  %v9160_v60 = vrot.slane %v8322_v51, %v8994_v12  ;;  %v8339_v61 = vld [vmem:[%s13284_s1 + $0x40] sm:$0xff] }
  0x9a   : > { %409 = vmatprep.mubr.f32.mxu0 %v13288_v8 }
  0x9b   : > { %v538_v15 = vpop.permute.xlu1 %537  ;;  %460 = vmatprep.subr.mxu1 %v264_v62  ;;  %v530_v16 = vpop.permute.xlu0 %529  ;;  %13372 = vst [vmem:[#allocation7_spill] sm:$0xff] %v9160_v60  ;;  %v269_v62 = vld [vmem:[%s13284_s1 + $0x10] sm:$0xff] }
  0x9c   : > { %v543_v19 = vsel %vm539_vm3, %v530_v16, %v538_v15  ;;  %v547_v20 = vsel %vm539_vm3, %v538_v15, %v530_v16  ;;  %461 = vmatpush1.msra.mxu1 %v263_v9 }
  0x9d   : > { %v565_v21 = vmul.f32 %v9090_v63, %v547_v20  ;;  %v566_v22 = vmul.f32 %v9094_v10, %v543_v19  ;;  %8333 = vmatmul.mubr.msk.f32.gmra.mxu0 %vm320_vm2, %v8329_v14 }
  0x9e   : > { %415 = vmatprep.mubr.f32.mxu0 %v13288_v8 }
  0x9f   : > { %v232_v24 = vpop.permute.xlu1 %231  ;;  %608 = vmatprep.subr.mxu0 %v566_v22  ;;  %v224_v25 = vpop.permute.xlu0 %223  ;;  %v270_v22 = vld [vmem:[%s13284_s1 + $0x18] sm:$0xff] }
  0xa0   : > { %v241_v26 = vsel %vm239_vm1, %v224_v25, %v232_v24  ;;  %v245_v27 = vsel %vm239_vm1, %v232_v24, %v224_v25  ;;  %609 = vmatpush1.msra.mxu0 %v565_v21  ;;  %v8340_v21 = vld [vmem:[%s13284_s1 + $0x48] sm:$0xff] }
  0xa1   : > { %v262_v28 = vmul.f32 %v9049_v42, %v241_v26  ;;  %v261_v29 = vmul.f32 %v9052_v43, %v245_v27  ;;  %8334 = vmatmul.mubr.msk.f32.gmra.mxu0 %vm320_vm2, %v8330_v23 }
  0xa2   : > { %648 = vmatprep.mubr.f32.mxu0 %v13288_v8 }
  0xa3   : > { %v536_v30 = vpop.permute.xlu1 %535  ;;  %462 = vmatprep.subr.mxu1 %v262_v28  ;;  %v528_v31 = vpop.permute.xlu0 %527  ;;  %v8341_v28 = vld [vmem:[%s13284_s1 + $0x50] sm:$0xff] }
  0xa4   : > { %v542_v32 = vsel %vm539_vm3, %v528_v31, %v536_v30  ;;  %v546_v33 = vsel %vm539_vm3, %v536_v30, %v528_v31  ;;  %463 = vmatpush1.msra.mxu1 %v261_v29 }
  0xa5   : > { %v563_v34 = vmul.f32 %v9090_v63, %v546_v33  ;;  %v564_v35 = vmul.f32 %v9094_v10, %v542_v32 }
  0xa7   : > { %v230_v36 = vpop.permute.xlu1 %229  ;;  %610 = vmatprep.subr.mxu0 %v564_v35  ;;  %v222_v37 = vpop.permute.xlu0 %221 }
  0xa8   : > { %v240_v38 = vsel %vm239_vm1, %v222_v37, %v230_v36  ;;  %v244_v39 = vsel %vm239_vm1, %v230_v36, %v222_v37  ;;  %611 = vmatpush1.msra.mxu0 %v563_v34 }
  0xa9   : > { %v260_v40 = vmul.f32 %v9049_v42, %v240_v38  ;;  %v259_v41 = vmul.f32 %v9052_v43, %v244_v39  ;;  %v8347_v39 = vld [vmem:[%s13284_s1 + $0x60] sm:$0xff] }
  0xab   : > { %v534_v45 = vpop.permute.xlu1 %533  ;;  %464 = vmatprep.subr.mxu1 %v260_v40  ;;  %v526_v46 = vpop.permute.xlu0 %525 }
  0xac   : > { %v541_v47 = vsel %vm539_vm3, %v526_v46, %v534_v45  ;;  %v545_v48 = vsel %vm539_vm3, %v534_v45, %v526_v46  ;;  %465 = vmatpush1.msra.mxu1 %v259_v41 }
  0xad   : > { %v561_v49 = vmul.f32 %v9090_v63, %v545_v48  ;;  %v562_v50 = vmul.f32 %v9094_v10, %v541_v47  ;;  %8335 = vmatmul.mubr.msk.f32.vlgmr.msra.gmra.mxu1 %vm320_vm2, %v267_v44  ;;  %v8324_v48 = vld [vmem:[%s13286_s3 + $0xc] sm:$0x3] }
  0xae   : > { %504 = vmatprep.mubr.f32.mxu1 %v13288_v8 }
  0xaf   : > { %v532_v53 = vpop.permute.xlu1 %531  ;;  %612 = vmatprep.subr.mxu0 %v562_v50  ;;  %v524_v54 = vpop.permute.xlu0 %523  ;;  %v8356_v50 = vld [vmem:[%s13284_s1 + $0x88] sm:$0xff] }
  0xb0   : > { %v540_v55 = vsel %vm539_vm3, %v524_v54, %v532_v53  ;;  %v544_v56 = vsel %vm539_vm3, %v532_v53, %v524_v54  ;;  %613 = vmatpush1.msra.mxu0 %v561_v49  ;;  %v8348_v49 = vld [vmem:[%s13284_s1 + $0x68] sm:$0xff] }
  0xb1   : > { %v559_v57 = vmul.f32 %v9090_v63, %v544_v56  ;;  %v560_v58 = vmul.f32 %v9094_v10, %v540_v55  ;;  %8336 = vmatmul.mubr.msk.f32.gmra.mxu1 %vm320_vm2, %v268_v52  ;;  %v9266_v55 = vrot.slane %v8324_v48, %v8996_v13 }
  0xb2   : > { %510 = vmatprep.mubr.f32.mxu1 %v13288_v8 }
  0xb3   : > { %v696_v9 = vpop.permute.xlu1 %695  ;;  %614 = vmatprep.subr.mxu0 %v560_v58  ;;  %v688_v14 = vpop.permute.xlu0 %687  ;;  %13375 = vst [vmem:[#allocation10_spill] sm:$0xff] %v9266_v55  ;;  %v9274_v58 = vrot.slane %v8324_v48, %v8994_v12 }
  0xb4   : > { %v701_v15 = vsel %vm697_vm4, %v688_v14, %v696_v9  ;;  %v705_v16 = vsel %vm697_vm4, %v696_v9, %v688_v14  ;;  %615 = vmatpush1.msra.mxu0 %v559_v57 }
  0xb5   : > { %v723_v19 = vmul.f32 %v9157_v59, %v705_v16  ;;  %v724_v20 = vmul.f32 %v9160_v60, %v701_v15  ;;  %8343 = vmatmul.mubr.msk.f32.vlgmr.msra.gmra.mxu0 %vm320_vm2, %v8339_v61  ;;  %8337 = vmatmul.mubr.msk.f32.gmra.mxu1 %vm320_vm2, %v269_v62  ;;  %13376 = vst [vmem:[#allocation11_spill] sm:$0xff] %v9274_v58  ;;  %v8349_v61 = vld [vmem:[%s13284_s1 + $0x70] sm:$0xff] }
  0xb6   : > { %654 = vmatprep.mubr.f32.mxu0 %v13288_v8  ;;  %880 = vmatprep.subr.mxu0 %v8866_v2  ;;  %v8357_v62 = vld [vmem:[%s13284_s1 + $0x90] sm:$0xff] }
  0xb7   : > { %v694_v23 = vpop.permute.xlu1 %693  ;;  %766 = vmatprep.subr.mxu1 %v724_v20  ;;  %v686_v24 = vpop.permute.xlu0 %685  ;;  %516 = vmatprep.mubr.f32.mxu1 %v13288_v8 }
  0xb8   : > { %v700_v25 = vsel %vm697_vm4, %v686_v24, %v694_v23  ;;  %v704_v26 = vsel %vm697_vm4, %v694_v23, %v686_v24  ;;  %767 = vmatpush1.msra.mxu1 %v723_v19  ;;  %881 = vmatpush1.msra.mxu0 %v8858_v0 }
  0xb9   : > { %v721_v2 = vmul.f32 %v9157_v59, %v704_v26  ;;  %v722_v27 = vmul.f32 %v9160_v60, %v700_v25  ;;  %8344 = vmatmul.mubr.msk.f32.gmra.mxu0 %vm320_vm2, %v8340_v21  ;;  %8338 = vmatmul.mubr.msk.f32.gmra.mxu1 %vm320_vm2, %v270_v22  ;;  %v8350_v21 = vld [vmem:[%s13284_s1 + $0x78] sm:$0xff] }
  0xba   : > { %660 = vmatprep.mubr.f32.mxu0 %v13288_v8  ;;  %882 = vmatprep.subr.mxu0 %v8868_v3  ;;  %v8342_v3 = vld [vmem:[%s13284_s1 + $0x58] sm:$0xff] }
  0xbb   : > { %v692_v29 = vpop.permute.xlu1 %691  ;;  %768 = vmatprep.subr.mxu1 %v722_v27  ;;  %v684_v30 = vpop.permute.xlu0 %683  ;;  %883 = vmatpush1.msra.mxu0 %v8860_v1  ;;  %v8323_v1 = vld [vmem:[%s13286_s3 + $0xa] sm:$0x3]  ;;  %v8358_v22 = vld [vmem:[%s13284_s1 + $0x98] sm:$0xff] }
  0xbc   : > { %v699_v0 = vsel %vm697_vm4, %v684_v30, %v692_v29  ;;  %v703_v31 = vsel %vm697_vm4, %v692_v29, %v684_v30  ;;  %769 = vmatpush1.msra.mxu1 %v721_v2  ;;  %884 = vmatprep.subr.mxu0 %v8874_v4  ;;  %v9229_v38 = vrot.slane %v8323_v1, %v8996_v13 }
  0xbd   : > { %v719_v32 = vmul.f32 %v9157_v59, %v703_v31  ;;  %v720_v33 = vmul.f32 %v9160_v60, %v699_v0  ;;  %8345 = vmatmul.mubr.msk.f32.gmra.mxu0 %vm320_vm2, %v8341_v28  ;;  %806 = vmatprep.mubr.f32.mxu1 %v13288_v8 }
  0xbe   : > { %666 = vmatprep.mubr.f32.mxu0 %v13288_v8  ;;  %885 = vmatpush1.msra.mxu0 %v8876_v5  ;;  %13373 = vst [vmem:[#allocation8_spill] sm:$0xff] %v9229_v38 }
  0xbf   : > { %v690_v4 = vpop.permute.xlu1 %689  ;;  %770 = vmatprep.subr.mxu1 %v720_v33  ;;  %v682_v34 = vpop.permute.xlu0 %681  ;;  %886 = vmatprep.subr.mxu0 %v8882_v6  ;;  %v9233_v6 = vrot.slane %v8323_v1, %v8994_v12 }
  0xc0   : > { %v698_v35 = vsel %vm697_vm4, %v682_v34, %v690_v4  ;;  %v702_v36 = vsel %vm697_vm4, %v690_v4, %v682_v34  ;;  %771 = vmatpush1.msra.mxu1 %v719_v32  ;;  %887 = vmatpush1.msra.mxu0 %v8884_v7  ;;  %v8355_v7 = vld [vmem:[%s13284_s1 + $0x80] sm:$0xff] }
  0xc1   : > { %v717_v37 = vmul.f32 %v9157_v59, %v702_v36  ;;  %v718_v5 = vmul.f32 %v9160_v60, %v698_v35  ;;  %8346 = vmatmul.mubr.msk.f32.gmra.mxu0 %vm320_vm2, %v8342_v3  ;;  %13374 = vst [vmem:[#allocation9_spill] sm:$0xff] %v9233_v6  ;;  %v8363_v36 = vld [vmem:[%s13284_s1 + $0xa0] sm:$0xff] }
  0xc2   : > { %920 = vmatprep.mubr.f32.mxu0 %v13288_v8 }
  0xc3   : > { %v968_v40 = vpop.permute.xlu1 %967  ;;  %772 = vmatprep.subr.mxu1 %v718_v5  ;;  %v960_v41 = vpop.permute.xlu0 %959 }
  0xc4   : > { %v973_v44 = vsel %vm969_vm5, %v960_v41, %v968_v40  ;;  %v977_v45 = vsel %vm969_vm5, %v968_v40, %v960_v41  ;;  %773 = vmatpush1.msra.mxu1 %v717_v37 }
  0xc5   : > { %v995_v46 = vmul.f32 %v9229_v38, %v973_v44  ;;  %8351 = vmatmul.mubr.msk.f32.vlgmr.msra.gmra.mxu1 %vm320_vm2, %v8347_v39  ;;  %v996_v47 = vmul.f32 %v9233_v6, %v977_v45  ;;  %8359 = vmatmul.mubr.msk.f32.vlgmr.msra.gmra.mxu0 %vm320_vm2, %v8355_v7  ;;  %v8364_v44 = vld [vmem:[%s13284_s1 + $0xa8] sm:$0xff] }
  0xc6   : > { %812 = vmatprep.mubr.f32.mxu1 %v13288_v8  ;;  %926 = vmatprep.mubr.f32.mxu0 %v13288_v8  ;;  %v8325_v45 = vld [vmem:[%s13286_s3 + $0xe] sm:$0x3] }
  0xc7   : > { %v966_v51 = vpop.permute.xlu1 %965  ;;  %1038 = vmatprep.subr.mxu1 %v996_v47  ;;  %v958_v52 = vpop.permute.xlu0 %957 }
  0xc8   : > { %v972_v53 = vsel %vm969_vm5, %v958_v52, %v966_v51  ;;  %v976_v54 = vsel %vm969_vm5, %v966_v51, %v958_v52  ;;  %1039 = vmatpush1.msra.mxu1 %v995_v46  ;;  %v9348_v52 = vrot.slane %v8325_v45, %v8996_v13 }
  0xc9   : > { %v993_v56 = vmul.f32 %v9229_v38, %v972_v53  ;;  %8352 = vmatmul.mubr.msk.f32.gmra.mxu1 %vm320_vm2, %v8348_v49  ;;  %v994_v57 = vmul.f32 %v9233_v6, %v976_v54  ;;  %8360 = vmatmul.mubr.msk.f32.gmra.mxu0 %vm320_vm2, %v8356_v50  ;;  %v9351_v53 = vrot.slane %v8325_v45, %v8994_v12  ;;  %v8365_v54 = vld [vmem:[%s13284_s1 + $0xb0] sm:$0xff] }
  0xca   : > { %818 = vmatprep.mubr.f32.mxu1 %v13288_v8  ;;  %932 = vmatprep.mubr.f32.mxu0 %v13288_v8  ;;  %13377 = vst [vmem:[#allocation12_spill] sm:$0xff] %v9348_v52 }
  0xcb   : > { %v1126_v9 = vpop.permute.xlu1 %1125  ;;  %1040 = vmatprep.subr.mxu1 %v994_v57  ;;  %v1118_v14 = vpop.permute.xlu0 %1117  ;;  %13378 = vst [vmem:[#allocation13_spill] sm:$0xff] %v9351_v53 }
  0xcc   : > { %v1131_v15 = vsel %vm1127_vm6, %v1118_v14, %v1126_v9  ;;  %v1135_v16 = vsel %vm1127_vm6, %v1126_v9, %v1118_v14  ;;  %1041 = vmatpush1.msra.mxu1 %v993_v56  ;;  %v8371_v56 = vld [vmem:[%s13284_s1 + $0xc0] sm:$0xff] }
  0xcd   : > { %v1153_v19 = vmul.f32 %v9266_v55, %v1131_v15  ;;  %8353 = vmatmul.mubr.msk.f32.gmra.mxu1 %vm320_vm2, %v8349_v61  ;;  %v1154_v20 = vmul.f32 %v9274_v58, %v1135_v16  ;;  %8361 = vmatmul.mubr.msk.f32.gmra.mxu0 %vm320_vm2, %v8357_v62  ;;  %v8326_v16 = vld [vmem:[%s13286_s3 + $0x10] sm:$0x3] }
  0xce   : > { %824 = vmatprep.mubr.f32.mxu1 %v13288_v8  ;;  %938 = vmatprep.mubr.f32.mxu0 %v13288_v8 }
  0xcf   : > { %v964_v23 = vpop.permute.xlu1 %963  ;;  %1196 = vmatprep.subr.mxu0 %v1154_v20  ;;  %v956_v24 = vpop.permute.xlu0 %955  ;;  %v8372_v20 = vld [vmem:[%s13284_s1 + $0xc8] sm:$0xff] }
  0xd0   : > { %v971_v25 = vsel %vm969_vm5, %v956_v24, %v964_v23  ;;  %v975_v26 = vsel %vm969_vm5, %v964_v23, %v956_v24  ;;  %1197 = vmatpush1.msra.mxu0 %v1153_v19  ;;  %v8366_v19 = vld [vmem:[%s13284_s1 + $0xb8] sm:$0xff] }
  0xd1   : > { %v991_v2 = vmul.f32 %v9229_v38, %v971_v25  ;;  %8354 = vmatmul.mubr.msk.f32.gmra.mxu1 %vm320_vm2, %v8350_v21  ;;  %v992_v27 = vmul.f32 %v9233_v6, %v975_v26  ;;  %8362 = vmatmul.mubr.msk.f32.gmra.mxu0 %vm320_vm2, %v8358_v22  ;;  %v9384_v25 = vrot.slane %v8326_v16, %v8996_v13  ;;  %v8373_v13 = vld [vmem:[%s13284_s1 + $0xd0] sm:$0xff] }
  0xd2   : > { %1078 = vmatprep.mubr.f32.mxu1 %v13288_v8  ;;  %1236 = vmatprep.mubr.f32.mxu0 %v13288_v8 }
  0xd3   : > { %v1124_v28 = vpop.permute.xlu1 %1123  ;;  %1042 = vmatprep.subr.mxu1 %v992_v27  ;;  %v1116_v29 = vpop.permute.xlu0 %1115  ;;  %13379 = vst [vmem:[#allocation14_spill] sm:$0xff] %v9384_v25  ;;  %v9392_v27 = vrot.slane %v8326_v16, %v8994_v12 }
  0xd4   : > { %v1130_v30 = vsel %vm1127_vm6, %v1116_v29, %v1124_v28  ;;  %v1134_v0 = vsel %vm1127_vm6, %v1124_v28, %v1116_v29  ;;  %1043 = vmatpush1.msra.mxu1 %v991_v2 }
  0xd5   : > { %v1151_v31 = vmul.f32 %v9266_v55, %v1130_v30  ;;  %v1152_v32 = vmul.f32 %v9274_v58, %v1134_v0  ;;  %13380 = vst [vmem:[#allocation15_spill] sm:$0xff] %v9392_v27 }
  0xd7   : > { %v962_v33 = vpop.permute.xlu1 %961  ;;  %1198 = vmatprep.subr.mxu0 %v1152_v32  ;;  %v954_v1 = vpop.permute.xlu0 %953  ;;  %v8374_v32 = vld [vmem:[%s13284_s1 + $0xd8] sm:$0xff] }
  0xd8   : > { %v970_v3 = vsel %vm969_vm5, %v954_v1, %v962_v33  ;;  %v974_v4 = vsel %vm969_vm5, %v962_v33, %v954_v1  ;;  %1199 = vmatpush1.msra.mxu0 %v1151_v31 }
  0xd9   : > { %v989_v34 = vmul.f32 %v9229_v38, %v970_v3  ;;  %v990_v35 = vmul.f32 %v9233_v6, %v974_v4 }
  0xdb   : > { %v1122_v37 = vpop.permute.xlu1 %1121  ;;  %1044 = vmatprep.subr.mxu1 %v990_v35  ;;  %v1114_v5 = vpop.permute.xlu0 %1113 }
  0xdc   : > { %v1129_v39 = vsel %vm1127_vm6, %v1114_v5, %v1122_v37  ;;  %v1133_v7 = vsel %vm1127_vm6, %v1122_v37, %v1114_v5  ;;  %1045 = vmatpush1.msra.mxu1 %v989_v34 }
  0xdd   : > { %v1149_v40 = vmul.f32 %v9266_v55, %v1129_v39  ;;  %8367 = vmatmul.mubr.msk.f32.vlgmr.msra.gmra.mxu1 %vm320_vm2, %v8363_v36  ;;  %v1150_v41 = vmul.f32 %v9274_v58, %v1133_v7 }
  0xde   : > { %1084 = vmatprep.mubr.f32.mxu1 %v13288_v8 }
  0xdf   : > { %v1120_v46 = vpop.permute.xlu1 %1119  ;;  %1200 = vmatprep.subr.mxu0 %v1150_v41  ;;  %v1112_v47 = vpop.permute.xlu0 %1111 }
  0xe0   : > { %v1128_v48 = vsel %vm1127_vm6, %v1112_v47, %v1120_v46  ;;  %v1132_v49 = vsel %vm1127_vm6, %v1120_v46, %v1112_v47  ;;  %1201 = vmatpush1.msra.mxu0 %v1149_v40 }
  0xe1   : > { %v1147_v50 = vmul.f32 %v9266_v55, %v1128_v48  ;;  %8368 = vmatmul.mubr.msk.f32.gmra.mxu1 %vm320_vm2, %v8364_v44  ;;  %v1148_v51 = vmul.f32 %v9274_v58, %v1132_v49  ;;  %v8379_v49 = vld [vmem:[%s13284_s1 + $0xe0] sm:$0xff] }
  0xe2   : > { %1090 = vmatprep.mubr.f32.mxu1 %v13288_v8 }
  0xe3   : > { %v1284_v57 = vpop.permute.xlu1 %1283  ;;  %1202 = vmatprep.subr.mxu0 %v1148_v51  ;;  %v1276_v61 = vpop.permute.xlu0 %1275 }
  0xe4   : > { %v1289_v62 = vsel %vm1285_vm7, %v1276_v61, %v1284_v57  ;;  %v1293_v9 = vsel %vm1285_vm7, %v1284_v57, %v1276_v61  ;;  %1203 = vmatpush1.msra.mxu0 %v1147_v50 }
  0xe5   : > { %v1311_v14 = vmul.f32 %v9348_v52, %v1289_v62  ;;  %8369 = vmatmul.mubr.msk.f32.gmra.mxu1 %vm320_vm2, %v8365_v54  ;;  %8375 = vmatmul.mubr.msk.f32.vlgmr.msra.gmra.mxu0 %vm320_vm2, %v8371_v56  ;;  %v1312_v15 = vmul.f32 %v9351_v53, %v1293_v9  ;;  %v8380_v62 = vld [vmem:[%s13284_s1 + $0xe8] sm:$0xff] }
  0xe6   : > { %1096 = vmatprep.mubr.f32.mxu1 %v13288_v8  ;;  %1242 = vmatprep.mubr.f32.mxu0 %v13288_v8 }
  0xe7   : > { %v1282_v21 = vpop.permute.xlu1 %1281  ;;  %1354 = vmatprep.subr.mxu1 %v1312_v15  ;;  %v1274_v22 = vpop.permute.xlu0 %1273 }
  0xe8   : > { %v1288_v23 = vsel %vm1285_vm7, %v1274_v22, %v1282_v21  ;;  %v1292_v24 = vsel %vm1285_vm7, %v1282_v21, %v1274_v22  ;;  %1355 = vmatpush1.msra.mxu1 %v1311_v14  ;;  %v8381_v21 = vld [vmem:[%s13284_s1 + $0xf0] sm:$0xff]  ;;  %v8387_v22 = vld [vmem:[%s13284_s1 + $0x100] sm:$0xff] }
  0xe9   : > { %v1309_v26 = vmul.f32 %v9348_v52, %v1288_v23  ;;  %8370 = vmatmul.mubr.msk.f32.gmra.mxu1 %vm320_vm2, %v8366_v19  ;;  %8376 = vmatmul.mubr.msk.f32.gmra.mxu0 %vm320_vm2, %v8372_v20  ;;  %v1310_v2 = vmul.f32 %v9351_v53, %v1292_v24  ;;  %v8382_v23 = vld [vmem:[%s13284_s1 + $0xf8] sm:$0xff]  ;;  %v8388_v24 = vld [vmem:[%s13284_s1 + $0x108] sm:$0xff] }
  0xea   : > { %1248 = vmatprep.mubr.f32.mxu0 %v13288_v8  ;;  %1394 = vmatprep.mubr.f32.mxu1 %v13288_v8 }
  0xeb   : > { %v1442_v28 = vpop.permute.xlu1 %1441  ;;  %1356 = vmatprep.subr.mxu1 %v1310_v2  ;;  %v1434_v29 = vpop.permute.xlu0 %1433  ;;  %v8390_v2 = vld [vmem:[%s13284_s1 + $0x118] sm:$0xff] }
  0xec   : > { %v1447_v30 = vsel %vm1443_vm8, %v1434_v29, %v1442_v28  ;;  %v1451_v0 = vsel %vm1443_vm8, %v1442_v28, %v1434_v29  ;;  %1357 = vmatpush1.msra.mxu1 %v1309_v26  ;;  %v8389_v26 = vld [vmem:[%s13284_s1 + $0x110] sm:$0xff] }
  0xed   : > { %v1469_v12 = vmul.f32 %v9384_v25, %v1447_v30  ;;  %8377 = vmatmul.mubr.msk.f32.gmra.mxu0 %vm320_vm2, %v8373_v13  ;;  %v1470_v31 = vmul.f32 %v9392_v27, %v1451_v0 }
  0xee   : > { %1254 = vmatprep.mubr.f32.mxu0 %v13288_v8 }
  0xef   : > { %v1280_v33 = vpop.permute.xlu1 %1279  ;;  %1512 = vmatprep.subr.mxu0 %v1470_v31  ;;  %v1272_v1 = vpop.permute.xlu0 %1271 }
  0xf0   : > { %v1287_v3 = vsel %vm1285_vm7, %v1272_v1, %v1280_v33  ;;  %v1291_v4 = vsel %vm1285_vm7, %v1280_v33, %v1272_v1  ;;  %1513 = vmatpush1.msra.mxu0 %v1469_v12 }
  0xf1   : > { %v1307_v34 = vmul.f32 %v9348_v52, %v1287_v3  ;;  %8378 = vmatmul.mubr.msk.f32.gmra.mxu0 %vm320_vm2, %v8374_v32  ;;  %v1308_v35 = vmul.f32 %v9351_v53, %v1291_v4 }
  0xf2   : > { %1552 = vmatprep.mubr.f32.mxu0 %v13288_v8 }
  0xf3   : > { %v1440_v36 = vpop.permute.xlu1 %1439  ;;  %1358 = vmatprep.subr.mxu1 %v1308_v35  ;;  %v1432_v37 = vpop.permute.xlu0 %1431 }
  0xf4   : > { %v1446_v5 = vsel %vm1443_vm8, %v1432_v37, %v1440_v36  ;;  %v1450_v39 = vsel %vm1443_vm8, %v1440_v36, %v1432_v37  ;;  %1359 = vmatpush1.msra.mxu1 %v1307_v34 }
  0xf5   : > { %v1467_v7 = vmul.f32 %v9384_v25, %v1446_v5  ;;  %v1468_v40 = vmul.f32 %v9392_v27, %v1450_v39 }
  0xf7   : > { %v1278_v41 = vpop.permute.xlu1 %1277  ;;  %1514 = vmatprep.subr.mxu0 %v1468_v40  ;;  %v1270_v44 = vpop.permute.xlu0 %1269 }
  0xf8   : > { %v1286_v45 = vsel %vm1285_vm7, %v1270_v44, %v1278_v41  ;;  %v1290_v46 = vsel %vm1285_vm7, %v1278_v41, %v1270_v44  ;;  %1515 = vmatpush1.msra.mxu0 %v1467_v7 }
  0xf9   : > { %v1305_v47 = vmul.f32 %v9348_v52, %v1286_v45  ;;  %v1306_v48 = vmul.f32 %v9351_v53, %v1290_v46 }
  0xfb   : > { %v1438_v50 = vpop.permute.xlu1 %1437  ;;  %1360 = vmatprep.subr.mxu1 %v1306_v48  ;;  %v1430_v51 = vpop.permute.xlu0 %1429 }
  0xfc   : > { %v1445_v54 = vsel %vm1443_vm8, %v1430_v51, %v1438_v50  ;;  %v1449_v56 = vsel %vm1443_vm8, %v1438_v50, %v1430_v51  ;;  %1361 = vmatpush1.msra.mxu1 %v1305_v47 }
  0xfd   : > { %v1465_v57 = vmul.f32 %v9384_v25, %v1445_v54  ;;  %8383 = vmatmul.mubr.msk.f32.vlgmr.msra.gmra.mxu1 %vm320_vm2, %v8379_v49  ;;  %v1466_v61 = vmul.f32 %v9392_v27, %v1449_v56 }
  0xfe   : > { %1400 = vmatprep.mubr.f32.mxu1 %v13288_v8 }
  0xff   : > { %v1436_v9 = vpop.permute.xlu1 %1435  ;;  %1516 = vmatprep.subr.mxu0 %v1466_v61 }
 0x100   : > { %v1428_v14 = vpop.permute.xlu0 %1427  ;;  %1517 = vmatpush1.msra.mxu0 %v1465_v57 }
 0x101   : > { %v1444_v15 = vsel %vm1443_vm8, %v1428_v14, %v1436_v9  ;;  %v1448_v16 = vsel %vm1443_vm8, %v1436_v9, %v1428_v14  ;;  %8384 = vmatmul.mubr.msk.f32.gmra.mxu1 %vm320_vm2, %v8380_v62 }
 0x102   : > { %v1463_v19 = vmul.f32 %v9384_v25, %v1444_v15  ;;  %v1464_v20 = vmul.f32 %v9392_v27, %v1448_v16  ;;  %1406 = vmatprep.mubr.f32.mxu1 %v13288_v8 }
 0x104   : > { %1518 = vmatprep.subr.mxu0 %v1464_v20 }
 0x105   : > { %1519 = vmatpush1.msra.mxu0 %v1463_v19  ;;  %8385 = vmatmul.mubr.msk.f32.gmra.mxu1 %vm320_vm2, %v8381_v21 }
 0x106   : > { %8391 = vmatmul.mubr.msk.f32.vlgmr.msra.gmra.mxu0 %vm320_vm2, %v8387_v22  ;;  %1412 = vmatprep.mubr.f32.mxu1 %v13288_v8 }
 0x107   : > { %1558 = vmatprep.mubr.f32.mxu0 %v13288_v8 }
 0x109   : > { %8386 = vmatmul.mubr.msk.f32.gmra.mxu1 %vm320_vm2, %v8382_v23 }
 0x10a   : > { %8392 = vmatmul.mubr.msk.f32.gmra.mxu0 %vm320_vm2, %v8388_v24  ;;  %1791 = vmatprep.mubr.f32.mxu1 %v13288_v8 }
 0x10b   : > { %1564 = vmatprep.mubr.f32.mxu0 %v13288_v8 }
 0x10d   : > { %v9528_v42 = vpop.permute.xlu0 %1606 }
 0x10e   : > { %8393 = vmatmul.mubr.msk.f32.gmra.mxu0 %vm320_vm2, %v8389_v26 }
 0x10f   : > { %1570 = vmatprep.mubr.f32.mxu0 %v13288_v8 }
 0x112   : > { %8394 = vmatmul.mubr.msk.f32.gmra.mxu0 %vm320_vm2, %v8390_v2 }
 0x113   : > { %1892 = vmatprep.mubr.f32.mxu0 %v13288_v8 }
 0x155   : > { %v399_v13 = vpop.f32.mrf.mxu0 }
 0x157   : > { %v401_v28 = vpop.f32.mrf.mxu0 }
 0x159   : > { %v405_v29 = vpop.f32.mrf.mxu0 }
 0x15b   : > { %v407_v30 = vpop.f32.mrf.mxu0 }
 0x15d   : > { %v9482_v0 = vpop.f32.mrf.mxu0 }
 0x15f   : > { %v9484_v12 = vpop.f32.mrf.mxu0 }
 0x161   : > { %v417_v31 = vpop.f32.mrf.mxu0 }
 0x163   : > { %v9486_v1 = vpop.f32.mrf.mxu0 }
 0x16d   : > { %v500_v32 = vpop.f32.mrf.mxu1 }
 0x16e   : > { %v501_v27 = vadd.f32 %v500_v32, %v399_v13 }
 0x16f   : > { %v502_v33 = vpop.f32.mrf.mxu1 }
 0x170   : > { %v503_v52 = vadd.f32 %v502_v33, %v401_v28 }
 0x171   : > { %v506_v3 = vpop.f32.mrf.mxu1 }
 0x172   : > { %v507_v38 = vadd.f32 %v506_v3, %v405_v29 }
 0x173   : > { %v508_v4 = vpop.f32.mrf.mxu1 }
 0x174   : > { %v509_v60 = vadd.f32 %v508_v4, %v407_v30 }
 0x175   : > { %v650_v34 = vpop.f32.mrf.mxu0  ;;  %v9488_v35 = vpop.f32.mrf.mxu1 }
 0x177   : > { %v652_v36 = vpop.f32.mrf.mxu0  ;;  %v9490_v37 = vpop.f32.mrf.mxu1 }
 0x179   : > { %v656_v5 = vpop.f32.mrf.mxu0  ;;  %v518_v39 = vpop.f32.mrf.mxu1 }
 0x17a   : > { %v519_v7 = vadd.f32 %v518_v39, %v417_v31  ;;  %v675_v32 = vadd.f32 %v656_v5, %v507_v38 }
 0x17b   : > { %v658_v40 = vpop.f32.mrf.mxu0  ;;  %v9496_v45 = vpop.f32.mrf.mxu1 }
 0x17d   : > { %v9492_v41 = vpop.f32.mrf.mxu0 }
 0x17f   : > { %v9494_v44 = vpop.f32.mrf.mxu0 }
 0x181   : > { %v668_v46 = vpop.f32.mrf.mxu0 }
 0x182   : > { %v679_v47 = vadd.f32 %v668_v46, %v519_v7 }
 0x183   : > { %v9498_v48 = vpop.f32.mrf.mxu0 }
 0x185   : > { %v808_v49 = vpop.f32.mrf.mxu1  ;;  %v922_v50 = vpop.f32.mrf.mxu0 }
 0x187   : > { %v810_v51 = vpop.f32.mrf.mxu1  ;;  %v924_v54 = vpop.f32.mrf.mxu0 }
 0x189   : > { %v814_v56 = vpop.f32.mrf.mxu1  ;;  %v928_v57 = vpop.f32.mrf.mxu0 }
 0x18a   : > { %v833_v29 = vadd.f32 %v814_v56, %v675_v32  ;;  %v513_v56 = vadd.f32 %v9488_v35, %v9482_v0 }
 0x18b   : > { %v816_v61 = vpop.f32.mrf.mxu1  ;;  %v930_v62 = vpop.f32.mrf.mxu0 }
 0x18c   : > { %v947_v38 = vadd.f32 %v928_v57, %v833_v29 }
 0x18d   : > { %v9500_v9 = vpop.f32.mrf.mxu1  ;;  %v9502_v14 = vpop.f32.mrf.mxu0 }
 0x18f   : > { %v9504_v15 = vpop.f32.mrf.mxu1  ;;  %v9506_v16 = vpop.f32.mrf.mxu0 }
 0x191   : > { %v826_v19 = vpop.f32.mrf.mxu1  ;;  %v940_v21 = vpop.f32.mrf.mxu0 }
 0x192   : > { %v837_v20 = vadd.f32 %v826_v19, %v679_v47  ;;  %v673_v19 = vadd.f32 %v650_v34, %v501_v27  ;;  %v676_v34 = vadd.f32 %v658_v40, %v509_v60 }
 0x193   : > { %v9510_v23 = vpop.f32.mrf.mxu1  ;;  %v9512_v26 = vpop.f32.mrf.mxu0 }
 0x194   : > { %v9508_v22 = vadd.f32 %v940_v21, %v837_v20  ;;  %v674_v21 = vadd.f32 %v652_v36, %v503_v52  ;;  %v831_v58 = vadd.f32 %v808_v49, %v673_v19  ;;  %v834_v4 = vadd.f32 %v816_v61, %v676_v34 }
 0x196   : > { %v832_v59 = vadd.f32 %v810_v51, %v674_v21  ;;  %v945_v63 = vadd.f32 %v922_v50, %v831_v58  ;;  %v1592_v21 = vpop.permute.xlu0 %1591  ;;  %v948_v60 = vadd.f32 %v930_v62, %v834_v4 }
 0x198   : > { %v946_v33 = vadd.f32 %v924_v54, %v832_v59 }
 0x19d   : > { %v1080_v24 = vpop.f32.mrf.mxu1 }
 0x19e   : > { %v1103_v27 = vadd.f32 %v1080_v24, %v945_v63 }
 0x19f   : > { %v1082_v2 = vpop.f32.mrf.mxu1 }
 0x1a0   : > { %v1104_v52 = vadd.f32 %v1082_v2, %v946_v33 }
 0x1a1   : > { %v1086_v39 = vpop.f32.mrf.mxu1 }
 0x1a2   : > { %v1105_v40 = vadd.f32 %v1086_v39, %v947_v38 }
 0x1a3   : > { %v1088_v46 = vpop.f32.mrf.mxu1 }
 0x1a4   : > { %v1106_v2 = vadd.f32 %v1088_v46, %v948_v60 }
 0x1a5   : > { %v1238_v31 = vpop.f32.mrf.mxu0  ;;  %v9514_v25 = vpop.f32.mrf.mxu1 }
 0x1a6   : > { %v1261_v36 = vadd.f32 %v1238_v31, %v1103_v27  ;;  %v1602_v31 = vpop.permute.xlu1 %1601 }
 0x1a7   : > { %v1240_v7 = vpop.f32.mrf.mxu0  ;;  %v9516_v47 = vpop.f32.mrf.mxu1 }
 0x1a8   : > { %v1262_v3 = vadd.f32 %v1240_v7, %v1104_v52 }
 0x1a9   : > { %v1244_v8 = vpop.f32.mrf.mxu0  ;;  %v9520_v55 = vpop.f32.mrf.mxu1 }
 0x1aa   : > { %v1263_v7 = vadd.f32 %v1244_v8, %v1105_v40  ;;  %v677_v8 = vadd.f32 %v9492_v41, %v513_v56  ;;  %v1597_v27 = vpop.permute.xlu1 %1596 }
 0x1ab   : > { %v1246_v53 = vpop.f32.mrf.mxu0  ;;  %v9524_v10 = vpop.f32.mrf.mxu1 }
 0x1ac   : > { %v1264_v62 = vadd.f32 %v1246_v53, %v1106_v2  ;;  %v835_v53 = vadd.f32 %v9500_v9, %v677_v8 }
 0x1ad   : > { %v9518_v20 = vpop.f32.mrf.mxu0 }
 0x1af   : > { %v9522_v6 = vpop.f32.mrf.mxu0 }
 0x1b1   : > { %v9526_v13 = vpop.f32.mrf.mxu0 }
 0x1b3   : > { %v9530_v49 = vpop.f32.mrf.mxu0 }
 0x1bd   : > { %v1396_v28 = vpop.f32.mrf.mxu1 }
 0x1be   : > { %v1419_v30 = vadd.f32 %v1396_v28, %v1261_v36  ;;  %v949_v36 = vadd.f32 %v9502_v14, %v835_v53 }
 0x1bf   : > { %v1398_v19 = vpop.f32.mrf.mxu1 }
 0x1c0   : > { %v1420_v58 = vadd.f32 %v1398_v19, %v1262_v3  ;;  %v1107_v29 = vadd.f32 %v9514_v25, %v949_v36 }
 0x1c1   : > { %v1402_v5 = vpop.f32.mrf.mxu1 }
 0x1c2   : > { %v1421_v39 = vadd.f32 %v1402_v5, %v1263_v7  ;;  %v1265_v14 = vadd.f32 %v9518_v20, %v1107_v29 }
 0x1c3   : > { %v1404_v57 = vpop.f32.mrf.mxu1 }
 0x1c4   : > { %v1422_v35 = vadd.f32 %v1404_v57, %v1264_v62 }
 0x1c6   : > { %v1554_v51 = vpop.f32.mrf.mxu0 }
 0x1c7   : > { %v1577_v50 = vadd.f32 %v1554_v51, %v1419_v30 }
 0x1c8   : > { %v1556_v43 = vpop.f32.mrf.mxu0 }
 0x1c9   : > { %v1609_v59 = vadd.f32 %v1592_v21, %v1577_v50  ;;  %v1578_v63 = vadd.f32 %v1556_v43, %v1420_v58  ;;  %v515_v43 = vadd.f32 %v9490_v37, %v9484_v12 }
 0x1ca   : > { %v1560_v61 = vpop.f32.mrf.mxu0 }
 0x1cb   : > { %vm1617_vm9 = vcmp.ge.f32.partialorder %v1609_v59, 0.0  ;;  %v1625_v54 = vmul.f32 0.2, %v1609_v59  ;;  %v1610_v24 = vadd.f32 %v1592_v21, %v1578_v63  ;;  %v1579_v46 = vadd.f32 %v1560_v61, %v1421_v39 }
 0x1cc   : > { %v1562_v0 = vpop.f32.mrf.mxu0  ;;  %v678_v34 = vadd.f32 %v9494_v44, %v515_v43  ;;  %v1408_v44 = vpop.f32.mrf.mxu1 }
 0x1cd   : > { %v9534_v28 = vsel %vm1617_vm9, %v1609_v59, %v1625_v54  ;;  %vm1618_vm10 = vcmp.ge.f32.partialorder %v1610_v24, 0.0  ;;  %v1626_v32 = vmul.f32 0.2, %v1610_v24  ;;  %v1580_v52 = vadd.f32 %v1562_v0, %v1422_v35 }
 0x1ce   : > { %13381 = vst [vmem:[#allocation16_spill] sm:$0xff] %v9534_v28  ;;  %1678 = vrot.lane.b32.xlu1 %v9534_v28, %s8807_s21  ;;  %v1611_v12 = vadd.f32 %v1597_v27, %v1579_v46  ;;  %v836_v37 = vadd.f32 %v9504_v15, %v678_v34  ;;  %v1566_v30 = vpop.f32.mrf.mxu0  ;;  %v1410_v51 = vpop.f32.mrf.mxu1  ;;  %v1423_v58 = vadd.f32 %v1408_v44, %v1265_v14 }
 0x1cf   : > { %v9540_v33 = vsel %vm1618_vm10, %v1610_v24, %v1626_v32  ;;  %v1612_v41 = vadd.f32 %v1597_v27, %v1580_v52  ;;  %v1109_v54 = vadd.f32 %v9520_v55, %v9508_v22  ;;  %v8470_v27 = vld [vmem:[%s13285_s2 + $0x38] sm:$0xff]  ;;  %v8469_v52 = vld [vmem:[%s13285_s2 + $0x30] sm:$0xff] }
 0x1d0   : > { %13382 = vst [vmem:[#allocation17_spill] sm:$0xff] %v9540_v33  ;;  %1686 = vrot.lane.b32.xlu0 %v9540_v33, %s8807_s21  ;;  %v1627_v19 = vmul.f32 0.2, %v1611_v12  ;;  %vm1619_vm11 = vcmp.ge.f32.partialorder %v1611_v12, 0.0  ;;  %v950_v9 = vadd.f32 %v9506_v16, %v836_v37  ;;  %v1568_v50 = vpop.f32.mrf.mxu0  ;;  %v1581_v38 = vadd.f32 %v1566_v30, %v1423_v58  ;;  %v1414_v40 = vpop.f32.mrf.mxu1 }
 0x1d1   : > { %v1628_v3 = vmul.f32 0.2, %v1612_v41  ;;  %vm1620_vm12 = vcmp.ge.f32.partialorder %v1612_v41, 0.0  ;;  %v1267_v2 = vadd.f32 %v9526_v13, %v1109_v54 }
 0x1d2   : > { %1641 = vrot.lane.b32.xlu1 %v9534_v28, %s8809_s22  ;;  %v1108_v15 = vadd.f32 %v9516_v47, %v950_v9  ;;  %v9565_v4 = vsel %vm1619_vm11, %v1611_v12, %v1627_v19  ;;  %v521_v47 = vadd.f32 %v9496_v45, %v9486_v1  ;;  %v1572_v56 = vpop.f32.mrf.mxu0  ;;  %v8468_v12 = vld [vmem:[%s13285_s2 + $0x28] sm:$0xff] }
 0x1d3   : > { %13383 = vst [vmem:[#allocation18_spill] sm:$0xff] %v9565_v4  ;;  %v9570_v25 = vsel %vm1620_vm12, %v1612_v41, %v1628_v3  ;;  %v8467_v41 = vld [vmem:[%s13285_s2 + $0x20] sm:$0xff] }
 0x1d4   : > { %1649 = vrot.lane.b32.xlu0 %v9540_v33, %s8809_s22  ;;  %v1266_v16 = vadd.f32 %v9522_v6, %v1108_v15  ;;  %13384 = vst [vmem:[#allocation19_spill] sm:$0xff] %v9570_v25  ;;  %v1613_v6 = vadd.f32 %v1602_v31, %v1581_v38  ;;  %v680_v59 = vadd.f32 %v9498_v48, %v521_v47  ;;  %v1574_v7 = vpop.f32.mrf.mxu0 }
 0x1d6   : > { %1917 = vrot.lane.b32.xlu1 %v9534_v28, %s8810_s23  ;;  %v1424_v21 = vadd.f32 %v1410_v51, %v1266_v16  ;;  %v1629_v60 = vmul.f32 0.2, %v1613_v6  ;;  %vm1621_vm13 = vcmp.ge.f32.partialorder %v1613_v6, 0.0  ;;  %v838_v1 = vadd.f32 %v9510_v23, %v680_v59 }
 0x1d8   : > { %1925 = vrot.lane.b32.xlu0 %v9540_v33, %s8810_s23  ;;  %v1582_v20 = vadd.f32 %v1568_v50, %v1424_v21  ;;  %v9590_v5 = vsel %vm1621_vm13, %v1613_v6, %v1629_v60  ;;  %v952_v48 = vadd.f32 %v9512_v26, %v838_v1  ;;  %v1425_v26 = vadd.f32 %v1414_v40, %v1267_v2 }
 0x1d9   : > { %13385 = vst [vmem:[#allocation20_spill] sm:$0xff] %v9590_v5 }
 0x1da   : > { %2063 = vrot.lane.b32.xlu1 %v9534_v28, %s8811_s24  ;;  %v1614_v63 = vadd.f32 %v1602_v31, %v1582_v20  ;;  %v1110_v23 = vadd.f32 %v9524_v10, %v952_v48  ;;  %v1416_v31 = vpop.f32.mrf.mxu1  ;;  %v1583_v22 = vadd.f32 %v1572_v56, %v1425_v26 }
 0x1dc   : > { %2071 = vrot.lane.b32.xlu0 %v9540_v33, %s8811_s24  ;;  %v1630_v45 = vmul.f32 0.2, %v1614_v63  ;;  %vm1622_vm14 = vcmp.ge.f32.partialorder %v1614_v63, 0.0  ;;  %v1268_v61 = vadd.f32 %v9530_v49, %v1110_v23  ;;  %v1615_v10 = vadd.f32 %v9528_v42, %v1583_v22 }
 0x1de   : > { %1680 = vrot.lane.b32.xlu1 %v9565_v4, %s8807_s21  ;;  %v9597_v24 = vsel %vm1622_vm14, %v1614_v63, %v1630_v45  ;;  %v1426_v55 = vadd.f32 %v1416_v31, %v1268_v61  ;;  %v1631_v49 = vmul.f32 0.2, %v1615_v10  ;;  %vm1623_vm15 = vcmp.ge.f32.partialorder %v1615_v10, 0.0 }
 0x1df   : > { %13386 = vst [vmem:[#allocation21_spill] sm:$0xff] %v9597_v24 }
 0x1e0   : > { %1688 = vrot.lane.b32.xlu0 %v9570_v25, %s8807_s21  ;;  %v1584_v32 = vadd.f32 %v1574_v7, %v1426_v55  ;;  %v9622_v43 = vsel %vm1623_vm15, %v1615_v10, %v1631_v49 }
 0x1e1   : > { %13387 = vst [vmem:[#allocation22_spill] sm:$0xff] %v9622_v43 }
 0x1e2   : > { %1643 = vrot.lane.b32.xlu1 %v9565_v4, %s8809_s22  ;;  %v1616_v13 = vadd.f32 %v9528_v42, %v1584_v32 }
 0x1e4   : > { %1651 = vrot.lane.b32.xlu0 %v9570_v25, %s8809_s22  ;;  %v1632_v57 = vmul.f32 0.2, %v1616_v13  ;;  %vm1624_vm9 = vcmp.ge.f32.partialorder %v1616_v13, 0.0 }
 0x1e6   : > { %1919 = vrot.lane.b32.xlu1 %v9565_v4, %s8810_s23  ;;  %v9626_v62 = vsel %vm1624_vm9, %v1616_v13, %v1632_v57  ;;  %v8399_v57 = vld [vmem:[%s13284_s1 + $0x140] sm:$0xff] }
 0x1e7   : > { %13388 = vst [vmem:[#allocation23_spill] sm:$0xff] %v9626_v62 }
 0x1e8   : > { %1927 = vrot.lane.b32.xlu0 %v9570_v25, %s8810_s23 }
 0x1ea   : > { %2065 = vrot.lane.b32.xlu1 %v9565_v4, %s8811_s24 }
 0x1ec   : > { %2073 = vrot.lane.b32.xlu0 %v9570_v25, %s8811_s24 }
 0x1ee   : > { %1682 = vrot.lane.b32.xlu1 %v9590_v5, %s8807_s21 }
 0x1f0   : > { %1690 = vrot.lane.b32.xlu0 %v9597_v24, %s8807_s21 }
 0x1f2   : > { %1645 = vrot.lane.b32.xlu1 %v9590_v5, %s8809_s22 }
 0x1f4   : > { %1653 = vrot.lane.b32.xlu0 %v9597_v24, %s8809_s22 }
 0x1f6   : > { %1921 = vrot.lane.b32.xlu1 %v9590_v5, %s8810_s23 }
 0x1f8   : > { %1929 = vrot.lane.b32.xlu0 %v9597_v24, %s8810_s23 }
 0x1fa   : > { %2067 = vrot.lane.b32.xlu1 %v9590_v5, %s8811_s24 }
 0x1fc   : > { %2075 = vrot.lane.b32.xlu0 %v9597_v24, %s8811_s24 }
 0x1fe   : > { %2327 = vrot.lane.b32.xlu1 %v9590_v5, %s8812_s25 }
 0x200   : > { %2335 = vrot.lane.b32.xlu0 %v9597_v24, %s8812_s25 }
 0x202   : > { %1684 = vrot.lane.b32.xlu1 %v9622_v43, %s8807_s21 }
 0x204   : > { %1692 = vrot.lane.b32.xlu0 %v9626_v62, %s8807_s21 }
 0x206   : > { %2325 = vrot.lane.b32.xlu1 %v9565_v4, %s8812_s25 }
 0x208   : > { %2333 = vrot.lane.b32.xlu0 %v9570_v25, %s8812_s25 }
 0x20a   : > { %1647 = vrot.lane.b32.xlu1 %v9622_v43, %s8809_s22 }
 0x20c   : > { %2481 = vrot.lane.b32.xlu0 %v9597_v24, %s8813_s26 }
 0x20e   : > { %1923 = vrot.lane.b32.xlu1 %v9622_v43, %s8810_s23 }
 0x210   : > { %1655 = vrot.lane.b32.xlu0 %v9626_v62, %s8809_s22 }
 0x212   : > { %2069 = vrot.lane.b32.xlu1 %v9622_v43, %s8811_s24 }
 0x214   : > { %1931 = vrot.lane.b32.xlu0 %v9626_v62, %s8810_s23 }
 0x216   : > { %2329 = vrot.lane.b32.xlu1 %v9622_v43, %s8812_s25 }
 0x218   : > { %2331 = vrot.lane.b32.xlu0 %v9540_v33, %s8812_s25 }
 0x21a   : > { %2475 = vrot.lane.b32.xlu1 %v9622_v43, %s8813_s26 }
 0x21c   : > { %2479 = vrot.lane.b32.xlu0 %v9570_v25, %s8813_s26 }
 0x21e   : > { %2473 = vrot.lane.b32.xlu1 %v9590_v5, %s8813_s26 }
 0x220   : > { %2477 = vrot.lane.b32.xlu0 %v9540_v33, %s8813_s26 }
 0x222   : > { %2323 = vrot.lane.b32.xlu1 %v9534_v28, %s8812_s25 }
 0x224   : > { %2077 = vrot.lane.b32.xlu0 %v9626_v62, %s8811_s24 }
 0x226   : > { %2471 = vrot.lane.b32.xlu1 %v9565_v4, %s8813_s26 }
 0x228   : > { %2627 = vrot.lane.b32.xlu0 %v9597_v24, %s8814_s27 }
 0x22a   : > { %2469 = vrot.lane.b32.xlu1 %v9534_v28, %s8813_s26 }
 0x22c   : > { %2625 = vrot.lane.b32.xlu0 %v9570_v25, %s8814_s27 }
 0x22e   : > { %2621 = vrot.lane.b32.xlu1 %v9622_v43, %s8814_s27 }
 0x230   : > { %2337 = vrot.lane.b32.xlu0 %v9626_v62, %s8812_s25 }
 0x232   : > { %2619 = vrot.lane.b32.xlu1 %v9590_v5, %s8814_s27 }
 0x234   : > { %2483 = vrot.lane.b32.xlu0 %v9626_v62, %s8813_s26 }
 0x236   : > { %2767 = vrot.lane.b32.xlu1 %v9622_v43, %s8815_s28 }
 0x238   : > { %2773 = vrot.lane.b32.xlu0 %v9597_v24, %s8815_s28 }
 0x23a   : > { %2617 = vrot.lane.b32.xlu1 %v9565_v4, %s8814_s27 }
 0x23c   : > { %2623 = vrot.lane.b32.xlu0 %v9540_v33, %s8814_s27 }
 0x23e   : > { %2765 = vrot.lane.b32.xlu1 %v9590_v5, %s8815_s28 }
 0x240   : > { %2629 = vrot.lane.b32.xlu0 %v9626_v62, %s8814_s27  ;;  %v1679_v42 = vpop.permute.xlu1 %1678 }
 0x242   : > { %v1687_v39 = vpop.permute.xlu0 %1686  ;;  %2615 = vrot.lane.b32.xlu1 %v9534_v28, %s8814_s27 }
 0x243   : > { %v1694_v61 = vsel %vm287_vm0, %v1679_v42, %v1687_v39  ;;  %v1698_v7 = vsel %vm287_vm0, %v1687_v39, %v1679_v42 }
 0x244   : > { %2775 = vrot.lane.b32.xlu0 %v9626_v62, %s8815_s28  ;;  %v9694_v0 = vpop.permute.xlu1 %1641  ;;  %v1703_v13 = vmul.f32 %v1694_v61, %v9007_v17  ;;  %v1702_v49 = vmul.f32 %v1698_v7, %v9010_v18  ;;  %v13393_v7 = vld [vmem:[#allocation5_spill] sm:$0xff] }
 0x246   : > { %v9696_v8 = vpop.permute.xlu0 %1649  ;;  %2763 = vrot.lane.b32.xlu1 %v9565_v4, %s8815_s28 }
 0x248   : > { %2771 = vrot.lane.b32.xlu0 %v9570_v25, %s8815_s28  ;;  %v9702_v35 = vpop.permute.xlu1 %1917 }
 0x24a   : > { %v9704_v46 = vpop.permute.xlu0 %1925  ;;  %2761 = vrot.lane.b32.xlu1 %v9534_v28, %s8815_s28 }
 0x24c   : > { %2769 = vrot.lane.b32.xlu0 %v9540_v33, %s8815_s28  ;;  %v9713_v34 = vpop.permute.xlu1 %2063 }
 0x24e   : > { %v9718_v53 = vpop.permute.xlu0 %2071  ;;  %2929 = vperm.xlu1 %8798, %v8470_v27  }
 0x250   : > { %2924 = vperm.xlu0 %8797, %v8469_v52   ;;  %v1681_v37 = vpop.permute.xlu1 %1680 }
 0x252   : > { %v1689_v36 = vpop.permute.xlu0 %1688  ;;  %2919 = vperm.xlu1 %8798, %v8468_v12  }
 0x253   : > { %v1695_v56 = vsel %vm287_vm0, %v1681_v37, %v1689_v36  ;;  %v1699_v23 = vsel %vm287_vm0, %v1689_v36, %v1681_v37  ;;  %v13389_v37 = vmov 0.0  }
 0x254   : > { %2914 = vperm.xlu0 %8797, %v8467_v41   ;;  %v1644_v19 = vpop.permute.xlu1 %1643  ;;  %v1705_v22 = vmul.f32 %v1695_v56, %v9007_v17  ;;  %v1704_v32 = vmul.f32 %v1699_v23, %v9010_v18  ;;  %v8400_v41 = vld [vmem:[%s13284_s1 + $0x148] sm:$0xff]  ;;  %v13392_v23 = vld [vmem:[#allocation4_spill] sm:$0xff] }
 0x256   : > { %v1652_v44 = vpop.permute.xlu0 %1651 }
 0x258   : > { %v9726_v9 = vpop.permute.xlu1 %1919 }
 0x25a   : > { %v9728_v29 = vpop.permute.xlu0 %1927 }
 0x25c   : > { %v9730_v3 = vpop.permute.xlu1 %2065 }
 0x25e   : > { %v9732_v30 = vpop.permute.xlu0 %2073 }
 0x260   : > { %v1683_v15 = vpop.permute.xlu1 %1682 }
 0x262   : > { %v1691_v14 = vpop.permute.xlu0 %1690 }
 0x263   : > { %v1696_v63 = vsel %vm287_vm0, %v1683_v15, %v1691_v14  ;;  %v1700_v45 = vsel %vm287_vm0, %v1691_v14, %v1683_v15  ;;  %v13390_v15 = vld [vmem:[#allocation3_spill] sm:$0xff] }
 0x264   : > { %v1646_v51 = vpop.permute.xlu1 %1645  ;;  %v1707_v31 = vmul.f32 %v1696_v63, %v9007_v17  ;;  %v1706_v26 = vmul.f32 %v1700_v45, %v9010_v18  ;;  %v1662_v45 = vsel %vm239_vm1, %v1652_v44, %v1644_v19 }
 0x266   : > { %v1654_v16 = vpop.permute.xlu0 %1653 }
 0x267   : > { %v1659_v27 = vsel %vm239_vm1, %v1646_v51, %v1654_v16  ;;  %v1663_v36 = vsel %vm239_vm1, %v1654_v16, %v1646_v51 }
 0x268   : > { %v9734_v58 = vpop.permute.xlu1 %1921  ;;  %v1669_v16 = vmul.f32 %v1663_v36, %v13390_v15 }
 0x26a   : > { %v9736_v50 = vpop.permute.xlu0 %1929 }
 0x26c   : > { %v9738_v21 = vpop.permute.xlu1 %2067 }
 0x26e   : > { %v9740_v38 = vpop.permute.xlu0 %2075 }
 0x270   : > { %v9742_v47 = vpop.permute.xlu1 %2327 }
 0x272   : > { %v9744_v20 = vpop.permute.xlu0 %2335 }
 0x274   : > { %v1685_v6 = vpop.permute.xlu1 %1684 }
 0x276   : > { %v1693_v59 = vpop.permute.xlu0 %1692 }
 0x277   : > { %v1697_v60 = vsel %vm287_vm0, %v1685_v6, %v1693_v59  ;;  %v1701_v1 = vsel %vm287_vm0, %v1693_v59, %v1685_v6  ;;  %v13391_v59 = vld [vmem:[#allocation2_spill] sm:$0xff] }
 0x278   : > { %v1708_v40 = vmul.f32 %v1701_v1, %v9010_v18  ;;  %v9755_v48 = vpop.permute.xlu1 %2325  ;;  %v1709_v54 = vmul.f32 %v1697_v60, %v9007_v17  ;;  %v1658_v60 = vsel %vm239_vm1, %v1644_v19, %v1652_v44  ;;  %v1657_v1 = vsel %vm239_vm1, %v9694_v0, %v9696_v8  ;;  %v8401_v19 = vld [vmem:[%s13284_s1 + $0x150] sm:$0xff] }
 0x279   : > { %v1670_v51 = vmul.f32 %v1659_v27, %v13391_v59  ;;  %v1935_v44 = vsel %vm539_vm3, %v9734_v58, %v9736_v50  ;;  %v8402_v27 = vld [vmem:[%s13284_s1 + $0x158] sm:$0xff] }
 0x27a   : > { %v9762_v2 = vpop.permute.xlu0 %2333  ;;  %1751 = vmatprep.subr.mxu1 %v1709_v54 }
 0x27b   : > { %1752 = vmatpush1.msra.mxu1 %v1708_v40 }
 0x27c   : > { %1753 = vmatprep.subr.mxu1 %v1707_v31  ;;  %v1648_v55 = vpop.permute.xlu1 %1647 }
 0x27d   : > { %1754 = vmatpush1.msra.mxu1 %v1706_v26  ;;  %v1668_v26 = vmul.f32 %v1658_v60, %v13391_v59  ;;  %v8411_v60 = vld [vmem:[%s13284_s1 + $0x160] sm:$0xff] }
 0x27e   : > { %v9772_v10 = vpop.permute.xlu0 %2481  ;;  %1755 = vmatprep.subr.mxu1 %v1705_v22  ;;  %v1661_v22 = vsel %vm239_vm1, %v9696_v8, %v9694_v0  ;;  %v1934_v0 = vsel %vm539_vm3, %v9726_v9, %v9728_v29  ;;  %v1946_v8 = vmul.f32 %v1935_v44, %v13393_v7  ;;  %v8398_v44 = vld [vmem:[%s13284_s1 + $0x138] sm:$0xff] }
 0x27f   : > { %1756 = vmatpush1.msra.mxu1 %v1704_v32  ;;  %v1667_v32 = vmul.f32 %v1662_v45, %v13390_v15 }
 0x280   : > { %1757 = vmatprep.subr.mxu1 %v1703_v13  ;;  %v1924_v42 = vpop.permute.xlu1 %1923  ;;  %v1939_v13 = vsel %vm539_vm3, %v9736_v50, %v9734_v58  ;;  %v1938_v58 = vsel %vm539_vm3, %v9728_v29, %v9726_v9  ;;  %v1937_v9 = vsel %vm539_vm3, %v9704_v46, %v9702_v35 }
 0x281   : > { %1758 = vmatpush1.msra.mxu1 %v1702_v49  ;;  %v1945_v50 = vmul.f32 %v1939_v13, %v13392_v23  ;;  %v1943_v36 = vmul.f32 %v1938_v58, %v13392_v23  ;;  %v2085_v13 = vsel %vm697_vm4, %v9740_v38, %v9738_v21 }
 0x282   : > { %v1656_v39 = vpop.permute.xlu0 %1655  ;;  %8403 = vmatmul.mubr.msk.f32.vlgmr.msra.gmra.mxu1 %vm320_vm2, %v8399_v57  ;;  %v1666_v57 = vmul.f32 %v1657_v1, %v13391_v59 }
 0x283   : > { %v1660_v52 = vsel %vm239_vm1, %v1648_v55, %v1656_v39  ;;  %v1664_v12 = vsel %vm239_vm1, %v1656_v39, %v1648_v55  ;;  %1797 = vmatprep.mubr.f32.mxu1 %v13389_v37 }
 0x284   : > { %v1671_v14 = vmul.f32 %v1664_v12, %v13390_v15  ;;  %v9793_v6 = vpop.permute.xlu1 %2069  ;;  %v1672_v63 = vmul.f32 %v1660_v52, %v13391_v59  ;;  %v8395_v52 = vld [vmem:[%s13284_s1 + $0x120] sm:$0xff]  ;;  %v1933_v12 = vsel %vm539_vm3, %v9702_v35, %v9704_v46  ;;  %v8396_v35 = vld [vmem:[%s13284_s1 + $0x128] sm:$0xff]  ;;  %v1941_v46 = vmul.f32 %v1937_v9, %v13392_v23 }
 0x286   : > { %v1932_v40 = vpop.permute.xlu0 %1931  ;;  %8404 = vmatmul.mubr.msk.f32.gmra.mxu1 %vm320_vm2, %v8400_v41  ;;  %1852 = vmatprep.subr.mxu0 %v1672_v63  ;;  %v1944_v41 = vmul.f32 %v1934_v0, %v13393_v7  ;;  %v2080_v0 = vsel %vm697_vm4, %v9730_v3, %v9732_v30 }
 0x287   : > { %v1936_v54 = vsel %vm539_vm3, %v1924_v42, %v1932_v40  ;;  %v1940_v56 = vsel %vm539_vm3, %v1932_v40, %v1924_v42  ;;  %1853 = vmatpush1.msra.mxu0 %v1671_v14  ;;  %1803 = vmatprep.mubr.f32.mxu1 %v13389_v37  ;;  %v1665_v42 = vmul.f32 %v1661_v22, %v13390_v15  ;;  %v8397_v40 = vld [vmem:[%s13284_s1 + $0x130] sm:$0xff] }
 0x288   : > { %v1947_v31 = vmul.f32 %v1940_v56, %v13392_v23  ;;  %1854 = vmatprep.subr.mxu0 %v1670_v51  ;;  %v9820_v61 = vpop.permute.xlu1 %2329  ;;  %v1948_v55 = vmul.f32 %v1936_v54, %v13393_v7  ;;  %v1942_v14 = vmul.f32 %v1933_v12, %v13393_v7  ;;  %v8412_v51 = vld [vmem:[%s13284_s1 + $0x168] sm:$0xff] }
 0x289   : > { %1855 = vmatpush1.msra.mxu0 %v1669_v16 }
 0x28a   : > { %v9833_v49 = vpop.permute.xlu0 %2331  ;;  %8405 = vmatmul.mubr.msk.f32.gmra.mxu1 %vm320_vm2, %v8401_v19  ;;  %1856 = vmatprep.subr.mxu0 %v1668_v26 }
 0x28b   : > { %1990 = vmatprep.subr.mxu1 %v1948_v55  ;;  %1857 = vmatpush1.msra.mxu0 %v1667_v32  ;;  %v2081_v55 = vsel %vm697_vm4, %v9738_v21, %v9740_v38  ;;  %v8413_v32 = vld [vmem:[%s13284_s1 + $0x170] sm:$0xff]  ;;  %v2084_v21 = vsel %vm697_vm4, %v9732_v30, %v9730_v3  ;;  %v8414_v3 = vld [vmem:[%s13284_s1 + $0x178] sm:$0xff]  ;;  %v2083_v30 = vsel %vm697_vm4, %v9718_v53, %v9713_v34 }
 0x28c   : > { %1991 = vmatpush1.msra.mxu1 %v1947_v31  ;;  %1858 = vmatprep.subr.mxu0 %v1666_v57  ;;  %v9848_v39 = vpop.permute.xlu1 %2475  ;;  %v13394_v31 = vld [vmem:[#allocation7_spill] sm:$0xff] }
 0x28d   : > { %1992 = vmatprep.subr.mxu1 %v1946_v8  ;;  %1809 = vmatprep.mubr.f32.mxu1 %v13389_v37  ;;  %v2092_v38 = vmul.f32 %v2081_v55, %v13394_v31 }
 0x28e   : > { %1859 = vmatpush1.msra.mxu0 %v1665_v42  ;;  %1993 = vmatpush1.msra.mxu1 %v1945_v50  ;;  %v9865_v29 = vpop.permute.xlu0 %2479  ;;  %v2079_v42 = vsel %vm697_vm4, %v9713_v34, %v9718_v53  ;;  %v8419_v34 = vld [vmem:[%s13284_s1 + $0x180] sm:$0xff] }
 0x28f   : > { %8406 = vmatmul.mubr.msk.f32.gmra.mxu1 %vm320_vm2, %v8402_v27  ;;  %8407 = vmatmul.mubr.msk.f32.vlgmr.msra.gmra.mxu0 %vm320_vm2, %v8395_v52  ;;  %v2090_v27 = vmul.f32 %v2080_v0, %v13394_v31  ;;  %v2088_v12 = vmul.f32 %v2079_v42, %v13394_v31  ;;  %v8427_v53 = vld [vmem:[%s13284_s1 + $0x1a0] sm:$0xff] }
 0x290   : > { %1994 = vmatprep.subr.mxu1 %v1944_v41  ;;  %v9872_v63 = vpop.permute.xlu1 %2473  ;;  %1898 = vmatprep.mubr.f32.mxu0 %v13389_v37 }
 0x291   : > { %1995 = vmatpush1.msra.mxu1 %v1943_v36  ;;  %2030 = vmatprep.mubr.f32.mxu1 %v13389_v37 }
 0x292   : > { %1996 = vmatprep.subr.mxu1 %v1942_v14  ;;  %v9883_v1 = vpop.permute.xlu0 %2477  ;;  %v2341_v14 = vsel %vm969_vm5, %v9742_v47, %v9744_v20 }
 0x293   : > { %1997 = vmatpush1.msra.mxu1 %v1941_v46  ;;  %8408 = vmatmul.mubr.msk.f32.gmra.mxu0 %vm320_vm2, %v8396_v35 }
 0x294   : > { %8415 = vmatmul.mubr.msk.f32.vlgmr.msra.gmra.mxu1 %vm320_vm2, %v8411_v60  ;;  %2250 = vmatprep.subr.mxu1 %v9626_v62  ;;  %v9888_v45 = vpop.permute.xlu1 %2323  ;;  %v2345_v60 = vsel %vm969_vm5, %v9744_v20, %v9742_v47  ;;  %v8420_v47 = vld [vmem:[%s13284_s1 + $0x188] sm:$0xff] }
 0x295   : > { %2251 = vmatpush1.msra.mxu1 %v9622_v43  ;;  %1904 = vmatprep.mubr.f32.mxu0 %v13389_v37  ;;  %v8428_v20 = vld [vmem:[%s13284_s1 + $0x1a8] sm:$0xff] }
 0x296   : > { %2252 = vmatprep.subr.mxu1 %v9597_v24  ;;  %2036 = vmatprep.mubr.f32.mxu1 %v13389_v37  ;;  %v2078_v16 = vpop.permute.xlu0 %2077 }
 0x297   : > { %2253 = vmatpush1.msra.mxu1 %v9590_v5  ;;  %v2082_v54 = vsel %vm697_vm4, %v9793_v6, %v2078_v16  ;;  %v2086_v56 = vsel %vm697_vm4, %v2078_v16, %v9793_v6  ;;  %8409 = vmatmul.mubr.msk.f32.gmra.mxu0 %vm320_vm2, %v8397_v40  ;;  %v13395_v6 = vld [vmem:[#allocation6_spill] sm:$0xff]  ;;  %v13396_v40 = vld [vmem:[#allocation8_spill] sm:$0xff] }
 0x298   : > { %8416 = vmatmul.mubr.msk.f32.gmra.mxu1 %vm320_vm2, %v8412_v51  ;;  %2254 = vmatprep.subr.mxu1 %v9570_v25  ;;  %v9910_v19 = vpop.permute.xlu1 %2471  ;;  %v2094_v26 = vmul.f32 %v2082_v54, %v13394_v31  ;;  %v2093_v22 = vmul.f32 %v2086_v56, %v13395_v6  ;;  %v2091_v58 = vmul.f32 %v2085_v13, %v13395_v6  ;;  %v13397_v54 = vld [vmem:[#allocation9_spill] sm:$0xff] }
 0x299   : > { %2255 = vmatpush1.msra.mxu1 %v9565_v4  ;;  %1910 = vmatprep.mubr.f32.mxu0 %v13389_v37  ;;  %v2089_v52 = vmul.f32 %v2084_v21, %v13395_v6  ;;  %v2087_v41 = vmul.f32 %v2083_v30, %v13395_v6  ;;  %v2340_v13 = vsel %vm969_vm5, %v9755_v48, %v9762_v2  ;;  %v8429_v30 = vld [vmem:[%s13284_s1 + $0x1b0] sm:$0xff] }
 0x29a   : > { %2256 = vmatprep.subr.mxu1 %v9540_v33  ;;  %2042 = vmatprep.mubr.f32.mxu1 %v13389_v37  ;;  %v9932_v57 = vpop.permute.xlu0 %2627 }
 0x29b   : > { %2257 = vmatpush1.msra.mxu1 %v9534_v28  ;;  %8410 = vmatmul.mubr.msk.f32.gmra.mxu0 %vm320_vm2, %v8398_v44 }
 0x29c   : > { %8417 = vmatmul.mubr.msk.f32.gmra.mxu1 %vm320_vm2, %v8413_v32  ;;  %2136 = vmatprep.subr.mxu0 %v2094_v26  ;;  %v9946_v8 = vpop.permute.xlu1 %2469  ;;  %v2351_v26 = vmul.f32 %v2341_v14, %v13396_v40  ;;  %v2352_v32 = vmul.f32 %v2345_v60, %v13397_v54 }
 0x29d   : > { %2137 = vmatpush1.msra.mxu0 %v2093_v22  ;;  %2048 = vmatprep.mubr.f32.mxu1 %v13389_v37  ;;  %v2485_v60 = vsel %vm1127_vm6, %v9946_v8, %v9883_v1 }
 0x29e   : > { %2138 = vmatprep.subr.mxu0 %v2092_v38  ;;  %v9961_v50 = vpop.permute.xlu0 %2625  ;;  %2176 = vmatprep.mubr.f32.mxu0 %v13389_v37  ;;  %v13398_v38 = vld [vmem:[#allocation11_spill] sm:$0xff] }
 0x29f   : > { %2139 = vmatpush1.msra.mxu0 %v2091_v58 }
 0x2a0   : > { %8418 = vmatmul.mubr.msk.f32.gmra.mxu1 %vm320_vm2, %v8414_v3  ;;  %2140 = vmatprep.subr.mxu0 %v2090_v27  ;;  %v9968_v9 = vpop.permute.xlu1 %2621  ;;  %v8421_v3 = vld [vmem:[%s13284_s1 + $0x190] sm:$0xff] }
 0x2a1   : > { %2141 = vmatpush1.msra.mxu0 %v2089_v52  ;;  %2290 = vmatprep.mubr.f32.mxu1 %v13389_v37  ;;  %v2349_v52 = vmul.f32 %v2340_v13, %v13396_v40 }
 0x2a2   : > { %2142 = vmatprep.subr.mxu0 %v2088_v12  ;;  %v2338_v36 = vpop.permute.xlu0 %2337  ;;  %v2487_v12 = vsel %vm1127_vm6, %v9872_v63, %v9772_v10 }
 0x2a3   : > { %2143 = vmatpush1.msra.mxu0 %v2087_v41  ;;  %v2342_v35 = vsel %vm969_vm5, %v9820_v61, %v2338_v36  ;;  %v2346_v46 = vsel %vm969_vm5, %v2338_v36, %v9820_v61  ;;  %v2344_v61 = vsel %vm969_vm5, %v9762_v2, %v9755_v48  ;;  %v2343_v48 = vsel %vm969_vm5, %v9833_v49, %v9888_v45  ;;  %v13399_v2 = vld [vmem:[#allocation10_spill] sm:$0xff] }
 0x2a4   : > { %v2353_v51 = vmul.f32 %v2342_v35, %v13396_v40  ;;  %8423 = vmatmul.mubr.msk.f32.vlgmr.msra.gmra.mxu0 %vm320_vm2, %v8419_v34  ;;  %8431 = vmatmul.mubr.msk.f32.vlgmr.msra.gmra.mxu1 %vm320_vm2, %v8427_v53  ;;  %v9995_v16 = vpop.permute.xlu1 %2619  ;;  %v2354_v56 = vmul.f32 %v2346_v46, %v13397_v54  ;;  %v2350_v21 = vmul.f32 %v2344_v61, %v13397_v54  ;;  %v8422_v35 = vld [vmem:[%s13284_s1 + $0x198] sm:$0xff] }
 0x2a5   : > { %2182 = vmatprep.mubr.f32.mxu0 %v13389_v37  ;;  %2296 = vmatprep.mubr.f32.mxu1 %v13389_v37  ;;  %v2339_v41 = vsel %vm969_vm5, %v9888_v45, %v9833_v49  ;;  %v2348_v34 = vmul.f32 %v2343_v48, %v13397_v54  ;;  %v2497_v49 = vmul.f32 %v2487_v12, %v13399_v2  ;;  %v8430_v46 = vld [vmem:[%s13284_s1 + $0x1b8] sm:$0xff]  ;;  %v8436_v48 = vld [vmem:[%s13284_s1 + $0x1c8] sm:$0xff] }
 0x2a6   : > { %v2484_v44 = vpop.permute.xlu0 %2483  ;;  %2396 = vmatprep.subr.mxu0 %v2354_v56  ;;  %v2486_v45 = vsel %vm1127_vm6, %v9910_v19, %v9865_v29  ;;  %v2493_v61 = vmul.f32 %v2485_v60, %v13399_v2  ;;  %v13402_v12 = vld [vmem:[#allocation15_spill] sm:$0xff]  ;;  %v8445_v60 = vld [vmem:[%s13284_s1 + $0x1f0] sm:$0xff] }
 0x2a7   : > { %v2488_v55 = vsel %vm1127_vm6, %v9848_v39, %v2484_v44  ;;  %v2492_v22 = vsel %vm1127_vm6, %v2484_v44, %v9848_v39  ;;  %2397 = vmatpush1.msra.mxu0 %v2353_v51  ;;  %v2491_v39 = vsel %vm1127_vm6, %v9772_v10, %v9872_v63  ;;  %v2490_v10 = vsel %vm1127_vm6, %v9865_v29, %v9910_v19 }
 0x2a8   : > { %8424 = vmatmul.mubr.msk.f32.gmra.mxu0 %vm320_vm2, %v8420_v47  ;;  %8432 = vmatmul.mubr.msk.f32.gmra.mxu1 %vm320_vm2, %v8428_v20  ;;  %v10024_v0 = vpop.permute.xlu1 %2767  ;;  %v2500_v42 = vmul.f32 %v2492_v22, %v13398_v38  ;;  %v2499_v58 = vmul.f32 %v2488_v55, %v13399_v2  ;;  %v2498_v53 = vmul.f32 %v2491_v39, %v13398_v38  ;;  %v8435_v47 = vld [vmem:[%s13284_s1 + $0x1c0] sm:$0xff]  ;;  %v13400_v22 = vld [vmem:[#allocation12_spill] sm:$0xff] }
 0x2a9   : > { %2398 = vmatprep.subr.mxu0 %v2352_v32  ;;  %2188 = vmatprep.mubr.f32.mxu0 %v13389_v37  ;;  %v2347_v63 = vmul.f32 %v2339_v41, %v13396_v40  ;;  %v2489_v29 = vsel %vm1127_vm6, %v9883_v1, %v9946_v8  ;;  %v2496_v19 = vmul.f32 %v2490_v10, %v13398_v38  ;;  %v8443_v55 = vld [vmem:[%s13284_s1 + $0x1e0] sm:$0xff] }
 0x2aa   : > { %2302 = vmatprep.mubr.f32.mxu1 %v13389_v37  ;;  %2399 = vmatpush1.msra.mxu0 %v2351_v26  ;;  %v10045_v27 = vpop.permute.xlu0 %2773  ;;  %v2495_v56 = vmul.f32 %v2486_v45, %v13399_v2  ;;  %v2494_v1 = vmul.f32 %v2489_v29, %v13398_v38  ;;  %v2637_v20 = vsel %vm1285_vm7, %v9932_v57, %v9995_v16  ;;  %v13403_v10 = vld [vmem:[#allocation14_spill] sm:$0xff] }
 0x2ab   : > { %2400 = vmatprep.subr.mxu0 %v2350_v21  ;;  %2542 = vmatprep.subr.mxu1 %v2500_v42  ;;  %v13401_v21 = vld [vmem:[#allocation13_spill] sm:$0xff]  ;;  %v2633_v39 = vsel %vm1285_vm7, %v9995_v16, %v9932_v57 }
 0x2ac   : > { %8425 = vmatmul.mubr.msk.f32.gmra.mxu0 %vm320_vm2, %v8421_v3  ;;  %8433 = vmatmul.mubr.msk.f32.gmra.mxu1 %vm320_vm2, %v8429_v30  ;;  %v2618_v36 = vpop.permute.xlu1 %2617  ;;  %v8444_v30 = vld [vmem:[%s13284_s1 + $0x1e8] sm:$0xff] }
 0x2ad   : > { %2401 = vmatpush1.msra.mxu0 %v2349_v52  ;;  %2543 = vmatpush1.msra.mxu1 %v2499_v58  ;;  %v2644_v58 = vmul.f32 %v2637_v20, %v13401_v21  ;;  %v2636_v3 = vsel %vm1285_vm7, %v9961_v50, %v2618_v36 }
 0x2ae   : > { %2402 = vmatprep.subr.mxu0 %v2348_v34  ;;  %2544 = vmatprep.subr.mxu1 %v2498_v53  ;;  %v2624_v14 = vpop.permute.xlu0 %2623  ;;  %v2643_v34 = vmul.f32 %v2633_v39, %v13400_v22  ;;  %v2632_v53 = vsel %vm1285_vm7, %v2618_v36, %v9961_v50  ;;  %v8437_v50 = vld [vmem:[%s13284_s1 + $0x1d0] sm:$0xff]  ;;  %v2642_v36 = vmul.f32 %v2636_v3, %v13401_v21  ;;  %v8451_v39 = vld [vmem:[%s13284_s1 + $0x200] sm:$0xff] }
 0x2af   : > { %2194 = vmatprep.mubr.f32.mxu0 %v13389_v37  ;;  %2308 = vmatprep.mubr.f32.mxu1 %v13389_v37  ;;  %v2641_v29 = vmul.f32 %v2632_v53, %v13400_v22  ;;  %v8453_v3 = vld [vmem:[%s13284_s1 + $0x210] sm:$0xff] }
 0x2b0   : > { %2403 = vmatpush1.msra.mxu0 %v2347_v63  ;;  %2545 = vmatpush1.msra.mxu1 %v2497_v49  ;;  %v2766_v51 = vpop.permute.xlu1 %2765 }
 0x2b1   : > { %8426 = vmatmul.mubr.msk.f32.gmra.mxu0 %vm320_vm2, %v8422_v35  ;;  %8434 = vmatmul.mubr.msk.f32.gmra.mxu1 %vm320_vm2, %v8430_v46  ;;  %v2779_v35 = vsel %vm1443_vm8, %v2766_v51, %v10045_v27 }
 0x2b2   : > { %2546 = vmatprep.subr.mxu1 %v2496_v19  ;;  %2436 = vmatprep.mubr.f32.mxu0 %v13389_v37  ;;  %v2630_v8 = vpop.permute.xlu0 %2629 }
 0x2b3   : > { %2547 = vmatpush1.msra.mxu1 %v2495_v56  ;;  %2582 = vmatprep.mubr.f32.mxu1 %v13389_v37  ;;  %v2634_v44 = vsel %vm1285_vm7, %v9968_v9, %v2630_v8  ;;  %v2638_v26 = vsel %vm1285_vm7, %v2630_v8, %v9968_v9  ;;  %v2789_v56 = vmul.f32 %v2779_v35, %v13403_v10 }
 0x2b4   : > { %2548 = vmatprep.subr.mxu1 %v2494_v1  ;;  %v2645_v32 = vmul.f32 %v2634_v44, %v13400_v22  ;;  %v2616_v13 = vpop.permute.xlu1 %2615  ;;  %v2646_v42 = vmul.f32 %v2638_v26, %v13401_v21  ;;  %v8438_v44 = vld [vmem:[%s13284_s1 + $0x1d8] sm:$0xff] }
 0x2b5   : > { %2549 = vmatpush1.msra.mxu1 %v2493_v61  ;;  %8439 = vmatmul.mubr.msk.f32.vlgmr.msra.gmra.mxu0 %vm320_vm2, %v8435_v47  ;;  %v2635_v63 = vsel %vm1285_vm7, %v2624_v14, %v2616_v13  ;;  %v2631_v46 = vsel %vm1285_vm7, %v2616_v13, %v2624_v14  ;;  %v8446_v26 = vld [vmem:[%s13284_s1 + $0x1f8] sm:$0xff] }
 0x2b6   : > { %8447 = vmatmul.mubr.msk.f32.vlgmr.msra.gmra.mxu1 %vm320_vm2, %v8443_v55  ;;  %2442 = vmatprep.mubr.f32.mxu0 %v13389_v37  ;;  %v2776_v9 = vpop.permute.xlu0 %2775  ;;  %v2640_v14 = vmul.f32 %v2635_v63, %v13401_v21  ;;  %v2639_v61 = vmul.f32 %v2631_v46, %v13400_v22 }
 0x2b7   : > { %2588 = vmatprep.mubr.f32.mxu1 %v13389_v37  ;;  %v2780_v57 = vsel %vm1443_vm8, %v10024_v0, %v2776_v9  ;;  %v2784_v16 = vsel %vm1443_vm8, %v2776_v9, %v10024_v0  ;;  %2688 = vmatprep.subr.mxu0 %v2646_v42  ;;  %v2783_v0 = vsel %vm1443_vm8, %v10045_v27, %v2766_v51  ;;  %v8459_v9 = vld [vmem:[%s13284_s1 + $0x220] sm:$0xff] }
 0x2b8   : > { %2689 = vmatpush1.msra.mxu0 %v2645_v32  ;;  %v2764_v52 = vpop.permute.xlu1 %2763  ;;  %v2792_v41 = vmul.f32 %v2784_v16, %v13402_v12  ;;  %v2791_v49 = vmul.f32 %v2780_v57, %v13403_v10  ;;  %v2790_v51 = vmul.f32 %v2783_v0, %v13402_v12  ;;  %v8461_v57 = vld [vmem:[%s13284_s1 + $0x230] sm:$0xff]  ;;  %v8454_v16 = vld [vmem:[%s13284_s1 + $0x218] sm:$0xff] }
 0x2b9   : > { %8440 = vmatmul.mubr.msk.f32.gmra.mxu0 %vm320_vm2, %v8436_v48  ;;  %2690 = vmatprep.subr.mxu0 %v2644_v58  ;;  %v8452_v48 = vld [vmem:[%s13284_s1 + $0x208] sm:$0xff] }
 0x2ba   : > { %8448 = vmatmul.mubr.msk.f32.gmra.mxu1 %vm320_vm2, %v8444_v30  ;;  %2448 = vmatprep.mubr.f32.mxu0 %v13389_v37  ;;  %v2772_v45 = vpop.permute.xlu0 %2771  ;;  %v8460_v58 = vld [vmem:[%s13284_s1 + $0x228] sm:$0xff]  ;;  %v8462_v30 = vld [vmem:[%s13284_s1 + $0x238] sm:$0xff] }
 0x2bb   : > { %2594 = vmatprep.mubr.f32.mxu1 %v13389_v37  ;;  %2691 = vmatpush1.msra.mxu0 %v2643_v34  ;;  %v2782_v19 = vsel %vm1443_vm8, %v2772_v45, %v2764_v52  ;;  %v2778_v27 = vsel %vm1443_vm8, %v2764_v52, %v2772_v45 }
 0x2bc   : > { %2692 = vmatprep.subr.mxu0 %v2642_v36  ;;  %2834 = vmatprep.subr.mxu1 %v2792_v41  ;;  %v2762_v1 = vpop.permute.xlu1 %2761  ;;  %v2788_v55 = vmul.f32 %v2782_v19, %v13402_v12  ;;  %v2787_v32 = vmul.f32 %v2778_v27, %v13403_v10 }
 0x2bd   : > { %8441 = vmatmul.mubr.msk.f32.gmra.mxu0 %vm320_vm2, %v8437_v50  ;;  %2835 = vmatpush1.msra.mxu1 %v2791_v49 }
 0x2be   : > { %8449 = vmatmul.mubr.msk.f32.gmra.mxu1 %vm320_vm2, %v8445_v60  ;;  %2693 = vmatpush1.msra.mxu0 %v2641_v29  ;;  %v2770_v8 = vpop.permute.xlu0 %2769 }
 0x2bf   : > { %2694 = vmatprep.subr.mxu0 %v2640_v14  ;;  %2836 = vmatprep.subr.mxu1 %v2790_v51  ;;  %v2777_v47 = vsel %vm1443_vm8, %v2762_v1, %v2770_v8  ;;  %v2781_v20 = vsel %vm1443_vm8, %v2770_v8, %v2762_v1 }
 0x2c0   : > { %2454 = vmatprep.mubr.f32.mxu0 %v13389_v37  ;;  %2600 = vmatprep.mubr.f32.mxu1 %v13389_v37  ;;  %v2786_v13 = vmul.f32 %v2781_v20, %v13402_v12  ;;  %v2785_v42 = vmul.f32 %v2777_v47, %v13403_v10 }
 0x2c1   : > { %2695 = vmatpush1.msra.mxu0 %v2639_v61  ;;  %2837 = vmatpush1.msra.mxu1 %v2789_v56 }
 0x2c2   : > { %8442 = vmatmul.mubr.msk.f32.gmra.mxu0 %vm320_vm2, %v8438_v44  ;;  %8450 = vmatmul.mubr.msk.f32.gmra.mxu1 %vm320_vm2, %v8446_v26 }
 0x2c3   : > { %2838 = vmatprep.subr.mxu1 %v2788_v55  ;;  %2728 = vmatprep.mubr.f32.mxu0 %v13389_v37 }
 0x2c4   : > { %2839 = vmatpush1.msra.mxu1 %v2787_v32  ;;  %2874 = vmatprep.mubr.f32.mxu1 %v13389_v37 }
 0x2c5   : > { %2840 = vmatprep.subr.mxu1 %v2786_v13 }
 0x2c6   : > { %8455 = vmatmul.mubr.msk.f32.vlgmr.msra.gmra.mxu0 %vm320_vm2, %v8451_v39  ;;  %2841 = vmatpush1.msra.mxu1 %v2785_v42 }
 0x2c7   : > { %8463 = vmatmul.mubr.msk.f32.vlgmr.msra.gmra.mxu1 %vm320_vm2, %v8459_v9  ;;  %2734 = vmatprep.mubr.f32.mxu0 %v13389_v37 }
 0x2c8   : > { %2880 = vmatprep.mubr.f32.mxu1 %v13389_v37 }
 0x2ca   : > { %8456 = vmatmul.mubr.msk.f32.gmra.mxu0 %vm320_vm2, %v8452_v48 }
 0x2cb   : > { %8464 = vmatmul.mubr.msk.f32.gmra.mxu1 %vm320_vm2, %v8460_v58  ;;  %2740 = vmatprep.mubr.f32.mxu0 %v13389_v37 }
 0x2cc   : > { %2886 = vmatprep.mubr.f32.mxu1 %v13389_v37 }
 0x2ce   : > { %8457 = vmatmul.mubr.msk.f32.gmra.mxu0 %vm320_vm2, %v8453_v3 }
 0x2cf   : > { %8465 = vmatmul.mubr.msk.f32.gmra.mxu1 %vm320_vm2, %v8461_v57  ;;  %2746 = vmatprep.mubr.f32.mxu0 %v13389_v37 }
 0x2d0   : > { %2892 = vmatprep.mubr.f32.mxu1 %v13389_v37 }
 0x2d2   : > { %8458 = vmatmul.mubr.msk.f32.gmra.mxu0 %vm320_vm2, %v8454_v16 }
 0x2d3   : > { %8466 = vmatmul.mubr.msk.f32.gmra.mxu1 %vm320_vm2, %v8462_v30  ;;  %3114 = vmatprep.mubr.f32.mxu0 %v13389_v37 }
 0x2d4   : > { %3215 = vmatprep.mubr.f32.mxu1 %v13389_v37 }
 0x342   : > { %v1793_v52 = vpop.f32.mrf.mxu1 }
 0x344   : > { %v1795_v41 = vpop.f32.mrf.mxu1 }
 0x346   : > { %v1799_v34 = vpop.f32.mrf.mxu1 }
 0x348   : > { %v1801_v53 = vpop.f32.mrf.mxu1 }
 0x34a   : > { %v10234_v49 = vpop.f32.mrf.mxu1 }
 0x34c   : > { %v10236_v0 = vpop.f32.mrf.mxu1 }
 0x34f   : > { %v1811_v63 = vpop.f32.mrf.mxu1  ;;  %v1894_v45 = vpop.f32.mrf.mxu0 }
 0x350   : > { %v1895_v25 = vadd.f32 %v1894_v45, %v1793_v52 }
 0x351   : > { %v10238_v50 = vpop.f32.mrf.mxu1  ;;  %v1896_v36 = vpop.f32.mrf.mxu0 }
 0x352   : > { %v1897_v28 = vadd.f32 %v1896_v36, %v1795_v41 }
 0x353   : > { %v1900_v35 = vpop.f32.mrf.mxu0 }
 0x354   : > { %v2032_v46 = vpop.f32.mrf.mxu1 }
 0x355   : > { %v1902_v60 = vpop.f32.mrf.mxu0  ;;  %v2055_v10 = vadd.f32 %v2032_v46, %v1895_v25 }
 0x356   : > { %v2034_v29 = vpop.f32.mrf.mxu1  ;;  %v1903_v52 = vadd.f32 %v1902_v60, %v1801_v53 }
 0x357   : > { %v10240_v19 = vpop.f32.mrf.mxu0  ;;  %v2056_v22 = vadd.f32 %v2034_v29, %v1897_v28 }
 0x358   : > { %v2038_v27 = vpop.f32.mrf.mxu1 }
 0x359   : > { %v10242_v14 = vpop.f32.mrf.mxu0 }
 0x35a   : > { %v2040_v51 = vpop.f32.mrf.mxu1 }
 0x35b   : > { %v1912_v56 = vpop.f32.mrf.mxu0  ;;  %v2058_v46 = vadd.f32 %v2040_v51, %v1903_v52 }
 0x35c   : > { %v1913_v61 = vadd.f32 %v1912_v56, %v1811_v63  ;;  %v10244_v1 = vpop.f32.mrf.mxu1 }
 0x35d   : > { %v10248_v44 = vpop.f32.mrf.mxu0 }
 0x35e   : > { %v10246_v8 = vpop.f32.mrf.mxu1 }
 0x360   : > { %v2050_v47 = vpop.f32.mrf.mxu1 }
 0x361   : > { %v2061_v20 = vadd.f32 %v2050_v47, %v1913_v61 }
 0x362   : > { %v10250_v26 = vpop.f32.mrf.mxu1 }
 0x364   : > { %v2178_v55 = vpop.f32.mrf.mxu0  ;;  %v2292_v32 = vpop.f32.mrf.mxu1 }
 0x365   : > { %v2201_v2 = vadd.f32 %v2178_v55, %v2055_v10  ;;  %v10278_v55 = vpop.permute.xlu0 %2924 }
 0x366   : > { %v2180_v13 = vpop.f32.mrf.mxu0  ;;  %v2294_v42 = vpop.f32.mrf.mxu1 }
 0x368   : > { %v2184_v39 = vpop.f32.mrf.mxu0  ;;  %v2298_v9 = vpop.f32.mrf.mxu1 }
 0x36a   : > { %v2186_v48 = vpop.f32.mrf.mxu0  ;;  %v2300_v58 = vpop.f32.mrf.mxu1 }
 0x36c   : > { %v10252_v3 = vpop.f32.mrf.mxu0  ;;  %v10254_v57 = vpop.f32.mrf.mxu1 }
 0x36e   : > { %v10256_v16 = vpop.f32.mrf.mxu0  ;;  %v10258_v30 = vpop.f32.mrf.mxu1 }
 0x371   : > { %v2196_v63 = vpop.f32.mrf.mxu0  ;;  %v2310_v56 = vpop.f32.mrf.mxu1 }
 0x372   : > { %v2207_v61 = vadd.f32 %v2196_v63, %v2061_v20  ;;  %v2202_v20 = vadd.f32 %v2180_v13, %v2056_v22  ;;  %v2204_v13 = vadd.f32 %v2186_v48, %v2058_v46 }
 0x373   : > { %v10260_v47 = vpop.f32.mrf.mxu0  ;;  %v10262_v62 = vpop.f32.mrf.mxu1 }
 0x374   : > { %v10264_v43 = vadd.f32 %v2310_v56, %v2207_v61  ;;  %v1901_v56 = vadd.f32 %v1900_v35, %v1799_v34  ;;  %v2315_v61 = vadd.f32 %v2292_v32, %v2201_v2  ;;  %v2316_v25 = vadd.f32 %v2294_v42, %v2202_v20 }
 0x375   : > { %v2438_v24 = vpop.f32.mrf.mxu0  ;;  %v2318_v51 = vadd.f32 %v2300_v58, %v2204_v13 }
 0x376   : > { %v2584_v5 = vpop.f32.mrf.mxu1  ;;  %v2057_v41 = vadd.f32 %v2038_v27, %v1901_v56  ;;  %v2461_v36 = vadd.f32 %v2438_v24, %v2315_v61 }
 0x377   : > { %v2440_v4 = vpop.f32.mrf.mxu0 }
 0x378   : > { %v2586_v33 = vpop.f32.mrf.mxu1  ;;  %v2203_v22 = vadd.f32 %v2184_v39, %v2057_v41  ;;  %v2462_v29 = vadd.f32 %v2440_v4, %v2316_v25  ;;  %v2607_v2 = vadd.f32 %v2584_v5, %v2461_v36  ;;  %v2915_v4 = vpop.permute.xlu0 %2914 }
 0x379   : > { %v2444_v12 = vpop.f32.mrf.mxu0 }
 0x37a   : > { %v2590_v21 = vpop.f32.mrf.mxu1  ;;  %v2317_v60 = vadd.f32 %v2298_v9, %v2203_v22  ;;  %v2608_v27 = vadd.f32 %v2586_v33, %v2462_v29  ;;  %v1907_v33 = vadd.f32 %v10240_v19, %v10234_v49 }
 0x37b   : > { %v2446_v38 = vpop.f32.mrf.mxu0 }
 0x37c   : > { %v2592_v54 = vpop.f32.mrf.mxu1  ;;  %v2463_v20 = vadd.f32 %v2444_v12, %v2317_v60  ;;  %v2464_v52 = vadd.f32 %v2446_v38, %v2318_v51  ;;  %v1909_v38 = vadd.f32 %v10242_v14, %v10236_v0 }
 0x37d   : > { %v10266_v63 = vpop.f32.mrf.mxu0 }
 0x37e   : > { %v10268_v40 = vpop.f32.mrf.mxu1  ;;  %v2609_v46 = vadd.f32 %v2590_v21, %v2463_v20  ;;  %v2610_v9 = vadd.f32 %v2592_v54, %v2464_v52  ;;  %v2059_v21 = vadd.f32 %v10244_v1, %v1907_v33  ;;  %v2060_v19 = vadd.f32 %v10246_v8, %v1909_v38 }
 0x37f   : > { %v10270_v6 = vpop.f32.mrf.mxu0 }
 0x380   : > { %v10272_v45 = vpop.f32.mrf.mxu1  ;;  %v2205_v60 = vadd.f32 %v10252_v3, %v2059_v21 }
 0x382   : > { %v10274_v28 = vpop.f32.mrf.mxu0  ;;  %v10276_v10 = vpop.f32.mrf.mxu1  ;;  %v2319_v1 = vadd.f32 %v10254_v57, %v2205_v60 }
 0x384   : > { %v10280_v34 = vpop.f32.mrf.mxu0  ;;  %v10282_v35 = vpop.f32.mrf.mxu1  ;;  %v2465_v3 = vadd.f32 %v10266_v63, %v2319_v1 }
 0x386   : > { %v2730_v53 = vpop.f32.mrf.mxu0  ;;  %v2611_v57 = vadd.f32 %v10268_v40, %v2465_v3  ;;  %v8545_v3 = vld [vmem:[%s13285_s2 + $0x50] sm:$0xff] }
 0x387   : > { %v2753_v32 = vadd.f32 %v2730_v53, %v2607_v2  ;;  %v2876_v24 = vpop.f32.mrf.mxu1  ;;  %v10288_v2 = vpop.permute.xlu1 %2929 }
 0x388   : > { %v2732_v42 = vpop.f32.mrf.mxu0 }
 0x389   : > { %v2754_v56 = vadd.f32 %v2732_v42, %v2608_v27  ;;  %v2899_v61 = vadd.f32 %v2876_v24, %v2753_v32  ;;  %v2878_v39 = vpop.f32.mrf.mxu1  ;;  %v2206_v32 = vadd.f32 %v10256_v16, %v2060_v19 }
 0x38a   : > { %v2736_v41 = vpop.f32.mrf.mxu0 }
 0x38b   : > { %v2932_v48 = vadd.f32 %v2915_v4, %v2899_v61  ;;  %v2900_v25 = vadd.f32 %v2878_v39, %v2754_v56  ;;  %v2882_v58 = vpop.f32.mrf.mxu1  ;;  %v2755_v12 = vadd.f32 %v2736_v41, %v2609_v46  ;;  %v2920_v14 = vpop.permute.xlu1 %2919  ;;  %v2320_v8 = vadd.f32 %v10258_v30, %v2206_v32 }
 0x38c   : > { %v2738_v22 = vpop.f32.mrf.mxu0 }
 0x38d   : > { %vm2940_vm10 = vcmp.ge.f32.partialorder %v2932_v48, 0.0  ;;  %v2948_v5 = vmul.f32 0.2, %v2932_v48  ;;  %v2933_v36 = vadd.f32 %v2915_v4, %v2900_v25  ;;  %v2756_v54 = vadd.f32 %v2738_v22, %v2610_v9  ;;  %v2884_v49 = vpop.f32.mrf.mxu1 }
 0x38e   : > { %v2901_v27 = vadd.f32 %v2882_v58, %v2755_v12  ;;  %v2742_v42 = vpop.f32.mrf.mxu0  ;;  %v2466_v16 = vadd.f32 %v10270_v6, %v2320_v8 }
 0x38f   : > { %v10286_v29 = vsel %vm2940_vm10, %v2932_v48, %v2948_v5  ;;  %vm2941_vm11 = vcmp.ge.f32.partialorder %v2933_v36, 0.0  ;;  %v2949_v13 = vmul.f32 0.2, %v2933_v36  ;;  %v2902_v0 = vadd.f32 %v2884_v49, %v2756_v54  ;;  %v2888_v30 = vpop.f32.mrf.mxu1 }
 0x390   : > { %3001 = vrot.lane.b32.xlu1 %v10286_v29, %s8807_s21  ;;  %v2934_v24 = vadd.f32 %v2920_v14, %v2901_v27  ;;  %v2744_v61 = vpop.f32.mrf.mxu0  ;;  %v2612_v63 = vadd.f32 %v10272_v45, %v2466_v16  ;;  %v2757_v4 = vadd.f32 %v2742_v42, %v2611_v57  ;;  %v1915_v45 = vadd.f32 %v10248_v44, %v10238_v50  ;;  %v8544_v42 = vld [vmem:[%s13285_s2 + $0x48] sm:$0xff] }
 0x391   : > { %v10295_v53 = vsel %vm2941_vm11, %v2933_v36, %v2949_v13  ;;  %v2935_v51 = vadd.f32 %v2920_v14, %v2902_v0  ;;  %v2890_v41 = vpop.f32.mrf.mxu1  ;;  %v2467_v44 = vadd.f32 %v10274_v28, %v10264_v43 }
 0x392   : > { %3009 = vrot.lane.b32.xlu0 %v10295_v53, %s8807_s21  ;;  %v2950_v20 = vmul.f32 0.2, %v2934_v24  ;;  %vm2942_vm12 = vcmp.ge.f32.partialorder %v2934_v24, 0.0  ;;  %v2758_v52 = vadd.f32 %v2744_v61, %v2612_v63  ;;  %v2903_v40 = vadd.f32 %v2888_v30, %v2757_v4  ;;  %v2748_v9 = vpop.f32.mrf.mxu0 }
 0x393   : > { %v2951_v56 = vmul.f32 0.2, %v2935_v51  ;;  %vm2943_vm13 = vcmp.ge.f32.partialorder %v2935_v51, 0.0  ;;  %v2062_v25 = vadd.f32 %v10250_v26, %v1915_v45  ;;  %v2613_v22 = vadd.f32 %v10276_v10, %v2467_v44  ;;  %v2894_v12 = vpop.f32.mrf.mxu1 }
 0x394   : > { %2964 = vrot.lane.b32.xlu1 %v10286_v29, %s8809_s22  ;;  %v10320_v39 = vsel %vm2942_vm12, %v2934_v24, %v2950_v20  ;;  %v2904_v48 = vadd.f32 %v2890_v41, %v2758_v52  ;;  %v2936_v46 = vadd.f32 %v10278_v55, %v2903_v40  ;;  %v8546_v24 = vld [vmem:[%s13285_s2 + $0x58] sm:$0xff]  ;;  %v8543_v20 = vld [vmem:[%s13285_s2 + $0x40] sm:$0xff] }
 0x395   : > { %v10324_v6 = vsel %vm2943_vm13, %v2935_v51, %v2951_v56  ;;  %v2208_v5 = vadd.f32 %v10260_v47, %v2062_v25  ;;  %v2759_v28 = vadd.f32 %v2748_v9, %v2613_v22  ;;  %v2896_v13 = vpop.f32.mrf.mxu1 }
 0x396   : > { %2972 = vrot.lane.b32.xlu0 %v10295_v53, %s8809_s22  ;;  %v2937_v36 = vadd.f32 %v10278_v55, %v2904_v48  ;;  %v2952_v33 = vmul.f32 0.2, %v2936_v46  ;;  %vm2944_vm14 = vcmp.ge.f32.partialorder %v2936_v46, 0.0 }
 0x397   : > { %v2322_v50 = vadd.f32 %v10262_v62, %v2208_v5  ;;  %v2750_v62 = vpop.f32.mrf.mxu0  ;;  %v2905_v38 = vadd.f32 %v2894_v12, %v2759_v28 }
 0x398   : > { %3240 = vrot.lane.b32.xlu1 %v10286_v29, %s8810_s23  ;;  %v2953_v26 = vmul.f32 0.2, %v2937_v36  ;;  %vm2945_vm15 = vcmp.ge.f32.partialorder %v2937_v36, 0.0  ;;  %v10350_v55 = vsel %vm2944_vm14, %v2936_v46, %v2952_v33 }
 0x399   : > { %v2468_v47 = vadd.f32 %v10280_v34, %v2322_v50  ;;  %v2938_v21 = vadd.f32 %v10288_v2, %v2905_v38 }
 0x39a   : > { %3248 = vrot.lane.b32.xlu0 %v10295_v53, %s8810_s23  ;;  %v10355_v58 = vsel %vm2945_vm15, %v2937_v36, %v2953_v26 }
 0x39b   : > { %v2614_v43 = vadd.f32 %v10282_v35, %v2468_v47  ;;  %v2954_v54 = vmul.f32 0.2, %v2938_v21  ;;  %vm2946_vm9 = vcmp.ge.f32.partialorder %v2938_v21, 0.0 }
 0x39c   : > { %3386 = vrot.lane.b32.xlu1 %v10286_v29, %s8811_s24 }
 0x39d   : > { %v2760_v34 = vadd.f32 %v2750_v62, %v2614_v43  ;;  %v10378_v19 = vsel %vm2946_vm9, %v2938_v21, %v2954_v54 }
 0x39e   : > { %3394 = vrot.lane.b32.xlu0 %v10295_v53, %s8811_s24 }
 0x39f   : > { %v2906_v10 = vadd.f32 %v2896_v13, %v2760_v34 }
 0x3a0   : > { %3003 = vrot.lane.b32.xlu1 %v10320_v39, %s8807_s21 }
 0x3a1   : > { %v2939_v35 = vadd.f32 %v10288_v2, %v2906_v10 }
 0x3a2   : > { %3011 = vrot.lane.b32.xlu0 %v10324_v6, %s8807_s21 }
 0x3a3   : > { %v2955_v49 = vmul.f32 0.2, %v2939_v35  ;;  %vm2947_vm10 = vcmp.ge.f32.partialorder %v2939_v35, 0.0 }
 0x3a4   : > { %2966 = vrot.lane.b32.xlu1 %v10320_v39, %s8809_s22 }
 0x3a5   : > { %v10382_v60 = vsel %vm2947_vm10, %v2939_v35, %v2955_v49 }
 0x3a6   : > { %2974 = vrot.lane.b32.xlu0 %v10324_v6, %s8809_s22 }
 0x3a8   : > { %3242 = vrot.lane.b32.xlu1 %v10320_v39, %s8810_s23 }
 0x3aa   : > { %3250 = vrot.lane.b32.xlu0 %v10324_v6, %s8810_s23 }
 0x3ac   : > { %3388 = vrot.lane.b32.xlu1 %v10320_v39, %s8811_s24 }
 0x3ae   : > { %3396 = vrot.lane.b32.xlu0 %v10324_v6, %s8811_s24 }
 0x3b0   : > { %3005 = vrot.lane.b32.xlu1 %v10350_v55, %s8807_s21 }
 0x3b2   : > { %3013 = vrot.lane.b32.xlu0 %v10355_v58, %s8807_s21 }
 0x3b4   : > { %2968 = vrot.lane.b32.xlu1 %v10350_v55, %s8809_s22 }
 0x3b6   : > { %2976 = vrot.lane.b32.xlu0 %v10355_v58, %s8809_s22 }
 0x3b8   : > { %3244 = vrot.lane.b32.xlu1 %v10350_v55, %s8810_s23 }
 0x3ba   : > { %3252 = vrot.lane.b32.xlu0 %v10355_v58, %s8810_s23 }
 0x3bc   : > { %3390 = vrot.lane.b32.xlu1 %v10350_v55, %s8811_s24 }
 0x3be   : > { %3398 = vrot.lane.b32.xlu0 %v10355_v58, %s8811_s24 }
 0x3c0   : > { %3650 = vrot.lane.b32.xlu1 %v10350_v55, %s8812_s25 }
 0x3c2   : > { %3658 = vrot.lane.b32.xlu0 %v10355_v58, %s8812_s25 }
 0x3c4   : > { %3007 = vrot.lane.b32.xlu1 %v10378_v19, %s8807_s21 }
 0x3c6   : > { %3015 = vrot.lane.b32.xlu0 %v10382_v60, %s8807_s21 }
 0x3c8   : > { %3648 = vrot.lane.b32.xlu1 %v10320_v39, %s8812_s25 }
 0x3ca   : > { %3656 = vrot.lane.b32.xlu0 %v10324_v6, %s8812_s25 }
 0x3cc   : > { %2970 = vrot.lane.b32.xlu1 %v10378_v19, %s8809_s22 }
 0x3ce   : > { %3804 = vrot.lane.b32.xlu0 %v10355_v58, %s8813_s26 }
 0x3d0   : > { %3246 = vrot.lane.b32.xlu1 %v10378_v19, %s8810_s23 }
 0x3d2   : > { %2978 = vrot.lane.b32.xlu0 %v10382_v60, %s8809_s22 }
 0x3d4   : > { %3392 = vrot.lane.b32.xlu1 %v10378_v19, %s8811_s24 }
 0x3d6   : > { %3254 = vrot.lane.b32.xlu0 %v10382_v60, %s8810_s23 }
 0x3d8   : > { %3652 = vrot.lane.b32.xlu1 %v10378_v19, %s8812_s25 }
 0x3da   : > { %3654 = vrot.lane.b32.xlu0 %v10295_v53, %s8812_s25 }
 0x3dc   : > { %3798 = vrot.lane.b32.xlu1 %v10378_v19, %s8813_s26 }
 0x3de   : > { %3802 = vrot.lane.b32.xlu0 %v10324_v6, %s8813_s26 }
 0x3e0   : > { %3796 = vrot.lane.b32.xlu1 %v10350_v55, %s8813_s26 }
 0x3e2   : > { %3800 = vrot.lane.b32.xlu0 %v10295_v53, %s8813_s26 }
 0x3e4   : > { %3646 = vrot.lane.b32.xlu1 %v10286_v29, %s8812_s25 }
 0x3e6   : > { %3400 = vrot.lane.b32.xlu0 %v10382_v60, %s8811_s24 }
 0x3e8   : > { %3794 = vrot.lane.b32.xlu1 %v10320_v39, %s8813_s26 }
 0x3ea   : > { %3950 = vrot.lane.b32.xlu0 %v10355_v58, %s8814_s27 }
 0x3ec   : > { %3792 = vrot.lane.b32.xlu1 %v10286_v29, %s8813_s26 }
 0x3ee   : > { %3948 = vrot.lane.b32.xlu0 %v10324_v6, %s8814_s27 }
 0x3f0   : > { %3944 = vrot.lane.b32.xlu1 %v10378_v19, %s8814_s27 }
 0x3f2   : > { %3660 = vrot.lane.b32.xlu0 %v10382_v60, %s8812_s25 }
 0x3f4   : > { %3942 = vrot.lane.b32.xlu1 %v10350_v55, %s8814_s27 }
 0x3f6   : > { %3806 = vrot.lane.b32.xlu0 %v10382_v60, %s8813_s26 }
 0x3f8   : > { %4090 = vrot.lane.b32.xlu1 %v10378_v19, %s8815_s28 }
 0x3fa   : > { %4096 = vrot.lane.b32.xlu0 %v10355_v58, %s8815_s28 }
 0x3fc   : > { %3940 = vrot.lane.b32.xlu1 %v10320_v39, %s8814_s27 }
 0x3fe   : > { %3946 = vrot.lane.b32.xlu0 %v10295_v53, %s8814_s27 }
 0x400   : > { %4088 = vrot.lane.b32.xlu1 %v10350_v55, %s8815_s28 }
 0x402   : > { %3952 = vrot.lane.b32.xlu0 %v10382_v60, %s8814_s27  ;;  %v3002_v2 = vpop.permute.xlu1 %3001 }
 0x404   : > { %v3010_v27 = vpop.permute.xlu0 %3009  ;;  %3938 = vrot.lane.b32.xlu1 %v10286_v29, %s8814_s27 }
 0x405   : > { %v3017_v21 = vsel %vm287_vm0, %v3002_v2, %v3010_v27  ;;  %v3021_v54 = vsel %vm287_vm0, %v3010_v27, %v3002_v2 }
 0x406   : > { %4098 = vrot.lane.b32.xlu0 %v10382_v60, %s8815_s28  ;;  %v10450_v32 = vpop.permute.xlu1 %2964 }
 0x408   : > { %v10452_v0 = vpop.permute.xlu0 %2972  ;;  %4086 = vrot.lane.b32.xlu1 %v10320_v39, %s8815_s28 }
 0x40a   : > { %4094 = vrot.lane.b32.xlu0 %v10324_v6, %s8815_s28  ;;  %v10458_v14 = vpop.permute.xlu1 %3240 }
 0x40c   : > { %v10460_v1 = vpop.permute.xlu0 %3248  ;;  %4084 = vrot.lane.b32.xlu1 %v10286_v29, %s8815_s28 }
 0x40e   : > { %4092 = vrot.lane.b32.xlu0 %v10295_v53, %s8815_s28  ;;  %v10469_v8 = vpop.permute.xlu1 %3386 }
 0x410   : > { %v10474_v51 = vpop.permute.xlu0 %3394  ;;  %4252 = vperm.xlu1 %8798, %v8546_v24  }
 0x412   : > { %4247 = vperm.xlu0 %8797, %v8545_v3   ;;  %v3004_v16 = vpop.permute.xlu1 %3003 }
 0x414   : > { %v3012_v57 = vpop.permute.xlu0 %3011  ;;  %4242 = vperm.xlu1 %8798, %v8544_v42  }
 0x415   : > { %v3018_v34 = vsel %vm287_vm0, %v3004_v16, %v3012_v57  ;;  %v3022_v13 = vsel %vm287_vm0, %v3012_v57, %v3004_v16  ;;  %v3026_v16 = vmul.f32 %v3017_v21, %v9007_v17  ;;  %v8475_v57 = vld [vmem:[%s13284_s1 + $0x260] sm:$0xff] }
 0x416   : > { %4237 = vperm.xlu0 %8797, %v8543_v20   ;;  %v2967_v56 = vpop.permute.xlu1 %2966  ;;  %v3028_v24 = vmul.f32 %v3018_v34, %v9007_v17  ;;  %v3027_v3 = vmul.f32 %v3022_v13, %v9010_v18  ;;  %v3025_v20 = vmul.f32 %v3021_v54, %v9010_v18 }
 0x418   : > { %v2975_v61 = vpop.permute.xlu0 %2974 }
 0x419   : > { %v2985_v34 = vsel %vm239_vm1, %v2975_v61, %v2967_v56 }
 0x41a   : > { %v10482_v30 = vpop.permute.xlu1 %3242 }
 0x41c   : > { %v10484_v63 = vpop.permute.xlu0 %3250 }
 0x41e   : > { %v10486_v4 = vpop.permute.xlu1 %3388 }
 0x420   : > { %v10488_v52 = vpop.permute.xlu0 %3396 }
 0x422   : > { %v3006_v41 = vpop.permute.xlu1 %3005 }
 0x424   : > { %v3014_v40 = vpop.permute.xlu0 %3013 }
 0x425   : > { %v3019_v9 = vsel %vm287_vm0, %v3006_v41, %v3014_v40  ;;  %v3023_v62 = vsel %vm287_vm0, %v3014_v40, %v3006_v41 }
 0x426   : > { %v2969_v45 = vpop.permute.xlu1 %2968  ;;  %v3030_v10 = vmul.f32 %v3019_v9, %v9007_v17  ;;  %v3029_v35 = vmul.f32 %v3023_v62, %v9010_v18 }
 0x428   : > { %v2977_v48 = vpop.permute.xlu0 %2976 }
 0x429   : > { %v2982_v41 = vsel %vm239_vm1, %v2969_v45, %v2977_v48  ;;  %v2986_v9 = vsel %vm239_vm1, %v2977_v48, %v2969_v45 }
 0x42a   : > { %v10490_v25 = vpop.permute.xlu1 %3244  ;;  %v2993_v45 = vmul.f32 %v2982_v41, %v13391_v59  ;;  %v2992_v48 = vmul.f32 %v2986_v9, %v13390_v15 }
 0x42c   : > { %v10492_v46 = vpop.permute.xlu0 %3252 }
 0x42e   : > { %v10494_v5 = vpop.permute.xlu1 %3390 }
 0x430   : > { %v10496_v36 = vpop.permute.xlu0 %3398 }
 0x432   : > { %v10498_v33 = vpop.permute.xlu1 %3650 }
 0x434   : > { %v10500_v50 = vpop.permute.xlu0 %3658 }
 0x436   : > { %v3008_v44 = vpop.permute.xlu1 %3007 }
 0x438   : > { %v3016_v26 = vpop.permute.xlu0 %3015 }
 0x439   : > { %v3020_v47 = vsel %vm287_vm0, %v3008_v44, %v3016_v26  ;;  %v3024_v22 = vsel %vm287_vm0, %v3016_v26, %v3008_v44  ;;  %v8476_v26 = vld [vmem:[%s13284_s1 + $0x268] sm:$0xff] }
 0x43a   : > { %v3031_v12 = vmul.f32 %v3024_v22, %v9010_v18  ;;  %v10511_v43 = vpop.permute.xlu1 %3648  ;;  %v3032_v28 = vmul.f32 %v3020_v47, %v9007_v17 }
 0x43c   : > { %v10518_v38 = vpop.permute.xlu0 %3656  ;;  %3074 = vmatprep.subr.mxu0 %v3032_v28  ;;  %v2980_v28 = vsel %vm239_vm1, %v10450_v32, %v10452_v0 }
 0x43d   : > { %3075 = vmatpush1.msra.mxu0 %v3031_v12  ;;  %v2981_v12 = vsel %vm239_vm1, %v2967_v56, %v2975_v61  ;;  %v8477_v56 = vld [vmem:[%s13284_s1 + $0x270] sm:$0xff]  ;;  %v3258_v61 = vsel %vm539_vm3, %v10490_v25, %v10492_v46 }
 0x43e   : > { %3076 = vmatprep.subr.mxu0 %v3030_v10  ;;  %v2971_v49 = vpop.permute.xlu1 %2970 }
 0x43f   : > { %3077 = vmatpush1.msra.mxu0 %v3029_v35 }
 0x440   : > { %v10528_v42 = vpop.permute.xlu0 %3804  ;;  %3078 = vmatprep.subr.mxu0 %v3028_v24 }
 0x441   : > { %3079 = vmatpush1.msra.mxu0 %v3027_v3  ;;  %v2984_v3 = vsel %vm239_vm1, %v10452_v0, %v10450_v32  ;;  %v3257_v32 = vsel %vm539_vm3, %v10482_v30, %v10484_v63  ;;  %v3269_v0 = vmul.f32 %v3258_v61, %v13393_v7 }
 0x442   : > { %3080 = vmatprep.subr.mxu0 %v3026_v16  ;;  %v3247_v2 = vpop.permute.xlu1 %3246  ;;  %v2990_v16 = vmul.f32 %v2985_v34, %v13390_v15  ;;  %v3267_v9 = vmul.f32 %v3257_v32, %v13393_v7 }
 0x443   : > { %3081 = vmatpush1.msra.mxu0 %v3025_v20  ;;  %v3262_v20 = vsel %vm539_vm3, %v10492_v46, %v10490_v25  ;;  %v3261_v25 = vsel %vm539_vm3, %v10484_v63, %v10482_v30  ;;  %v3260_v30 = vsel %vm539_vm3, %v10460_v1, %v10458_v14 }
 0x444   : > { %v2979_v27 = vpop.permute.xlu0 %2978  ;;  %8479 = vmatmul.mubr.msk.f32.vlgmr.msra.gmra.mxu0 %vm320_vm2, %v8475_v57  ;;  %v3268_v46 = vmul.f32 %v3262_v20, %v13392_v23 }
 0x445   : > { %v2983_v40 = vsel %vm239_vm1, %v2971_v49, %v2979_v27  ;;  %v2987_v44 = vsel %vm239_vm1, %v2979_v27, %v2971_v49  ;;  %3120 = vmatprep.mubr.f32.mxu0 %v13389_v37  ;;  %v2991_v49 = vmul.f32 %v2981_v12, %v13391_v59  ;;  %v2988_v27 = vmul.f32 %v2984_v3, %v13390_v15 }
 0x446   : > { %v2994_v47 = vmul.f32 %v2987_v44, %v13390_v15  ;;  %v10549_v22 = vpop.permute.xlu1 %3392  ;;  %v2995_v62 = vmul.f32 %v2983_v40, %v13391_v59  ;;  %v8478_v40 = vld [vmem:[%s13284_s1 + $0x278] sm:$0xff]  ;;  %v8471_v44 = vld [vmem:[%s13284_s1 + $0x240] sm:$0xff] }
 0x448   : > { %v3255_v13 = vpop.permute.xlu0 %3254  ;;  %8480 = vmatmul.mubr.msk.f32.gmra.mxu0 %vm320_vm2, %v8476_v26  ;;  %3175 = vmatprep.subr.mxu1 %v2995_v62  ;;  %v3256_v26 = vsel %vm539_vm3, %v10458_v14, %v10460_v1  ;;  %v8472_v14 = vld [vmem:[%s13284_s1 + $0x248] sm:$0xff]  ;;  %v3264_v1 = vmul.f32 %v3260_v30, %v13392_v23 }
 0x449   : > { %v3259_v10 = vsel %vm539_vm3, %v3247_v2, %v3255_v13  ;;  %v3263_v21 = vsel %vm539_vm3, %v3255_v13, %v3247_v2  ;;  %3176 = vmatpush1.msra.mxu1 %v2994_v47  ;;  %3126 = vmatprep.mubr.f32.mxu0 %v13389_v37  ;;  %v2989_v2 = vmul.f32 %v2980_v28, %v13391_v59  ;;  %v8487_v28 = vld [vmem:[%s13284_s1 + $0x280] sm:$0xff] }
 0x44a   : > { %v3270_v35 = vmul.f32 %v3263_v21, %v13392_v23  ;;  %3177 = vmatprep.subr.mxu1 %v2993_v45  ;;  %v10576_v54 = vpop.permute.xlu1 %3652  ;;  %v3271_v24 = vmul.f32 %v3259_v10, %v13393_v7  ;;  %v3266_v47 = vmul.f32 %v3261_v25, %v13392_v23  ;;  %v3265_v62 = vmul.f32 %v3256_v26, %v13393_v7  ;;  %v8473_v45 = vld [vmem:[%s13284_s1 + $0x250] sm:$0xff] }
 0x44b   : > { %3178 = vmatpush1.msra.mxu1 %v2992_v48  ;;  %v8488_v48 = vld [vmem:[%s13284_s1 + $0x288] sm:$0xff]  ;;  %v3664_v25 = vsel %vm969_vm5, %v10498_v33, %v10500_v50  ;;  %v13405_v26 = vld [vmem:[#allocation8_spill] sm:$0xff] }
 0x44c   : > { %v10589_v57 = vpop.permute.xlu0 %3654  ;;  %8481 = vmatmul.mubr.msk.f32.gmra.mxu0 %vm320_vm2, %v8477_v56  ;;  %3179 = vmatprep.subr.mxu1 %v2991_v49  ;;  %v3404_v56 = vsel %vm697_vm4, %v10494_v5, %v10496_v36 }
 0x44d   : > { %3313 = vmatprep.subr.mxu0 %v3271_v24  ;;  %3180 = vmatpush1.msra.mxu1 %v2990_v16  ;;  %v3402_v24 = vsel %vm697_vm4, %v10469_v8, %v10474_v51 }
 0x44e   : > { %3314 = vmatpush1.msra.mxu0 %v3270_v35  ;;  %3181 = vmatprep.subr.mxu1 %v2989_v2  ;;  %v10604_v41 = vpop.permute.xlu1 %3798  ;;  %v3408_v35 = vsel %vm697_vm4, %v10496_v36, %v10494_v5  ;;  %v3407_v5 = vsel %vm697_vm4, %v10488_v52, %v10486_v4  ;;  %v3411_v2 = vmul.f32 %v3402_v24, %v13394_v31 }
 0x44f   : > { %3315 = vmatprep.subr.mxu0 %v3269_v0  ;;  %3132 = vmatprep.mubr.f32.mxu0 %v13389_v37 }
 0x450   : > { %3182 = vmatpush1.msra.mxu1 %v2988_v27  ;;  %3316 = vmatpush1.msra.mxu0 %v3268_v46  ;;  %v10621_v63 = vpop.permute.xlu0 %3802 }
 0x451   : > { %8482 = vmatmul.mubr.msk.f32.gmra.mxu0 %vm320_vm2, %v8478_v40  ;;  %8483 = vmatmul.mubr.msk.f32.vlgmr.msra.gmra.mxu1 %vm320_vm2, %v8471_v44  ;;  %v3668_v44 = vsel %vm969_vm5, %v10500_v50, %v10498_v33  ;;  %v8496_v33 = vld [vmem:[%s13284_s1 + $0x2a8] sm:$0xff] }
 0x452   : > { %3317 = vmatprep.subr.mxu0 %v3267_v9  ;;  %v10628_v12 = vpop.permute.xlu1 %3796  ;;  %3221 = vmatprep.mubr.f32.mxu1 %v13389_v37  ;;  %v8504_v50 = vld [vmem:[%s13284_s1 + $0x2c8] sm:$0xff] }
 0x453   : > { %3318 = vmatpush1.msra.mxu0 %v3266_v47  ;;  %3353 = vmatprep.mubr.f32.mxu0 %v13389_v37  ;;  %v13406_v47 = vld [vmem:[#allocation9_spill] sm:$0xff] }
 0x454   : > { %3319 = vmatprep.subr.mxu0 %v3265_v62  ;;  %v10639_v34 = vpop.permute.xlu0 %3800 }
 0x455   : > { %3320 = vmatpush1.msra.mxu0 %v3264_v1  ;;  %8484 = vmatmul.mubr.msk.f32.gmra.mxu1 %vm320_vm2, %v8472_v14  ;;  %v3674_v1 = vmul.f32 %v3664_v25, %v13405_v26 }
 0x456   : > { %8491 = vmatmul.mubr.msk.f32.vlgmr.msra.gmra.mxu0 %vm320_vm2, %v8487_v28  ;;  %3573 = vmatprep.subr.mxu0 %v10382_v60  ;;  %v10644_v13 = vpop.permute.xlu1 %3646 }
 0x457   : > { %3574 = vmatpush1.msra.mxu0 %v10378_v19  ;;  %3227 = vmatprep.mubr.f32.mxu1 %v13389_v37 }
 0x458   : > { %3575 = vmatprep.subr.mxu0 %v10355_v58  ;;  %3359 = vmatprep.mubr.f32.mxu0 %v13389_v37  ;;  %v3401_v10 = vpop.permute.xlu0 %3400 }
 0x459   : > { %3576 = vmatpush1.msra.mxu0 %v10350_v55  ;;  %v3405_v60 = vsel %vm697_vm4, %v10549_v22, %v3401_v10  ;;  %v3409_v19 = vsel %vm697_vm4, %v3401_v10, %v10549_v22  ;;  %8485 = vmatmul.mubr.msk.f32.gmra.mxu1 %vm320_vm2, %v8473_v45  ;;  %v8474_v55 = vld [vmem:[%s13284_s1 + $0x258] sm:$0xff]  ;;  %v13404_v22 = vld [vmem:[#allocation6_spill] sm:$0xff]  ;;  %v3663_v10 = vsel %vm969_vm5, %v10511_v43, %v10518_v38 }
 0x45a   : > { %8492 = vmatmul.mubr.msk.f32.gmra.mxu0 %vm320_vm2, %v8488_v48  ;;  %3577 = vmatprep.subr.mxu0 %v10324_v6  ;;  %v10666_v58 = vpop.permute.xlu1 %3794  ;;  %v3417_v21 = vmul.f32 %v3405_v60, %v13394_v31  ;;  %v3416_v61 = vmul.f32 %v3409_v19, %v13404_v22  ;;  %v8489_v6 = vld [vmem:[%s13284_s1 + $0x290] sm:$0xff]  ;;  %v3412_v20 = vmul.f32 %v3407_v5, %v13404_v22 }
 0x45b   : > { %3578 = vmatpush1.msra.mxu0 %v10320_v39  ;;  %3233 = vmatprep.mubr.f32.mxu1 %v13389_v37  ;;  %v3403_v39 = vsel %vm697_vm4, %v10486_v4, %v10488_v52  ;;  %v8490_v4 = vld [vmem:[%s13284_s1 + $0x298] sm:$0xff]  ;;  %v3406_v52 = vsel %vm697_vm4, %v10474_v51, %v10469_v8  ;;  %v8495_v8 = vld [vmem:[%s13284_s1 + $0x2a0] sm:$0xff]  ;;  %v3675_v48 = vmul.f32 %v3668_v44, %v13406_v47 }
 0x45c   : > { %3579 = vmatprep.subr.mxu0 %v10295_v53  ;;  %3365 = vmatprep.mubr.f32.mxu0 %v13389_v37  ;;  %v10688_v49 = vpop.permute.xlu0 %3950  ;;  %v3415_v53 = vmul.f32 %v3404_v56, %v13394_v31  ;;  %v3413_v16 = vmul.f32 %v3403_v39, %v13394_v31  ;;  %v3410_v0 = vmul.f32 %v3406_v52, %v13404_v22  ;;  %v8503_v51 = vld [vmem:[%s13284_s1 + $0x2c0] sm:$0xff] }
 0x45d   : > { %3580 = vmatpush1.msra.mxu0 %v10286_v29  ;;  %8486 = vmatmul.mubr.msk.f32.gmra.mxu1 %vm320_vm2, %v8474_v55  ;;  %v3414_v29 = vmul.f32 %v3408_v35, %v13404_v22  ;;  %v13407_v55 = vld [vmem:[#allocation11_spill] sm:$0xff]  ;;  %v3672_v39 = vmul.f32 %v3663_v10, %v13405_v26  ;;  %v3810_v5 = vsel %vm1127_vm6, %v10628_v12, %v10528_v42  ;;  %v8519_v44 = vld [vmem:[%s13284_s1 + $0x300] sm:$0xff] }
 0x45e   : > { %8493 = vmatmul.mubr.msk.f32.gmra.mxu0 %vm320_vm2, %v8489_v6  ;;  %3459 = vmatprep.subr.mxu1 %v3417_v21  ;;  %v10702_v36 = vpop.permute.xlu1 %3792  ;;  %v8505_v6 = vld [vmem:[%s13284_s1 + $0x2d0] sm:$0xff] }
 0x45f   : > { %3460 = vmatpush1.msra.mxu1 %v3416_v61  ;;  %3371 = vmatprep.mubr.f32.mxu0 %v13389_v37  ;;  %v8497_v61 = vld [vmem:[%s13284_s1 + $0x2b0] sm:$0xff] }
 0x460   : > { %3461 = vmatprep.subr.mxu1 %v3415_v53  ;;  %v10717_v3 = vpop.permute.xlu0 %3948  ;;  %3499 = vmatprep.mubr.f32.mxu1 %v13389_v37  ;;  %v3662_v53 = vsel %vm969_vm5, %v10644_v13, %v10589_v57 }
 0x461   : > { %3462 = vmatpush1.msra.mxu1 %v3414_v29 }
 0x462   : > { %8494 = vmatmul.mubr.msk.f32.gmra.mxu0 %vm320_vm2, %v8490_v4  ;;  %3463 = vmatprep.subr.mxu1 %v3413_v16  ;;  %v10724_v32 = vpop.permute.xlu1 %3944  ;;  %v8498_v16 = vld [vmem:[%s13284_s1 + $0x2b8] sm:$0xff] }
 0x463   : > { %3464 = vmatpush1.msra.mxu1 %v3412_v20  ;;  %3613 = vmatprep.mubr.f32.mxu0 %v13389_v37  ;;  %v8506_v20 = vld [vmem:[%s13284_s1 + $0x2d8] sm:$0xff] }
 0x464   : > { %3465 = vmatprep.subr.mxu1 %v3411_v2  ;;  %v3661_v27 = vpop.permute.xlu0 %3660  ;;  %v3808_v2 = vsel %vm1127_vm6, %v10702_v36, %v10639_v34 }
 0x465   : > { %3466 = vmatpush1.msra.mxu1 %v3410_v0  ;;  %v3665_v46 = vsel %vm969_vm5, %v10576_v54, %v3661_v27  ;;  %v3669_v40 = vsel %vm969_vm5, %v3661_v27, %v10576_v54  ;;  %v3667_v54 = vsel %vm969_vm5, %v10518_v38, %v10511_v43  ;;  %v3666_v43 = vsel %vm969_vm5, %v10589_v57, %v10644_v13  ;;  %v13408_v38 = vld [vmem:[#allocation10_spill] sm:$0xff] }
 0x466   : > { %v3676_v30 = vmul.f32 %v3665_v46, %v13405_v26  ;;  %8499 = vmatmul.mubr.msk.f32.vlgmr.msra.gmra.mxu1 %vm320_vm2, %v8495_v8  ;;  %8507 = vmatmul.mubr.msk.f32.vlgmr.msra.gmra.mxu0 %vm320_vm2, %v8503_v51  ;;  %v10751_v9 = vpop.permute.xlu1 %3942  ;;  %v3677_v62 = vmul.f32 %v3669_v40, %v13406_v47  ;;  %v3673_v19 = vmul.f32 %v3667_v54, %v13406_v47  ;;  %v8511_v27 = vld [vmem:[%s13284_s1 + $0x2e0] sm:$0xff] }
 0x467   : > { %3505 = vmatprep.mubr.f32.mxu1 %v13389_v37  ;;  %3619 = vmatprep.mubr.f32.mxu0 %v13389_v37  ;;  %v3671_v24 = vmul.f32 %v3666_v43, %v13406_v47  ;;  %v3820_v57 = vmul.f32 %v3810_v5, %v13408_v38  ;;  %v3809_v13 = vsel %vm1127_vm6, %v10666_v58, %v10621_v63 }
 0x468   : > { %v3807_v14 = vpop.permute.xlu0 %3806  ;;  %3719 = vmatprep.subr.mxu1 %v3677_v62  ;;  %v3818_v8 = vmul.f32 %v3809_v13, %v13408_v38  ;;  %v3816_v51 = vmul.f32 %v3808_v2, %v13408_v38  ;;  %v3960_v25 = vsel %vm1285_vm7, %v10688_v49, %v10751_v9 }
 0x469   : > { %v3811_v28 = vsel %vm1127_vm6, %v10604_v41, %v3807_v14  ;;  %v3815_v45 = vsel %vm1127_vm6, %v3807_v14, %v10604_v41  ;;  %3720 = vmatpush1.msra.mxu1 %v3676_v30  ;;  %v3814_v41 = vsel %vm1127_vm6, %v10528_v42, %v10628_v12  ;;  %v3813_v42 = vsel %vm1127_vm6, %v10621_v63, %v10666_v58  ;;  %v13409_v30 = vld [vmem:[#allocation12_spill] sm:$0xff] }
 0x46a   : > { %8500 = vmatmul.mubr.msk.f32.gmra.mxu1 %vm320_vm2, %v8496_v33  ;;  %8508 = vmatmul.mubr.msk.f32.gmra.mxu0 %vm320_vm2, %v8504_v50  ;;  %v10780_v60 = vpop.permute.xlu1 %4090  ;;  %v3823_v21 = vmul.f32 %v3815_v45, %v13407_v55  ;;  %v3822_v56 = vmul.f32 %v3811_v28, %v13408_v38  ;;  %v3821_v29 = vmul.f32 %v3814_v41, %v13407_v55  ;;  %v13410_v33 = vld [vmem:[#allocation13_spill] sm:$0xff] }
 0x46b   : > { %3721 = vmatprep.subr.mxu1 %v3675_v48  ;;  %3511 = vmatprep.mubr.f32.mxu1 %v13389_v37  ;;  %v3670_v12 = vmul.f32 %v3662_v53, %v13405_v26  ;;  %v3812_v63 = vsel %vm1127_vm6, %v10639_v34, %v10702_v36  ;;  %v3819_v58 = vmul.f32 %v3813_v42, %v13407_v55  ;;  %v8520_v48 = vld [vmem:[%s13284_s1 + $0x308] sm:$0xff] }
 0x46c   : > { %3625 = vmatprep.mubr.f32.mxu0 %v13389_v37  ;;  %3722 = vmatpush1.msra.mxu1 %v3674_v1  ;;  %v10801_v35 = vpop.permute.xlu0 %4096  ;;  %v3817_v34 = vmul.f32 %v3812_v63, %v13407_v55  ;;  %v3956_v14 = vsel %vm1285_vm7, %v10751_v9, %v10688_v49  ;;  %v8512_v1 = vld [vmem:[%s13284_s1 + $0x2e8] sm:$0xff]  ;;  %v3967_v28 = vmul.f32 %v3960_v25, %v13410_v33  ;;  %v8535_v25 = vld [vmem:[%s13284_s1 + $0x340] sm:$0xff] }
 0x46d   : > { %3723 = vmatprep.subr.mxu1 %v3673_v19  ;;  %3865 = vmatprep.subr.mxu0 %v3823_v21  ;;  %v13411_v19 = vld [vmem:[#allocation15_spill] sm:$0xff]  ;;  %v3966_v41 = vmul.f32 %v3956_v14, %v13409_v30 }
 0x46e   : > { %8501 = vmatmul.mubr.msk.f32.gmra.mxu1 %vm320_vm2, %v8497_v61  ;;  %8509 = vmatmul.mubr.msk.f32.gmra.mxu0 %vm320_vm2, %v8505_v6  ;;  %v3941_v4 = vpop.permute.xlu1 %3940 }
 0x46f   : > { %3724 = vmatpush1.msra.mxu1 %v3672_v39  ;;  %3866 = vmatpush1.msra.mxu0 %v3822_v56  ;;  %v3959_v45 = vsel %vm1285_vm7, %v10717_v3, %v3941_v4  ;;  %v3955_v43 = vsel %vm1285_vm7, %v3941_v4, %v10717_v3  ;;  %v13412_v56 = vld [vmem:[#allocation14_spill] sm:$0xff]  ;;  %v8513_v3 = vld [vmem:[%s13284_s1 + $0x2f0] sm:$0xff] }
 0x470   : > { %3725 = vmatprep.subr.mxu1 %v3671_v24  ;;  %3867 = vmatprep.subr.mxu0 %v3821_v29  ;;  %v3947_v52 = vpop.permute.xlu0 %3946  ;;  %v3965_v5 = vmul.f32 %v3959_v45, %v13410_v33  ;;  %v8521_v29 = vld [vmem:[%s13284_s1 + $0x310] sm:$0xff]  ;;  %v3964_v4 = vmul.f32 %v3955_v43, %v13409_v30 }
 0x471   : > { %3517 = vmatprep.mubr.f32.mxu1 %v13389_v37  ;;  %3631 = vmatprep.mubr.f32.mxu0 %v13389_v37 }
 0x472   : > { %3726 = vmatpush1.msra.mxu1 %v3670_v12  ;;  %3868 = vmatpush1.msra.mxu0 %v3820_v57  ;;  %v4089_v0 = vpop.permute.xlu1 %4088 }
 0x473   : > { %8502 = vmatmul.mubr.msk.f32.gmra.mxu1 %vm320_vm2, %v8498_v16  ;;  %8510 = vmatmul.mubr.msk.f32.gmra.mxu0 %vm320_vm2, %v8506_v20  ;;  %v4102_v53 = vsel %vm1443_vm8, %v4089_v0, %v10801_v35 }
 0x474   : > { %3869 = vmatprep.subr.mxu0 %v3819_v58  ;;  %3759 = vmatprep.mubr.f32.mxu1 %v13389_v37  ;;  %v3953_v36 = vpop.permute.xlu0 %3952  ;;  %v4112_v13 = vmul.f32 %v4102_v53, %v13412_v56  ;;  %v8514_v58 = vld [vmem:[%s13284_s1 + $0x2f8] sm:$0xff] }
 0x475   : > { %3870 = vmatpush1.msra.mxu0 %v3818_v8  ;;  %3905 = vmatprep.mubr.f32.mxu0 %v13389_v37  ;;  %v3957_v46 = vsel %vm1285_vm7, %v10724_v32, %v3953_v36  ;;  %v3961_v40 = vsel %vm1285_vm7, %v3953_v36, %v10724_v32 }
 0x476   : > { %3871 = vmatprep.subr.mxu0 %v3817_v34  ;;  %v3968_v62 = vmul.f32 %v3957_v46, %v13409_v30  ;;  %v3939_v54 = vpop.permute.xlu1 %3938  ;;  %v3969_v50 = vmul.f32 %v3961_v40, %v13410_v33  ;;  %v8528_v46 = vld [vmem:[%s13284_s1 + $0x328] sm:$0xff] }
 0x477   : > { %3872 = vmatpush1.msra.mxu0 %v3816_v51  ;;  %8515 = vmatmul.mubr.msk.f32.vlgmr.msra.gmra.mxu1 %vm320_vm2, %v8511_v27  ;;  %v3958_v6 = vsel %vm1285_vm7, %v3947_v52, %v3939_v54  ;;  %v3954_v24 = vsel %vm1285_vm7, %v3939_v54, %v3947_v52  ;;  %v8527_v27 = vld [vmem:[%s13284_s1 + $0x320] sm:$0xff]  ;;  %v8536_v40 = vld [vmem:[%s13284_s1 + $0x348] sm:$0xff]  ;;  %v8530_v54 = vld [vmem:[%s13284_s1 + $0x338] sm:$0xff] }
 0x478   : > { %8523 = vmatmul.mubr.msk.f32.vlgmr.msra.gmra.mxu0 %vm320_vm2, %v8519_v44  ;;  %3765 = vmatprep.mubr.f32.mxu1 %v13389_v37  ;;  %v4099_v32 = vpop.permute.xlu0 %4098  ;;  %v3963_v57 = vmul.f32 %v3958_v6, %v13410_v33  ;;  %v3962_v52 = vmul.f32 %v3954_v24, %v13409_v30  ;;  %v8529_v44 = vld [vmem:[%s13284_s1 + $0x330] sm:$0xff] }
 0x479   : > { %3911 = vmatprep.mubr.f32.mxu0 %v13389_v37  ;;  %v4103_v49 = vsel %vm1443_vm8, %v10780_v60, %v4099_v32  ;;  %v4107_v9 = vsel %vm1443_vm8, %v4099_v32, %v10780_v60  ;;  %4011 = vmatprep.subr.mxu1 %v3969_v50  ;;  %v4106_v60 = vsel %vm1443_vm8, %v10801_v35, %v4089_v0  ;;  %v8522_v0 = vld [vmem:[%s13284_s1 + $0x318] sm:$0xff] }
 0x47a   : > { %4012 = vmatpush1.msra.mxu1 %v3968_v62  ;;  %v4087_v10 = vpop.permute.xlu1 %4086  ;;  %v4115_v21 = vmul.f32 %v4107_v9, %v13411_v19  ;;  %v4114_v61 = vmul.f32 %v4103_v49, %v13412_v56  ;;  %v4113_v12 = vmul.f32 %v4106_v60, %v13411_v19  ;;  %v8537_v62 = vld [vmem:[%s13284_s1 + $0x350] sm:$0xff]  ;;  %v8538_v50 = vld [vmem:[%s13284_s1 + $0x358] sm:$0xff] }
 0x47b   : > { %8516 = vmatmul.mubr.msk.f32.gmra.mxu1 %vm320_vm2, %v8512_v1  ;;  %4013 = vmatprep.subr.mxu1 %v3967_v28 }
 0x47c   : > { %8524 = vmatmul.mubr.msk.f32.gmra.mxu0 %vm320_vm2, %v8520_v48  ;;  %3771 = vmatprep.mubr.f32.mxu1 %v13389_v37  ;;  %v4095_v39 = vpop.permute.xlu0 %4094 }
 0x47d   : > { %3917 = vmatprep.mubr.f32.mxu0 %v13389_v37  ;;  %4014 = vmatpush1.msra.mxu1 %v3966_v41  ;;  %v4105_v42 = vsel %vm1443_vm8, %v4095_v39, %v4087_v10  ;;  %v4101_v35 = vsel %vm1443_vm8, %v4087_v10, %v4095_v39 }
 0x47e   : > { %4015 = vmatprep.subr.mxu1 %v3965_v5  ;;  %4157 = vmatprep.subr.mxu0 %v4115_v21  ;;  %v4085_v16 = vpop.permute.xlu1 %4084  ;;  %v4111_v8 = vmul.f32 %v4105_v42, %v13411_v19  ;;  %v4110_v51 = vmul.f32 %v4101_v35, %v13412_v56 }
 0x47f   : > { %8517 = vmatmul.mubr.msk.f32.gmra.mxu1 %vm320_vm2, %v8513_v3  ;;  %4158 = vmatpush1.msra.mxu0 %v4114_v61 }
 0x480   : > { %8525 = vmatmul.mubr.msk.f32.gmra.mxu0 %vm320_vm2, %v8521_v29  ;;  %4016 = vmatpush1.msra.mxu1 %v3964_v4  ;;  %v4093_v20 = vpop.permute.xlu0 %4092 }
 0x481   : > { %4017 = vmatprep.subr.mxu1 %v3963_v57  ;;  %4159 = vmatprep.subr.mxu0 %v4113_v12  ;;  %v4100_v2 = vsel %vm1443_vm8, %v4085_v16, %v4093_v20  ;;  %v4104_v63 = vsel %vm1443_vm8, %v4093_v20, %v4085_v16 }
 0x482   : > { %3777 = vmatprep.mubr.f32.mxu1 %v13389_v37  ;;  %3923 = vmatprep.mubr.f32.mxu0 %v13389_v37  ;;  %v4109_v34 = vmul.f32 %v4104_v63, %v13411_v19  ;;  %v4108_v36 = vmul.f32 %v4100_v2, %v13412_v56 }
 0x483   : > { %4018 = vmatpush1.msra.mxu1 %v3962_v52  ;;  %4160 = vmatpush1.msra.mxu0 %v4112_v13 }
 0x484   : > { %8518 = vmatmul.mubr.msk.f32.gmra.mxu1 %vm320_vm2, %v8514_v58  ;;  %8526 = vmatmul.mubr.msk.f32.gmra.mxu0 %vm320_vm2, %v8522_v0 }
 0x485   : > { %4161 = vmatprep.subr.mxu0 %v4111_v8  ;;  %4051 = vmatprep.mubr.f32.mxu1 %v13389_v37 }
 0x486   : > { %4162 = vmatpush1.msra.mxu0 %v4110_v51  ;;  %4197 = vmatprep.mubr.f32.mxu0 %v13389_v37 }
 0x487   : > { %4163 = vmatprep.subr.mxu0 %v4109_v34 }
 0x488   : > { %8531 = vmatmul.mubr.msk.f32.vlgmr.msra.gmra.mxu1 %vm320_vm2, %v8527_v27  ;;  %4164 = vmatpush1.msra.mxu0 %v4108_v36 }
 0x489   : > { %8539 = vmatmul.mubr.msk.f32.vlgmr.msra.gmra.mxu0 %vm320_vm2, %v8535_v25  ;;  %4057 = vmatprep.mubr.f32.mxu1 %v13389_v37 }
 0x48a   : > { %4203 = vmatprep.mubr.f32.mxu0 %v13389_v37 }
 0x48c   : > { %8532 = vmatmul.mubr.msk.f32.gmra.mxu1 %vm320_vm2, %v8528_v46 }
 0x48d   : > { %8540 = vmatmul.mubr.msk.f32.gmra.mxu0 %vm320_vm2, %v8536_v40  ;;  %4063 = vmatprep.mubr.f32.mxu1 %v13389_v37 }
 0x48e   : > { %4209 = vmatprep.mubr.f32.mxu0 %v13389_v37 }
 0x490   : > { %8533 = vmatmul.mubr.msk.f32.gmra.mxu1 %vm320_vm2, %v8529_v44 }
 0x491   : > { %8541 = vmatmul.mubr.msk.f32.gmra.mxu0 %vm320_vm2, %v8537_v62  ;;  %4069 = vmatprep.mubr.f32.mxu1 %v13389_v37 }
 0x492   : > { %4215 = vmatprep.mubr.f32.mxu0 %v13389_v37 }
 0x494   : > { %8534 = vmatmul.mubr.msk.f32.gmra.mxu1 %vm320_vm2, %v8530_v54 }
 0x495   : > { %8542 = vmatmul.mubr.msk.f32.gmra.mxu0 %vm320_vm2, %v8538_v50  ;;  %4445 = vmatprep.mubr.f32.mxu1 %v13389_v37 }
 0x496   : > { %4546 = vmatprep.mubr.f32.mxu0 %v13389_v37 }
 0x504   : > { %v3116_v14 = vpop.f32.mrf.mxu0 }
 0x506   : > { %v3118_v32 = vpop.f32.mrf.mxu0 }
 0x508   : > { %v3122_v1 = vpop.f32.mrf.mxu0 }
 0x50a   : > { %v3124_v28 = vpop.f32.mrf.mxu0 }
 0x50c   : > { %v10990_v45 = vpop.f32.mrf.mxu0 }
 0x50e   : > { %v10992_v49 = vpop.f32.mrf.mxu0 }
 0x511   : > { %v3134_v9 = vpop.f32.mrf.mxu0  ;;  %v3217_v48 = vpop.f32.mrf.mxu1 }
 0x513   : > { %v10994_v10 = vpop.f32.mrf.mxu0  ;;  %v3219_v21 = vpop.f32.mrf.mxu1 }
 0x515   : > { %v3223_v41 = vpop.f32.mrf.mxu1 }
 0x516   : > { %v3355_v43 = vpop.f32.mrf.mxu0 }
 0x517   : > { %v3225_v61 = vpop.f32.mrf.mxu1 }
 0x518   : > { %v3357_v60 = vpop.f32.mrf.mxu0 }
 0x519   : > { %v10996_v6 = vpop.f32.mrf.mxu1 }
 0x51a   : > { %v3361_v39 = vpop.f32.mrf.mxu0 }
 0x51b   : > { %v10998_v3 = vpop.f32.mrf.mxu1 }
 0x51c   : > { %v3363_v5 = vpop.f32.mrf.mxu0 }
 0x51d   : > { %v3235_v53 = vpop.f32.mrf.mxu1 }
 0x51e   : > { %v3236_v24 = vadd.f32 %v3235_v53, %v3134_v9  ;;  %v11000_v29 = vpop.f32.mrf.mxu0  ;;  %v3218_v9 = vadd.f32 %v3217_v48, %v3116_v14 }
 0x51f   : > { %v11004_v57 = vpop.f32.mrf.mxu1 }
 0x520   : > { %v11002_v4 = vpop.f32.mrf.mxu0  ;;  %v3378_v56 = vadd.f32 %v3355_v43, %v3218_v9 }
 0x522   : > { %v3373_v42 = vpop.f32.mrf.mxu0 }
 0x523   : > { %v3384_v35 = vadd.f32 %v3373_v42, %v3236_v24  ;;  %v3220_v42 = vadd.f32 %v3219_v21, %v3118_v32 }
 0x524   : > { %v11006_v12 = vpop.f32.mrf.mxu0 }
 0x525   : > { %v3379_v30 = vadd.f32 %v3357_v60, %v3220_v42 }
 0x526   : > { %v3501_v13 = vpop.f32.mrf.mxu1  ;;  %v3615_v52 = vpop.f32.mrf.mxu0 }
 0x527   : > { %v3524_v38 = vadd.f32 %v3501_v13, %v3378_v56 }
 0x528   : > { %v3503_v16 = vpop.f32.mrf.mxu1  ;;  %v3617_v20 = vpop.f32.mrf.mxu0 }
 0x529   : > { %v3638_v31 = vadd.f32 %v3615_v52, %v3524_v38 }
 0x52a   : > { %v3507_v2 = vpop.f32.mrf.mxu1  ;;  %v3621_v63 = vpop.f32.mrf.mxu0 }
 0x52c   : > { %v3509_v58 = vpop.f32.mrf.mxu1  ;;  %v3623_v0 = vpop.f32.mrf.mxu0 }
 0x52e   : > { %v11008_v8 = vpop.f32.mrf.mxu1  ;;  %v11010_v51 = vpop.f32.mrf.mxu0 }
 0x530   : > { %v11012_v34 = vpop.f32.mrf.mxu1  ;;  %v11014_v36 = vpop.f32.mrf.mxu0 }
 0x533   : > { %v3519_v27 = vpop.f32.mrf.mxu1  ;;  %v3633_v25 = vpop.f32.mrf.mxu0 }
 0x534   : > { %v3530_v46 = vadd.f32 %v3519_v27, %v3384_v35  ;;  %v3224_v35 = vadd.f32 %v3223_v41, %v3122_v1  ;;  %v3525_v27 = vadd.f32 %v3503_v16, %v3379_v30  ;;  %v11034_v41 = vpop.permute.xlu0 %4247 }
 0x535   : > { %v11016_v40 = vpop.f32.mrf.mxu1  ;;  %v11018_v44 = vpop.f32.mrf.mxu0 }
 0x536   : > { %v11020_v62 = vadd.f32 %v3633_v25, %v3530_v46  ;;  %v3226_v25 = vadd.f32 %v3225_v61, %v3124_v28  ;;  %v3380_v46 = vadd.f32 %v3361_v39, %v3224_v35  ;;  %v3639_v21 = vadd.f32 %v3617_v20, %v3525_v27 }
 0x537   : > { %v3761_v54 = vpop.f32.mrf.mxu1 }
 0x538   : > { %v3907_v50 = vpop.f32.mrf.mxu0  ;;  %v3381_v32 = vadd.f32 %v3363_v5, %v3226_v25  ;;  %v3526_v43 = vadd.f32 %v3507_v2, %v3380_v46  ;;  %v3784_v60 = vadd.f32 %v3761_v54, %v3638_v31 }
 0x539   : > { %v3763_v53 = vpop.f32.mrf.mxu1 }
 0x53a   : > { %v3909_v24 = vpop.f32.mrf.mxu0  ;;  %v3527_v30 = vadd.f32 %v3509_v58, %v3381_v32  ;;  %v3785_v1 = vadd.f32 %v3763_v53, %v3639_v21  ;;  %v3640_v28 = vadd.f32 %v3621_v63, %v3526_v43  ;;  %v3930_v38 = vadd.f32 %v3907_v50, %v3784_v60  ;;  %v4238_v53 = vpop.permute.xlu0 %4237 }
 0x53b   : > { %v3767_v19 = vpop.f32.mrf.mxu1  ;;  %v3230_v63 = vadd.f32 %v10996_v6, %v10990_v45 }
 0x53c   : > { %v3913_v33 = vpop.f32.mrf.mxu0  ;;  %v3641_v52 = vadd.f32 %v3623_v0, %v3527_v30  ;;  %v3931_v5 = vadd.f32 %v3909_v24, %v3785_v1  ;;  %v3786_v20 = vadd.f32 %v3767_v19, %v3640_v28  ;;  %v13413_v24 = vld [vmem:[#allocation16_spill] sm:$0xff]  ;;  %v11043_v30 = vpop.permute.xlu1 %4252  ;;  %v13414_v28 = vld [vmem:[#allocation17_spill] sm:$0xff] }
 0x53d   : > { %v3769_v55 = vpop.f32.mrf.mxu1  ;;  %v3382_v1 = vadd.f32 %v11000_v29, %v3230_v63 }
 0x53e   : > { %v3915_v47 = vpop.f32.mrf.mxu0  ;;  %v3787_v9 = vadd.f32 %v3769_v55, %v3641_v52  ;;  %v3932_v25 = vadd.f32 %v3913_v33, %v3786_v20  ;;  %v3232_v55 = vadd.f32 %v10998_v3, %v10992_v49 }
 0x53f   : > { %v11022_v26 = vpop.f32.mrf.mxu1 }
 0x540   : > { %v11024_v22 = vpop.f32.mrf.mxu0  ;;  %v3933_v0 = vadd.f32 %v3915_v47, %v3787_v9  ;;  %v3383_v45 = vadd.f32 %v11002_v4, %v3232_v55  ;;  %v3528_v47 = vadd.f32 %v11008_v8, %v3382_v1 }
 0x541   : > { %v11026_v14 = vpop.f32.mrf.mxu1 }
 0x542   : > { %v11028_v48 = vpop.f32.mrf.mxu0  ;;  %v3529_v49 = vadd.f32 %v11012_v34, %v3383_v45  ;;  %v3642_v4 = vadd.f32 %v11010_v51, %v3528_v47 }
 0x544   : > { %v11030_v56 = vpop.f32.mrf.mxu1  ;;  %v11032_v13 = vpop.f32.mrf.mxu0 }
 0x546   : > { %v11036_v16 = vpop.f32.mrf.mxu1  ;;  %v11038_v61 = vpop.f32.mrf.mxu0 }
 0x548   : > { %v4053_v39 = vpop.f32.mrf.mxu1 }
 0x549   : > { %v4076_v2 = vadd.f32 %v4053_v39, %v3930_v38  ;;  %v4199_v31 = vpop.f32.mrf.mxu0 }
 0x54a   : > { %v4055_v54 = vpop.f32.mrf.mxu1 }
 0x54b   : > { %v4077_v42 = vadd.f32 %v4055_v54, %v3931_v5  ;;  %v4222_v35 = vadd.f32 %v4199_v31, %v4076_v2  ;;  %v4201_v58 = vpop.f32.mrf.mxu0  ;;  %v4243_v2 = vpop.permute.xlu1 %4242  ;;  %v3643_v31 = vadd.f32 %v11014_v36, %v3529_v49  ;;  %v3788_v54 = vadd.f32 %v11022_v26, %v3642_v4 }
 0x54c   : > { %v4059_v27 = vpop.f32.mrf.mxu1 }
 0x54d   : > { %v4255_v46 = vadd.f32 %v4238_v53, %v4222_v35  ;;  %v4223_v32 = vadd.f32 %v4201_v58, %v4077_v42  ;;  %v4205_v21 = vpop.f32.mrf.mxu0  ;;  %v4078_v43 = vadd.f32 %v4059_v27, %v3932_v25  ;;  %v3789_v34 = vadd.f32 %v11026_v14, %v3643_v31  ;;  %v13417_v35 = vld [vmem:[#allocation18_spill] sm:$0xff] }
 0x54e   : > { %v4061_v50 = vpop.f32.mrf.mxu1  ;;  %v3934_v51 = vadd.f32 %v11024_v22, %v3788_v54 }
 0x54f   : > { %v4263_v19 = vadd.f32 %v4255_v46, %v13413_v24  ;;  %v4256_v60 = vadd.f32 %v4238_v53, %v4223_v32  ;;  %v4079_v39 = vadd.f32 %v4061_v50, %v3933_v0  ;;  %v4207_v6 = vpop.f32.mrf.mxu0  ;;  %v4224_v20 = vadd.f32 %v4205_v21, %v4078_v43  ;;  %v13418_v53 = vld [vmem:[#allocation19_spill] sm:$0xff] }
 0x550   : > { %v4065_v42 = vpop.f32.mrf.mxu1  ;;  %v3935_v26 = vadd.f32 %v11028_v48, %v3789_v34  ;;  %v3238_v48 = vadd.f32 %v11004_v57, %v10994_v10  ;;  %v13421_v10 = vld [vmem:[#allocation20_spill] sm:$0xff] }
 0x551   : > { %vm4271_vm11 = vcmp.ge.f32.partialorder %v4263_v19, 0.0  ;;  %v4279_v33 = vmul.f32 0.2, %v4263_v19  ;;  %v4264_v38 = vadd.f32 %v4256_v60, %v13414_v28  ;;  %v4225_v29 = vadd.f32 %v4207_v6, %v4079_v39  ;;  %v4211_v36 = vpop.f32.mrf.mxu0 }
 0x552   : > { %v4257_v8 = vadd.f32 %v4243_v2, %v4224_v20  ;;  %v4067_v25 = vpop.f32.mrf.mxu1  ;;  %v4080_v32 = vadd.f32 %v4065_v42, %v3934_v51 }
 0x553   : > { %v11051_v52 = vsel %vm4271_vm11, %v4263_v19, %v4279_v33  ;;  %vm4272_vm12 = vcmp.ge.f32.partialorder %v4264_v38, 0.0  ;;  %v4280_v5 = vmul.f32 0.2, %v4264_v38  ;;  %v4258_v9 = vadd.f32 %v4243_v2, %v4225_v29  ;;  %v4213_v50 = vpop.f32.mrf.mxu0  ;;  %v13422_v33 = vld [vmem:[#allocation21_spill] sm:$0xff]  ;;  %v13425_v2 = vld [vmem:[#allocation22_spill] sm:$0xff] }
 0x554   : > { %13415 = vst [vmem:[#allocation3_spill] sm:$0xff] %v11051_v52  ;;  %4332 = vrot.lane.b32.xlu1 %v11051_v52, %s8807_s21  ;;  %v4265_v58 = vadd.f32 %v4257_v8, %v13417_v35  ;;  %v4081_v63 = vadd.f32 %v4067_v25, %v3935_v26  ;;  %v4226_v21 = vadd.f32 %v4211_v36, %v4080_v32  ;;  %v13426_v8 = vld [vmem:[#allocation23_spill] sm:$0xff]  ;;  %v8622_v25 = vld [vmem:[%s13285_s2 + $0x78] sm:$0xff]  ;;  %v8621_v26 = vld [vmem:[%s13285_s2 + $0x70] sm:$0xff] }
 0x555   : > { %v11056_v3 = vsel %vm4272_vm12, %v4264_v38, %v4280_v5  ;;  %v4266_v27 = vadd.f32 %v4258_v9, %v13418_v53  ;;  %v3385_v19 = vadd.f32 %v11006_v12, %v3238_v48  ;;  %v3790_v12 = vadd.f32 %v11030_v56, %v11020_v62  ;;  %v4071_v38 = vpop.f32.mrf.mxu1  ;;  %v4217_v47 = vpop.f32.mrf.mxu0  ;;  %v8620_v32 = vld [vmem:[%s13285_s2 + $0x68] sm:$0xff] }
 0x556   : > { %13416 = vst [vmem:[#allocation2_spill] sm:$0xff] %v11056_v3  ;;  %4340 = vrot.lane.b32.xlu0 %v11056_v3, %s8807_s21  ;;  %v4281_v46 = vmul.f32 0.2, %v4265_v58  ;;  %vm4273_vm13 = vcmp.ge.f32.partialorder %v4265_v58, 0.0  ;;  %v4227_v24 = vadd.f32 %v4213_v50, %v4081_v63  ;;  %v4259_v43 = vadd.f32 %v11034_v41, %v4226_v21  ;;  %v8619_v63 = vld [vmem:[%s13285_s2 + $0x60] sm:$0xff] }
 0x557   : > { %v4282_v14 = vmul.f32 0.2, %v4266_v27  ;;  %vm4274_vm14 = vcmp.ge.f32.partialorder %v4266_v27, 0.0  ;;  %v3531_v60 = vadd.f32 %v11016_v40, %v3385_v19  ;;  %v3936_v39 = vadd.f32 %v11032_v13, %v3790_v12  ;;  %v4219_v20 = vpop.f32.mrf.mxu0 }
 0x558   : > { %4295 = vrot.lane.b32.xlu1 %v11051_v52, %s8809_s22  ;;  %v11080_v22 = vsel %vm4273_vm13, %v4265_v58, %v4281_v46  ;;  %v4260_v55 = vadd.f32 %v11034_v41, %v4227_v24  ;;  %v4267_v57 = vadd.f32 %v4259_v43, %v13421_v10 }
 0x559   : > { %13419 = vst [vmem:[#allocation4_spill] sm:$0xff] %v11080_v22  ;;  %v11086_v0 = vsel %vm4274_vm14, %v4266_v27, %v4282_v14  ;;  %v3645_v1 = vadd.f32 %v11018_v44, %v3531_v60  ;;  %v4073_v44 = vpop.f32.mrf.mxu1  ;;  %v4082_v6 = vadd.f32 %v4071_v38, %v3936_v39 }
 0x55a   : > { %4303 = vrot.lane.b32.xlu0 %v11056_v3, %s8809_s22  ;;  %13420 = vst [vmem:[#allocation5_spill] sm:$0xff] %v11086_v0  ;;  %v4268_v28 = vadd.f32 %v4260_v55, %v13422_v33  ;;  %v4283_v41 = vmul.f32 0.2, %v4267_v57  ;;  %vm4275_vm15 = vcmp.ge.f32.partialorder %v4267_v57, 0.0 }
 0x55b   : > { %v3791_v40 = vadd.f32 %v11036_v16, %v3645_v1  ;;  %v4228_v13 = vadd.f32 %v4217_v47, %v4082_v6 }
 0x55c   : > { %4571 = vrot.lane.b32.xlu1 %v11051_v52, %s8810_s23  ;;  %v4284_v45 = vmul.f32 0.2, %v4268_v28  ;;  %vm4276_vm9 = vcmp.ge.f32.partialorder %v4268_v28, 0.0  ;;  %v11114_v56 = vsel %vm4275_vm15, %v4267_v57, %v4283_v41 }
 0x55d   : > { %v3937_v62 = vadd.f32 %v11038_v61, %v3791_v40  ;;  %13423 = vst [vmem:[#allocation16_spill] sm:$0xff] %v11114_v56  ;;  %v4261_v61 = vadd.f32 %v11043_v30, %v4228_v13 }
 0x55e   : > { %4579 = vrot.lane.b32.xlu0 %v11056_v3, %s8810_s23  ;;  %v11118_v16 = vsel %vm4276_vm9, %v4268_v28, %v4284_v45 }
 0x55f   : > { %13424 = vst [vmem:[#allocation17_spill] sm:$0xff] %v11118_v16  ;;  %v4083_v5 = vadd.f32 %v4073_v44, %v3937_v62  ;;  %v4269_v4 = vadd.f32 %v4261_v61, %v13425_v2 }
 0x560   : > { %4717 = vrot.lane.b32.xlu1 %v11051_v52, %s8811_s24 }
 0x561   : > { %v4229_v49 = vadd.f32 %v4219_v20, %v4083_v5  ;;  %v4285_v54 = vmul.f32 0.2, %v4269_v4  ;;  %vm4277_vm10 = vcmp.ge.f32.partialorder %v4269_v4, 0.0 }
 0x562   : > { %4725 = vrot.lane.b32.xlu0 %v11056_v3, %s8811_s24 }
 0x563   : > { %v4262_v29 = vadd.f32 %v11043_v30, %v4229_v49  ;;  %v11142_v30 = vsel %vm4277_vm10, %v4269_v4, %v4285_v54 }
 0x564   : > { %4334 = vrot.lane.b32.xlu1 %v11080_v22, %s8807_s21  ;;  %13427 = vst [vmem:[#allocation18_spill] sm:$0xff] %v11142_v30 }
 0x565   : > { %v4270_v31 = vadd.f32 %v4262_v29, %v13426_v8 }
 0x566   : > { %4342 = vrot.lane.b32.xlu0 %v11086_v0, %s8807_s21 }
 0x567   : > { %v4286_v9 = vmul.f32 0.2, %v4270_v31  ;;  %vm4278_vm11 = vcmp.ge.f32.partialorder %v4270_v31, 0.0 }
 0x568   : > { %4297 = vrot.lane.b32.xlu1 %v11080_v22, %s8809_s22 }
 0x569   : > { %v11146_v42 = vsel %vm4278_vm11, %v4270_v31, %v4286_v9 }
 0x56a   : > { %4305 = vrot.lane.b32.xlu0 %v11086_v0, %s8809_s22  ;;  %13428 = vst [vmem:[#allocation19_spill] sm:$0xff] %v11146_v42 }
 0x56c   : > { %4573 = vrot.lane.b32.xlu1 %v11080_v22, %s8810_s23 }
 0x56e   : > { %4581 = vrot.lane.b32.xlu0 %v11086_v0, %s8810_s23 }
 0x570   : > { %4719 = vrot.lane.b32.xlu1 %v11080_v22, %s8811_s24 }
 0x572   : > { %4727 = vrot.lane.b32.xlu0 %v11086_v0, %s8811_s24 }
 0x574   : > { %4336 = vrot.lane.b32.xlu1 %v11114_v56, %s8807_s21 }
 0x576   : > { %4344 = vrot.lane.b32.xlu0 %v11118_v16, %s8807_s21 }
 0x578   : > { %4299 = vrot.lane.b32.xlu1 %v11114_v56, %s8809_s22 }
 0x57a   : > { %4307 = vrot.lane.b32.xlu0 %v11118_v16, %s8809_s22 }
 0x57c   : > { %4575 = vrot.lane.b32.xlu1 %v11114_v56, %s8810_s23 }
 0x57e   : > { %4583 = vrot.lane.b32.xlu0 %v11118_v16, %s8810_s23 }
 0x580   : > { %4721 = vrot.lane.b32.xlu1 %v11114_v56, %s8811_s24 }
 0x582   : > { %4729 = vrot.lane.b32.xlu0 %v11118_v16, %s8811_s24 }
 0x584   : > { %4981 = vrot.lane.b32.xlu1 %v11114_v56, %s8812_s25 }
 0x586   : > { %4989 = vrot.lane.b32.xlu0 %v11118_v16, %s8812_s25 }
 0x588   : > { %4338 = vrot.lane.b32.xlu1 %v11142_v30, %s8807_s21 }
 0x58a   : > { %4346 = vrot.lane.b32.xlu0 %v11146_v42, %s8807_s21 }
 0x58c   : > { %4979 = vrot.lane.b32.xlu1 %v11080_v22, %s8812_s25 }
 0x58e   : > { %4987 = vrot.lane.b32.xlu0 %v11086_v0, %s8812_s25 }
 0x590   : > { %4301 = vrot.lane.b32.xlu1 %v11142_v30, %s8809_s22 }
 0x592   : > { %5135 = vrot.lane.b32.xlu0 %v11118_v16, %s8813_s26 }
 0x594   : > { %4577 = vrot.lane.b32.xlu1 %v11142_v30, %s8810_s23 }
 0x596   : > { %4309 = vrot.lane.b32.xlu0 %v11146_v42, %s8809_s22 }
 0x598   : > { %4723 = vrot.lane.b32.xlu1 %v11142_v30, %s8811_s24 }
 0x59a   : > { %4585 = vrot.lane.b32.xlu0 %v11146_v42, %s8810_s23 }
 0x59c   : > { %4983 = vrot.lane.b32.xlu1 %v11142_v30, %s8812_s25 }
 0x59e   : > { %4985 = vrot.lane.b32.xlu0 %v11056_v3, %s8812_s25 }
 0x5a0   : > { %5129 = vrot.lane.b32.xlu1 %v11142_v30, %s8813_s26 }
 0x5a2   : > { %5133 = vrot.lane.b32.xlu0 %v11086_v0, %s8813_s26 }
 0x5a4   : > { %5127 = vrot.lane.b32.xlu1 %v11114_v56, %s8813_s26 }
 0x5a6   : > { %5131 = vrot.lane.b32.xlu0 %v11056_v3, %s8813_s26 }
 0x5a8   : > { %4977 = vrot.lane.b32.xlu1 %v11051_v52, %s8812_s25 }
 0x5aa   : > { %4731 = vrot.lane.b32.xlu0 %v11146_v42, %s8811_s24 }
 0x5ac   : > { %5125 = vrot.lane.b32.xlu1 %v11080_v22, %s8813_s26 }
 0x5ae   : > { %5281 = vrot.lane.b32.xlu0 %v11118_v16, %s8814_s27 }
 0x5b0   : > { %5123 = vrot.lane.b32.xlu1 %v11051_v52, %s8813_s26 }
 0x5b2   : > { %5279 = vrot.lane.b32.xlu0 %v11086_v0, %s8814_s27 }
 0x5b4   : > { %5275 = vrot.lane.b32.xlu1 %v11142_v30, %s8814_s27 }
 0x5b6   : > { %4991 = vrot.lane.b32.xlu0 %v11146_v42, %s8812_s25 }
 0x5b8   : > { %5273 = vrot.lane.b32.xlu1 %v11114_v56, %s8814_s27 }
 0x5ba   : > { %5137 = vrot.lane.b32.xlu0 %v11146_v42, %s8813_s26 }
 0x5bc   : > { %5421 = vrot.lane.b32.xlu1 %v11142_v30, %s8815_s28 }
 0x5be   : > { %5427 = vrot.lane.b32.xlu0 %v11118_v16, %s8815_s28 }
 0x5c0   : > { %5271 = vrot.lane.b32.xlu1 %v11080_v22, %s8814_s27 }
 0x5c2   : > { %5277 = vrot.lane.b32.xlu0 %v11056_v3, %s8814_s27 }
 0x5c4   : > { %5419 = vrot.lane.b32.xlu1 %v11114_v56, %s8815_s28 }
 0x5c6   : > { %5283 = vrot.lane.b32.xlu0 %v11146_v42, %s8814_s27  ;;  %v4333_v34 = vpop.permute.xlu1 %4332 }
 0x5c8   : > { %v4341_v35 = vpop.permute.xlu0 %4340  ;;  %5269 = vrot.lane.b32.xlu1 %v11051_v52, %s8814_s27 }
 0x5c9   : > { %v4348_v4 = vsel %vm287_vm0, %v4333_v34, %v4341_v35  ;;  %v4352_v31 = vsel %vm287_vm0, %v4341_v35, %v4333_v34 }
 0x5ca   : > { %5429 = vrot.lane.b32.xlu0 %v11146_v42, %s8815_s28  ;;  %v11214_v58 = vpop.permute.xlu1 %4295 }
 0x5cc   : > { %v11216_v51 = vpop.permute.xlu0 %4303  ;;  %5417 = vrot.lane.b32.xlu1 %v11080_v22, %s8815_s28 }
 0x5ce   : > { %5425 = vrot.lane.b32.xlu0 %v11086_v0, %s8815_s28  ;;  %v11222_v53 = vpop.permute.xlu1 %4571 }
 0x5d0   : > { %v11224_v27 = vpop.permute.xlu0 %4579  ;;  %5415 = vrot.lane.b32.xlu1 %v11051_v52, %s8815_s28 }
 0x5d2   : > { %5423 = vrot.lane.b32.xlu0 %v11056_v3, %s8815_s28  ;;  %v11233_v36 = vpop.permute.xlu1 %4717 }
 0x5d4   : > { %v11238_v46 = vpop.permute.xlu0 %4725  ;;  %5583 = vperm.xlu1 %8798, %v8622_v25  }
 0x5d6   : > { %5578 = vperm.xlu0 %8797, %v8621_v26   ;;  %v4335_v14 = vpop.permute.xlu1 %4334 }
 0x5d8   : > { %v4343_v50 = vpop.permute.xlu0 %4342  ;;  %5573 = vperm.xlu1 %8798, %v8620_v32   ;;  %v4357_v32 = vmul.f32 %v4348_v4, %v9007_v17 }
 0x5d9   : > { %v4349_v49 = vsel %vm287_vm0, %v4335_v14, %v4343_v50  ;;  %v4353_v61 = vsel %vm287_vm0, %v4343_v50, %v4335_v14  ;;  %v4356_v14 = vmul.f32 %v4352_v31, %v9010_v18 }
 0x5da   : > { %5568 = vperm.xlu0 %8797, %v8619_v63   ;;  %v4298_v21 = vpop.permute.xlu1 %4297  ;;  %v4359_v9 = vmul.f32 %v4349_v49, %v9007_v17  ;;  %v4358_v25 = vmul.f32 %v4353_v61, %v9010_v18  ;;  %v8551_v63 = vld [vmem:[%s13284_s1 + $0x380] sm:$0xff] }
 0x5dc   : > { %v4306_v48 = vpop.permute.xlu0 %4305 }
 0x5de   : > { %v11246_v24 = vpop.permute.xlu1 %4573 }
 0x5e0   : > { %v11248_v19 = vpop.permute.xlu0 %4581 }
 0x5e2   : > { %v11250_v43 = vpop.permute.xlu1 %4719 }
 0x5e4   : > { %v11252_v60 = vpop.permute.xlu0 %4727 }
 0x5e6   : > { %v4337_v55 = vpop.permute.xlu1 %4336 }
 0x5e8   : > { %v4345_v10 = vpop.permute.xlu0 %4344 }
 0x5e9   : > { %v4350_v44 = vsel %vm287_vm0, %v4337_v55, %v4345_v10  ;;  %v4354_v6 = vsel %vm287_vm0, %v4345_v10, %v4337_v55 }
 0x5ea   : > { %v4300_v57 = vpop.permute.xlu1 %4299  ;;  %v4361_v2 = vmul.f32 %v4350_v44, %v9007_v17  ;;  %v4360_v8 = vmul.f32 %v4354_v6, %v9010_v18  ;;  %v4312_v6 = vsel %vm239_vm1, %v4298_v21, %v4306_v48 }
 0x5eb   : > { %v4322_v31 = vmul.f32 %v4312_v6, %v13391_v59  ;;  %v8563_v6 = vld [vmem:[%s13284_s1 + $0x3a0] sm:$0xff] }
 0x5ec   : > { %v4308_v1 = vpop.permute.xlu0 %4307 }
 0x5ed   : > { %v4313_v50 = vsel %vm239_vm1, %v4300_v57, %v4308_v1 }
 0x5ee   : > { %v11254_v12 = vpop.permute.xlu1 %4575 }
 0x5f0   : > { %v11256_v33 = vpop.permute.xlu0 %4583 }
 0x5f2   : > { %v11258_v28 = vpop.permute.xlu1 %4721 }
 0x5f4   : > { %v11260_v38 = vpop.permute.xlu0 %4729 }
 0x5f6   : > { %v11262_v40 = vpop.permute.xlu1 %4981 }
 0x5f8   : > { %v11264_v41 = vpop.permute.xlu0 %4989 }
 0x5fa   : > { %v4339_v39 = vpop.permute.xlu1 %4338 }
 0x5fc   : > { %v4347_v45 = vpop.permute.xlu0 %4346 }
 0x5fd   : > { %v4351_v47 = vsel %vm287_vm0, %v4339_v39, %v4347_v45  ;;  %v4355_v62 = vsel %vm287_vm0, %v4347_v45, %v4339_v39  ;;  %v8552_v39 = vld [vmem:[%s13284_s1 + $0x388] sm:$0xff]  ;;  %v4317_v45 = vsel %vm239_vm1, %v4308_v1, %v4300_v57  ;;  %v4324_v57 = vmul.f32 %v4313_v50, %v13391_v59  ;;  %v8554_v50 = vld [vmem:[%s13284_s1 + $0x398] sm:$0xff] }
 0x5fe   : > { %v4362_v5 = vmul.f32 %v4355_v62, %v9010_v18  ;;  %v11275_v20 = vpop.permute.xlu1 %4979  ;;  %v4363_v13 = vmul.f32 %v4351_v47, %v9007_v17  ;;  %v4323_v1 = vmul.f32 %v4317_v45, %v13390_v15 }
 0x600   : > { %v11282_v29 = vpop.permute.xlu0 %4987  ;;  %4405 = vmatprep.subr.mxu1 %v4363_v13  ;;  %v4316_v13 = vsel %vm239_vm1, %v4306_v48, %v4298_v21  ;;  %v8553_v21 = vld [vmem:[%s13284_s1 + $0x390] sm:$0xff]  ;;  %v4589_v48 = vsel %vm539_vm3, %v11254_v12, %v11256_v33 }
 0x601   : > { %4406 = vmatpush1.msra.mxu1 %v4362_v5  ;;  %v4311_v5 = vsel %vm239_vm1, %v11214_v58, %v11216_v51 }
 0x602   : > { %4407 = vmatprep.subr.mxu1 %v4361_v2  ;;  %v4302_v54 = vpop.permute.xlu1 %4301 }
 0x603   : > { %4408 = vmatpush1.msra.mxu1 %v4360_v8 }
 0x604   : > { %v11292_v26 = vpop.permute.xlu0 %5135  ;;  %4409 = vmatprep.subr.mxu1 %v4359_v9  ;;  %v4315_v9 = vsel %vm239_vm1, %v11216_v51, %v11214_v58  ;;  %v4588_v58 = vsel %vm539_vm3, %v11246_v24, %v11248_v19  ;;  %v4600_v51 = vmul.f32 %v4589_v48, %v13393_v7  ;;  %v8550_v48 = vld [vmem:[%s13284_s1 + $0x378] sm:$0xff] }
 0x605   : > { %4410 = vmatpush1.msra.mxu1 %v4358_v25  ;;  %v4321_v25 = vmul.f32 %v4316_v13, %v13390_v15 }
 0x606   : > { %4411 = vmatprep.subr.mxu1 %v4357_v32  ;;  %v4578_v34 = vpop.permute.xlu1 %4577  ;;  %v4593_v32 = vsel %vm539_vm3, %v11256_v33, %v11254_v12  ;;  %v4592_v12 = vsel %vm539_vm3, %v11248_v19, %v11246_v24  ;;  %v4591_v24 = vsel %vm539_vm3, %v11224_v27, %v11222_v53 }
 0x607   : > { %4412 = vmatpush1.msra.mxu1 %v4356_v14  ;;  %v4599_v33 = vmul.f32 %v4593_v32, %v13392_v23  ;;  %v4597_v45 = vmul.f32 %v4592_v12, %v13392_v23  ;;  %v4739_v32 = vsel %vm697_vm4, %v11260_v38, %v11258_v28 }
 0x608   : > { %v4310_v35 = vpop.permute.xlu0 %4309  ;;  %8555 = vmatmul.mubr.msk.f32.vlgmr.msra.gmra.mxu1 %vm320_vm2, %v8551_v63  ;;  %v4320_v63 = vmul.f32 %v4311_v5, %v13391_v59 }
 0x609   : > { %v4314_v55 = vsel %vm239_vm1, %v4302_v54, %v4310_v35  ;;  %v4318_v10 = vsel %vm239_vm1, %v4310_v35, %v4302_v54  ;;  %4451 = vmatprep.mubr.f32.mxu1 %v13389_v37 }
 0x60a   : > { %v4325_v44 = vmul.f32 %v4318_v10, %v13390_v15  ;;  %v11313_v47 = vpop.permute.xlu1 %4723  ;;  %v4326_v62 = vmul.f32 %v4314_v55, %v13391_v59  ;;  %v8547_v55 = vld [vmem:[%s13284_s1 + $0x360] sm:$0xff]  ;;  %v4587_v10 = vsel %vm539_vm3, %v11222_v53, %v11224_v27  ;;  %v8548_v53 = vld [vmem:[%s13284_s1 + $0x368] sm:$0xff]  ;;  %v4595_v27 = vmul.f32 %v4591_v24, %v13392_v23 }
 0x60c   : > { %v4586_v49 = vpop.permute.xlu0 %4585  ;;  %8556 = vmatmul.mubr.msk.f32.gmra.mxu1 %vm320_vm2, %v8552_v39  ;;  %4506 = vmatprep.subr.mxu0 %v4326_v62  ;;  %v4598_v39 = vmul.f32 %v4588_v58, %v13393_v7  ;;  %v4734_v58 = vsel %vm697_vm4, %v11250_v43, %v11252_v60 }
 0x60d   : > { %v4590_v61 = vsel %vm539_vm3, %v4578_v34, %v4586_v49  ;;  %v4594_v2 = vsel %vm539_vm3, %v4586_v49, %v4578_v34  ;;  %4507 = vmatpush1.msra.mxu0 %v4325_v44  ;;  %4457 = vmatprep.mubr.f32.mxu1 %v13389_v37  ;;  %v4319_v34 = vmul.f32 %v4315_v9, %v13390_v15  ;;  %v8549_v49 = vld [vmem:[%s13284_s1 + $0x370] sm:$0xff] }
 0x60e   : > { %v4601_v4 = vmul.f32 %v4594_v2, %v13392_v23  ;;  %4508 = vmatprep.subr.mxu0 %v4324_v57  ;;  %v11340_v8 = vpop.permute.xlu1 %4983  ;;  %v4602_v54 = vmul.f32 %v4590_v61, %v13393_v7  ;;  %v4596_v44 = vmul.f32 %v4587_v10, %v13393_v7  ;;  %v8564_v57 = vld [vmem:[%s13284_s1 + $0x3a8] sm:$0xff] }
 0x60f   : > { %4509 = vmatpush1.msra.mxu0 %v4323_v1 }
 0x610   : > { %v11353_v14 = vpop.permute.xlu0 %4985  ;;  %8557 = vmatmul.mubr.msk.f32.gmra.mxu1 %vm320_vm2, %v8553_v21  ;;  %4510 = vmatprep.subr.mxu0 %v4322_v31 }
 0x611   : > { %4644 = vmatprep.subr.mxu1 %v4602_v54  ;;  %4511 = vmatpush1.msra.mxu0 %v4321_v25  ;;  %v4735_v54 = vsel %vm697_vm4, %v11258_v28, %v11260_v38  ;;  %v8565_v25 = vld [vmem:[%s13284_s1 + $0x3b0] sm:$0xff]  ;;  %v4738_v28 = vsel %vm697_vm4, %v11252_v60, %v11250_v43  ;;  %v8566_v43 = vld [vmem:[%s13284_s1 + $0x3b8] sm:$0xff]  ;;  %v4737_v60 = vsel %vm697_vm4, %v11238_v46, %v11233_v36 }
 0x612   : > { %4645 = vmatpush1.msra.mxu1 %v4601_v4  ;;  %4512 = vmatprep.subr.mxu0 %v4320_v63  ;;  %v11368_v35 = vpop.permute.xlu1 %5129  ;;  %v13429_v4 = vld [vmem:[#allocation7_spill] sm:$0xff] }
 0x613   : > { %4646 = vmatprep.subr.mxu1 %v4600_v51  ;;  %4463 = vmatprep.mubr.f32.mxu1 %v13389_v37  ;;  %v4746_v38 = vmul.f32 %v4735_v54, %v13429_v4 }
 0x614   : > { %4513 = vmatpush1.msra.mxu0 %v4319_v34  ;;  %4647 = vmatpush1.msra.mxu1 %v4599_v33  ;;  %v11385_v19 = vpop.permute.xlu0 %5133  ;;  %v4733_v34 = vsel %vm697_vm4, %v11233_v36, %v11238_v46  ;;  %v8571_v36 = vld [vmem:[%s13284_s1 + $0x3c0] sm:$0xff] }
 0x615   : > { %8558 = vmatmul.mubr.msk.f32.gmra.mxu1 %vm320_vm2, %v8554_v50  ;;  %8559 = vmatmul.mubr.msk.f32.vlgmr.msra.gmra.mxu0 %vm320_vm2, %v8547_v55  ;;  %v4744_v50 = vmul.f32 %v4734_v58, %v13429_v4  ;;  %v4742_v10 = vmul.f32 %v4733_v34, %v13429_v4  ;;  %v8579_v46 = vld [vmem:[%s13284_s1 + $0x3e0] sm:$0xff] }
 0x616   : > { %4648 = vmatprep.subr.mxu1 %v4598_v39  ;;  %v11392_v62 = vpop.permute.xlu1 %5127  ;;  %4552 = vmatprep.mubr.f32.mxu0 %v13389_v37 }
 0x617   : > { %4649 = vmatpush1.msra.mxu1 %v4597_v45  ;;  %4684 = vmatprep.mubr.f32.mxu1 %v13389_v37 }
 0x618   : > { %4650 = vmatprep.subr.mxu1 %v4596_v44  ;;  %v11403_v5 = vpop.permute.xlu0 %5131  ;;  %v4995_v44 = vsel %vm969_vm5, %v11262_v40, %v11264_v41 }
 0x619   : > { %4651 = vmatpush1.msra.mxu1 %v4595_v27  ;;  %8560 = vmatmul.mubr.msk.f32.gmra.mxu0 %vm320_vm2, %v8548_v53 }
 0x61a   : > { %8567 = vmatmul.mubr.msk.f32.vlgmr.msra.gmra.mxu1 %vm320_vm2, %v8563_v6  ;;  %4904 = vmatprep.subr.mxu1 %v11146_v42  ;;  %v11408_v13 = vpop.permute.xlu1 %4977  ;;  %v4999_v6 = vsel %vm969_vm5, %v11264_v41, %v11262_v40  ;;  %v8572_v40 = vld [vmem:[%s13284_s1 + $0x3c8] sm:$0xff] }
 0x61b   : > { %4905 = vmatpush1.msra.mxu1 %v11142_v30  ;;  %4558 = vmatprep.mubr.f32.mxu0 %v13389_v37  ;;  %v8580_v41 = vld [vmem:[%s13284_s1 + $0x3e8] sm:$0xff] }
 0x61c   : > { %4906 = vmatprep.subr.mxu1 %v11118_v16  ;;  %4690 = vmatprep.mubr.f32.mxu1 %v13389_v37  ;;  %v4732_v1 = vpop.permute.xlu0 %4731 }
 0x61d   : > { %4907 = vmatpush1.msra.mxu1 %v11114_v56  ;;  %v4736_v61 = vsel %vm697_vm4, %v11313_v47, %v4732_v1  ;;  %v4740_v2 = vsel %vm697_vm4, %v4732_v1, %v11313_v47  ;;  %8561 = vmatmul.mubr.msk.f32.gmra.mxu0 %vm320_vm2, %v8549_v49  ;;  %v13430_v47 = vld [vmem:[#allocation6_spill] sm:$0xff]  ;;  %v13431_v49 = vld [vmem:[#allocation8_spill] sm:$0xff] }
 0x61e   : > { %8568 = vmatmul.mubr.msk.f32.gmra.mxu1 %vm320_vm2, %v8564_v57  ;;  %4908 = vmatprep.subr.mxu1 %v11086_v0  ;;  %v11430_v21 = vpop.permute.xlu1 %5125  ;;  %v4748_v31 = vmul.f32 %v4736_v61, %v13429_v4  ;;  %v4747_v9 = vmul.f32 %v4740_v2, %v13430_v47  ;;  %v4745_v12 = vmul.f32 %v4739_v32, %v13430_v47  ;;  %v13432_v61 = vld [vmem:[#allocation9_spill] sm:$0xff] }
 0x61f   : > { %4909 = vmatpush1.msra.mxu1 %v11080_v22  ;;  %4564 = vmatprep.mubr.f32.mxu0 %v13389_v37  ;;  %v4743_v55 = vmul.f32 %v4738_v28, %v13430_v47  ;;  %v4741_v39 = vmul.f32 %v4737_v60, %v13430_v47  ;;  %v4994_v32 = vsel %vm969_vm5, %v11275_v20, %v11282_v29  ;;  %v8581_v60 = vld [vmem:[%s13284_s1 + $0x3f0] sm:$0xff] }
 0x620   : > { %4910 = vmatprep.subr.mxu1 %v11056_v3  ;;  %4696 = vmatprep.mubr.f32.mxu1 %v13389_v37  ;;  %v11452_v63 = vpop.permute.xlu0 %5281 }
 0x621   : > { %4911 = vmatpush1.msra.mxu1 %v11051_v52  ;;  %8562 = vmatmul.mubr.msk.f32.gmra.mxu0 %vm320_vm2, %v8550_v48 }
 0x622   : > { %8569 = vmatmul.mubr.msk.f32.gmra.mxu1 %vm320_vm2, %v8565_v25  ;;  %4790 = vmatprep.subr.mxu0 %v4748_v31  ;;  %v11466_v51 = vpop.permute.xlu1 %5123  ;;  %v5005_v31 = vmul.f32 %v4995_v44, %v13431_v49  ;;  %v5006_v25 = vmul.f32 %v4999_v6, %v13432_v61 }
 0x623   : > { %4791 = vmatpush1.msra.mxu0 %v4747_v9  ;;  %4702 = vmatprep.mubr.f32.mxu1 %v13389_v37  ;;  %v5139_v6 = vsel %vm1127_vm6, %v11466_v51, %v11403_v5 }
 0x624   : > { %4792 = vmatprep.subr.mxu0 %v4746_v38  ;;  %v11481_v33 = vpop.permute.xlu0 %5279  ;;  %4830 = vmatprep.mubr.f32.mxu0 %v13389_v37  ;;  %v13433_v38 = vld [vmem:[#allocation11_spill] sm:$0xff] }
 0x625   : > { %4793 = vmatpush1.msra.mxu0 %v4745_v12 }
 0x626   : > { %8570 = vmatmul.mubr.msk.f32.gmra.mxu1 %vm320_vm2, %v8566_v43  ;;  %4794 = vmatprep.subr.mxu0 %v4744_v50  ;;  %v11488_v24 = vpop.permute.xlu1 %5275  ;;  %v8573_v43 = vld [vmem:[%s13284_s1 + $0x3d0] sm:$0xff] }
 0x627   : > { %4795 = vmatpush1.msra.mxu0 %v4743_v55  ;;  %4944 = vmatprep.mubr.f32.mxu1 %v13389_v37  ;;  %v5003_v55 = vmul.f32 %v4994_v32, %v13431_v49 }
 0x628   : > { %4796 = vmatprep.subr.mxu0 %v4742_v10  ;;  %v4992_v45 = vpop.permute.xlu0 %4991  ;;  %v5141_v10 = vsel %vm1127_vm6, %v11392_v62, %v11292_v26 }
 0x629   : > { %4797 = vmatpush1.msra.mxu0 %v4741_v39  ;;  %v4996_v53 = vsel %vm969_vm5, %v11340_v8, %v4992_v45  ;;  %v5000_v27 = vsel %vm969_vm5, %v4992_v45, %v11340_v8  ;;  %v4998_v8 = vsel %vm969_vm5, %v11282_v29, %v11275_v20  ;;  %v4997_v20 = vsel %vm969_vm5, %v11353_v14, %v11408_v13  ;;  %v13434_v29 = vld [vmem:[#allocation10_spill] sm:$0xff] }
 0x62a   : > { %v5007_v57 = vmul.f32 %v4996_v53, %v13431_v49  ;;  %8575 = vmatmul.mubr.msk.f32.vlgmr.msra.gmra.mxu0 %vm320_vm2, %v8571_v36  ;;  %8583 = vmatmul.mubr.msk.f32.vlgmr.msra.gmra.mxu1 %vm320_vm2, %v8579_v46  ;;  %v11515_v1 = vpop.permute.xlu1 %5273  ;;  %v5008_v2 = vmul.f32 %v5000_v27, %v13432_v61  ;;  %v5004_v28 = vmul.f32 %v4998_v8, %v13432_v61  ;;  %v8574_v53 = vld [vmem:[%s13284_s1 + $0x3d8] sm:$0xff] }
 0x62b   : > { %4836 = vmatprep.mubr.f32.mxu0 %v13389_v37  ;;  %4950 = vmatprep.mubr.f32.mxu1 %v13389_v37  ;;  %v4993_v39 = vsel %vm969_vm5, %v11408_v13, %v11353_v14  ;;  %v5002_v36 = vmul.f32 %v4997_v20, %v13432_v61  ;;  %v5151_v14 = vmul.f32 %v5141_v10, %v13434_v29  ;;  %v8582_v27 = vld [vmem:[%s13284_s1 + $0x3f8] sm:$0xff]  ;;  %v8588_v20 = vld [vmem:[%s13284_s1 + $0x408] sm:$0xff] }
 0x62c   : > { %v5138_v48 = vpop.permute.xlu0 %5137  ;;  %5050 = vmatprep.subr.mxu0 %v5008_v2  ;;  %v5140_v13 = vsel %vm1127_vm6, %v11430_v21, %v11385_v19  ;;  %v5147_v8 = vmul.f32 %v5139_v6, %v13434_v29  ;;  %v13437_v10 = vld [vmem:[#allocation15_spill] sm:$0xff]  ;;  %v8597_v6 = vld [vmem:[%s13284_s1 + $0x430] sm:$0xff] }
 0x62d   : > { %v5142_v54 = vsel %vm1127_vm6, %v11368_v35, %v5138_v48  ;;  %v5146_v9 = vsel %vm1127_vm6, %v5138_v48, %v11368_v35  ;;  %5051 = vmatpush1.msra.mxu0 %v5007_v57  ;;  %v5145_v35 = vsel %vm1127_vm6, %v11292_v26, %v11392_v62  ;;  %v5144_v26 = vsel %vm1127_vm6, %v11385_v19, %v11430_v21 }
 0x62e   : > { %8576 = vmatmul.mubr.msk.f32.gmra.mxu0 %vm320_vm2, %v8572_v40  ;;  %8584 = vmatmul.mubr.msk.f32.gmra.mxu1 %vm320_vm2, %v8580_v41  ;;  %v11544_v58 = vpop.permute.xlu1 %5421  ;;  %v5154_v34 = vmul.f32 %v5146_v9, %v13433_v38  ;;  %v5153_v12 = vmul.f32 %v5142_v54, %v13434_v29  ;;  %v5152_v46 = vmul.f32 %v5145_v35, %v13433_v38  ;;  %v8587_v40 = vld [vmem:[%s13284_s1 + $0x400] sm:$0xff]  ;;  %v13435_v9 = vld [vmem:[#allocation12_spill] sm:$0xff] }
 0x62f   : > { %5052 = vmatprep.subr.mxu0 %v5006_v25  ;;  %4842 = vmatprep.mubr.f32.mxu0 %v13389_v37  ;;  %v5001_v62 = vmul.f32 %v4993_v39, %v13431_v49  ;;  %v5143_v19 = vsel %vm1127_vm6, %v11403_v5, %v11466_v51  ;;  %v5150_v21 = vmul.f32 %v5144_v26, %v13433_v38  ;;  %v8595_v54 = vld [vmem:[%s13284_s1 + $0x420] sm:$0xff] }
 0x630   : > { %4956 = vmatprep.mubr.f32.mxu1 %v13389_v37  ;;  %5053 = vmatpush1.msra.mxu0 %v5005_v31  ;;  %v11565_v50 = vpop.permute.xlu0 %5427  ;;  %v5149_v2 = vmul.f32 %v5140_v13, %v13434_v29  ;;  %v5148_v5 = vmul.f32 %v5143_v19, %v13433_v38  ;;  %v5291_v41 = vsel %vm1285_vm7, %v11452_v63, %v11515_v1  ;;  %v13438_v26 = vld [vmem:[#allocation14_spill] sm:$0xff] }
 0x631   : > { %5054 = vmatprep.subr.mxu0 %v5004_v28  ;;  %5196 = vmatprep.subr.mxu1 %v5154_v34  ;;  %v13436_v28 = vld [vmem:[#allocation13_spill] sm:$0xff]  ;;  %v5287_v35 = vsel %vm1285_vm7, %v11515_v1, %v11452_v63 }
 0x632   : > { %8577 = vmatmul.mubr.msk.f32.gmra.mxu0 %vm320_vm2, %v8573_v43  ;;  %8585 = vmatmul.mubr.msk.f32.gmra.mxu1 %vm320_vm2, %v8581_v60  ;;  %v5272_v45 = vpop.permute.xlu1 %5271  ;;  %v8596_v60 = vld [vmem:[%s13284_s1 + $0x428] sm:$0xff] }
 0x633   : > { %5055 = vmatpush1.msra.mxu0 %v5003_v55  ;;  %5197 = vmatpush1.msra.mxu1 %v5153_v12  ;;  %v5298_v12 = vmul.f32 %v5291_v41, %v13436_v28  ;;  %v5290_v43 = vsel %vm1285_vm7, %v11481_v33, %v5272_v45 }
 0x634   : > { %5056 = vmatprep.subr.mxu0 %v5002_v36  ;;  %5198 = vmatprep.subr.mxu1 %v5152_v46  ;;  %v5278_v44 = vpop.permute.xlu0 %5277  ;;  %v5297_v36 = vmul.f32 %v5287_v35, %v13435_v9  ;;  %v5286_v46 = vsel %vm1285_vm7, %v5272_v45, %v11481_v33  ;;  %v8589_v33 = vld [vmem:[%s13284_s1 + $0x410] sm:$0xff]  ;;  %v5296_v45 = vmul.f32 %v5290_v43, %v13436_v28  ;;  %v8603_v35 = vld [vmem:[%s13284_s1 + $0x440] sm:$0xff] }
 0x635   : > { %4848 = vmatprep.mubr.f32.mxu0 %v13389_v37  ;;  %4962 = vmatprep.mubr.f32.mxu1 %v13389_v37  ;;  %v5295_v19 = vmul.f32 %v5286_v46, %v13435_v9  ;;  %v8605_v43 = vld [vmem:[%s13284_s1 + $0x450] sm:$0xff] }
 0x636   : > { %5057 = vmatpush1.msra.mxu0 %v5001_v62  ;;  %5199 = vmatpush1.msra.mxu1 %v5151_v14  ;;  %v5420_v57 = vpop.permute.xlu1 %5419 }
 0x637   : > { %8578 = vmatmul.mubr.msk.f32.gmra.mxu0 %vm320_vm2, %v8574_v53  ;;  %8586 = vmatmul.mubr.msk.f32.gmra.mxu1 %vm320_vm2, %v8582_v27  ;;  %v5433_v53 = vsel %vm1443_vm8, %v5420_v57, %v11565_v50 }
 0x638   : > { %5200 = vmatprep.subr.mxu1 %v5150_v21  ;;  %5090 = vmatprep.mubr.f32.mxu0 %v13389_v37  ;;  %v5284_v51 = vpop.permute.xlu0 %5283 }
 0x639   : > { %5201 = vmatpush1.msra.mxu1 %v5149_v2  ;;  %5236 = vmatprep.mubr.f32.mxu1 %v13389_v37  ;;  %v5288_v48 = vsel %vm1285_vm7, %v11488_v24, %v5284_v51  ;;  %v5292_v31 = vsel %vm1285_vm7, %v5284_v51, %v11488_v24  ;;  %v5443_v2 = vmul.f32 %v5433_v53, %v13438_v26 }
 0x63a   : > { %5202 = vmatprep.subr.mxu1 %v5148_v5  ;;  %v5299_v25 = vmul.f32 %v5288_v48, %v13435_v9  ;;  %v5270_v32 = vpop.permute.xlu1 %5269  ;;  %v5300_v34 = vmul.f32 %v5292_v31, %v13436_v28  ;;  %v8590_v48 = vld [vmem:[%s13284_s1 + $0x418] sm:$0xff] }
 0x63b   : > { %5203 = vmatpush1.msra.mxu1 %v5147_v8  ;;  %8591 = vmatmul.mubr.msk.f32.vlgmr.msra.gmra.mxu0 %vm320_vm2, %v8587_v40  ;;  %v5289_v62 = vsel %vm1285_vm7, %v5278_v44, %v5270_v32  ;;  %v5285_v27 = vsel %vm1285_vm7, %v5270_v32, %v5278_v44  ;;  %v8598_v31 = vld [vmem:[%s13284_s1 + $0x438] sm:$0xff] }
 0x63c   : > { %8599 = vmatmul.mubr.msk.f32.vlgmr.msra.gmra.mxu1 %vm320_vm2, %v8595_v54  ;;  %5096 = vmatprep.mubr.f32.mxu0 %v13389_v37  ;;  %v5430_v24 = vpop.permute.xlu0 %5429  ;;  %v5294_v44 = vmul.f32 %v5289_v62, %v13436_v28  ;;  %v5293_v8 = vmul.f32 %v5285_v27, %v13435_v9 }
 0x63d   : > { %5242 = vmatprep.mubr.f32.mxu1 %v13389_v37  ;;  %v5434_v63 = vsel %vm1443_vm8, %v11544_v58, %v5430_v24  ;;  %v5438_v1 = vsel %vm1443_vm8, %v5430_v24, %v11544_v58  ;;  %5342 = vmatprep.subr.mxu0 %v5300_v34  ;;  %v5437_v58 = vsel %vm1443_vm8, %v11565_v50, %v5420_v57  ;;  %v8611_v24 = vld [vmem:[%s13284_s1 + $0x460] sm:$0xff] }
 0x63e   : > { %5343 = vmatpush1.msra.mxu0 %v5299_v25  ;;  %v5418_v55 = vpop.permute.xlu1 %5417  ;;  %v5446_v39 = vmul.f32 %v5438_v1, %v13437_v10  ;;  %v5445_v14 = vmul.f32 %v5434_v63, %v13438_v26  ;;  %v5444_v57 = vmul.f32 %v5437_v58, %v13437_v10  ;;  %v8613_v63 = vld [vmem:[%s13284_s1 + $0x470] sm:$0xff]  ;;  %v8606_v1 = vld [vmem:[%s13284_s1 + $0x458] sm:$0xff] }
 0x63f   : > { %8592 = vmatmul.mubr.msk.f32.gmra.mxu0 %vm320_vm2, %v8588_v20  ;;  %5344 = vmatprep.subr.mxu0 %v5298_v12  ;;  %v8604_v20 = vld [vmem:[%s13284_s1 + $0x448] sm:$0xff] }
 0x640   : > { %8600 = vmatmul.mubr.msk.f32.gmra.mxu1 %vm320_vm2, %v8596_v60  ;;  %5102 = vmatprep.mubr.f32.mxu0 %v13389_v37  ;;  %v5426_v13 = vpop.permute.xlu0 %5425  ;;  %v8612_v12 = vld [vmem:[%s13284_s1 + $0x468] sm:$0xff]  ;;  %v8614_v60 = vld [vmem:[%s13284_s1 + $0x478] sm:$0xff] }
 0x641   : > { %5248 = vmatprep.mubr.f32.mxu1 %v13389_v37  ;;  %5345 = vmatpush1.msra.mxu0 %v5297_v36  ;;  %v5436_v21 = vsel %vm1443_vm8, %v5426_v13, %v5418_v55  ;;  %v5432_v50 = vsel %vm1443_vm8, %v5418_v55, %v5426_v13 }
 0x642   : > { %5346 = vmatprep.subr.mxu0 %v5296_v45  ;;  %5488 = vmatprep.subr.mxu1 %v5446_v39  ;;  %v5416_v5 = vpop.permute.xlu1 %5415  ;;  %v5442_v54 = vmul.f32 %v5436_v21, %v13437_v10  ;;  %v5441_v25 = vmul.f32 %v5432_v50, %v13438_v26 }
 0x643   : > { %8593 = vmatmul.mubr.msk.f32.gmra.mxu0 %vm320_vm2, %v8589_v33  ;;  %5489 = vmatpush1.msra.mxu1 %v5445_v14 }
 0x644   : > { %8601 = vmatmul.mubr.msk.f32.gmra.mxu1 %vm320_vm2, %v8597_v6  ;;  %5347 = vmatpush1.msra.mxu0 %v5295_v19  ;;  %v5424_v51 = vpop.permute.xlu0 %5423 }
 0x645   : > { %5348 = vmatprep.subr.mxu0 %v5294_v44  ;;  %5490 = vmatprep.subr.mxu1 %v5444_v57  ;;  %v5431_v40 = vsel %vm1443_vm8, %v5416_v5, %v5424_v51  ;;  %v5435_v41 = vsel %vm1443_vm8, %v5424_v51, %v5416_v5 }
 0x646   : > { %5108 = vmatprep.mubr.f32.mxu0 %v13389_v37  ;;  %5254 = vmatprep.mubr.f32.mxu1 %v13389_v37  ;;  %v5440_v32 = vmul.f32 %v5435_v41, %v13437_v10  ;;  %v5439_v34 = vmul.f32 %v5431_v40, %v13438_v26 }
 0x647   : > { %5349 = vmatpush1.msra.mxu0 %v5293_v8  ;;  %5491 = vmatpush1.msra.mxu1 %v5443_v2 }
 0x648   : > { %8594 = vmatmul.mubr.msk.f32.gmra.mxu0 %vm320_vm2, %v8590_v48  ;;  %8602 = vmatmul.mubr.msk.f32.gmra.mxu1 %vm320_vm2, %v8598_v31 }
 0x649   : > { %5492 = vmatprep.subr.mxu1 %v5442_v54  ;;  %5382 = vmatprep.mubr.f32.mxu0 %v13389_v37 }
 0x64a   : > { %5493 = vmatpush1.msra.mxu1 %v5441_v25  ;;  %5528 = vmatprep.mubr.f32.mxu1 %v13389_v37 }
 0x64b   : > { %5494 = vmatprep.subr.mxu1 %v5440_v32 }
 0x64c   : > { %8607 = vmatmul.mubr.msk.f32.vlgmr.msra.gmra.mxu0 %vm320_vm2, %v8603_v35  ;;  %5495 = vmatpush1.msra.mxu1 %v5439_v34 }
 0x64d   : > { %8615 = vmatmul.mubr.msk.f32.vlgmr.msra.gmra.mxu1 %vm320_vm2, %v8611_v24  ;;  %5388 = vmatprep.mubr.f32.mxu0 %v13389_v37 }
 0x64e   : > { %5534 = vmatprep.mubr.f32.mxu1 %v13389_v37 }
 0x650   : > { %8608 = vmatmul.mubr.msk.f32.gmra.mxu0 %vm320_vm2, %v8604_v20 }
 0x651   : > { %8616 = vmatmul.mubr.msk.f32.gmra.mxu1 %vm320_vm2, %v8612_v12  ;;  %5394 = vmatprep.mubr.f32.mxu0 %v13389_v37 }
 0x652   : > { %5540 = vmatprep.mubr.f32.mxu1 %v13389_v37 }
 0x654   : > { %8609 = vmatmul.mubr.msk.f32.gmra.mxu0 %vm320_vm2, %v8605_v43 }
 0x655   : > { %8617 = vmatmul.mubr.msk.f32.gmra.mxu1 %vm320_vm2, %v8613_v63  ;;  %5400 = vmatprep.mubr.f32.mxu0 %v13389_v37 }
 0x656   : > { %5546 = vmatprep.mubr.f32.mxu1 %v13389_v37 }
 0x658   : > { %8610 = vmatmul.mubr.msk.f32.gmra.mxu0 %vm320_vm2, %v8606_v1 }
 0x659   : > { %8618 = vmatmul.mubr.msk.f32.gmra.mxu1 %vm320_vm2, %v8614_v60  ;;  %5768 = vmatprep.mubr.f32.mxu0 %v13389_v37 }
 0x65a   : > { %5869 = vmatprep.mubr.f32.mxu1 %v13389_v37 }
 0x6c8   : > { %v4447_v55 = vpop.f32.mrf.mxu1 }
 0x6ca   : > { %v4449_v39 = vpop.f32.mrf.mxu1 }
 0x6cc   : > { %v4453_v36 = vpop.f32.mrf.mxu1 }
 0x6ce   : > { %v11754_v46 = vpop.f32.mrf.mxu1 }
 0x6d0   : > { %v11756_v14 = vpop.f32.mrf.mxu1 }
 0x6d2   : > { %v11758_v58 = vpop.f32.mrf.mxu1 }
 0x6d5   : > { %v4465_v62 = vpop.f32.mrf.mxu1  ;;  %v4548_v13 = vpop.f32.mrf.mxu0 }
 0x6d6   : > { %v4549_v0 = vadd.f32 %v4548_v13, %v4447_v55 }
 0x6d7   : > { %v4467_v33 = vpop.f32.mrf.mxu1  ;;  %v4550_v45 = vpop.f32.mrf.mxu0 }
 0x6d8   : > { %v4551_v52 = vadd.f32 %v4550_v45, %v4449_v39 }
 0x6d9   : > { %v4554_v53 = vpop.f32.mrf.mxu0 }
 0x6da   : > { %v4686_v27 = vpop.f32.mrf.mxu1 }
 0x6db   : > { %v4556_v6 = vpop.f32.mrf.mxu0  ;;  %v4709_v26 = vadd.f32 %v4686_v27, %v4549_v0 }
 0x6dc   : > { %v4688_v19 = vpop.f32.mrf.mxu1  ;;  %v4557_v55 = vadd.f32 %v4556_v6, %v11754_v46 }
 0x6dd   : > { %v11760_v21 = vpop.f32.mrf.mxu0  ;;  %v4710_v9 = vadd.f32 %v4688_v19, %v4551_v52 }
 0x6de   : > { %v4692_v50 = vpop.f32.mrf.mxu1 }
 0x6df   : > { %v11762_v44 = vpop.f32.mrf.mxu0 }
 0x6e0   : > { %v4694_v57 = vpop.f32.mrf.mxu1 }
 0x6e1   : > { %v4566_v2 = vpop.f32.mrf.mxu0  ;;  %v4712_v52 = vadd.f32 %v4694_v57, %v4557_v55 }
 0x6e2   : > { %v4567_v8 = vadd.f32 %v4566_v2, %v4465_v62  ;;  %v11764_v5 = vpop.f32.mrf.mxu1 }
 0x6e3   : > { %v4568_v51 = vpop.f32.mrf.mxu0 }
 0x6e4   : > { %v4569_v40 = vadd.f32 %v4568_v51, %v4467_v33  ;;  %v11766_v41 = vpop.f32.mrf.mxu1 }
 0x6e6   : > { %v4704_v48 = vpop.f32.mrf.mxu1 }
 0x6e7   : > { %v4715_v31 = vadd.f32 %v4704_v48, %v4567_v8 }
 0x6e8   : > { %v4706_v54 = vpop.f32.mrf.mxu1 }
 0x6e9   : > { %v4716_v25 = vadd.f32 %v4706_v54, %v4569_v40 }
 0x6ea   : > { %v4832_v32 = vpop.f32.mrf.mxu0  ;;  %v4946_v34 = vpop.f32.mrf.mxu1 }
 0x6eb   : > { %v4855_v29 = vadd.f32 %v4832_v32, %v4709_v26  ;;  %v11793_v32 = vpop.permute.xlu0 %5578 }
 0x6ec   : > { %v4834_v35 = vpop.f32.mrf.mxu0  ;;  %v4948_v24 = vpop.f32.mrf.mxu1 }
 0x6ee   : > { %v4838_v20 = vpop.f32.mrf.mxu0  ;;  %v4952_v12 = vpop.f32.mrf.mxu1 }
 0x6f0   : > { %v4840_v43 = vpop.f32.mrf.mxu0  ;;  %v4954_v63 = vpop.f32.mrf.mxu1 }
 0x6f2   : > { %v11768_v1 = vpop.f32.mrf.mxu0  ;;  %v11770_v60 = vpop.f32.mrf.mxu1 }
 0x6f4   : > { %v11772_v62 = vpop.f32.mrf.mxu0  ;;  %v11774_v33 = vpop.f32.mrf.mxu1 }
 0x6f7   : > { %v4850_v2 = vpop.f32.mrf.mxu0  ;;  %v4964_v8 = vpop.f32.mrf.mxu1 }
 0x6f8   : > { %v4861_v51 = vadd.f32 %v4850_v2, %v4715_v31  ;;  %v4856_v2 = vadd.f32 %v4834_v35, %v4710_v9 }
 0x6f9   : > { %v4852_v40 = vpop.f32.mrf.mxu0  ;;  %v4966_v48 = vpop.f32.mrf.mxu1 }
 0x6fa   : > { %v11776_v54 = vadd.f32 %v4964_v8, %v4861_v51  ;;  %v4862_v42 = vadd.f32 %v4852_v40, %v4716_v25  ;;  %v4555_v25 = vadd.f32 %v4554_v53, %v4453_v36  ;;  %v4970_v39 = vadd.f32 %v4948_v24, %v4856_v2 }
 0x6fb   : > { %v5092_v30 = vpop.f32.mrf.mxu0  ;;  %v4858_v36 = vadd.f32 %v4840_v43, %v4712_v52 }
 0x6fc   : > { %v11778_v16 = vadd.f32 %v4966_v48, %v4862_v42  ;;  %v5238_v56 = vpop.f32.mrf.mxu1  ;;  %v4969_v42 = vadd.f32 %v4946_v34, %v4855_v29  ;;  %v4711_v0 = vadd.f32 %v4692_v50, %v4555_v25 }
 0x6fd   : > { %v5094_v22 = vpop.f32.mrf.mxu0  ;;  %v4972_v57 = vadd.f32 %v4954_v63, %v4858_v36 }
 0x6fe   : > { %v5240_v3 = vpop.f32.mrf.mxu1  ;;  %v5115_v45 = vadd.f32 %v5092_v30, %v4969_v42  ;;  %v4857_v9 = vadd.f32 %v4838_v20, %v4711_v0  ;;  %v5116_v19 = vadd.f32 %v5094_v22, %v4970_v39  ;;  %v5569_v22 = vpop.permute.xlu0 %5568 }
 0x6ff   : > { %v5098_v10 = vpop.f32.mrf.mxu0 }
 0x700   : > { %v5244_v28 = vpop.f32.mrf.mxu1  ;;  %v5261_v53 = vadd.f32 %v5238_v56, %v5115_v45  ;;  %v4971_v6 = vadd.f32 %v4952_v12, %v4857_v9  ;;  %v5262_v50 = vadd.f32 %v5240_v3, %v5116_v19  ;;  %v4561_v3 = vadd.f32 %v11760_v21, %v11756_v14  ;;  %v11803_v19 = vpop.permute.xlu1 %5583 }
 0x701   : > { %v5100_v38 = vpop.f32.mrf.mxu0 }
 0x702   : > { %v5246_v31 = vpop.f32.mrf.mxu1  ;;  %v5117_v40 = vadd.f32 %v5098_v10, %v4971_v6  ;;  %v5118_v25 = vadd.f32 %v5100_v38, %v4972_v57  ;;  %v4563_v38 = vadd.f32 %v11762_v44, %v11758_v58 }
 0x703   : > { %v11780_v61 = vpop.f32.mrf.mxu0 }
 0x704   : > { %v11782_v8 = vpop.f32.mrf.mxu1  ;;  %v5263_v0 = vadd.f32 %v5244_v28, %v5117_v40  ;;  %v5264_v12 = vadd.f32 %v5246_v31, %v5118_v25  ;;  %v4713_v28 = vadd.f32 %v11764_v5, %v4561_v3  ;;  %v4714_v31 = vadd.f32 %v11766_v41, %v4563_v38  ;;  %v5574_v44 = vpop.permute.xlu1 %5573 }
 0x705   : > { %v11784_v51 = vpop.f32.mrf.mxu0 }
 0x706   : > { %v11787_v13 = vpop.f32.mrf.mxu1  ;;  %v4860_v6 = vadd.f32 %v11772_v62, %v4714_v31 }
 0x708   : > { %v11789_v26 = vpop.f32.mrf.mxu0  ;;  %v11791_v27 = vpop.f32.mrf.mxu1  ;;  %v4974_v41 = vadd.f32 %v11774_v33, %v4860_v6 }
 0x70a   : > { %v11795_v29 = vpop.f32.mrf.mxu0  ;;  %v11797_v34 = vpop.f32.mrf.mxu1  ;;  %v5120_v62 = vadd.f32 %v11784_v51, %v4974_v41 }
 0x70c   : > { %v5384_v46 = vpop.f32.mrf.mxu0 }
 0x70d   : > { %v5407_v35 = vadd.f32 %v5384_v46, %v5261_v53  ;;  %v5530_v30 = vpop.f32.mrf.mxu1  ;;  %v4859_v53 = vadd.f32 %v11768_v1, %v4713_v28 }
 0x70e   : > { %v5386_v24 = vpop.f32.mrf.mxu0 }
 0x70f   : > { %v5408_v48 = vadd.f32 %v5386_v24, %v5262_v50  ;;  %v5553_v2 = vadd.f32 %v5530_v30, %v5407_v35  ;;  %v5532_v20 = vpop.f32.mrf.mxu1  ;;  %v4973_v5 = vadd.f32 %v11770_v60, %v4859_v53 }
 0x710   : > { %v5390_v42 = vpop.f32.mrf.mxu0 }
 0x711   : > { %v5586_v43 = vadd.f32 %v5569_v22, %v5553_v2  ;;  %v5554_v55 = vadd.f32 %v5532_v20, %v5408_v48  ;;  %v5536_v63 = vpop.f32.mrf.mxu1  ;;  %v5409_v10 = vadd.f32 %v5390_v42, %v5263_v0  ;;  %v5119_v1 = vadd.f32 %v11780_v61, %v4973_v5 }
 0x712   : > { %v5392_v45 = vpop.f32.mrf.mxu0  ;;  %v5266_v61 = vadd.f32 %v11787_v13, %v5120_v62 }
 0x713   : > { %vm5594_vm12 = vcmp.ge.f32.partialorder %v5586_v43, 0.0  ;;  %v5602_v56 = vmul.f32 0.2, %v5586_v43  ;;  %v5587_v39 = vadd.f32 %v5569_v22, %v5554_v55  ;;  %v5410_v14 = vadd.f32 %v5392_v45, %v5264_v12  ;;  %v5538_v21 = vpop.f32.mrf.mxu1 }
 0x714   : > { %v5555_v46 = vadd.f32 %v5536_v63, %v5409_v10  ;;  %v5396_v30 = vpop.f32.mrf.mxu0  ;;  %v5265_v60 = vadd.f32 %v11782_v8, %v5119_v1  ;;  %v5121_v55 = vadd.f32 %v11789_v26, %v11776_v54  ;;  %v8696_v1 = vld [vmem:[%s13285_s2 + $0x88] sm:$0xff] }
 0x715   : > { %v11801_v52 = vsel %vm5594_vm12, %v5586_v43, %v5602_v56  ;;  %vm5595_vm13 = vcmp.ge.f32.partialorder %v5587_v39, 0.0  ;;  %v5603_v9 = vmul.f32 0.2, %v5587_v39  ;;  %v5556_v58 = vadd.f32 %v5538_v21, %v5410_v14  ;;  %v5542_v33 = vpop.f32.mrf.mxu1 }
 0x716   : > { %5655 = vrot.lane.b32.xlu1 %v11801_v52, %s8807_s21  ;;  %v5588_v50 = vadd.f32 %v5574_v44, %v5555_v46  ;;  %v5398_v40 = vpop.f32.mrf.mxu0  ;;  %v5411_v2 = vadd.f32 %v5396_v30, %v5265_v60  ;;  %v5267_v3 = vadd.f32 %v11791_v27, %v5121_v55  ;;  %v8695_v30 = vld [vmem:[%s13285_s2 + $0x80] sm:$0xff] }
 0x717   : > { %v11810_v36 = vsel %vm5595_vm13, %v5587_v39, %v5603_v9  ;;  %v5589_v35 = vadd.f32 %v5574_v44, %v5556_v58  ;;  %v5412_v20 = vadd.f32 %v5398_v40, %v5266_v61  ;;  %v5544_v22 = vpop.f32.mrf.mxu1  ;;  %v8698_v44 = vld [vmem:[%s13285_s2 + $0x98] sm:$0xff] }
 0x718   : > { %5663 = vrot.lane.b32.xlu0 %v11810_v36, %s8807_s21  ;;  %v5604_v57 = vmul.f32 0.2, %v5588_v50  ;;  %vm5596_vm14 = vcmp.ge.f32.partialorder %v5588_v50, 0.0  ;;  %v5557_v8 = vadd.f32 %v5542_v33, %v5411_v2  ;;  %v5402_v56 = vpop.f32.mrf.mxu0 }
 0x719   : > { %v5605_v24 = vmul.f32 0.2, %v5589_v35  ;;  %vm5597_vm15 = vcmp.ge.f32.partialorder %v5589_v35, 0.0  ;;  %v5558_v25 = vadd.f32 %v5544_v22, %v5412_v20  ;;  %v5548_v54 = vpop.f32.mrf.mxu1  ;;  %v5413_v63 = vadd.f32 %v5402_v56, %v5267_v3 }
 0x71a   : > { %5618 = vrot.lane.b32.xlu1 %v11801_v52, %s8809_s22  ;;  %v11835_v48 = vsel %vm5596_vm14, %v5588_v50, %v5604_v57  ;;  %v5590_v13 = vadd.f32 %v11793_v32, %v5557_v8  ;;  %v5404_v45 = vpop.f32.mrf.mxu0  ;;  %v8697_v50 = vld [vmem:[%s13285_s2 + $0x90] sm:$0xff] }
 0x71b   : > { %v11839_v51 = vsel %vm5597_vm15, %v5589_v35, %v5605_v24  ;;  %v5591_v42 = vadd.f32 %v11793_v32, %v5558_v25  ;;  %v5122_v32 = vadd.f32 %v11795_v29, %v11778_v16  ;;  %v5550_v29 = vpop.f32.mrf.mxu1  ;;  %v5559_v10 = vadd.f32 %v5548_v54, %v5413_v63 }
 0x71c   : > { %5626 = vrot.lane.b32.xlu0 %v11810_v36, %s8809_s22  ;;  %v5606_v43 = vmul.f32 0.2, %v5590_v13  ;;  %vm5598_vm9 = vcmp.ge.f32.partialorder %v5590_v13, 0.0 }
 0x71d   : > { %v5607_v0 = vmul.f32 0.2, %v5591_v42  ;;  %vm5599_vm10 = vcmp.ge.f32.partialorder %v5591_v42, 0.0  ;;  %v5268_v26 = vadd.f32 %v11797_v34, %v5122_v32  ;;  %v5592_v9 = vadd.f32 %v11803_v19, %v5559_v10 }
 0x71e   : > { %5894 = vrot.lane.b32.xlu1 %v11801_v52, %s8810_s23  ;;  %v11861_v39 = vsel %vm5598_vm9, %v5590_v13, %v5606_v43 }
 0x71f   : > { %v11866_v12 = vsel %vm5599_vm10, %v5591_v42, %v5607_v0  ;;  %v5414_v16 = vadd.f32 %v5404_v45, %v5268_v26  ;;  %v5608_v38 = vmul.f32 0.2, %v5592_v9  ;;  %vm5600_vm11 = vcmp.ge.f32.partialorder %v5592_v9, 0.0 }
 0x720   : > { %5902 = vrot.lane.b32.xlu0 %v11810_v36, %s8810_s23 }
 0x721   : > { %v5560_v27 = vadd.f32 %v5550_v29, %v5414_v16  ;;  %v11889_v14 = vsel %vm5600_vm11, %v5592_v9, %v5608_v38 }
 0x722   : > { %6040 = vrot.lane.b32.xlu1 %v11801_v52, %s8811_s24 }
 0x723   : > { %v5593_v34 = vadd.f32 %v11803_v19, %v5560_v27 }
 0x724   : > { %6048 = vrot.lane.b32.xlu0 %v11810_v36, %s8811_s24 }
 0x725   : > { %v5609_v28 = vmul.f32 0.2, %v5593_v34  ;;  %vm5601_vm12 = vcmp.ge.f32.partialorder %v5593_v34, 0.0 }
 0x726   : > { %5657 = vrot.lane.b32.xlu1 %v11835_v48, %s8807_s21 }
 0x727   : > { %v11893_v21 = vsel %vm5601_vm12, %v5593_v34, %v5609_v28 }
 0x728   : > { %5665 = vrot.lane.b32.xlu0 %v11839_v51, %s8807_s21 }
 0x72a   : > { %5620 = vrot.lane.b32.xlu1 %v11835_v48, %s8809_s22 }
 0x72c   : > { %5628 = vrot.lane.b32.xlu0 %v11839_v51, %s8809_s22 }
 0x72e   : > { %5896 = vrot.lane.b32.xlu1 %v11835_v48, %s8810_s23 }
 0x730   : > { %5904 = vrot.lane.b32.xlu0 %v11839_v51, %s8810_s23 }
 0x732   : > { %6042 = vrot.lane.b32.xlu1 %v11835_v48, %s8811_s24 }
 0x734   : > { %6050 = vrot.lane.b32.xlu0 %v11839_v51, %s8811_s24 }
 0x736   : > { %5659 = vrot.lane.b32.xlu1 %v11861_v39, %s8807_s21 }
 0x738   : > { %5667 = vrot.lane.b32.xlu0 %v11866_v12, %s8807_s21 }
 0x73a   : > { %5622 = vrot.lane.b32.xlu1 %v11861_v39, %s8809_s22 }
 0x73c   : > { %5630 = vrot.lane.b32.xlu0 %v11866_v12, %s8809_s22 }
 0x73e   : > { %5898 = vrot.lane.b32.xlu1 %v11861_v39, %s8810_s23 }
 0x740   : > { %5906 = vrot.lane.b32.xlu0 %v11866_v12, %s8810_s23 }
 0x742   : > { %6044 = vrot.lane.b32.xlu1 %v11861_v39, %s8811_s24 }
 0x744   : > { %6052 = vrot.lane.b32.xlu0 %v11866_v12, %s8811_s24 }
 0x746   : > { %6304 = vrot.lane.b32.xlu1 %v11861_v39, %s8812_s25 }
 0x748   : > { %6312 = vrot.lane.b32.xlu0 %v11866_v12, %s8812_s25 }
 0x74a   : > { %5661 = vrot.lane.b32.xlu1 %v11889_v14, %s8807_s21 }
 0x74c   : > { %5669 = vrot.lane.b32.xlu0 %v11893_v21, %s8807_s21 }
 0x74e   : > { %6302 = vrot.lane.b32.xlu1 %v11835_v48, %s8812_s25 }
 0x750   : > { %6310 = vrot.lane.b32.xlu0 %v11839_v51, %s8812_s25 }
 0x752   : > { %5624 = vrot.lane.b32.xlu1 %v11889_v14, %s8809_s22 }
 0x754   : > { %6458 = vrot.lane.b32.xlu0 %v11866_v12, %s8813_s26 }
 0x756   : > { %5900 = vrot.lane.b32.xlu1 %v11889_v14, %s8810_s23 }
 0x758   : > { %5632 = vrot.lane.b32.xlu0 %v11893_v21, %s8809_s22 }
 0x75a   : > { %6046 = vrot.lane.b32.xlu1 %v11889_v14, %s8811_s24 }
 0x75c   : > { %5908 = vrot.lane.b32.xlu0 %v11893_v21, %s8810_s23 }
 0x75e   : > { %6306 = vrot.lane.b32.xlu1 %v11889_v14, %s8812_s25 }
 0x760   : > { %6308 = vrot.lane.b32.xlu0 %v11810_v36, %s8812_s25 }
 0x762   : > { %6452 = vrot.lane.b32.xlu1 %v11889_v14, %s8813_s26 }
 0x764   : > { %6456 = vrot.lane.b32.xlu0 %v11839_v51, %s8813_s26 }
 0x766   : > { %6450 = vrot.lane.b32.xlu1 %v11861_v39, %s8813_s26 }
 0x768   : > { %6454 = vrot.lane.b32.xlu0 %v11810_v36, %s8813_s26 }
 0x76a   : > { %6300 = vrot.lane.b32.xlu1 %v11801_v52, %s8812_s25 }
 0x76c   : > { %6054 = vrot.lane.b32.xlu0 %v11893_v21, %s8811_s24 }
 0x76e   : > { %6448 = vrot.lane.b32.xlu1 %v11835_v48, %s8813_s26 }
 0x770   : > { %6604 = vrot.lane.b32.xlu0 %v11866_v12, %s8814_s27 }
 0x772   : > { %6446 = vrot.lane.b32.xlu1 %v11801_v52, %s8813_s26 }
 0x774   : > { %6602 = vrot.lane.b32.xlu0 %v11839_v51, %s8814_s27 }
 0x776   : > { %6598 = vrot.lane.b32.xlu1 %v11889_v14, %s8814_s27 }
 0x778   : > { %6314 = vrot.lane.b32.xlu0 %v11893_v21, %s8812_s25 }
 0x77a   : > { %6596 = vrot.lane.b32.xlu1 %v11861_v39, %s8814_s27 }
 0x77c   : > { %6460 = vrot.lane.b32.xlu0 %v11893_v21, %s8813_s26 }
 0x77e   : > { %6744 = vrot.lane.b32.xlu1 %v11889_v14, %s8815_s28 }
 0x780   : > { %6750 = vrot.lane.b32.xlu0 %v11866_v12, %s8815_s28 }
 0x782   : > { %6594 = vrot.lane.b32.xlu1 %v11835_v48, %s8814_s27 }
 0x784   : > { %6600 = vrot.lane.b32.xlu0 %v11810_v36, %s8814_s27 }
 0x786   : > { %6742 = vrot.lane.b32.xlu1 %v11861_v39, %s8815_s28 }
 0x788   : > { %6606 = vrot.lane.b32.xlu0 %v11893_v21, %s8814_s27  ;;  %v5656_v19 = vpop.permute.xlu1 %5655 }
 0x78a   : > { %v5664_v31 = vpop.permute.xlu0 %5663  ;;  %6592 = vrot.lane.b32.xlu1 %v11801_v52, %s8814_s27 }
 0x78b   : > { %v5671_v38 = vsel %vm287_vm0, %v5656_v19, %v5664_v31 }
 0x78c   : > { %6752 = vrot.lane.b32.xlu0 %v11893_v21, %s8815_s28  ;;  %v11961_v53 = vpop.permute.xlu1 %5618 }
 0x78e   : > { %v11963_v46 = vpop.permute.xlu0 %5626  ;;  %6740 = vrot.lane.b32.xlu1 %v11835_v48, %s8815_s28 }
 0x790   : > { %6748 = vrot.lane.b32.xlu0 %v11839_v51, %s8815_s28  ;;  %v11969_v6 = vpop.permute.xlu1 %5894 }
 0x792   : > { %v11971_v58 = vpop.permute.xlu0 %5902  ;;  %6738 = vrot.lane.b32.xlu1 %v11801_v52, %s8815_s28 }
 0x794   : > { %6746 = vrot.lane.b32.xlu0 %v11810_v36, %s8815_s28  ;;  %v11980_v5 = vpop.permute.xlu1 %6040 }
 0x796   : > { %v11985_v41 = vpop.permute.xlu0 %6048  ;;  %6906 = vperm.xlu1 %8798, %v8698_v44   ;;  %v5675_v44 = vsel %vm287_vm0, %v5664_v31, %v5656_v19 }
 0x798   : > { %6901 = vperm.xlu0 %8797, %v8697_v50   ;;  %v5658_v35 = vpop.permute.xlu1 %5657 }
 0x79a   : > { %v5666_v62 = vpop.permute.xlu0 %5665  ;;  %6896 = vperm.xlu1 %8798, %v8696_v1  }
 0x79b   : > { %v5672_v10 = vsel %vm287_vm0, %v5658_v35, %v5666_v62  ;;  %v5676_v27 = vsel %vm287_vm0, %v5666_v62, %v5658_v35  ;;  %v5680_v62 = vmul.f32 %v5671_v38, %v9007_v17 }
 0x79c   : > { %6891 = vperm.xlu0 %8797, %v8695_v30   ;;  %v5621_v57 = vpop.permute.xlu1 %5620  ;;  %v5682_v1 = vmul.f32 %v5672_v10, %v9007_v17  ;;  %v5681_v35 = vmul.f32 %v5676_v27, %v9010_v18  ;;  %v5634_v27 = vsel %vm239_vm1, %v11961_v53, %v11963_v46 }
 0x79e   : > { %v5629_v60 = vpop.permute.xlu0 %5628 }
 0x79f   : > { %v5635_v10 = vsel %vm239_vm1, %v5621_v57, %v5629_v60 }
 0x7a0   : > { %v11993_v24 = vpop.permute.xlu1 %5896 }
 0x7a2   : > { %v11995_v40 = vpop.permute.xlu0 %5904 }
 0x7a4   : > { %v11997_v33 = vpop.permute.xlu1 %6042 }
 0x7a6   : > { %v11999_v61 = vpop.permute.xlu0 %6050 }
 0x7a8   : > { %v5660_v2 = vpop.permute.xlu1 %5659 }
 0x7aa   : > { %v5668_v20 = vpop.permute.xlu0 %5667 }
 0x7ab   : > { %v5673_v3 = vsel %vm287_vm0, %v5660_v2, %v5668_v20  ;;  %v5677_v26 = vsel %vm287_vm0, %v5668_v20, %v5660_v2  ;;  %v5679_v2 = vmul.f32 %v5675_v44, %v9010_v18  ;;  %v8627_v20 = vld [vmem:[%s13284_s1 + $0x4a0] sm:$0xff] }
 0x7ac   : > { %v5623_v22 = vpop.permute.xlu1 %5622  ;;  %v5684_v34 = vmul.f32 %v5673_v3, %v9007_v17  ;;  %v5683_v28 = vmul.f32 %v5677_v26, %v9010_v18 }
 0x7ae   : > { %v5631_v8 = vpop.permute.xlu0 %5630 }
 0x7b0   : > { %v12001_v25 = vpop.permute.xlu1 %5898 }
 0x7b2   : > { %v12003_v13 = vpop.permute.xlu0 %5906 }
 0x7b4   : > { %v12005_v42 = vpop.permute.xlu1 %6044 }
 0x7b6   : > { %v12007_v43 = vpop.permute.xlu0 %6052 }
 0x7b8   : > { %v12009_v55 = vpop.permute.xlu1 %6304 }
 0x7ba   : > { %v12011_v0 = vpop.permute.xlu0 %6312 }
 0x7bc   : > { %v5662_v56 = vpop.permute.xlu1 %5661 }
 0x7be   : > { %v5670_v32 = vpop.permute.xlu0 %5669 }
 0x7bf   : > { %v5674_v45 = vsel %vm287_vm0, %v5662_v56, %v5670_v32  ;;  %v5678_v54 = vsel %vm287_vm0, %v5670_v32, %v5662_v56  ;;  %v5636_v56 = vsel %vm239_vm1, %v5623_v22, %v5631_v8 }
 0x7c0   : > { %v5685_v63 = vmul.f32 %v5678_v54, %v9010_v18  ;;  %v12022_v16 = vpop.permute.xlu1 %6302  ;;  %v5686_v29 = vmul.f32 %v5674_v45, %v9007_v17  ;;  %v8628_v45 = vld [vmem:[%s13284_s1 + $0x4a8] sm:$0xff]  ;;  %v5640_v54 = vsel %vm239_vm1, %v5631_v8, %v5623_v22  ;;  %v5647_v22 = vmul.f32 %v5636_v56, %v13391_v59 }
 0x7c1   : > { %v5646_v8 = vmul.f32 %v5640_v54, %v13390_v15  ;;  %v5643_v56 = vmul.f32 %v5634_v27, %v13391_v59  ;;  %v8623_v54 = vld [vmem:[%s13284_s1 + $0x480] sm:$0xff] }
 0x7c2   : > { %v12029_v9 = vpop.permute.xlu0 %6310  ;;  %5728 = vmatprep.subr.mxu0 %v5686_v29 }
 0x7c3   : > { %5729 = vmatpush1.msra.mxu0 %v5685_v63 }
 0x7c4   : > { %5730 = vmatprep.subr.mxu0 %v5684_v34  ;;  %v5625_v50 = vpop.permute.xlu1 %5624  ;;  %v5639_v34 = vsel %vm239_vm1, %v5629_v60, %v5621_v57  ;;  %v8629_v57 = vld [vmem:[%s13284_s1 + $0x4b0] sm:$0xff]  ;;  %v5912_v60 = vsel %vm539_vm3, %v12001_v25, %v12003_v13 }
 0x7c5   : > { %5731 = vmatpush1.msra.mxu0 %v5683_v28 }
 0x7c6   : > { %v12039_v30 = vpop.permute.xlu0 %6458  ;;  %5732 = vmatprep.subr.mxu0 %v5682_v1 }
 0x7c7   : > { %5733 = vmatpush1.msra.mxu0 %v5681_v35  ;;  %v5645_v35 = vmul.f32 %v5635_v10, %v13391_v59 }
 0x7c8   : > { %5734 = vmatprep.subr.mxu0 %v5680_v62  ;;  %v5901_v19 = vpop.permute.xlu1 %5900 }
 0x7c9   : > { %5735 = vmatpush1.msra.mxu0 %v5679_v2  ;;  %v5638_v2 = vsel %vm239_vm1, %v11963_v46, %v11961_v53  ;;  %v5911_v53 = vsel %vm539_vm3, %v11993_v24, %v11995_v40  ;;  %v5923_v46 = vmul.f32 %v5912_v60, %v13393_v7 }
 0x7ca   : > { %v5633_v31 = vpop.permute.xlu0 %5632  ;;  %8631 = vmatmul.mubr.msk.f32.vlgmr.msra.gmra.mxu0 %vm320_vm2, %v8627_v20  ;;  %v5644_v20 = vmul.f32 %v5639_v34, %v13390_v15 }
 0x7cb   : > { %v5637_v32 = vsel %vm239_vm1, %v5625_v50, %v5633_v31  ;;  %v5641_v3 = vsel %vm239_vm1, %v5633_v31, %v5625_v50  ;;  %5774 = vmatprep.mubr.f32.mxu0 %v13389_v37 }
 0x7cc   : > { %v5648_v26 = vmul.f32 %v5641_v3, %v13390_v15  ;;  %v12060_v63 = vpop.permute.xlu1 %6046  ;;  %v5649_v29 = vmul.f32 %v5637_v32, %v13391_v59  ;;  %v5642_v32 = vmul.f32 %v5638_v2, %v13390_v15  ;;  %v6056_v2 = vsel %vm697_vm4, %v11980_v5, %v11985_v41 }
 0x7ce   : > { %v5909_v38 = vpop.permute.xlu0 %5908  ;;  %8632 = vmatmul.mubr.msk.f32.gmra.mxu0 %vm320_vm2, %v8628_v45  ;;  %5829 = vmatprep.subr.mxu1 %v5649_v29  ;;  %v8630_v45 = vld [vmem:[%s13284_s1 + $0x4b8] sm:$0xff]  ;;  %v5921_v29 = vmul.f32 %v5911_v53, %v13393_v7  ;;  %v6065_v53 = vmul.f32 %v6056_v2, %v13429_v4 }
 0x7cf   : > { %v5913_v28 = vsel %vm539_vm3, %v5901_v19, %v5909_v38  ;;  %v5917_v44 = vsel %vm539_vm3, %v5909_v38, %v5901_v19  ;;  %5830 = vmatpush1.msra.mxu1 %v5648_v26  ;;  %5780 = vmatprep.mubr.f32.mxu0 %v13389_v37  ;;  %v5916_v19 = vsel %vm539_vm3, %v12003_v13, %v12001_v25  ;;  %v8639_v38 = vld [vmem:[%s13284_s1 + $0x4c0] sm:$0xff] }
 0x7d0   : > { %v5924_v50 = vmul.f32 %v5917_v44, %v13392_v23  ;;  %5831 = vmatprep.subr.mxu1 %v5647_v22  ;;  %v12087_v1 = vpop.permute.xlu1 %6306  ;;  %v5925_v62 = vmul.f32 %v5913_v28, %v13393_v7  ;;  %v5915_v25 = vsel %vm539_vm3, %v11995_v40, %v11993_v24  ;;  %v5922_v13 = vmul.f32 %v5916_v19, %v13392_v23  ;;  %v8625_v28 = vld [vmem:[%s13284_s1 + $0x490] sm:$0xff]  ;;  %v8640_v44 = vld [vmem:[%s13284_s1 + $0x4c8] sm:$0xff] }
 0x7d1   : > { %5832 = vmatpush1.msra.mxu1 %v5646_v8  ;;  %v5910_v26 = vsel %vm539_vm3, %v11969_v6, %v11971_v58  ;;  %v5914_v24 = vsel %vm539_vm3, %v11971_v58, %v11969_v6  ;;  %v5920_v10 = vmul.f32 %v5915_v25, %v13392_v23  ;;  %v8624_v6 = vld [vmem:[%s13284_s1 + $0x488] sm:$0xff] }
 0x7d2   : > { %v12100_v31 = vpop.permute.xlu0 %6308  ;;  %8633 = vmatmul.mubr.msk.f32.gmra.mxu0 %vm320_vm2, %v8629_v57  ;;  %5833 = vmatprep.subr.mxu1 %v5645_v35  ;;  %v5919_v27 = vmul.f32 %v5910_v26, %v13393_v7  ;;  %v5918_v58 = vmul.f32 %v5914_v24, %v13392_v23  ;;  %v6062_v35 = vsel %vm697_vm4, %v12007_v43, %v12005_v42 }
 0x7d3   : > { %5967 = vmatprep.subr.mxu0 %v5925_v62  ;;  %5834 = vmatpush1.msra.mxu1 %v5644_v20  ;;  %v6322_v26 = vsel %vm969_vm5, %v12011_v0, %v12009_v55 }
 0x7d4   : > { %5968 = vmatpush1.msra.mxu0 %v5924_v50  ;;  %5835 = vmatprep.subr.mxu1 %v5643_v56  ;;  %v12115_v3 = vpop.permute.xlu1 %6452  ;;  %v6058_v50 = vsel %vm697_vm4, %v12005_v42, %v12007_v43  ;;  %v6061_v42 = vsel %vm697_vm4, %v11999_v61, %v11997_v33 }
 0x7d5   : > { %5969 = vmatprep.subr.mxu0 %v5923_v46  ;;  %5786 = vmatprep.mubr.f32.mxu0 %v13389_v37  ;;  %v6066_v56 = vmul.f32 %v6061_v42, %v13430_v47 }
 0x7d6   : > { %5836 = vmatpush1.msra.mxu1 %v5642_v32  ;;  %5970 = vmatpush1.msra.mxu0 %v5922_v13  ;;  %v12132_v40 = vpop.permute.xlu0 %6456  ;;  %v6318_v13 = vsel %vm969_vm5, %v12009_v55, %v12011_v0  ;;  %v8648_v55 = vld [vmem:[%s13284_s1 + $0x4e8] sm:$0xff] }
 0x7d7   : > { %8634 = vmatmul.mubr.msk.f32.gmra.mxu0 %vm320_vm2, %v8630_v45  ;;  %8635 = vmatmul.mubr.msk.f32.vlgmr.msra.gmra.mxu1 %vm320_vm2, %v8623_v54  ;;  %v8656_v0 = vld [vmem:[%s13284_s1 + $0x508] sm:$0xff] }
 0x7d8   : > { %5971 = vmatprep.subr.mxu0 %v5921_v29  ;;  %v12139_v34 = vpop.permute.xlu1 %6450  ;;  %5875 = vmatprep.mubr.f32.mxu1 %v13389_v37  ;;  %v13439_v29 = vld [vmem:[#allocation9_spill] sm:$0xff] }
 0x7d9   : > { %5972 = vmatpush1.msra.mxu0 %v5920_v10  ;;  %6007 = vmatprep.mubr.f32.mxu0 %v13389_v37  ;;  %v6464_v42 = vsel %vm1127_vm6, %v12139_v34, %v12039_v30 }
 0x7da   : > { %5973 = vmatprep.subr.mxu0 %v5919_v27  ;;  %v12150_v22 = vpop.permute.xlu0 %6454 }
 0x7db   : > { %5974 = vmatpush1.msra.mxu0 %v5918_v58  ;;  %8636 = vmatmul.mubr.msk.f32.gmra.mxu1 %vm320_vm2, %v8624_v6  ;;  %v6328_v58 = vmul.f32 %v6318_v13, %v13431_v49 }
 0x7dc   : > { %8643 = vmatmul.mubr.msk.f32.vlgmr.msra.gmra.mxu0 %vm320_vm2, %v8639_v38  ;;  %6227 = vmatprep.subr.mxu0 %v11893_v21  ;;  %v12155_v8 = vpop.permute.xlu1 %6300 }
 0x7dd   : > { %6228 = vmatpush1.msra.mxu0 %v11889_v14  ;;  %5881 = vmatprep.mubr.f32.mxu1 %v13389_v37 }
 0x7de   : > { %6229 = vmatprep.subr.mxu0 %v11866_v12  ;;  %6013 = vmatprep.mubr.f32.mxu0 %v13389_v37  ;;  %v6055_v57 = vpop.permute.xlu0 %6054 }
 0x7df   : > { %6230 = vmatpush1.msra.mxu0 %v11861_v39  ;;  %v6059_v21 = vsel %vm697_vm4, %v12060_v63, %v6055_v57  ;;  %v6063_v14 = vsel %vm697_vm4, %v6055_v57, %v12060_v63  ;;  %8637 = vmatmul.mubr.msk.f32.gmra.mxu1 %vm320_vm2, %v8625_v28  ;;  %v8626_v39 = vld [vmem:[%s13284_s1 + $0x498] sm:$0xff]  ;;  %v6317_v57 = vsel %vm969_vm5, %v12022_v16, %v12029_v9 }
 0x7e0   : > { %v6071_v60 = vmul.f32 %v6059_v21, %v13429_v4  ;;  %8644 = vmatmul.mubr.msk.f32.gmra.mxu0 %vm320_vm2, %v8640_v44  ;;  %6231 = vmatprep.subr.mxu0 %v11839_v51  ;;  %v12178_v12 = vpop.permute.xlu1 %6448  ;;  %v6070_v63 = vmul.f32 %v6063_v14, %v13430_v47  ;;  %v8641_v51 = vld [vmem:[%s13284_s1 + $0x4d0] sm:$0xff]  ;;  %v6329_v44 = vmul.f32 %v6322_v26, %v13439_v29  ;;  %v13440_v21 = vld [vmem:[#allocation11_spill] sm:$0xff]  ;;  %v8671_v26 = vld [vmem:[%s13284_s1 + $0x540] sm:$0xff] }
 0x7e1   : > { %6232 = vmatpush1.msra.mxu0 %v11835_v48  ;;  %5887 = vmatprep.mubr.f32.mxu1 %v13389_v37  ;;  %v6057_v48 = vsel %vm697_vm4, %v11997_v33, %v11999_v61  ;;  %v8642_v33 = vld [vmem:[%s13284_s1 + $0x4d8] sm:$0xff]  ;;  %v6060_v61 = vsel %vm697_vm4, %v11985_v41, %v11980_v5  ;;  %v8647_v5 = vld [vmem:[%s13284_s1 + $0x4e0] sm:$0xff] }
 0x7e2   : > { %6233 = vmatprep.subr.mxu0 %v11810_v36  ;;  %6019 = vmatprep.mubr.f32.mxu0 %v13389_v37  ;;  %v12199_v62 = vpop.permute.xlu0 %6604  ;;  %v6069_v36 = vmul.f32 %v6058_v50, %v13429_v4  ;;  %v6067_v19 = vmul.f32 %v6057_v48, %v13429_v4  ;;  %v6064_v32 = vmul.f32 %v6060_v61, %v13430_v47  ;;  %v8655_v41 = vld [vmem:[%s13284_s1 + $0x500] sm:$0xff] }
 0x7e3   : > { %6234 = vmatpush1.msra.mxu0 %v11801_v52  ;;  %8638 = vmatmul.mubr.msk.f32.gmra.mxu1 %vm320_vm2, %v8626_v39  ;;  %v6068_v52 = vmul.f32 %v6062_v35, %v13430_v47  ;;  %v6326_v48 = vmul.f32 %v6317_v57, %v13431_v49  ;;  %v13444_v57 = vld [vmem:[#allocation15_spill] sm:$0xff] }
 0x7e4   : > { %8645 = vmatmul.mubr.msk.f32.gmra.mxu0 %vm320_vm2, %v8641_v51  ;;  %6113 = vmatprep.subr.mxu1 %v6071_v60  ;;  %v12213_v43 = vpop.permute.xlu1 %6446  ;;  %v8657_v51 = vld [vmem:[%s13284_s1 + $0x510] sm:$0xff] }
 0x7e5   : > { %6114 = vmatpush1.msra.mxu1 %v6070_v63  ;;  %6025 = vmatprep.mubr.f32.mxu0 %v13389_v37  ;;  %v8649_v63 = vld [vmem:[%s13284_s1 + $0x4f0] sm:$0xff] }
 0x7e6   : > { %6115 = vmatprep.subr.mxu1 %v6069_v36  ;;  %v12228_v20 = vpop.permute.xlu0 %6602  ;;  %6153 = vmatprep.mubr.f32.mxu1 %v13389_v37  ;;  %v6316_v36 = vsel %vm969_vm5, %v12155_v8, %v12100_v31 }
 0x7e7   : > { %6116 = vmatpush1.msra.mxu1 %v6068_v52 }
 0x7e8   : > { %8646 = vmatmul.mubr.msk.f32.gmra.mxu0 %vm320_vm2, %v8642_v33  ;;  %6117 = vmatprep.subr.mxu1 %v6067_v19  ;;  %v12235_v46 = vpop.permute.xlu1 %6598  ;;  %v8650_v19 = vld [vmem:[%s13284_s1 + $0x4f8] sm:$0xff] }
 0x7e9   : > { %6118 = vmatpush1.msra.mxu1 %v6066_v56  ;;  %6267 = vmatprep.mubr.f32.mxu0 %v13389_v37  ;;  %v8658_v56 = vld [vmem:[%s13284_s1 + $0x518] sm:$0xff] }
 0x7ea   : > { %6119 = vmatprep.subr.mxu1 %v6065_v53  ;;  %v6315_v25 = vpop.permute.xlu0 %6314  ;;  %v6462_v53 = vsel %vm1127_vm6, %v12213_v43, %v12150_v22 }
 0x7eb   : > { %6120 = vmatpush1.msra.mxu1 %v6064_v32  ;;  %v6319_v45 = vsel %vm969_vm5, %v12087_v1, %v6315_v25  ;;  %v6323_v54 = vsel %vm969_vm5, %v6315_v25, %v12087_v1  ;;  %v6321_v1 = vsel %vm969_vm5, %v12029_v9, %v12022_v16  ;;  %v6320_v16 = vsel %vm969_vm5, %v12100_v31, %v12155_v8  ;;  %v13441_v9 = vld [vmem:[#allocation10_spill] sm:$0xff] }
 0x7ec   : > { %v6330_v24 = vmul.f32 %v6319_v45, %v13431_v49  ;;  %v6331_v10 = vmul.f32 %v6323_v54, %v13439_v29  ;;  %8651 = vmatmul.mubr.msk.f32.vlgmr.msra.gmra.mxu1 %vm320_vm2, %v8647_v5  ;;  %8659 = vmatmul.mubr.msk.f32.vlgmr.msra.gmra.mxu0 %vm320_vm2, %v8655_v41  ;;  %v12263_v27 = vpop.permute.xlu1 %6596  ;;  %v6327_v39 = vmul.f32 %v6321_v1, %v13439_v29  ;;  %v13443_v1 = vld [vmem:[#allocation13_spill] sm:$0xff] }
 0x7ed   : > { %6159 = vmatprep.mubr.f32.mxu1 %v13389_v37  ;;  %6273 = vmatprep.mubr.f32.mxu0 %v13389_v37  ;;  %v6325_v52 = vmul.f32 %v6320_v16, %v13439_v29  ;;  %v6474_v31 = vmul.f32 %v6464_v42, %v13441_v9  ;;  %v6463_v8 = vsel %vm1127_vm6, %v12178_v12, %v12132_v40 }
 0x7ee   : > { %v6461_v6 = vpop.permute.xlu0 %6460  ;;  %6373 = vmatprep.subr.mxu1 %v6331_v10  ;;  %v6472_v5 = vmul.f32 %v6463_v8, %v13441_v9  ;;  %v6470_v41 = vmul.f32 %v6462_v53, %v13441_v9  ;;  %v6614_v13 = vsel %vm1285_vm7, %v12199_v62, %v12263_v27 }
 0x7ef   : > { %v6465_v38 = vsel %vm1127_vm6, %v12115_v3, %v6461_v6  ;;  %v6469_v28 = vsel %vm1127_vm6, %v6461_v6, %v12115_v3  ;;  %6374 = vmatpush1.msra.mxu1 %v6330_v24  ;;  %v6468_v3 = vsel %vm1127_vm6, %v12039_v30, %v12139_v34  ;;  %v6467_v30 = vsel %vm1127_vm6, %v12132_v40, %v12178_v12  ;;  %v13442_v24 = vld [vmem:[#allocation12_spill] sm:$0xff] }
 0x7f0   : > { %v6477_v14 = vmul.f32 %v6469_v28, %v13440_v21  ;;  %8652 = vmatmul.mubr.msk.f32.gmra.mxu1 %vm320_vm2, %v8648_v55  ;;  %8660 = vmatmul.mubr.msk.f32.gmra.mxu0 %vm320_vm2, %v8656_v0  ;;  %v12292_v60 = vpop.permute.xlu1 %6744  ;;  %v6476_v50 = vmul.f32 %v6465_v38, %v13441_v9  ;;  %v6475_v2 = vmul.f32 %v6468_v3, %v13440_v21  ;;  %v8664_v38 = vld [vmem:[%s13284_s1 + $0x528] sm:$0xff] }
 0x7f1   : > { %6375 = vmatprep.subr.mxu1 %v6329_v44  ;;  %6165 = vmatprep.mubr.f32.mxu1 %v13389_v37  ;;  %v6324_v34 = vmul.f32 %v6316_v36, %v13431_v49  ;;  %v6466_v40 = vsel %vm1127_vm6, %v12150_v22, %v12213_v43  ;;  %v6473_v12 = vmul.f32 %v6467_v30, %v13440_v21  ;;  %v8663_v43 = vld [vmem:[%s13284_s1 + $0x520] sm:$0xff]  ;;  %v8672_v44 = vld [vmem:[%s13284_s1 + $0x548] sm:$0xff] }
 0x7f2   : > { %6279 = vmatprep.mubr.f32.mxu0 %v13389_v37  ;;  %6376 = vmatpush1.msra.mxu1 %v6328_v58  ;;  %v12312_v35 = vpop.permute.xlu0 %6750  ;;  %v6471_v25 = vmul.f32 %v6466_v40, %v13440_v21  ;;  %v6610_v6 = vsel %vm1285_vm7, %v12263_v27, %v12199_v62 }
 0x7f3   : > { %6377 = vmatprep.subr.mxu1 %v6327_v39  ;;  %6519 = vmatprep.subr.mxu0 %v6477_v14  ;;  %v6620_v3 = vmul.f32 %v6610_v6, %v13442_v24 }
 0x7f4   : > { %8653 = vmatmul.mubr.msk.f32.gmra.mxu1 %vm320_vm2, %v8649_v63  ;;  %8661 = vmatmul.mubr.msk.f32.gmra.mxu0 %vm320_vm2, %v8657_v51  ;;  %v6595_v33 = vpop.permute.xlu1 %6594 }
 0x7f5   : > { %6378 = vmatpush1.msra.mxu1 %v6326_v48  ;;  %6520 = vmatpush1.msra.mxu0 %v6476_v50  ;;  %v6613_v28 = vsel %vm1285_vm7, %v12228_v20, %v6595_v33  ;;  %v6609_v16 = vsel %vm1285_vm7, %v6595_v33, %v12228_v20  ;;  %v13445_v50 = vld [vmem:[#allocation14_spill] sm:$0xff]  ;;  %v8665_v20 = vld [vmem:[%s13284_s1 + $0x530] sm:$0xff] }
 0x7f6   : > { %6379 = vmatprep.subr.mxu1 %v6325_v52  ;;  %6521 = vmatprep.subr.mxu0 %v6475_v2  ;;  %v6601_v61 = vpop.permute.xlu0 %6600  ;;  %v8673_v52 = vld [vmem:[%s13284_s1 + $0x550] sm:$0xff]  ;;  %v6618_v33 = vmul.f32 %v6609_v16, %v13442_v24 }
 0x7f7   : > { %6171 = vmatprep.mubr.f32.mxu1 %v13389_v37  ;;  %6285 = vmatprep.mubr.f32.mxu0 %v13389_v37 }
 0x7f8   : > { %6380 = vmatpush1.msra.mxu1 %v6324_v34  ;;  %6522 = vmatpush1.msra.mxu0 %v6474_v31  ;;  %v6743_v32 = vpop.permute.xlu1 %6742 }
 0x7f9   : > { %8654 = vmatmul.mubr.msk.f32.gmra.mxu1 %vm320_vm2, %v8650_v19  ;;  %8662 = vmatmul.mubr.msk.f32.gmra.mxu0 %vm320_vm2, %v8658_v56  ;;  %v6760_v51 = vsel %vm1443_vm8, %v12312_v35, %v6743_v32  ;;  %v6756_v36 = vsel %vm1443_vm8, %v6743_v32, %v12312_v35  ;;  %v8666_v32 = vld [vmem:[%s13284_s1 + $0x538] sm:$0xff] }
 0x7fa   : > { %6523 = vmatprep.subr.mxu0 %v6473_v12  ;;  %6413 = vmatprep.mubr.f32.mxu1 %v13389_v37  ;;  %v6607_v22 = vpop.permute.xlu0 %6606  ;;  %v6767_v31 = vmul.f32 %v6760_v51, %v13444_v57  ;;  %v6766_v8 = vmul.f32 %v6756_v36, %v13445_v50 }
 0x7fb   : > { %6524 = vmatpush1.msra.mxu0 %v6472_v5  ;;  %6559 = vmatprep.mubr.f32.mxu0 %v13389_v37  ;;  %v6611_v45 = vsel %vm1285_vm7, %v12235_v46, %v6607_v22  ;;  %v6615_v54 = vsel %vm1285_vm7, %v6607_v22, %v12235_v46  ;;  %v6621_v46 = vmul.f32 %v6614_v13, %v13443_v1  ;;  %v8674_v5 = vld [vmem:[%s13284_s1 + $0x558] sm:$0xff]  ;;  %v8687_v13 = vld [vmem:[%s13284_s1 + $0x580] sm:$0xff] }
 0x7fc   : > { %6525 = vmatprep.subr.mxu0 %v6471_v25  ;;  %v6622_v10 = vmul.f32 %v6611_v45, %v13442_v24  ;;  %v6623_v55 = vmul.f32 %v6615_v54, %v13443_v1  ;;  %v6593_v0 = vpop.permute.xlu1 %6592  ;;  %v8680_v45 = vld [vmem:[%s13284_s1 + $0x568] sm:$0xff] }
 0x7fd   : > { %6526 = vmatpush1.msra.mxu0 %v6470_v41  ;;  %8667 = vmatmul.mubr.msk.f32.vlgmr.msra.gmra.mxu1 %vm320_vm2, %v8663_v43  ;;  %v6612_v48 = vsel %vm1285_vm7, %v6601_v61, %v6593_v0  ;;  %v6608_v2 = vsel %vm1285_vm7, %v6593_v0, %v6601_v61  ;;  %v8679_v43 = vld [vmem:[%s13284_s1 + $0x560] sm:$0xff]  ;;  %v8688_v54 = vld [vmem:[%s13284_s1 + $0x588] sm:$0xff]  ;;  %v8690_v0 = vld [vmem:[%s13284_s1 + $0x598] sm:$0xff] }
 0x7fe   : > { %8675 = vmatmul.mubr.msk.f32.vlgmr.msra.gmra.mxu0 %vm320_vm2, %v8671_v26  ;;  %6419 = vmatprep.mubr.f32.mxu1 %v13389_v37  ;;  %v6753_v58 = vpop.permute.xlu0 %6752  ;;  %v6617_v35 = vmul.f32 %v6612_v48, %v13443_v1  ;;  %v6616_v61 = vmul.f32 %v6608_v2, %v13442_v24  ;;  %v8681_v26 = vld [vmem:[%s13284_s1 + $0x570] sm:$0xff] }
 0x7ff   : > { %6565 = vmatprep.mubr.f32.mxu0 %v13389_v37  ;;  %v6757_v62 = vsel %vm1443_vm8, %v12292_v60, %v6753_v58  ;;  %v6761_v27 = vsel %vm1443_vm8, %v6753_v58, %v12292_v60  ;;  %6665 = vmatprep.subr.mxu1 %v6623_v55  ;;  %v6619_v60 = vmul.f32 %v6613_v28, %v13443_v1  ;;  %v8682_v55 = vld [vmem:[%s13284_s1 + $0x578] sm:$0xff] }
 0x800   : > { %v6769_v14 = vmul.f32 %v6761_v27, %v13444_v57  ;;  %6666 = vmatpush1.msra.mxu1 %v6622_v10  ;;  %v6741_v39 = vpop.permute.xlu1 %6740  ;;  %v6768_v63 = vmul.f32 %v6757_v62, %v13445_v50  ;;  %v8689_v10 = vld [vmem:[%s13284_s1 + $0x590] sm:$0xff] }
 0x801   : > { %8668 = vmatmul.mubr.msk.f32.gmra.mxu1 %vm320_vm2, %v8664_v38  ;;  %6667 = vmatprep.subr.mxu1 %v6621_v46 }
 0x802   : > { %8676 = vmatmul.mubr.msk.f32.gmra.mxu0 %vm320_vm2, %v8672_v44  ;;  %6425 = vmatprep.mubr.f32.mxu1 %v13389_v37  ;;  %v6749_v42 = vpop.permute.xlu0 %6748 }
 0x803   : > { %6571 = vmatprep.mubr.f32.mxu0 %v13389_v37  ;;  %6668 = vmatpush1.msra.mxu1 %v6620_v3  ;;  %v6759_v30 = vsel %vm1443_vm8, %v6749_v42, %v6741_v39  ;;  %v6755_v34 = vsel %vm1443_vm8, %v6741_v39, %v6749_v42 }
 0x804   : > { %6669 = vmatprep.subr.mxu1 %v6619_v60  ;;  %6811 = vmatprep.subr.mxu0 %v6769_v14  ;;  %v6739_v19 = vpop.permute.xlu1 %6738  ;;  %v6765_v53 = vmul.f32 %v6759_v30, %v13444_v57  ;;  %v6764_v41 = vmul.f32 %v6755_v34, %v13445_v50 }
 0x805   : > { %8669 = vmatmul.mubr.msk.f32.gmra.mxu1 %vm320_vm2, %v8665_v20  ;;  %6812 = vmatpush1.msra.mxu0 %v6768_v63 }
 0x806   : > { %8677 = vmatmul.mubr.msk.f32.gmra.mxu0 %vm320_vm2, %v8673_v52  ;;  %6670 = vmatpush1.msra.mxu1 %v6618_v33  ;;  %v6747_v56 = vpop.permute.xlu0 %6746 }
 0x807   : > { %6671 = vmatprep.subr.mxu1 %v6617_v35  ;;  %6813 = vmatprep.subr.mxu0 %v6767_v31  ;;  %v6754_v40 = vsel %vm1443_vm8, %v6739_v19, %v6747_v56  ;;  %v6758_v12 = vsel %vm1443_vm8, %v6747_v56, %v6739_v19 }
 0x808   : > { %6431 = vmatprep.mubr.f32.mxu1 %v13389_v37  ;;  %6577 = vmatprep.mubr.f32.mxu0 %v13389_v37  ;;  %v6763_v25 = vmul.f32 %v6758_v12, %v13444_v57  ;;  %v6762_v22 = vmul.f32 %v6754_v40, %v13445_v50 }
 0x809   : > { %6672 = vmatpush1.msra.mxu1 %v6616_v61  ;;  %6814 = vmatpush1.msra.mxu0 %v6766_v8 }
 0x80a   : > { %8670 = vmatmul.mubr.msk.f32.gmra.mxu1 %vm320_vm2, %v8666_v32  ;;  %8678 = vmatmul.mubr.msk.f32.gmra.mxu0 %vm320_vm2, %v8674_v5 }
 0x80b   : > { %6815 = vmatprep.subr.mxu0 %v6765_v53  ;;  %6705 = vmatprep.mubr.f32.mxu1 %v13389_v37 }
 0x80c   : > { %6816 = vmatpush1.msra.mxu0 %v6764_v41  ;;  %6851 = vmatprep.mubr.f32.mxu0 %v13389_v37 }
 0x80d   : > { %6817 = vmatprep.subr.mxu0 %v6763_v25 }
 0x80e   : > { %8683 = vmatmul.mubr.msk.f32.vlgmr.msra.gmra.mxu1 %vm320_vm2, %v8679_v43  ;;  %6818 = vmatpush1.msra.mxu0 %v6762_v22 }
 0x80f   : > { %8691 = vmatmul.mubr.msk.f32.vlgmr.msra.gmra.mxu0 %vm320_vm2, %v8687_v13  ;;  %6711 = vmatprep.mubr.f32.mxu1 %v13389_v37 }
 0x810   : > { %6857 = vmatprep.mubr.f32.mxu0 %v13389_v37 }
 0x812   : > { %8684 = vmatmul.mubr.msk.f32.gmra.mxu1 %vm320_vm2, %v8680_v45 }
 0x813   : > { %8692 = vmatmul.mubr.msk.f32.gmra.mxu0 %vm320_vm2, %v8688_v54  ;;  %6717 = vmatprep.mubr.f32.mxu1 %v13389_v37 }
 0x814   : > { %6863 = vmatprep.mubr.f32.mxu0 %v13389_v37 }
 0x816   : > { %8685 = vmatmul.mubr.msk.f32.gmra.mxu1 %vm320_vm2, %v8681_v26 }
 0x817   : > { %8693 = vmatmul.mubr.msk.f32.gmra.mxu0 %vm320_vm2, %v8689_v10  ;;  %6723 = vmatprep.mubr.f32.mxu1 %v13389_v37 }
 0x818   : > { %6869 = vmatprep.mubr.f32.mxu0 %v13389_v37 }
 0x81a   : > { %8686 = vmatmul.mubr.msk.f32.gmra.mxu1 %vm320_vm2, %v8682_v55 }
 0x81b   : > { %8694 = vmatmul.mubr.msk.f32.gmra.mxu0 %vm320_vm2, %v8690_v0  ;;  %7099 = vmatprep.mubr.f32.mxu1 %v13389_v37 }
 0x81c   : > { %7200 = vmatprep.mubr.f32.mxu0 %v13389_v37 }
 0x88a   : > { %v5770_v6 = vpop.f32.mrf.mxu0 }
 0x88c   : > { %v5772_v46 = vpop.f32.mrf.mxu0 }
 0x88e   : > { %v5776_v58 = vpop.f32.mrf.mxu0 }
 0x890   : > { %v5778_v38 = vpop.f32.mrf.mxu0 }
 0x892   : > { %v12501_v28 = vpop.f32.mrf.mxu0 }
 0x894   : > { %v12503_v62 = vpop.f32.mrf.mxu0 }
 0x897   : > { %v5788_v27 = vpop.f32.mrf.mxu0  ;;  %v5871_v44 = vpop.f32.mrf.mxu1 }
 0x899   : > { %v5790_v14 = vpop.f32.mrf.mxu0  ;;  %v5873_v39 = vpop.f32.mrf.mxu1 }
 0x89b   : > { %v5877_v3 = vpop.f32.mrf.mxu1 }
 0x89c   : > { %v6009_v16 = vpop.f32.mrf.mxu0 }
 0x89d   : > { %v5879_v63 = vpop.f32.mrf.mxu1 }
 0x89e   : > { %v6011_v60 = vpop.f32.mrf.mxu0 }
 0x89f   : > { %v12505_v51 = vpop.f32.mrf.mxu1 }
 0x8a0   : > { %v6015_v48 = vpop.f32.mrf.mxu0 }
 0x8a1   : > { %v12507_v42 = vpop.f32.mrf.mxu1 }
 0x8a2   : > { %v6017_v20 = vpop.f32.mrf.mxu0 }
 0x8a3   : > { %v5889_v36 = vpop.f32.mrf.mxu1 }
 0x8a4   : > { %v5890_v2 = vadd.f32 %v5889_v36, %v5788_v27  ;;  %v12509_v52 = vpop.f32.mrf.mxu0 }
 0x8a5   : > { %v5891_v33 = vpop.f32.mrf.mxu1 }
 0x8a6   : > { %v5892_v30 = vadd.f32 %v5891_v33, %v5790_v14  ;;  %v12511_v31 = vpop.f32.mrf.mxu0  ;;  %v5872_v33 = vadd.f32 %v5871_v44, %v5770_v6 }
 0x8a8   : > { %v6027_v35 = vpop.f32.mrf.mxu0  ;;  %v6032_v50 = vadd.f32 %v6009_v16, %v5872_v33 }
 0x8a9   : > { %v6038_v34 = vadd.f32 %v6027_v35, %v5890_v2 }
 0x8aa   : > { %v6029_v8 = vpop.f32.mrf.mxu0 }
 0x8ab   : > { %v6039_v61 = vadd.f32 %v6029_v8, %v5892_v30  ;;  %v5874_v8 = vadd.f32 %v5873_v39, %v5772_v46 }
 0x8ac   : > { %v6155_v19 = vpop.f32.mrf.mxu1  ;;  %v6269_v56 = vpop.f32.mrf.mxu0 }
 0x8ad   : > { %v6033_v24 = vadd.f32 %v6011_v60, %v5874_v8  ;;  %v6178_v21 = vadd.f32 %v6155_v19, %v6032_v50 }
 0x8ae   : > { %v6157_v53 = vpop.f32.mrf.mxu1  ;;  %v6271_v40 = vpop.f32.mrf.mxu0 }
 0x8af   : > { %v6179_v29 = vadd.f32 %v6157_v53, %v6033_v24 }
 0x8b0   : > { %v6161_v12 = vpop.f32.mrf.mxu1  ;;  %v6275_v32 = vpop.f32.mrf.mxu0 }
 0x8b1   : > { %v6293_v39 = vadd.f32 %v6271_v40, %v6179_v29 }
 0x8b2   : > { %v6163_v5 = vpop.f32.mrf.mxu1  ;;  %v6277_v41 = vpop.f32.mrf.mxu0 }
 0x8b4   : > { %v12513_v25 = vpop.f32.mrf.mxu1  ;;  %v12515_v22 = vpop.f32.mrf.mxu0 }
 0x8b6   : > { %v12517_v43 = vpop.f32.mrf.mxu1  ;;  %v12519_v13 = vpop.f32.mrf.mxu0 }
 0x8b9   : > { %v6173_v45 = vpop.f32.mrf.mxu1  ;;  %v6287_v54 = vpop.f32.mrf.mxu0 }
 0x8ba   : > { %v6184_v26 = vadd.f32 %v6173_v45, %v6038_v34  ;;  %v5878_v45 = vadd.f32 %v5877_v3, %v5776_v58  ;;  %v12537_v3 = vpop.permute.xlu0 %6901 }
 0x8bb   : > { %v6175_v10 = vpop.f32.mrf.mxu1  ;;  %v6289_v55 = vpop.f32.mrf.mxu0 }
 0x8bc   : > { %v12521_v0 = vadd.f32 %v6287_v54, %v6184_v26  ;;  %v6185_v27 = vadd.f32 %v6175_v10, %v6039_v61  ;;  %v5880_v26 = vadd.f32 %v5879_v63, %v5778_v38  ;;  %v6034_v10 = vadd.f32 %v6015_v48, %v5878_v45 }
 0x8bd   : > { %v6415_v14 = vpop.f32.mrf.mxu1 }
 0x8be   : > { %v12523_v36 = vadd.f32 %v6289_v55, %v6185_v27  ;;  %v6561_v2 = vpop.f32.mrf.mxu0  ;;  %v6292_v55 = vadd.f32 %v6269_v56, %v6178_v21  ;;  %v6035_v46 = vadd.f32 %v6017_v20, %v5880_v26  ;;  %v6180_v16 = vadd.f32 %v6161_v12, %v6034_v10 }
 0x8bf   : > { %v6417_v30 = vpop.f32.mrf.mxu1 }
 0x8c0   : > { %v6563_v35 = vpop.f32.mrf.mxu0  ;;  %v6438_v60 = vadd.f32 %v6415_v14, %v6292_v55  ;;  %v6181_v24 = vadd.f32 %v6163_v5, %v6035_v46  ;;  %v6439_v58 = vadd.f32 %v6417_v30, %v6293_v39  ;;  %v6294_v38 = vadd.f32 %v6275_v32, %v6180_v16  ;;  %v6892_v30 = vpop.permute.xlu0 %6891 }
 0x8c1   : > { %v6421_v57 = vpop.f32.mrf.mxu1  ;;  %v5884_v32 = vadd.f32 %v12505_v51, %v12501_v28 }
 0x8c2   : > { %v6567_v1 = vpop.f32.mrf.mxu0  ;;  %v6584_v21 = vadd.f32 %v6561_v2, %v6438_v60  ;;  %v6295_v56 = vadd.f32 %v6277_v41, %v6181_v24  ;;  %v6585_v20 = vadd.f32 %v6563_v35, %v6439_v58  ;;  %v6440_v29 = vadd.f32 %v6421_v57, %v6294_v38  ;;  %v13446_v35 = vld [vmem:[#allocation3_spill] sm:$0xff]  ;;  %v12546_v60 = vpop.permute.xlu1 %6906  ;;  %v13447_v58 = vld [vmem:[#allocation2_spill] sm:$0xff] }
 0x8c3   : > { %v6423_v9 = vpop.f32.mrf.mxu1  ;;  %v6036_v24 = vadd.f32 %v12509_v52, %v5884_v32 }
 0x8c4   : > { %v6569_v34 = vpop.f32.mrf.mxu0  ;;  %v6441_v14 = vadd.f32 %v6423_v9, %v6295_v56  ;;  %v6586_v26 = vadd.f32 %v6567_v1, %v6440_v29  ;;  %v5886_v9 = vadd.f32 %v12507_v42, %v12503_v62 }
 0x8c5   : > { %v12525_v54 = vpop.f32.mrf.mxu1  ;;  %v6182_v51 = vadd.f32 %v12513_v25, %v6036_v24 }
 0x8c6   : > { %v12527_v61 = vpop.f32.mrf.mxu0  ;;  %v6587_v41 = vadd.f32 %v6569_v34, %v6441_v14  ;;  %v6037_v28 = vadd.f32 %v12511_v31, %v5886_v9  ;;  %v6897_v29 = vpop.permute.xlu1 %6896  ;;  %v13451_v9 = vld [vmem:[#allocation17_spill] sm:$0xff] }
 0x8c7   : > { %v12529_v6 = vpop.f32.mrf.mxu1  ;;  %v6296_v31 = vadd.f32 %v12515_v22, %v6182_v51 }
 0x8c8   : > { %v12531_v44 = vpop.f32.mrf.mxu0  ;;  %v6183_v62 = vadd.f32 %v12517_v43, %v6037_v28 }
 0x8ca   : > { %v12533_v50 = vpop.f32.mrf.mxu1  ;;  %v12535_v19 = vpop.f32.mrf.mxu0 }
 0x8cc   : > { %v12539_v53 = vpop.f32.mrf.mxu1  ;;  %v12541_v63 = vpop.f32.mrf.mxu0 }
 0x8ce   : > { %v6707_v48 = vpop.f32.mrf.mxu1 }
 0x8cf   : > { %v6730_v40 = vadd.f32 %v6707_v48, %v6584_v21  ;;  %v6853_v12 = vpop.f32.mrf.mxu0 }
 0x8d0   : > { %v6709_v27 = vpop.f32.mrf.mxu1 }
 0x8d1   : > { %v6731_v33 = vadd.f32 %v6709_v27, %v6585_v20  ;;  %v6876_v8 = vadd.f32 %v6853_v12, %v6730_v40  ;;  %v6855_v5 = vpop.f32.mrf.mxu0  ;;  %v6297_v40 = vadd.f32 %v12519_v13, %v6183_v62  ;;  %v6442_v12 = vadd.f32 %v12525_v54, %v6296_v31  ;;  %v13453_v31 = vld [vmem:[#allocation19_spill] sm:$0xff] }
 0x8d2   : > { %v6713_v45 = vpop.f32.mrf.mxu1 }
 0x8d3   : > { %v6909_v10 = vadd.f32 %v6892_v30, %v6876_v8  ;;  %v6877_v55 = vadd.f32 %v6855_v5, %v6731_v33  ;;  %v6859_v46 = vpop.f32.mrf.mxu0  ;;  %v6732_v39 = vadd.f32 %v6713_v45, %v6586_v26  ;;  %v6443_v43 = vadd.f32 %v12529_v6, %v6297_v40  ;;  %v13448_v33 = vld [vmem:[#allocation4_spill] sm:$0xff]  ;;  %v13449_v5 = vld [vmem:[#allocation5_spill] sm:$0xff] }
 0x8d4   : > { %v6715_v2 = vpop.f32.mrf.mxu1  ;;  %v6588_v22 = vadd.f32 %v12527_v61, %v6442_v12 }
 0x8d5   : > { %v6917_v57 = vadd.f32 %v6909_v10, %v13446_v35  ;;  %v6910_v16 = vadd.f32 %v6892_v30, %v6877_v55  ;;  %v6733_v21 = vadd.f32 %v6715_v2, %v6587_v41  ;;  %v6861_v34 = vpop.f32.mrf.mxu0  ;;  %v6878_v20 = vadd.f32 %v6859_v46, %v6732_v39 }
 0x8d6   : > { %v6719_v14 = vpop.f32.mrf.mxu1  ;;  %v6589_v54 = vadd.f32 %v12531_v44, %v6443_v43 }
 0x8d7   : > { %vm6925_vm13 = vcmp.ge.f32.partialorder %v6917_v57, 0.0  ;;  %v6933_v1 = vmul.f32 0.2, %v6917_v57  ;;  %v6918_v38 = vadd.f32 %v6910_v16, %v13447_v58  ;;  %v6879_v52 = vadd.f32 %v6861_v34, %v6733_v21  ;;  %v6865_v13 = vpop.f32.mrf.mxu0 }
 0x8d8   : > { %v6911_v25 = vadd.f32 %v6897_v29, %v6878_v20  ;;  %v6721_v45 = vpop.f32.mrf.mxu1  ;;  %v6734_v10 = vadd.f32 %v6719_v14, %v6588_v22  ;;  %v6444_v16 = vadd.f32 %v12533_v50, %v12521_v0 }
 0x8d9   : > { %v12554_v48 = vsel %vm6925_vm13, %v6917_v57, %v6933_v1  ;;  %vm6926_vm14 = vcmp.ge.f32.partialorder %v6918_v38, 0.0  ;;  %v6934_v56 = vmul.f32 0.2, %v6918_v38  ;;  %v6912_v27 = vadd.f32 %v6897_v29, %v6879_v52  ;;  %v6867_v32 = vpop.f32.mrf.mxu0  ;;  %v13450_v57 = vld [vmem:[#allocation16_spill] sm:$0xff]  ;;  %v13452_v52 = vld [vmem:[#allocation18_spill] sm:$0xff] }
 0x8da   : > { %6986 = vrot.lane.b32.xlu1 %v12554_v48, %s8807_s21  ;;  %v6919_v8 = vadd.f32 %v6911_v25, %v13448_v33  ;;  %v6735_v55 = vadd.f32 %v6721_v45, %v6589_v54  ;;  %v6880_v2 = vadd.f32 %v6865_v13, %v6734_v10  ;;  %v6725_v1 = vpop.f32.mrf.mxu1 }
 0x8db   : > { %v12559_v42 = vsel %vm6926_vm14, %v6918_v38, %v6934_v56  ;;  %v6920_v30 = vadd.f32 %v6912_v27, %v13449_v5  ;;  %v6590_v38 = vadd.f32 %v12535_v19, %v6444_v16  ;;  %v6871_v0 = vpop.f32.mrf.mxu0 }
 0x8dc   : > { %6994 = vrot.lane.b32.xlu0 %v12559_v42, %s8807_s21  ;;  %v6935_v26 = vmul.f32 0.2, %v6919_v8  ;;  %vm6927_vm15 = vcmp.ge.f32.partialorder %v6919_v8, 0.0  ;;  %v6881_v46 = vadd.f32 %v6867_v32, %v6735_v55  ;;  %v6913_v41 = vadd.f32 %v12537_v3, %v6880_v2  ;;  %v6727_v28 = vpop.f32.mrf.mxu1 }
 0x8dd   : > { %v6936_v6 = vmul.f32 0.2, %v6920_v30  ;;  %vm6928_vm9 = vcmp.ge.f32.partialorder %v6920_v30, 0.0  ;;  %v6736_v34 = vadd.f32 %v6725_v1, %v6590_v38  ;;  %v6873_v56 = vpop.f32.mrf.mxu0 }
 0x8de   : > { %6949 = vrot.lane.b32.xlu1 %v12554_v48, %s8809_s22  ;;  %v12583_v61 = vsel %vm6927_vm15, %v6919_v8, %v6935_v26  ;;  %v6914_v35 = vadd.f32 %v12537_v3, %v6881_v46  ;;  %v6921_v39 = vadd.f32 %v6913_v41, %v13450_v57  ;;  %v6445_v3 = vadd.f32 %v12539_v53, %v12523_v36  ;;  %v8771_v26 = vld [vmem:[%s13285_s2 + $0xa0] sm:$0xff]  ;;  %v8773_v46 = vld [vmem:[%s13285_s2 + $0xb0] sm:$0xff] }
 0x8df   : > { %v12587_v44 = vsel %vm6928_vm9, %v6920_v30, %v6936_v6  ;;  %v6882_v19 = vadd.f32 %v6871_v0, %v6736_v34  ;;  %v8772_v6 = vld [vmem:[%s13285_s2 + $0xa8] sm:$0xff] }
 0x8e0   : > { %6957 = vrot.lane.b32.xlu0 %v12559_v42, %s8809_s22  ;;  %v6922_v24 = vadd.f32 %v6914_v35, %v13451_v9  ;;  %v6937_v58 = vmul.f32 0.2, %v6921_v39  ;;  %vm6929_vm10 = vcmp.ge.f32.partialorder %v6921_v39, 0.0  ;;  %v6591_v50 = vadd.f32 %v12541_v63, %v6445_v3  ;;  %v8774_v35 = vld [vmem:[%s13285_s2 + $0xb8] sm:$0xff] }
 0x8e1   : > { %v6915_v63 = vadd.f32 %v12546_v60, %v6882_v19 }
 0x8e2   : > { %7225 = vrot.lane.b32.xlu1 %v12554_v48, %s8810_s23  ;;  %v6938_v21 = vmul.f32 0.2, %v6922_v24  ;;  %vm6930_vm11 = vcmp.ge.f32.partialorder %v6922_v24, 0.0  ;;  %v12613_v51 = vsel %vm6929_vm10, %v6921_v39, %v6937_v58  ;;  %v6737_v53 = vadd.f32 %v6727_v28, %v6591_v50 }
 0x8e3   : > { %v6923_v29 = vadd.f32 %v6915_v63, %v13452_v52 }
 0x8e4   : > { %7233 = vrot.lane.b32.xlu0 %v12559_v42, %s8810_s23  ;;  %v12617_v36 = vsel %vm6930_vm11, %v6922_v24, %v6938_v21  ;;  %v6883_v20 = vadd.f32 %v6873_v56, %v6737_v53 }
 0x8e5   : > { %v6939_v40 = vmul.f32 0.2, %v6923_v29  ;;  %vm6931_vm12 = vcmp.ge.f32.partialorder %v6923_v29, 0.0 }
 0x8e6   : > { %7371 = vrot.lane.b32.xlu1 %v12554_v48, %s8811_s24  ;;  %v6916_v62 = vadd.f32 %v12546_v60, %v6883_v20 }
 0x8e7   : > { %v12641_v60 = vsel %vm6931_vm12, %v6923_v29, %v6939_v40 }
 0x8e8   : > { %7379 = vrot.lane.b32.xlu0 %v12559_v42, %s8811_s24  ;;  %v6924_v25 = vadd.f32 %v6916_v62, %v13453_v31 }
 0x8ea   : > { %6988 = vrot.lane.b32.xlu1 %v12583_v61, %s8807_s21  ;;  %v6940_v12 = vmul.f32 0.2, %v6924_v25  ;;  %vm6932_vm13 = vcmp.ge.f32.partialorder %v6924_v25, 0.0 }
 0x8ec   : > { %6996 = vrot.lane.b32.xlu0 %v12587_v44, %s8807_s21  ;;  %v12645_v27 = vsel %vm6932_vm13, %v6924_v25, %v6940_v12 }
 0x8ee   : > { %6951 = vrot.lane.b32.xlu1 %v12583_v61, %s8809_s22 }
 0x8f0   : > { %6959 = vrot.lane.b32.xlu0 %v12587_v44, %s8809_s22 }
 0x8f2   : > { %7227 = vrot.lane.b32.xlu1 %v12583_v61, %s8810_s23 }
 0x8f4   : > { %7235 = vrot.lane.b32.xlu0 %v12587_v44, %s8810_s23 }
 0x8f6   : > { %7373 = vrot.lane.b32.xlu1 %v12583_v61, %s8811_s24 }
 0x8f8   : > { %7381 = vrot.lane.b32.xlu0 %v12587_v44, %s8811_s24 }
 0x8fa   : > { %6990 = vrot.lane.b32.xlu1 %v12613_v51, %s8807_s21 }
 0x8fc   : > { %6998 = vrot.lane.b32.xlu0 %v12617_v36, %s8807_s21 }
 0x8fe   : > { %6953 = vrot.lane.b32.xlu1 %v12613_v51, %s8809_s22 }
 0x900   : > { %6961 = vrot.lane.b32.xlu0 %v12617_v36, %s8809_s22 }
 0x902   : > { %7229 = vrot.lane.b32.xlu1 %v12613_v51, %s8810_s23 }
 0x904   : > { %7237 = vrot.lane.b32.xlu0 %v12617_v36, %s8810_s23 }
 0x906   : > { %7375 = vrot.lane.b32.xlu1 %v12613_v51, %s8811_s24 }
 0x908   : > { %7383 = vrot.lane.b32.xlu0 %v12617_v36, %s8811_s24 }
 0x90a   : > { %7635 = vrot.lane.b32.xlu1 %v12613_v51, %s8812_s25 }
 0x90c   : > { %7643 = vrot.lane.b32.xlu0 %v12617_v36, %s8812_s25 }
 0x90e   : > { %6992 = vrot.lane.b32.xlu1 %v12641_v60, %s8807_s21 }
 0x910   : > { %7000 = vrot.lane.b32.xlu0 %v12645_v27, %s8807_s21 }
 0x912   : > { %7633 = vrot.lane.b32.xlu1 %v12583_v61, %s8812_s25 }
 0x914   : > { %7641 = vrot.lane.b32.xlu0 %v12587_v44, %s8812_s25 }
 0x916   : > { %6955 = vrot.lane.b32.xlu1 %v12641_v60, %s8809_s22 }
 0x918   : > { %7789 = vrot.lane.b32.xlu0 %v12617_v36, %s8813_s26 }
 0x91a   : > { %7231 = vrot.lane.b32.xlu1 %v12641_v60, %s8810_s23 }
 0x91c   : > { %6963 = vrot.lane.b32.xlu0 %v12645_v27, %s8809_s22 }
 0x91e   : > { %7377 = vrot.lane.b32.xlu1 %v12641_v60, %s8811_s24 }
 0x920   : > { %7239 = vrot.lane.b32.xlu0 %v12645_v27, %s8810_s23 }
 0x922   : > { %7637 = vrot.lane.b32.xlu1 %v12641_v60, %s8812_s25 }
 0x924   : > { %7639 = vrot.lane.b32.xlu0 %v12559_v42, %s8812_s25 }
 0x926   : > { %7783 = vrot.lane.b32.xlu1 %v12641_v60, %s8813_s26 }
 0x928   : > { %7787 = vrot.lane.b32.xlu0 %v12587_v44, %s8813_s26 }
 0x92a   : > { %7781 = vrot.lane.b32.xlu1 %v12613_v51, %s8813_s26 }
 0x92c   : > { %7785 = vrot.lane.b32.xlu0 %v12559_v42, %s8813_s26 }
 0x92e   : > { %7631 = vrot.lane.b32.xlu1 %v12554_v48, %s8812_s25 }
 0x930   : > { %7385 = vrot.lane.b32.xlu0 %v12645_v27, %s8811_s24 }
 0x932   : > { %7779 = vrot.lane.b32.xlu1 %v12583_v61, %s8813_s26 }
 0x934   : > { %7935 = vrot.lane.b32.xlu0 %v12617_v36, %s8814_s27 }
 0x936   : > { %7777 = vrot.lane.b32.xlu1 %v12554_v48, %s8813_s26 }
 0x938   : > { %7933 = vrot.lane.b32.xlu0 %v12587_v44, %s8814_s27 }
 0x93a   : > { %7929 = vrot.lane.b32.xlu1 %v12641_v60, %s8814_s27 }
 0x93c   : > { %7645 = vrot.lane.b32.xlu0 %v12645_v27, %s8812_s25 }
 0x93e   : > { %7927 = vrot.lane.b32.xlu1 %v12613_v51, %s8814_s27 }
 0x940   : > { %7791 = vrot.lane.b32.xlu0 %v12645_v27, %s8813_s26 }
 0x942   : > { %8075 = vrot.lane.b32.xlu1 %v12641_v60, %s8815_s28 }
 0x944   : > { %8081 = vrot.lane.b32.xlu0 %v12617_v36, %s8815_s28 }
 0x946   : > { %7925 = vrot.lane.b32.xlu1 %v12583_v61, %s8814_s27 }
 0x948   : > { %7931 = vrot.lane.b32.xlu0 %v12559_v42, %s8814_s27 }
 0x94a   : > { %8073 = vrot.lane.b32.xlu1 %v12613_v51, %s8815_s28 }
 0x94c   : > { %7937 = vrot.lane.b32.xlu0 %v12645_v27, %s8814_s27  ;;  %v12709_v14 = vpop.permute.xlu1 %6986 }
 0x94e   : > { %v12711_v43 = vpop.permute.xlu0 %6994  ;;  %7923 = vrot.lane.b32.xlu1 %v12554_v48, %s8814_s27 }
 0x950   : > { %8083 = vrot.lane.b32.xlu0 %v12645_v27, %s8815_s28  ;;  %v6950_v33 = vpop.permute.xlu1 %6949 }
 0x952   : > { %v6958_v8 = vpop.permute.xlu0 %6957  ;;  %8071 = vrot.lane.b32.xlu1 %v12583_v61, %s8815_s28 }
 0x953   : > { %v12721_v22 = vsel %vm239_vm1, %v6950_v33, %v6958_v8  ;;  %v12725_v5 = vsel %vm239_vm1, %v6958_v8, %v6950_v33 }
 0x954   : > { %8079 = vrot.lane.b32.xlu0 %v12587_v44, %s8815_s28  ;;  %v7226_v30 = vpop.permute.xlu1 %7225 }
 0x956   : > { %v7234_v45 = vpop.permute.xlu0 %7233  ;;  %8069 = vrot.lane.b32.xlu1 %v12554_v48, %s8815_s28 }
 0x957   : > { %v12733_v13 = vsel %vm539_vm3, %v7226_v30, %v7234_v45  ;;  %v12737_v54 = vsel %vm539_vm3, %v7234_v45, %v7226_v30 }
 0x958   : > { %8077 = vrot.lane.b32.xlu0 %v12559_v42, %s8815_s28  ;;  %v7372_v10 = vpop.permute.xlu1 %7371 }
 0x95a   : > { %v7380_v55 = vpop.permute.xlu0 %7379  ;;  %8222 = vperm.xlu1 %8798, %v8771_v26   ;;  %v7002_v26 = vsel %vm287_vm0, %v12709_v14, %v12711_v43 }
 0x95b   : > { %v12749_v32 = vsel %vm697_vm4, %v7372_v10, %v7380_v55  ;;  %v12753_v2 = vsel %vm697_vm4, %v7380_v55, %v7372_v10 }
 0x95c   : > { %8227 = vperm.xlu0 %8797, %v8772_v6   ;;  %v6989_v41 = vpop.permute.xlu1 %6988  ;;  %v7006_v6 = vsel %vm287_vm0, %v12711_v43, %v12709_v14 }
 0x95e   : > { %v6997_v57 = vpop.permute.xlu0 %6996  ;;  %8232 = vperm.xlu1 %8798, %v8773_v46  }
 0x95f   : > { %v7003_v33 = vsel %vm287_vm0, %v6989_v41, %v6997_v57  ;;  %v7007_v8 = vsel %vm287_vm0, %v6997_v57, %v6989_v41 }
 0x960   : > { %8237 = vperm.xlu0 %8797, %v8774_v35   ;;  %v6952_v39 = vpop.permute.xlu1 %6951  ;;  %v7013_v55 = vmul.f32 %v7003_v33, %v9007_v17  ;;  %v7012_v41 = vmul.f32 %v7007_v8, %v9010_v18  ;;  %v7011_v35 = vmul.f32 %v7002_v26, %v9007_v17 }
 0x962   : > { %v6960_v16 = vpop.permute.xlu0 %6959 }
 0x964   : > { %v12761_v9 = vpop.permute.xlu1 %7227 }
 0x966   : > { %v12763_v24 = vpop.permute.xlu0 %7235 }
 0x968   : > { %v12765_v1 = vpop.permute.xlu1 %7373 }
 0x96a   : > { %v12767_v3 = vpop.permute.xlu0 %7381 }
 0x96c   : > { %v6991_v58 = vpop.permute.xlu1 %6990 }
 0x96e   : > { %v6999_v38 = vpop.permute.xlu0 %6998 }
 0x96f   : > { %v7004_v62 = vsel %vm287_vm0, %v6991_v58, %v6999_v38  ;;  %v7008_v31 = vsel %vm287_vm0, %v6999_v38, %v6991_v58  ;;  %v7010_v58 = vmul.f32 %v7006_v6, %v9010_v18  ;;  %v8703_v38 = vld [vmem:[%s13284_s1 + $0x5c0] sm:$0xff] }
 0x970   : > { %v6954_v21 = vpop.permute.xlu1 %6953  ;;  %v7015_v30 = vmul.f32 %v7004_v62, %v9007_v17  ;;  %v7014_v10 = vmul.f32 %v7008_v31, %v9010_v18 }
 0x972   : > { %v6962_v28 = vpop.permute.xlu0 %6961 }
 0x973   : > { %v6971_v62 = vsel %vm239_vm1, %v6962_v28, %v6954_v21 }
 0x974   : > { %v12769_v0 = vpop.permute.xlu1 %7229 }
 0x976   : > { %v12771_v50 = vpop.permute.xlu0 %7237 }
 0x977   : > { %v7243_v26 = vsel %vm539_vm3, %v12769_v0, %v12771_v50 }
 0x978   : > { %v12773_v34 = vpop.permute.xlu1 %7375 }
 0x97a   : > { %v12775_v53 = vpop.permute.xlu0 %7383 }
 0x97c   : > { %v12777_v56 = vpop.permute.xlu1 %7635 }
 0x97e   : > { %v12779_v19 = vpop.permute.xlu0 %7643 }
 0x980   : > { %v6993_v20 = vpop.permute.xlu1 %6992 }
 0x982   : > { %v7001_v63 = vpop.permute.xlu0 %7000 }
 0x983   : > { %v7005_v52 = vsel %vm287_vm0, %v6993_v20, %v7001_v63  ;;  %v7009_v29 = vsel %vm287_vm0, %v7001_v63, %v6993_v20  ;;  %v6967_v20 = vsel %vm239_vm1, %v6954_v21, %v6962_v28  ;;  %v8704_v63 = vld [vmem:[%s13284_s1 + $0x5c8] sm:$0xff]  ;;  %v6977_v21 = vmul.f32 %v6971_v62, %v13390_v15  ;;  %v8715_v62 = vld [vmem:[%s13284_s1 + $0x5e0] sm:$0xff] }
 0x984   : > { %v7016_v25 = vmul.f32 %v7009_v29, %v9010_v18  ;;  %v7017_v40 = vmul.f32 %v7005_v52, %v9007_v17  ;;  %v12791_v12 = vpop.permute.xlu1 %7633  ;;  %v6978_v33 = vmul.f32 %v6967_v20, %v13391_v59  ;;  %v8699_v20 = vld [vmem:[%s13284_s1 + $0x5a0] sm:$0xff] }
 0x986   : > { %v12798_v45 = vpop.permute.xlu0 %7641  ;;  %7059 = vmatprep.subr.mxu1 %v7017_v40  ;;  %v6970_v40 = vsel %vm239_vm1, %v6960_v16, %v6952_v39 }
 0x987   : > { %7060 = vmatpush1.msra.mxu1 %v7016_v25  ;;  %v6966_v25 = vsel %vm239_vm1, %v6952_v39, %v6960_v16  ;;  %v8705_v39 = vld [vmem:[%s13284_s1 + $0x5d0] sm:$0xff] }
 0x988   : > { %7061 = vmatprep.subr.mxu1 %v7015_v30  ;;  %v6956_v46 = vpop.permute.xlu1 %6955  ;;  %v6976_v16 = vmul.f32 %v6966_v25, %v13391_v59  ;;  %v7389_v25 = vsel %vm697_vm4, %v12773_v34, %v12775_v53 }
 0x989   : > { %7062 = vmatpush1.msra.mxu1 %v7014_v10 }
 0x98a   : > { %v12812_v57 = vpop.permute.xlu0 %7789  ;;  %7063 = vmatprep.subr.mxu1 %v7013_v55 }
 0x98b   : > { %7064 = vmatpush1.msra.mxu1 %v7012_v41  ;;  %v7247_v41 = vsel %vm539_vm3, %v12771_v50, %v12769_v0  ;;  %v6973_v0 = vmul.f32 %v12725_v5, %v13390_v15 }
 0x98c   : > { %7065 = vmatprep.subr.mxu1 %v7011_v35  ;;  %v7232_v14 = vpop.permute.xlu1 %7231  ;;  %v6974_v35 = vmul.f32 %v12721_v22, %v13391_v59  ;;  %v7253_v22 = vmul.f32 %v7247_v41, %v13392_v23 }
 0x98d   : > { %7066 = vmatpush1.msra.mxu1 %v7010_v58 }
 0x98e   : > { %v6964_v43 = vpop.permute.xlu0 %6963  ;;  %8707 = vmatmul.mubr.msk.f32.vlgmr.msra.gmra.mxu1 %vm320_vm2, %v8703_v38  ;;  %v7242_v38 = vsel %vm539_vm3, %v12761_v9, %v12763_v24 }
 0x98f   : > { %v6968_v17 = vsel %vm239_vm1, %v6956_v46, %v6964_v43  ;;  %v6972_v18 = vsel %vm239_vm1, %v6964_v43, %v6956_v46  ;;  %7105 = vmatprep.mubr.f32.mxu1 %v13389_v37  ;;  %v6975_v46 = vmul.f32 %v6970_v40, %v13390_v15  ;;  %v8706_v43 = vld [vmem:[%s13284_s1 + $0x5d8] sm:$0xff]  ;;  %v7393_v40 = vsel %vm697_vm4, %v12775_v53, %v12773_v34 }
 0x990   : > { %v6979_v52 = vmul.f32 %v6972_v18, %v13390_v15  ;;  %v6980_v29 = vmul.f32 %v6968_v17, %v13391_v59  ;;  %v12833_v31 = vpop.permute.xlu1 %7377  ;;  %v7246_v59 = vsel %vm539_vm3, %v12763_v24, %v12761_v9  ;;  %v7252_v15 = vmul.f32 %v7242_v38, %v13393_v7  ;;  %v8700_v18 = vld [vmem:[%s13284_s1 + $0x5a8] sm:$0xff] }
 0x991   : > { %v7251_v9 = vmul.f32 %v7246_v59, %v13392_v23  ;;  %v7250_v24 = vmul.f32 %v12733_v13, %v13393_v7  ;;  %v7392_v34 = vsel %vm697_vm4, %v12767_v3, %v12765_v1 }
 0x992   : > { %v7240_v8 = vpop.permute.xlu0 %7239  ;;  %8708 = vmatmul.mubr.msk.f32.gmra.mxu1 %vm320_vm2, %v8704_v63  ;;  %7160 = vmatprep.subr.mxu0 %v6980_v29  ;;  %v7249_v63 = vmul.f32 %v12737_v54, %v13392_v23  ;;  %v8716_v54 = vld [vmem:[%s13284_s1 + $0x5e8] sm:$0xff] }
 0x993   : > { %v7244_v28 = vsel %vm539_vm3, %v7232_v14, %v7240_v8  ;;  %v7248_v30 = vsel %vm539_vm3, %v7240_v8, %v7232_v14  ;;  %7161 = vmatpush1.msra.mxu0 %v6979_v52  ;;  %7111 = vmatprep.mubr.f32.mxu1 %v13389_v37  ;;  %v7254_v14 = vmul.f32 %v7243_v26, %v13393_v7  ;;  %v8731_v26 = vld [vmem:[%s13284_s1 + $0x620] sm:$0xff] }
 0x994   : > { %v7255_v10 = vmul.f32 %v7248_v30, %v13392_v23  ;;  %v7256_v6 = vmul.f32 %v7244_v28, %v13393_v7  ;;  %7162 = vmatprep.subr.mxu0 %v6978_v33  ;;  %v12857_v55 = vpop.permute.xlu1 %7637  ;;  %v8701_v23 = vld [vmem:[%s13284_s1 + $0x5b0] sm:$0xff]  ;;  %v7399_v8 = vmul.f32 %v7393_v40, %v13430_v47  ;;  %v7396_v28 = vmul.f32 %v12749_v32, %v13429_v4  ;;  %v8734_v40 = vld [vmem:[%s13284_s1 + $0x638] sm:$0xff] }
 0x995   : > { %7163 = vmatpush1.msra.mxu0 %v6977_v21  ;;  %v7649_v32 = vsel %vm969_vm5, %v12777_v56, %v12779_v19 }
 0x996   : > { %v12866_v58 = vpop.permute.xlu0 %7639  ;;  %8709 = vmatmul.mubr.msk.f32.gmra.mxu1 %vm320_vm2, %v8705_v39  ;;  %7164 = vmatprep.subr.mxu0 %v6976_v16  ;;  %v7395_v39 = vmul.f32 %v12753_v2, %v13430_v47  ;;  %v8723_v16 = vld [vmem:[%s13284_s1 + $0x600] sm:$0xff] }
 0x997   : > { %7298 = vmatprep.subr.mxu1 %v7256_v6  ;;  %7165 = vmatpush1.msra.mxu0 %v6975_v46  ;;  %v13454_v46 = vld [vmem:[#allocation9_spill] sm:$0xff] }
 0x998   : > { %7299 = vmatpush1.msra.mxu1 %v7255_v10  ;;  %7166 = vmatprep.subr.mxu0 %v6974_v35  ;;  %v12881_v50 = vpop.permute.xlu1 %7783  ;;  %v7653_v10 = vsel %vm969_vm5, %v12779_v19, %v12777_v56  ;;  %v8732_v56 = vld [vmem:[%s13284_s1 + $0x628] sm:$0xff]  ;;  %v7652_v19 = vsel %vm969_vm5, %v12798_v45, %v12791_v12 }
 0x999   : > { %7300 = vmatprep.subr.mxu1 %v7254_v14  ;;  %7117 = vmatprep.mubr.f32.mxu1 %v13389_v37  ;;  %v7659_v14 = vmul.f32 %v7649_v32, %v13431_v49 }
 0x99a   : > { %7167 = vmatpush1.msra.mxu0 %v6973_v0  ;;  %7301 = vmatpush1.msra.mxu1 %v7253_v22  ;;  %v12891_v5 = vpop.permute.xlu0 %7787  ;;  %v7660_v0 = vmul.f32 %v7653_v10, %v13454_v46 }
 0x99b   : > { %8710 = vmatmul.mubr.msk.f32.gmra.mxu1 %vm320_vm2, %v8706_v43  ;;  %8711 = vmatmul.mubr.msk.f32.vlgmr.msra.gmra.mxu0 %vm320_vm2, %v8699_v20  ;;  %v7648_v43 = vsel %vm969_vm5, %v12791_v12, %v12798_v45  ;;  %v13455_v20 = vld [vmem:[#allocation10_spill] sm:$0xff]  ;;  %v8725_v45 = vld [vmem:[%s13284_s1 + $0x610] sm:$0xff] }
 0x99c   : > { %7302 = vmatprep.subr.mxu1 %v7252_v15  ;;  %v12898_v17 = vpop.permute.xlu1 %7781  ;;  %7206 = vmatprep.mubr.f32.mxu0 %v13389_v37 }
 0x99d   : > { %7303 = vmatpush1.msra.mxu1 %v7251_v9  ;;  %7338 = vmatprep.mubr.f32.mxu1 %v13389_v37  ;;  %v13456_v9 = vld [vmem:[#allocation11_spill] sm:$0xff] }
 0x99e   : > { %7304 = vmatprep.subr.mxu1 %v7250_v24  ;;  %v12910_v7 = vpop.permute.xlu0 %7785 }
 0x99f   : > { %7305 = vmatpush1.msra.mxu1 %v7249_v63  ;;  %8712 = vmatmul.mubr.msk.f32.gmra.mxu0 %vm320_vm2, %v8700_v18  ;;  %v7658_v63 = vmul.f32 %v7652_v19, %v13454_v46 }
 0x9a0   : > { %8719 = vmatmul.mubr.msk.f32.vlgmr.msra.gmra.mxu1 %vm320_vm2, %v8715_v62  ;;  %7558 = vmatprep.subr.mxu1 %v12645_v27  ;;  %v12915_v13 = vpop.permute.xlu1 %7631 }
 0x9a1   : > { %7559 = vmatpush1.msra.mxu1 %v12641_v60  ;;  %7212 = vmatprep.mubr.f32.mxu0 %v13389_v37  ;;  %v7651_v12 = vsel %vm969_vm5, %v12866_v58, %v12915_v13  ;;  %v7647_v62 = vsel %vm969_vm5, %v12915_v13, %v12866_v58 }
 0x9a2   : > { %7560 = vmatprep.subr.mxu1 %v12617_v36  ;;  %7344 = vmatprep.mubr.f32.mxu1 %v13389_v37  ;;  %v7386_v52 = vpop.permute.xlu0 %7385  ;;  %v7656_v13 = vmul.f32 %v7651_v12, %v13454_v46  ;;  %v8749_v12 = vld [vmem:[%s13284_s1 + $0x670] sm:$0xff] }
 0x9a3   : > { %7561 = vmatpush1.msra.mxu1 %v12613_v51  ;;  %v7390_v27 = vsel %vm697_vm4, %v12833_v31, %v7386_v52  ;;  %v7394_v60 = vsel %vm697_vm4, %v7386_v52, %v12833_v31  ;;  %8713 = vmatmul.mubr.msk.f32.gmra.mxu0 %vm320_vm2, %v8701_v23  ;;  %v8702_v51 = vld [vmem:[%s13284_s1 + $0x5b8] sm:$0xff]  ;;  %v7657_v52 = vmul.f32 %v7648_v43, %v13431_v49 }
 0x9a4   : > { %v7402_v29 = vmul.f32 %v7390_v27, %v13429_v4  ;;  %8720 = vmatmul.mubr.msk.f32.gmra.mxu1 %vm320_vm2, %v8716_v54  ;;  %7562 = vmatprep.subr.mxu1 %v12587_v44  ;;  %v12938_v36 = vpop.permute.xlu1 %7779  ;;  %v7401_v31 = vmul.f32 %v7394_v60, %v13430_v47  ;;  %v8717_v44 = vld [vmem:[%s13284_s1 + $0x5f0] sm:$0xff]  ;;  %v7795_v27 = vsel %vm1127_vm6, %v12898_v17, %v12812_v57 }
 0x9a5   : > { %7563 = vmatpush1.msra.mxu1 %v12583_v61  ;;  %7218 = vmatprep.mubr.f32.mxu0 %v13389_v37  ;;  %v7388_v61 = vsel %vm697_vm4, %v12765_v1, %v12767_v3  ;;  %v7397_v3 = vmul.f32 %v7392_v34, %v13430_v47  ;;  %v8733_v54 = vld [vmem:[%s13284_s1 + $0x630] sm:$0xff]  ;;  %v7798_v60 = vsel %vm1127_vm6, %v12891_v5, %v12938_v36 }
 0x9a6   : > { %7564 = vmatprep.subr.mxu1 %v12559_v42  ;;  %7350 = vmatprep.mubr.f32.mxu1 %v13389_v37  ;;  %v12959_v33 = vpop.permute.xlu0 %7935  ;;  %v7400_v42 = vmul.f32 %v7389_v25, %v13429_v4  ;;  %v7398_v21 = vmul.f32 %v7388_v61, %v13429_v4  ;;  %v7805_v25 = vmul.f32 %v7795_v27, %v13455_v20 }
 0x9a7   : > { %7565 = vmatpush1.msra.mxu1 %v12554_v48  ;;  %8714 = vmatmul.mubr.msk.f32.gmra.mxu0 %vm320_vm2, %v8702_v51  ;;  %v8718_v48 = vld [vmem:[%s13284_s1 + $0x5f8] sm:$0xff]  ;;  %v7655_v51 = vmul.f32 %v7647_v62, %v13431_v49 }
 0x9a8   : > { %8721 = vmatmul.mubr.msk.f32.gmra.mxu1 %vm320_vm2, %v8717_v44  ;;  %7444 = vmatprep.subr.mxu0 %v7402_v29  ;;  %v12973_v53 = vpop.permute.xlu1 %7777  ;;  %v7804_v44 = vmul.f32 %v7798_v60, %v13456_v9 }
 0x9a9   : > { %7445 = vmatpush1.msra.mxu0 %v7401_v31  ;;  %7356 = vmatprep.mubr.f32.mxu1 %v13389_v37  ;;  %v7797_v31 = vsel %vm1127_vm6, %v12910_v7, %v12973_v53 }
 0x9aa   : > { %7446 = vmatprep.subr.mxu0 %v7400_v42  ;;  %v12981_v1 = vpop.permute.xlu0 %7933  ;;  %7484 = vmatprep.mubr.f32.mxu0 %v13389_v37  ;;  %v7802_v34 = vmul.f32 %v7797_v31, %v13456_v9  ;;  %v8764_v31 = vld [vmem:[%s13284_s1 + $0x6a8] sm:$0xff] }
 0x9ab   : > { %7447 = vmatpush1.msra.mxu0 %v7399_v8 }
 0x9ac   : > { %8722 = vmatmul.mubr.msk.f32.gmra.mxu1 %vm320_vm2, %v8718_v48  ;;  %7448 = vmatprep.subr.mxu0 %v7398_v21  ;;  %v12988_v30 = vpop.permute.xlu1 %7929 }
 0x9ad   : > { %7449 = vmatpush1.msra.mxu0 %v7397_v3  ;;  %7598 = vmatprep.mubr.f32.mxu1 %v13389_v37  ;;  %v13457_v3 = vld [vmem:[#allocation12_spill] sm:$0xff] }
 0x9ae   : > { %7450 = vmatprep.subr.mxu0 %v7396_v28  ;;  %v7646_v4 = vpop.permute.xlu0 %7645 }
 0x9af   : > { %7451 = vmatpush1.msra.mxu0 %v7395_v39  ;;  %v7650_v47 = vsel %vm969_vm5, %v12857_v55, %v7646_v4  ;;  %v7654_v2 = vsel %vm969_vm5, %v7646_v4, %v12857_v55  ;;  %v8724_v55 = vld [vmem:[%s13284_s1 + $0x608] sm:$0xff]  ;;  %v13458_v39 = vld [vmem:[#allocation13_spill] sm:$0xff] }
 0x9b0   : > { %v7661_v6 = vmul.f32 %v7650_v47, %v13431_v49  ;;  %v7662_v41 = vmul.f32 %v7654_v2, %v13454_v46  ;;  %8727 = vmatmul.mubr.msk.f32.vlgmr.msra.gmra.mxu0 %vm320_vm2, %v8723_v16  ;;  %8735 = vmatmul.mubr.msk.f32.vlgmr.msra.gmra.mxu1 %vm320_vm2, %v8731_v26  ;;  %v13017_v35 = vpop.permute.xlu1 %7927  ;;  %v8747_v26 = vld [vmem:[%s13284_s1 + $0x660] sm:$0xff]  ;;  %v8740_v47 = vld [vmem:[%s13284_s1 + $0x648] sm:$0xff] }
 0x9b1   : > { %7490 = vmatprep.mubr.f32.mxu0 %v13389_v37  ;;  %7604 = vmatprep.mubr.f32.mxu1 %v13389_v37  ;;  %v7945_v8 = vsel %vm1285_vm7, %v12959_v33, %v13017_v35  ;;  %v7941_v32 = vsel %vm1285_vm7, %v13017_v35, %v12959_v33 }
 0x9b2   : > { %v7792_v38 = vpop.permute.xlu0 %7791  ;;  %7704 = vmatprep.subr.mxu0 %v7662_v41  ;;  %v7952_v2 = vmul.f32 %v7945_v8, %v13458_v39  ;;  %v7951_v41 = vmul.f32 %v7941_v32, %v13457_v3 }
 0x9b3   : > { %v7796_v59 = vsel %vm1127_vm6, %v12881_v50, %v7792_v38  ;;  %v7800_v22 = vsel %vm1127_vm6, %v7792_v38, %v12881_v50  ;;  %7705 = vmatpush1.msra.mxu0 %v7661_v6  ;;  %v7799_v50 = vsel %vm1127_vm6, %v12812_v57, %v12898_v17  ;;  %v7794_v57 = vsel %vm1127_vm6, %v12938_v36, %v12891_v5  ;;  %v8726_v17 = vld [vmem:[%s13284_s1 + $0x618] sm:$0xff] }
 0x9b4   : > { %v7807_v15 = vmul.f32 %v7796_v59, %v13455_v20  ;;  %v7808_v24 = vmul.f32 %v7800_v22, %v13456_v9  ;;  %8728 = vmatmul.mubr.msk.f32.gmra.mxu0 %vm320_vm2, %v8724_v55  ;;  %8736 = vmatmul.mubr.msk.f32.gmra.mxu1 %vm320_vm2, %v8732_v56  ;;  %v13047_v18 = vpop.permute.xlu1 %8075  ;;  %v7806_v58 = vmul.f32 %v7799_v50, %v13456_v9  ;;  %v13459_v55 = vld [vmem:[#allocation15_spill] sm:$0xff]  ;;  %v8741_v22 = vld [vmem:[%s13284_s1 + $0x650] sm:$0xff] }
 0x9b5   : > { %7706 = vmatprep.subr.mxu0 %v7660_v0  ;;  %7496 = vmatprep.mubr.f32.mxu0 %v13389_v37  ;;  %v7793_v5 = vsel %vm1127_vm6, %v12973_v53, %v12910_v7  ;;  %v7803_v36 = vmul.f32 %v7794_v57, %v13455_v20  ;;  %v8739_v7 = vld [vmem:[%s13284_s1 + $0x640] sm:$0xff] }
 0x9b6   : > { %7707 = vmatpush1.msra.mxu0 %v7659_v14  ;;  %v13066_v23 = vpop.permute.xlu0 %8081  ;;  %7850 = vmatprep.subr.mxu1 %v7808_v24  ;;  %v7801_v42 = vmul.f32 %v7793_v5, %v13455_v20  ;;  %v13460_v0 = vld [vmem:[#allocation14_spill] sm:$0xff]  ;;  %v8758_v5 = vld [vmem:[%s13284_s1 + $0x698] sm:$0xff] }
 0x9b7   : > { %7708 = vmatprep.subr.mxu0 %v7658_v63  ;;  %7610 = vmatprep.mubr.f32.mxu1 %v13389_v37 }
 0x9b8   : > { %8729 = vmatmul.mubr.msk.f32.gmra.mxu0 %vm320_vm2, %v8725_v45  ;;  %7851 = vmatpush1.msra.mxu1 %v7807_v15  ;;  %v7926_v29 = vpop.permute.xlu1 %7925 }
 0x9b9   : > { %7709 = vmatpush1.msra.mxu0 %v7657_v52  ;;  %8737 = vmatmul.mubr.msk.f32.gmra.mxu1 %vm320_vm2, %v8733_v54  ;;  %v7940_v33 = vsel %vm1285_vm7, %v7926_v29, %v12981_v1 }
 0x9ba   : > { %7710 = vmatprep.subr.mxu0 %v7656_v13  ;;  %7852 = vmatprep.subr.mxu1 %v7806_v58  ;;  %v7932_v49 = vpop.permute.xlu0 %7931  ;;  %v7949_v43 = vmul.f32 %v7940_v33, %v13457_v3  ;;  %v8742_v58 = vld [vmem:[%s13284_s1 + $0x658] sm:$0xff] }
 0x9bb   : > { %7502 = vmatprep.mubr.f32.mxu0 %v13389_v37  ;;  %7711 = vmatpush1.msra.mxu0 %v7655_v51  ;;  %v8750_v51 = vld [vmem:[%s13284_s1 + $0x678] sm:$0xff] }
 0x9bc   : > { %7853 = vmatpush1.msra.mxu1 %v7805_v25  ;;  %8730 = vmatmul.mubr.msk.f32.gmra.mxu0 %vm320_vm2, %v8726_v17  ;;  %v8074_v61 = vpop.permute.xlu1 %8073  ;;  %v8763_v17 = vld [vmem:[%s13284_s1 + $0x6a0] sm:$0xff]  ;;  %v8756_v25 = vld [vmem:[%s13284_s1 + $0x688] sm:$0xff] }
 0x9bd   : > { %7854 = vmatprep.subr.mxu1 %v7804_v44  ;;  %7616 = vmatprep.mubr.f32.mxu1 %v13389_v37  ;;  %v8091_v38 = vsel %vm1443_vm8, %v13066_v23, %v8074_v61  ;;  %v8087_v20 = vsel %vm1443_vm8, %v8074_v61, %v13066_v23  ;;  %v8765_v44 = vld [vmem:[%s13284_s1 + $0x6b0] sm:$0xff] }
 0x9be   : > { %7855 = vmatpush1.msra.mxu1 %v7803_v36  ;;  %7744 = vmatprep.mubr.f32.mxu0 %v13389_v37  ;;  %v7938_v53 = vpop.permute.xlu0 %7937  ;;  %v8098_v63 = vmul.f32 %v8091_v38, %v13459_v55  ;;  %v8097_v62 = vmul.f32 %v8087_v20, %v13460_v0  ;;  %v8766_v36 = vld [vmem:[%s13284_s1 + $0x6b8] sm:$0xff] }
 0x9bf   : > { %8738 = vmatmul.mubr.msk.f32.gmra.mxu1 %vm320_vm2, %v8734_v40  ;;  %7856 = vmatprep.subr.mxu1 %v7802_v34  ;;  %v7942_v48 = vsel %vm1285_vm7, %v12988_v30, %v7938_v53  ;;  %v7946_v21 = vsel %vm1285_vm7, %v7938_v53, %v12988_v30  ;;  %v7944_v30 = vsel %vm1285_vm7, %v12981_v1, %v7926_v29  ;;  %v8748_v1 = vld [vmem:[%s13284_s1 + $0x668] sm:$0xff] }
 0x9c0   : > { %7857 = vmatpush1.msra.mxu1 %v7801_v42  ;;  %v7953_v28 = vmul.f32 %v7942_v48, %v13457_v3  ;;  %v7954_v16 = vmul.f32 %v7946_v21, %v13458_v39  ;;  %8743 = vmatmul.mubr.msk.f32.vlgmr.msra.gmra.mxu0 %vm320_vm2, %v8739_v7  ;;  %v7924_v4 = vpop.permute.xlu1 %7923  ;;  %v7950_v35 = vmul.f32 %v7944_v30, %v13458_v39 }
 0x9c1   : > { %7890 = vmatprep.mubr.f32.mxu1 %v13389_v37  ;;  %7750 = vmatprep.mubr.f32.mxu0 %v13389_v37  ;;  %v7943_v14 = vsel %vm1285_vm7, %v7932_v49, %v7924_v4  ;;  %v7939_v9 = vsel %vm1285_vm7, %v7924_v4, %v7932_v49  ;;  %v8757_v49 = vld [vmem:[%s13284_s1 + $0x690] sm:$0xff] }
 0x9c2   : > { %v8084_v10 = vpop.permute.xlu0 %8083  ;;  %7996 = vmatprep.subr.mxu0 %v7954_v16  ;;  %v7948_v50 = vmul.f32 %v7943_v14, %v13458_v39  ;;  %v7947_v23 = vmul.f32 %v7939_v9, %v13457_v3 }
 0x9c3   : > { %8751 = vmatmul.mubr.msk.f32.vlgmr.msra.gmra.mxu1 %vm320_vm2, %v8747_v26  ;;  %v8088_v6 = vsel %vm1443_vm8, %v13047_v18, %v8084_v10  ;;  %v8092_v46 = vsel %vm1443_vm8, %v8084_v10, %v13047_v18  ;;  %7997 = vmatpush1.msra.mxu0 %v7953_v28 }
 0x9c4   : > { %v8100_v56 = vmul.f32 %v8092_v46, %v13459_v55  ;;  %8744 = vmatmul.mubr.msk.f32.gmra.mxu0 %vm320_vm2, %v8740_v47  ;;  %7896 = vmatprep.mubr.f32.mxu1 %v13389_v37  ;;  %v8072_v19 = vpop.permute.xlu1 %8071  ;;  %v8099_v59 = vmul.f32 %v8088_v6, %v13460_v0 }
 0x9c5   : > { %7998 = vmatprep.subr.mxu0 %v7952_v2  ;;  %7756 = vmatprep.mubr.f32.mxu0 %v13389_v37 }
 0x9c6   : > { %7999 = vmatpush1.msra.mxu0 %v7951_v41  ;;  %v8080_v15 = vpop.permute.xlu0 %8079  ;;  %8142 = vmatprep.subr.mxu1 %v8100_v56 }
 0x9c7   : > { %8752 = vmatmul.mubr.msk.f32.gmra.mxu1 %vm320_vm2, %v8748_v1  ;;  %v8086_v24 = vsel %vm1443_vm8, %v8072_v19, %v8080_v15  ;;  %v8090_v18 = vsel %vm1443_vm8, %v8080_v15, %v8072_v19  ;;  %8000 = vmatprep.subr.mxu0 %v7950_v35 }
 0x9c8   : > { %8745 = vmatmul.mubr.msk.f32.gmra.mxu0 %vm320_vm2, %v8741_v22  ;;  %7902 = vmatprep.mubr.f32.mxu1 %v13389_v37  ;;  %v8096_v45 = vmul.f32 %v8090_v18, %v13459_v55  ;;  %v8095_v54 = vmul.f32 %v8086_v24, %v13460_v0  ;;  %v8070_v52 = vpop.permute.xlu1 %8069 }
 0x9c9   : > { %8001 = vmatpush1.msra.mxu0 %v7949_v43  ;;  %8143 = vmatpush1.msra.mxu1 %v8099_v59 }
 0x9ca   : > { %8002 = vmatprep.subr.mxu0 %v7948_v50  ;;  %8144 = vmatprep.subr.mxu1 %v8098_v63  ;;  %v8078_v27 = vpop.permute.xlu0 %8077 }
 0x9cb   : > { %8753 = vmatmul.mubr.msk.f32.gmra.mxu1 %vm320_vm2, %v8749_v12  ;;  %7762 = vmatprep.mubr.f32.mxu0 %v13389_v37  ;;  %v8085_v13 = vsel %vm1443_vm8, %v8070_v52, %v8078_v27  ;;  %v8089_v60 = vsel %vm1443_vm8, %v8078_v27, %v8070_v52 }
 0x9cc   : > { %8003 = vmatpush1.msra.mxu0 %v7947_v23  ;;  %8145 = vmatpush1.msra.mxu1 %v8097_v62  ;;  %v8094_v29 = vmul.f32 %v8089_v60, %v13459_v55  ;;  %v8093_v57 = vmul.f32 %v8085_v13, %v13460_v0 }
 0x9cd   : > { %8746 = vmatmul.mubr.msk.f32.gmra.mxu0 %vm320_vm2, %v8742_v58  ;;  %8146 = vmatprep.subr.mxu1 %v8096_v45 }
 0x9ce   : > { %7908 = vmatprep.mubr.f32.mxu1 %v13389_v37  ;;  %8147 = vmatpush1.msra.mxu1 %v8095_v54 }
 0x9cf   : > { %8754 = vmatmul.mubr.msk.f32.gmra.mxu1 %vm320_vm2, %v8750_v51  ;;  %8036 = vmatprep.mubr.f32.mxu0 %v13389_v37 }
 0x9d0   : > { %8148 = vmatprep.subr.mxu1 %v8094_v29  ;;  %8182 = vmatprep.mubr.f32.mxu1 %v13389_v37 }
 0x9d1   : > { %8759 = vmatmul.mubr.msk.f32.vlgmr.msra.gmra.mxu0 %vm320_vm2, %v8755_v11  ;;  %8149 = vmatpush1.msra.mxu1 %v8093_v57 }
 0x9d2   : > { %8042 = vmatprep.mubr.f32.mxu0 %v13389_v37 }
 0x9d3   : > { %8767 = vmatmul.mubr.msk.f32.vlgmr.msra.gmra.mxu1 %vm320_vm2, %v8763_v17 }
 0x9d4   : > { %8188 = vmatprep.mubr.f32.mxu1 %v13389_v37 }
 0x9d5   : > { %8760 = vmatmul.mubr.msk.f32.gmra.mxu0 %vm320_vm2, %v8756_v25 }
 0x9d6   : > { %8048 = vmatprep.mubr.f32.mxu0 %v13389_v37 }
 0x9d7   : > { %8768 = vmatmul.mubr.msk.f32.gmra.mxu1 %vm320_vm2, %v8764_v31 }
 0x9d8   : > { %8194 = vmatprep.mubr.f32.mxu1 %v13389_v37 }
 0x9d9   : > { %8761 = vmatmul.mubr.msk.f32.gmra.mxu0 %vm320_vm2, %v8757_v49 }
 0x9da   : > { %8054 = vmatprep.mubr.f32.mxu0 %v13389_v37 }
 0x9db   : > { %8769 = vmatmul.mubr.msk.f32.gmra.mxu1 %vm320_vm2, %v8765_v44 }
 0x9dc   : > { %8200 = vmatprep.mubr.f32.mxu1 %v13389_v37 }
 0x9dd   : > { %8762 = vmatmul.mubr.msk.f32.gmra.mxu0 %vm320_vm2, %v8758_v5 }
 0x9df   : > { %8770 = vmatmul.mubr.msk.f32.gmra.mxu1 %vm320_vm2, %v8766_v36 }
 0xa4e   : > { %v7101_v40 = vpop.f32.mrf.mxu1 }
 0xa50   : > { %v7103_v61 = vpop.f32.mrf.mxu1 }
 0xa52   : > { %v7107_v34 = vpop.f32.mrf.mxu1 }
 0xa54   : > { %v7109_v7 = vpop.f32.mrf.mxu1 }
 0xa56   : > { %v7113_v42 = vpop.f32.mrf.mxu1 }
 0xa58   : > { %v7115_v53 = vpop.f32.mrf.mxu1 }
 0xa5b   : > { %v13253_v8 = vpop.f32.mrf.mxu1  ;;  %v7202_v48 = vpop.f32.mrf.mxu0 }
 0xa5c   : > { %v7203_v63 = vadd.f32 %v7202_v48, %v7101_v40 }
 0xa5d   : > { %v13255_v21 = vpop.f32.mrf.mxu1  ;;  %v7204_v37 = vpop.f32.mrf.mxu0 }
 0xa5e   : > { %v7205_v45 = vadd.f32 %v7204_v37, %v7103_v61 }
 0xa5f   : > { %v7208_v3 = vpop.f32.mrf.mxu0 }
 0xa60   : > { %v7340_v28 = vpop.f32.mrf.mxu1  ;;  %v7209_v52 = vadd.f32 %v7208_v3, %v7107_v34 }
 0xa61   : > { %v7210_v39 = vpop.f32.mrf.mxu0  ;;  %v7363_v62 = vadd.f32 %v7340_v28, %v7203_v63 }
 0xa62   : > { %v7342_v16 = vpop.f32.mrf.mxu1  ;;  %v7211_v29 = vadd.f32 %v7210_v39, %v7109_v7 }
 0xa63   : > { %v7214_v26 = vpop.f32.mrf.mxu0  ;;  %v7364_v27 = vadd.f32 %v7342_v16, %v7205_v45 }
 0xa64   : > { %v7346_v4 = vpop.f32.mrf.mxu1  ;;  %v7215_v17 = vadd.f32 %v7214_v26, %v7113_v42 }
 0xa65   : > { %v7216_v32 = vpop.f32.mrf.mxu0  ;;  %v7365_v51 = vadd.f32 %v7346_v4, %v7209_v52 }
 0xa66   : > { %v7348_v30 = vpop.f32.mrf.mxu1  ;;  %v7217_v36 = vadd.f32 %v7216_v32, %v7115_v53 }
 0xa67   : > { %v7220_v2 = vpop.f32.mrf.mxu0  ;;  %v7366_v31 = vadd.f32 %v7348_v30, %v7211_v29 }
 0xa68   : > { %v7352_v47 = vpop.f32.mrf.mxu1  ;;  %v7221_v3 = vadd.f32 %v7220_v2, %v13253_v8 }
 0xa69   : > { %v7222_v6 = vpop.f32.mrf.mxu0  ;;  %v7367_v40 = vadd.f32 %v7352_v47, %v7215_v17 }
 0xa6a   : > { %v7354_v10 = vpop.f32.mrf.mxu1  ;;  %v7223_v42 = vadd.f32 %v7222_v6, %v13255_v21  ;;  %v8223_v6 = vpop.permute.xlu1 %8222 }
 0xa6b   : > { %v7368_v28 = vadd.f32 %v7354_v10, %v7217_v36 }
 0xa6c   : > { %v7358_v33 = vpop.f32.mrf.mxu1 }
 0xa6d   : > { %v7369_v26 = vadd.f32 %v7358_v33, %v7221_v3 }
 0xa6e   : > { %v7360_v46 = vpop.f32.mrf.mxu1  ;;  %v8233_v36 = vpop.permute.xlu1 %8232 }
 0xa70   : > { %v7486_v41 = vpop.f32.mrf.mxu0  ;;  %v7600_v35 = vpop.f32.mrf.mxu1 }
 0xa71   : > { %v7509_v58 = vadd.f32 %v7486_v41, %v7363_v62 }
 0xa72   : > { %v7488_v55 = vpop.f32.mrf.mxu0  ;;  %v7602_v56 = vpop.f32.mrf.mxu1 }
 0xa73   : > { %v7510_v57 = vadd.f32 %v7488_v55, %v7364_v27  ;;  %v7623_v49 = vadd.f32 %v7600_v35, %v7509_v58  ;;  %v8228_v58 = vpop.permute.xlu0 %8227 }
 0xa74   : > { %v7492_v1 = vpop.f32.mrf.mxu0  ;;  %v7606_v19 = vpop.f32.mrf.mxu1 }
 0xa75   : > { %v7511_v44 = vadd.f32 %v7492_v1, %v7365_v51  ;;  %v7624_v48 = vadd.f32 %v7602_v56, %v7510_v57  ;;  %v7370_v56 = vadd.f32 %v7360_v46, %v7223_v42 }
 0xa76   : > { %v7494_v38 = vpop.f32.mrf.mxu0  ;;  %v7608_v14 = vpop.f32.mrf.mxu1 }
 0xa77   : > { %v7512_v37 = vadd.f32 %v7494_v38, %v7366_v31  ;;  %v7625_v4 = vadd.f32 %v7606_v19, %v7511_v44 }
 0xa78   : > { %v7498_v0 = vpop.f32.mrf.mxu0 }
 0xa79   : > { %v7612_v59 = vpop.f32.mrf.mxu1  ;;  %v7513_v16 = vadd.f32 %v7498_v0, %v7367_v40  ;;  %v7626_v53 = vadd.f32 %v7608_v14, %v7512_v37 }
 0xa7a   : > { %v7500_v22 = vpop.f32.mrf.mxu0 }
 0xa7b   : > { %v7614_v43 = vpop.f32.mrf.mxu1  ;;  %v7514_v30 = vadd.f32 %v7500_v22, %v7368_v28  ;;  %v7627_v1 = vadd.f32 %v7612_v59, %v7513_v16 }
 0xa7c   : > { %v7504_v20 = vpop.f32.mrf.mxu0 }
 0xa7d   : > { %v7515_v38 = vadd.f32 %v7504_v20, %v7369_v26  ;;  %v7628_v19 = vadd.f32 %v7614_v43, %v7514_v30 }
 0xa7e   : > { %v7506_v15 = vpop.f32.mrf.mxu0 }
 0xa7f   : > { %v13257_v9 = vpop.f32.mrf.mxu1  ;;  %v7516_v63 = vadd.f32 %v7506_v15, %v7370_v56 }
 0xa80   : > { %v7746_v24 = vpop.f32.mrf.mxu0 }
 0xa81   : > { %v13259_v18 = vpop.f32.mrf.mxu1  ;;  %v7769_v34 = vadd.f32 %v7746_v24, %v7623_v49 }
 0xa82   : > { %v7748_v50 = vpop.f32.mrf.mxu0 }
 0xa83   : > { %v7892_v12 = vpop.f32.mrf.mxu1  ;;  %v7770_v41 = vadd.f32 %v7748_v50, %v7624_v48 }
 0xa84   : > { %v7752_v23 = vpop.f32.mrf.mxu0  ;;  %v7915_v32 = vadd.f32 %v7892_v12, %v7769_v34  ;;  %v7629_v12 = vadd.f32 %v13257_v9, %v7515_v38 }
 0xa85   : > { %v7894_v54 = vpop.f32.mrf.mxu1  ;;  %v7771_v47 = vadd.f32 %v7752_v23, %v7625_v4 }
 0xa86   : > { %v7754_v13 = vpop.f32.mrf.mxu0  ;;  %v7916_v2 = vadd.f32 %v7894_v54, %v7770_v41  ;;  %v7630_v54 = vadd.f32 %v13259_v18, %v7516_v63 }
 0xa87   : > { %v7898_v60 = vpop.f32.mrf.mxu1  ;;  %v7772_v10 = vadd.f32 %v7754_v13, %v7626_v53 }
 0xa88   : > { %v7758_v11 = vpop.f32.mrf.mxu0  ;;  %v7917_v22 = vadd.f32 %v7898_v60, %v7771_v47 }
 0xa89   : > { %v7900_v25 = vpop.f32.mrf.mxu1  ;;  %v7773_v50 = vadd.f32 %v7758_v11, %v7627_v1 }
 0xa8a   : > { %v7760_v5 = vpop.f32.mrf.mxu0  ;;  %v7918_v20 = vadd.f32 %v7900_v25, %v7772_v10 }
 0xa8b   : > { %v7904_v61 = vpop.f32.mrf.mxu1  ;;  %v7774_v46 = vadd.f32 %v7760_v5, %v7628_v19 }
 0xa8c   : > { %v7919_v52 = vadd.f32 %v7904_v61, %v7773_v50 }
 0xa8d   : > { %v7764_v7 = vpop.f32.mrf.mxu0  ;;  %v7906_v39 = vpop.f32.mrf.mxu1 }
 0xa8e   : > { %v7775_v13 = vadd.f32 %v7764_v7, %v7629_v12  ;;  %v7920_v57 = vadd.f32 %v7906_v39, %v7774_v46 }
 0xa8f   : > { %v7766_v35 = vpop.f32.mrf.mxu0  ;;  %v7910_v55 = vpop.f32.mrf.mxu1 }
 0xa90   : > { %v7776_v25 = vadd.f32 %v7766_v35, %v7630_v54  ;;  %v7921_v40 = vadd.f32 %v7910_v55, %v7775_v13  ;;  %v8238_v35 = vpop.permute.xlu0 %8237 }
 0xa91   : > { %v7912_v24 = vpop.f32.mrf.mxu1  ;;  %v8038_v8 = vpop.f32.mrf.mxu0 }
 0xa92   : > { %v8061_v0 = vadd.f32 %v8038_v8, %v7915_v32  ;;  %v7922_v28 = vadd.f32 %v7912_v24, %v7776_v25 }
 0xa93   : > { %v8040_v21 = vpop.f32.mrf.mxu0  ;;  %v8184_v33 = vpop.f32.mrf.mxu1 }
 0xa94   : > { %v8062_v45 = vadd.f32 %v8040_v21, %v7916_v2  ;;  %v8207_v14 = vadd.f32 %v8184_v33, %v8061_v0 }
 0xa95   : > { %v8044_v59 = vpop.f32.mrf.mxu0  ;;  %v8186_v43 = vpop.f32.mrf.mxu1 }
 0xa96   : > { %v8240_v15 = vadd.f32 %v8223_v6, %v8207_v14  ;;  %v8063_v62 = vadd.f32 %v8044_v59, %v7917_v22  ;;  %v8208_v23 = vadd.f32 %v8186_v43, %v8062_v45 }
 0xa97   : > { %v8046_v27 = vpop.f32.mrf.mxu0  ;;  %v8190_v9 = vpop.f32.mrf.mxu1 }
 0xa98   : > { %8248 = vst [vmem:[%s13269_s30] sm:$0xff] %v8240_v15  ;;  %v8241_v60 = vadd.f32 %v8223_v6, %v8208_v23  ;;  %v8064_v29 = vadd.f32 %v8046_v27, %v7918_v20  ;;  %v8209_v51 = vadd.f32 %v8190_v9, %v8063_v62 }
 0xa99   : > { %v8050_v11 = vpop.f32.mrf.mxu0  ;;  %v8192_v17 = vpop.f32.mrf.mxu1 }
 0xa9a   : > { %8249 = vst [vmem:[%s13269_s30 + $0x8] sm:$0xff] %v8241_v60  ;;  %v8242_v31 = vadd.f32 %v8228_v58, %v8209_v51  ;;  %v8065_v49 = vadd.f32 %v8050_v11, %v7919_v52  ;;  %v8210_v44 = vadd.f32 %v8192_v17, %v8064_v29 }
 0xa9b   : > { %v8052_v18 = vpop.f32.mrf.mxu0  ;;  %v8196_v5 = vpop.f32.mrf.mxu1 }
 0xa9c   : > { %8250 = vst [vmem:[%s13269_s30 + $0x10] sm:$0xff] %v8242_v31  ;;  %v8243_v61 = vadd.f32 %v8228_v58, %v8210_v44  ;;  %v8066_v48 = vadd.f32 %v8052_v18, %v7920_v57  ;;  %v8211_v37 = vadd.f32 %v8196_v5, %v8065_v49 }
 0xa9d   : > { %v8056_v34 = vpop.f32.mrf.mxu0  ;;  %v8198_v3 = vpop.f32.mrf.mxu1 }
 0xa9e   : > { %8251 = vst [vmem:[%s13269_s30 + $0x18] sm:$0xff] %v8243_v61  ;;  %v8244_v16 = vadd.f32 %v8233_v36, %v8211_v37  ;;  %v8067_v7 = vadd.f32 %v8056_v34, %v7921_v40  ;;  %v8212_v39 = vadd.f32 %v8198_v3, %v8066_v48 }
 0xa9f   : > { %v8058_v4 = vpop.f32.mrf.mxu0  ;;  %v8202_v41 = vpop.f32.mrf.mxu1 }
 0xaa0   : > { %8252 = vst [vmem:[%s13269_s30 + $0x20] sm:$0xff] %v8244_v16  ;;  %v8245_v42 = vadd.f32 %v8233_v36, %v8212_v39  ;;  %v8068_v26 = vadd.f32 %v8058_v4, %v7922_v28  ;;  %v8213_v30 = vadd.f32 %v8202_v41, %v8067_v7 }
 0xaa1   : > { %v8204_v55 = vpop.f32.mrf.mxu1 }
 0xaa2   : > { %8253 = vst [vmem:[%s13269_s30 + $0x28] sm:$0xff] %v8245_v42  ;;  %v8246_v53 = vadd.f32 %v8238_v35, %v8213_v30  ;;  %v8214_v32 = vadd.f32 %v8204_v55, %v8068_v26 }
 0xaa4   : > { %8254 = vst [vmem:[%s13269_s30 + $0x30] sm:$0xff] %v8246_v53  ;;  %v8247_v47 = vadd.f32 %v8238_v35, %v8214_v32 }
 0xaa6   : > { %8255 = vst [vmem:[%s13269_s30 + $0x38] sm:$0xff] %v8247_v47 }
 0xaa7 PF: > { %s14_s15 = sadd.s32 1, %s8805_s15  }
 0xaa8   : > { %p11_p4 = scmp.ge.s32.totalorder %s14_s15, 4  }
 0xaaa   :  { %13 = sbr.rel (!%p11_p4) target bundleno = 1 (0x1), region = 131 }

</bundles_post_ra>
